<compile_context>
chip_gen: v7x
topology: tpu7x:2x2x1
jax: 0.10.0
libtpu: 0.0.40
codegen_flags: <defaults>
</compile_context>

<pallas_src>
import functools
import math

import jax
import jax.numpy as jnp
from jax.experimental import pallas as pl
from jax.experimental.pallas import tpu as pltpu


# ---------------------------------------------------------------------------
# Pallas kernels: fused (im2col-matmul) + folded-BN shift + activation,
# optionally followed by a fused 1x1-conv epilogue (second matmul + shift + act).
# ---------------------------------------------------------------------------
def _apply_act(y, act):
    if act == "leaky_relu":
        return jnp.where(y >= 0.0, y, 0.2 * y)
    if act == "tanh":
        return jnp.tanh(y)
    raise ValueError(f"unknown act {act}")


def _mm_shift_act_kernel(a_ref, w_ref, s_ref, o_ref, *, act):
    # a_ref: (tm, K) bf16 patches   w_ref: (K, tn) bf16 (BN scale folded in)
    # s_ref: (1, tn) f32 shift
    y = jnp.dot(a_ref[...], w_ref[...], preferred_element_type=jnp.float32)
    y = _apply_act(y + s_ref[...], act)
    o_ref[...] = y.astype(o_ref.dtype)


def _mm_shift_act_x2_kernel(a_ref, w1_ref, s1_ref, w2_ref, s2_ref, o_ref, *,
                            act1, act2):
    # First conv block on the MXU, then the following 1x1 conv block as an epilogue
    # on the already-resident (tm, N1) tile -> only the final tile is stored.
    y = jnp.dot(a_ref[...], w1_ref[...], preferred_element_type=jnp.float32)
    y = _apply_act(y + s1_ref[...], act1)
    z = jnp.dot(y.astype(w2_ref.dtype), w2_ref[...],
                preferred_element_type=jnp.float32)
    z = _apply_act(z + s2_ref[...], act2)
    o_ref[...] = z.astype(o_ref.dtype)


def _round_up(x, m):
    return ((x + m - 1) // m) * m


_MAX_TM_SINGLE = 512  # standalone path: big M tiles amortize per-grid-step overhead
_MAX_TM_FUSED = 256   # fused x2 path: keep the f32 intermediate near vreg capacity (no spills)


def _itemsize(dtype):
    return 4 if dtype == jnp.float32 else 2


def _fused_block_matmul(a, w1, s1, act1, w2=None, s2=None, act2=None,
                        out_dtype=jnp.bfloat16):
    """a: (M, K) bf16 patches; w1: (K, N1) bf16; s1: (N1,) f32.
    Optional fused 1x1 epilogue: w2 (N1, N2) bf16, s2 (N2,) f32."""
    M, K = a.shape
    N1 = w1.shape[1]
    n_out = N1 if w2 is None else w2.shape[1]

    # M tiling: no padding / slicing.  Either a single full-extent block (tm == M, always a
    # legal block shape) or max_tm-sized blocks with a masked partial last block.
    max_tm = _MAX_TM_SINGLE if w2 is None else _MAX_TM_FUSED
    tm = M if M <= max_tm else max_tm
    num_m_tiles = pl.cdiv(M, tm)

    flops = 2 * M * K * N1
    bytes_accessed = (a.size * 2 + w1.size * 2 + N1 * 4
                      + M * n_out * _itemsize(out_dtype))

    if w2 is None:
        # Standalone block: tile N on a second "parallel" axis so both v7x TensorCores have
        # work even when the M grid collapses to one step in the late layers.
        if N1 % 512 == 0:
            tn = 256           # 256-wide MXU fill (v6e/v7x) while keeping >= 2 N steps
        elif N1 % 128 == 0:
            tn = 128
        else:
            tn = N1
        num_n_tiles = N1 // tn
        grid = (num_m_tiles, num_n_tiles)
        kernel = functools.partial(_mm_shift_act_kernel, act=act1)
        in_specs = [
            pl.BlockSpec((tm, K), lambda i, j: (i, 0)),
            pl.BlockSpec((K, tn), lambda i, j: (0, j)),
            pl.BlockSpec((1, tn), lambda i, j: (0, j)),
        ]
        out_specs = pl.BlockSpec((tm, tn), lambda i, j: (i, j))
        operands = (a, w1, s1.reshape(1, N1))
        dim_sem = ("parallel", "parallel")
        final_act = act1
    else:
        grid = (num_m_tiles,)
        kernel = functools.partial(_mm_shift_act_x2_kernel, act1=act1, act2=act2)
        in_specs = [
            pl.BlockSpec((tm, K), lambda i: (i, 0)),
            pl.BlockSpec((K, N1), lambda i: (0, 0)),
            pl.BlockSpec((1, N1), lambda i: (0, 0)),
            pl.BlockSpec((N1, n_out), lambda i: (0, 0)),
            pl.BlockSpec((1, n_out), lambda i: (0, 0)),
        ]
        out_specs = pl.BlockSpec((tm, n_out), lambda i: (i, 0))
        operands = (a, w1, s1.reshape(1, N1), w2, s2.reshape(1, n_out))
        dim_sem = ("parallel",)
        flops += 2 * M * N1 * n_out
        bytes_accessed += w2.size * 2 + n_out * 4
        final_act = act2

    cost = pl.CostEstimate(
        flops=int(flops),
        transcendentals=int(M * n_out) if final_act == "tanh" else 0,
        bytes_accessed=int(bytes_accessed),
    )

    return pl.pallas_call(
        kernel,
        out_shape=jax.ShapeDtypeStruct((M, n_out), out_dtype),
        grid_spec=pltpu.PrefetchScalarGridSpec(
            num_scalar_prefetch=0,
            grid=grid,
            in_specs=in_specs,
            out_specs=out_specs,
        ),
        compiler_params=pltpu.CompilerParams(dimension_semantics=dim_sem),
        cost_estimate=cost,
    )(*operands)


# ---------------------------------------------------------------------------
# ConvBlock plumbing: im2col (bf16) + BN folding
# ---------------------------------------------------------------------------
def _im2col_bf16(x, kernel, stride, padding):
    """x: (B, H, W, C) -> bf16 patches (B*Ho*Wo, k*k*C); patch layout (kh, kw, C), C fastest."""
    x = x.astype(jnp.bfloat16)
    B, H, W, C = x.shape
    if kernel == 1 and stride == 1 and padding == 0:
        return x.reshape(B * H * W, C), (B, H, W)
    xp = jnp.pad(x, ((0, 0), (padding, padding), (padding, padding), (0, 0)))
    Hp, Wp = H + 2 * padding, W + 2 * padding
    Ho = (Hp - kernel) // stride + 1
    Wo = (Wp - kernel) // stride + 1
    cols = []
    for i in range(kernel):
        for j in range(kernel):
            cols.append(xp[:, i:i + stride * (Ho - 1) + 1:stride,
                           j:j + stride * (Wo - 1) + 1:stride, :])
    patches = jnp.concatenate(cols, axis=-1)            # (B, Ho, Wo, k*k*C)
    return patches.reshape(B * Ho * Wo, kernel * kernel * C), (B, Ho, Wo)


def _fold_conv_bn(params, kernel, eps=1e-5, weight_dtype=jnp.bfloat16):
    """PyTorch conv weight (Cout, Cin, kh, kw) + eval-mode BN -> (K, Cout), shift (Cout,) f32."""
    w, b_conv, gamma, beta, mean, var = params
    cout, cin = w.shape[0], w.shape[1]
    s = gamma / jnp.sqrt(var + eps)
    wmat = jnp.transpose(w, (2, 3, 1, 0)).reshape(kernel * kernel * cin, cout)
    wmat = (wmat * s[None, :]).astype(weight_dtype)      # fold BN scale into weights
    shift = ((b_conv - mean) * s + beta).astype(jnp.float32)
    return wmat, shift


def _pointwise_block_xla(x, params, act):
    """Tiny 1x1 ConvBlock (K = in_channels) as plain fused XLA: a K=2 MXU matmul with a
    lane-sparse output would be <1% MXU utilization plus a full-resolution HBM round trip."""
    w, shift = _fold_conv_bn(params, 1, weight_dtype=jnp.float32)
    y = jnp.einsum("bhwc,cd->bhwd", x.astype(jnp.float32), w) + shift
    return _apply_act(y, act)


def conv_super_block(x, cfg1, p1, cfg2=None, p2=None, out_dtype=jnp.bfloat16):
    """One ConvBlock (optionally with a fused following 1x1 ConvBlock). NHWC in/out."""
    _, cout1, k, s, pad, act1 = cfg1
    a, (B, Ho, Wo) = _im2col_bf16(x, k, s, pad)
    w1, shift1 = _fold_conv_bn(p1, k)
    if cfg2 is None:
        y = _fused_block_matmul(a, w1, shift1, act1, out_dtype=out_dtype)
        cout = cout1
    else:
        _, cout2, k2, _, _, act2 = cfg2
        w2, shift2 = _fold_conv_bn(p2, k2)
        y = _fused_block_matmul(a, w1, shift1, act1, w2, shift2, act2,
                                out_dtype=out_dtype)
        cout = cout2
    return y.reshape(B, Ho, Wo, cout)


# ---------------------------------------------------------------------------
# VelocityEncoder configuration, parameters & forward
# ---------------------------------------------------------------------------
def _encoder_config(in_channels, dim1, dim2, dim3, dim4, dim5):
    # (cin, cout, kernel, stride, padding, act)
    stage1 = [
        (in_channels, dim1, 1, 1, 0, "leaky_relu"),
        (dim1, dim1, 3, 1, 1, "leaky_relu"),
        (dim1, dim2, 3, 2, 1, "leaky_relu"),
        (dim2, dim2, 1, 1, 0, "leaky_relu"),
        (dim2, dim2, 3, 1, 1, "leaky_relu"),
        (dim2, dim2, 1, 1, 0, "leaky_relu"),
        (dim2, dim3, 3, 2, 1, "leaky_relu"),
        (dim3, dim3, 1, 1, 0, "leaky_relu"),
        (dim3, dim3, 3, 1, 0, "leaky_relu"),
        (dim3, dim3, 1, 1, 0, "leaky_relu"),
    ]
    stage2 = [
        (dim3, dim4, 3, 2, 1, "leaky_relu"),
        (dim4, dim4, 1, 1, 0, "leaky_relu"),
        (dim4, dim4, 3, 2, 1, "leaky_relu"),
        (dim4, dim4, 3, 2, 1, "leaky_relu"),
        (dim4, dim5, 3, 2, 1, "tanh"),  # ConvBlockTanh
    ]
    return stage1 + stage2


def _is_pointwise(c):
    return c[2] == 1 and c[3] == 1 and c[4] == 0


def _group_layers(cfg):
    """Pair every conv block with a following 1x1 block (fused epilogue) where possible."""
    groups, i = [], 0
    while i < len(cfg):
        if i + 1 < len(cfg) and _is_pointwise(cfg[i + 1]) and not _is_pointwise(cfg[i]):
            groups.append((i, i + 1))
            i += 2
        else:
            groups.append((i, None))
            i += 1
    return groups


def _init_conv_block(key, cin, cout, kernel):
    fan_in = cin * kernel * kernel
    bound = 1.0 / math.sqrt(fan_in)
    kw_, kb_ = jax.random.split(key)
    w = jax.random.uniform(kw_, (cout, cin, kernel, kernel),
                           minval=-bound, maxval=bound, dtype=jnp.float32)
    b = jax.random.uniform(kb_, (cout,), minval=-bound, maxval=bound,
                           dtype=jnp.float32)
    gamma = jnp.ones((cout,), jnp.float32)
    beta = jnp.zeros((cout,), jnp.float32)
    mean = jnp.zeros((cout,), jnp.float32)
    var = jnp.ones((cout,), jnp.float32)
    return (w, b, gamma, beta, mean, var)


def make_velocity_encoder(key, in_channels, dim1=32, dim2=64, dim3=128,
                          dim4=256, dim5=512):
    cfg = _encoder_config(in_channels, dim1, dim2, dim3, dim4, dim5)
    keys = jax.random.split(key, len(cfg))
    params = [_init_conv_block(k, cin, cout, ker)
              for k, (cin, cout, ker, _, _, _) in zip(keys, cfg)]
    return cfg, params


def velocity_encoder_forward(x_nchw, cfg, params):
    """x_nchw: (B, C, H, W) f32 -> (B, dim5, Ho, Wo) f32 (NCHW)."""
    x = jnp.transpose(x_nchw, (0, 2, 3, 1)).astype(jnp.float32)   # -> NHWC
    groups = _group_layers(cfg)
    for gi, (ia, ib) in enumerate(groups):
        out_dtype = jnp.float32 if gi == len(groups) - 1 else jnp.bfloat16
        cin, _, k, _, _, act = cfg[ia]
        if ib is None and k == 1 and cin <= 8:
            # First (tiny-K) 1x1 ConvBlock: plain XLA, fuses into the next layer's im2col.
            x = _pointwise_block_xla(x, params[ia], act)
        elif ib is None:
            x = conv_super_block(x, cfg[ia], params[ia], out_dtype=out_dtype)
        else:
            x = conv_super_block(x, cfg[ia], params[ia], cfg[ib], params[ib],
                                 out_dtype=out_dtype)
    return jnp.transpose(x, (0, 3, 1, 2))                         # -> NCHW


if __name__ == "__main__":
    key = jax.random.PRNGKey(0)
    k_param, k_input = jax.random.split(key)

    # 70x70 input is the geometry that yields the module's documented (dim5, 1, 1) latent;
    # feature dims are scaled down to keep the test small.
    in_channels = 2
    dims = dict(dim1=16, dim2=32, dim3=64, dim4=128, dim5=256)
    cfg, params = make_velocity_encoder(k_param, in_channels, **dims)

    x = jax.random.normal(k_input, (2, in_channels, 70, 70), dtype=jnp.float32)

    fwd = jax.jit(lambda xx: velocity_encoder_forward(xx, cfg, params))
    out = fwd(x)
    jax.block_until_ready(out)

    assert out.shape == (2, dims["dim5"], 1, 1), out.shape
    assert bool(jnp.all(jnp.isfinite(out)))
    # Final block is Tanh -> outputs bounded in [-1, 1].
    assert bool(jnp.all(jnp.abs(out) <= 1.0 + 1e-6))

    print("KERNEL_OK")
</pallas_src>

<mosaic_0001>
module attributes {stable_mosaic.version = 11 : i64} {
  func.func @_mm_shift_act_kernel(%arg0: i32, %arg1: i32, %arg2: memref<512x144xbf16, #tpu.memory_space<vmem>>, %arg3: memref<144x16xbf16, #tpu.memory_space<vmem>>, %arg4: memref<1x16xf32, #tpu.memory_space<vmem>>, %arg5: memref<512x16xbf16, #tpu.memory_space<vmem>>) attributes {dimension_semantics = [#tpu.dimension_semantics<parallel>, #tpu.dimension_semantics<parallel>], iteration_bounds = array<i64: 20, 1>, scalar_prefetch = 0 : i64, scratch_operands = 0 : i64, tpu.core_type = #tpu.core_type<tc>, window_params = [{transform_indices = @transform_0, window_bounds = array<i64: 512, 144>}, {transform_indices = @transform_1, window_bounds = array<i64: 144, 16>}, {transform_indices = @transform_2, window_bounds = array<i64: 1, 16>}, {transform_indices = @transform_3, window_bounds = array<i64: 512, 16>}]} {
    %c0 = arith.constant 0 : index
    %c0_0 = arith.constant 0 : index
    %0 = vector.load %arg2[%c0, %c0_0] : memref<512x144xbf16, #tpu.memory_space<vmem>>, vector<512x144xbf16>
    %c0_1 = arith.constant 0 : index
    %c0_2 = arith.constant 0 : index
    %1 = vector.load %arg3[%c0_1, %c0_2] : memref<144x16xbf16, #tpu.memory_space<vmem>>, vector<144x16xbf16>
    %cst = arith.constant dense<0.000000e+00> : vector<512x16xf32>
    %2 = tpu.matmul %0, %1, %cst {dimension_numbers = #tpu.dot_dimension_numbers<[1], [0], [0], [1], [0, 0, 1, 1], [], []>} : vector<512x144xbf16>, vector<144x16xbf16>, vector<512x16xf32> -> vector<512x16xf32>
    %c0_3 = arith.constant 0 : index
    %c0_4 = arith.constant 0 : index
    %3 = vector.load %arg4[%c0_3, %c0_4] : memref<1x16xf32, #tpu.memory_space<vmem>>, vector<1x16xf32>
    %4 = vector.broadcast %3 : vector<1x16xf32> to vector<512x16xf32>
    %5 = arith.addf %2, %4 : vector<512x16xf32>
    %cst_5 = arith.constant 0.000000e+00 : f32
    %6 = vector.broadcast %cst_5 : f32 to vector<512x16xf32>
    %7 = arith.cmpf oge, %5, %6 : vector<512x16xf32>
    %cst_6 = arith.constant 2.000000e-01 : f32
    %8 = vector.broadcast %cst_6 : f32 to vector<512x16xf32>
    %9 = arith.mulf %8, %5 : vector<512x16xf32>
    %10 = arith.select %7, %5, %9 : vector<512x16xi1>, vector<512x16xf32>
    %11 = arith.truncf %10 : vector<512x16xf32> to vector<512x16xbf16>
    %c0_7 = arith.constant 0 : index
    %c0_8 = arith.constant 0 : index
    %12 = vector.load %arg5[%c0_7, %c0_8] : memref<512x16xbf16, #tpu.memory_space<vmem>>, vector<512x16xbf16>
    tpu.vector_store %arg5[%c0_7, %c0_8], %11 {strides = array<i32>} : memref<512x16xbf16, #tpu.memory_space<vmem>>, vector<512x16xbf16>,
    return
  }
  func.func @transform_0(%arg0: i32, %arg1: i32) -> (i32, i32) {
    %c0_i32 = arith.constant 0 : i32
    %c0_i32_0 = arith.constant 0 : i32
    return %arg0, %c0_i32 : i32, i32
  }
  func.func @transform_1(%arg0: i32, %arg1: i32) -> (i32, i32) {
    %c0_i32 = arith.constant 0 : i32
    %c0_i32_0 = arith.constant 0 : i32
    return %c0_i32, %arg1 : i32, i32
  }
  func.func @transform_2(%arg0: i32, %arg1: i32) -> (i32, i32) {
    %c0_i32 = arith.constant 0 : i32
    %c0_i32_0 = arith.constant 0 : i32
    return %c0_i32, %arg1 : i32, i32
  }
  func.func @transform_3(%arg0: i32, %arg1: i32) -> (i32, i32) {
    %c0_i32 = arith.constant 0 : i32
    return %arg0, %arg1 : i32, i32
  }
}

module attributes {stable_mosaic.version = 11 : i64} {
  func.func @_mm_shift_act_x2_kernel(%arg0: i32, %arg1: memref<256x144xbf16, #tpu.memory_space<vmem>>, %arg2: memref<144x32xbf16, #tpu.memory_space<vmem>>, %arg3: memref<1x32xf32, #tpu.memory_space<vmem>>, %arg4: memref<32x32xbf16, #tpu.memory_space<vmem>>, %arg5: memref<1x32xf32, #tpu.memory_space<vmem>>, %arg6: memref<256x32xbf16, #tpu.memory_space<vmem>>) attributes {dimension_semantics = [#tpu.dimension_semantics<parallel>], iteration_bounds = array<i64: 10>, scalar_prefetch = 0 : i64, scratch_operands = 0 : i64, tpu.core_type = #tpu.core_type<tc>, window_params = [{transform_indices = @transform_0, window_bounds = array<i64: 256, 144>}, {pipeline_mode = #tpu.pipeline_mode<synchronous>, transform_indices = @transform_1, window_bounds = array<i64: 144, 32>}, {pipeline_mode = #tpu.pipeline_mode<synchronous>, transform_indices = @transform_2, window_bounds = array<i64: 1, 32>}, {pipeline_mode = #tpu.pipeline_mode<synchronous>, transform_indices = @transform_3, window_bounds = array<i64: 32, 32>}, {pipeline_mode = #tpu.pipeline_mode<synchronous>, transform_indices = @transform_4, window_bounds = array<i64: 1, 32>}, {transform_indices = @transform_5, window_bounds = array<i64: 256, 32>}]} {
    %c0 = arith.constant 0 : index
    %c0_0 = arith.constant 0 : index
    %0 = vector.load %arg1[%c0, %c0_0] : memref<256x144xbf16, #tpu.memory_space<vmem>>, vector<256x144xbf16>
    %c0_1 = arith.constant 0 : index
    %c0_2 = arith.constant 0 : index
    %1 = vector.load %arg2[%c0_1, %c0_2] : memref<144x32xbf16, #tpu.memory_space<vmem>>, vector<144x32xbf16>
    %cst = arith.constant dense<0.000000e+00> : vector<256x32xf32>
    %2 = tpu.matmul %0, %1, %cst {dimension_numbers = #tpu.dot_dimension_numbers<[1], [0], [0], [1], [0, 0, 1, 1], [], []>} : vector<256x144xbf16>, vector<144x32xbf16>, vector<256x32xf32> -> vector<256x32xf32>
    %c0_3 = arith.constant 0 : index
    %c0_4 = arith.constant 0 : index
    %3 = vector.load %arg3[%c0_3, %c0_4] : memref<1x32xf32, #tpu.memory_space<vmem>>, vector<1x32xf32>
    %4 = vector.broadcast %3 : vector<1x32xf32> to vector<256x32xf32>
    %5 = arith.addf %2, %4 : vector<256x32xf32>
    %cst_5 = arith.constant 0.000000e+00 : f32
    %6 = vector.broadcast %cst_5 : f32 to vector<256x32xf32>
    %7 = arith.cmpf oge, %5, %6 : vector<256x32xf32>
    %cst_6 = arith.constant 2.000000e-01 : f32
    %8 = vector.broadcast %cst_6 : f32 to vector<256x32xf32>
    %9 = arith.mulf %8, %5 : vector<256x32xf32>
    %10 = arith.select %7, %5, %9 : vector<256x32xi1>, vector<256x32xf32>
    %11 = arith.truncf %10 : vector<256x32xf32> to vector<256x32xbf16>
    %c0_7 = arith.constant 0 : index
    %c0_8 = arith.constant 0 : index
    %12 = vector.load %arg4[%c0_7, %c0_8] : memref<32x32xbf16, #tpu.memory_space<vmem>>, vector<32x32xbf16>
    %cst_9 = arith.constant dense<0.000000e+00> : vector<256x32xf32>
    %13 = tpu.matmul %11, %12, %cst_9 {dimension_numbers = #tpu.dot_dimension_numbers<[1], [0], [0], [1], [0, 0, 1, 1], [], []>} : vector<256x32xbf16>, vector<32x32xbf16>, vector<256x32xf32> -> vector<256x32xf32>
    %c0_10 = arith.constant 0 : index
    %c0_11 = arith.constant 0 : index
    %14 = vector.load %arg5[%c0_10, %c0_11] : memref<1x32xf32, #tpu.memory_space<vmem>>, vector<1x32xf32>
    %15 = vector.broadcast %14 : vector<1x32xf32> to vector<256x32xf32>
    %16 = arith.addf %13, %15 : vector<256x32xf32>
    %cst_12 = arith.constant 0.000000e+00 : f32
    %17 = vector.broadcast %cst_12 : f32 to vector<256x32xf32>
    %18 = arith.cmpf oge, %16, %17 : vector<256x32xf32>
    %cst_13 = arith.constant 2.000000e-01 : f32
    %19 = vector.broadcast %cst_13 : f32 to vector<256x32xf32>
    %20 = arith.mulf %19, %16 : vector<256x32xf32>
    %21 = arith.select %18, %16, %20 : vector<256x32xi1>, vector<256x32xf32>
    %22 = arith.truncf %21 : vector<256x32xf32> to vector<256x32xbf16>
    %c0_14 = arith.constant 0 : index
    %c0_15 = arith.constant 0 : index
    %23 = vector.load %arg6[%c0_14, %c0_15] : memref<256x32xbf16, #tpu.memory_space<vmem>>, vector<256x32xbf16>
    tpu.vector_store %arg6[%c0_14, %c0_15], %22 {strides = array<i32>} : memref<256x32xbf16, #tpu.memory_space<vmem>>, vector<256x32xbf16>,
    return
  }
  func.func @transform_0(%arg0: i32) -> (i32, i32) {
    %c0_i32 = arith.constant 0 : i32
    %c0_i32_0 = arith.constant 0 : i32
    return %arg0, %c0_i32 : i32, i32
  }
  func.func @transform_1(%arg0: i32) -> (i32, i32) {
    %c0_i32 = arith.constant 0 : i32
    %c0_i32_0 = arith.constant 0 : i32
    %c0_i32_1 = arith.constant 0 : i32
    return %c0_i32, %c0_i32_0 : i32, i32
  }
  func.func @transform_2(%arg0: i32) -> (i32, i32) {
    %c0_i32 = arith.constant 0 : i32
    %c0_i32_0 = arith.constant 0 : i32
    %c0_i32_1 = arith.constant 0 : i32
    return %c0_i32, %c0_i32_0 : i32, i32
  }
  func.func @transform_3(%arg0: i32) -> (i32, i32) {
    %c0_i32 = arith.constant 0 : i32
    %c0_i32_0 = arith.constant 0 : i32
    %c0_i32_1 = arith.constant 0 : i32
    return %c0_i32, %c0_i32_0 : i32, i32
  }
  func.func @transform_4(%arg0: i32) -> (i32, i32) {
    %c0_i32 = arith.constant 0 : i32
    %c0_i32_0 = arith.constant 0 : i32
    %c0_i32_1 = arith.constant 0 : i32
    return %c0_i32, %c0_i32_0 : i32, i32
  }
  func.func @transform_5(%arg0: i32) -> (i32, i32) {
    %c0_i32 = arith.constant 0 : i32
    %c0_i32_0 = arith.constant 0 : i32
    return %arg0, %c0_i32 : i32, i32
  }
}

module attributes {stable_mosaic.version = 11 : i64} {
  func.func @_mm_shift_act_x2_kernel(%arg0: i32, %arg1: memref<256x288xbf16, #tpu.memory_space<vmem>>, %arg2: memref<288x32xbf16, #tpu.memory_space<vmem>>, %arg3: memref<1x32xf32, #tpu.memory_space<vmem>>, %arg4: memref<32x32xbf16, #tpu.memory_space<vmem>>, %arg5: memref<1x32xf32, #tpu.memory_space<vmem>>, %arg6: memref<256x32xbf16, #tpu.memory_space<vmem>>) attributes {dimension_semantics = [#tpu.dimension_semantics<parallel>], iteration_bounds = array<i64: 10>, scalar_prefetch = 0 : i64, scratch_operands = 0 : i64, tpu.core_type = #tpu.core_type<tc>, window_params = [{transform_indices = @transform_0, window_bounds = array<i64: 256, 288>}, {pipeline_mode = #tpu.pipeline_mode<synchronous>, transform_indices = @transform_1, window_bounds = array<i64: 288, 32>}, {pipeline_mode = #tpu.pipeline_mode<synchronous>, transform_indices = @transform_2, window_bounds = array<i64: 1, 32>}, {pipeline_mode = #tpu.pipeline_mode<synchronous>, transform_indices = @transform_3, window_bounds = array<i64: 32, 32>}, {pipeline_mode = #tpu.pipeline_mode<synchronous>, transform_indices = @transform_4, window_bounds = array<i64: 1, 32>}, {transform_indices = @transform_5, window_bounds = array<i64: 256, 32>}]} {
    %c0 = arith.constant 0 : index
    %c0_0 = arith.constant 0 : index
    %0 = vector.load %arg1[%c0, %c0_0] : memref<256x288xbf16, #tpu.memory_space<vmem>>, vector<256x288xbf16>
    %c0_1 = arith.constant 0 : index
    %c0_2 = arith.constant 0 : index
    %1 = vector.load %arg2[%c0_1, %c0_2] : memref<288x32xbf16, #tpu.memory_space<vmem>>, vector<288x32xbf16>
    %cst = arith.constant dense<0.000000e+00> : vector<256x32xf32>
    %2 = tpu.matmul %0, %1, %cst {dimension_numbers = #tpu.dot_dimension_numbers<[1], [0], [0], [1], [0, 0, 1, 1], [], []>} : vector<256x288xbf16>, vector<288x32xbf16>, vector<256x32xf32> -> vector<256x32xf32>
    %c0_3 = arith.constant 0 : index
    %c0_4 = arith.constant 0 : index
    %3 = vector.load %arg3[%c0_3, %c0_4] : memref<1x32xf32, #tpu.memory_space<vmem>>, vector<1x32xf32>
    %4 = vector.broadcast %3 : vector<1x32xf32> to vector<256x32xf32>
    %5 = arith.addf %2, %4 : vector<256x32xf32>
    %cst_5 = arith.constant 0.000000e+00 : f32
    %6 = vector.broadcast %cst_5 : f32 to vector<256x32xf32>
    %7 = arith.cmpf oge, %5, %6 : vector<256x32xf32>
    %cst_6 = arith.constant 2.000000e-01 : f32
    %8 = vector.broadcast %cst_6 : f32 to vector<256x32xf32>
    %9 = arith.mulf %8, %5 : vector<256x32xf32>
    %10 = arith.select %7, %5, %9 : vector<256x32xi1>, vector<256x32xf32>
    %11 = arith.truncf %10 : vector<256x32xf32> to vector<256x32xbf16>
    %c0_7 = arith.constant 0 : index
    %c0_8 = arith.constant 0 : index
    %12 = vector.load %arg4[%c0_7, %c0_8] : memref<32x32xbf16, #tpu.memory_space<vmem>>, vector<32x32xbf16>
    %cst_9 = arith.constant dense<0.000000e+00> : vector<256x32xf32>
    %13 = tpu.matmul %11, %12, %cst_9 {dimension_numbers = #tpu.dot_dimension_numbers<[1], [0], [0], [1], [0, 0, 1, 1], [], []>} : vector<256x32xbf16>, vector<32x32xbf16>, vector<256x32xf32> -> vector<256x32xf32>
    %c0_10 = arith.constant 0 : index
    %c0_11 = arith.constant 0 : index
    %14 = vector.load %arg5[%c0_10, %c0_11] : memref<1x32xf32, #tpu.memory_space<vmem>>, vector<1x32xf32>
    %15 = vector.broadcast %14 : vector<1x32xf32> to vector<256x32xf32>
    %16 = arith.addf %13, %15 : vector<256x32xf32>
    %cst_12 = arith.constant 0.000000e+00 : f32
    %17 = vector.broadcast %cst_12 : f32 to vector<256x32xf32>
    %18 = arith.cmpf oge, %16, %17 : vector<256x32xf32>
    %cst_13 = arith.constant 2.000000e-01 : f32
    %19 = vector.broadcast %cst_13 : f32 to vector<256x32xf32>
    %20 = arith.mulf %19, %16 : vector<256x32xf32>
    %21 = arith.select %18, %16, %20 : vector<256x32xi1>, vector<256x32xf32>
    %22 = arith.truncf %21 : vector<256x32xf32> to vector<256x32xbf16>
    %c0_14 = arith.constant 0 : index
    %c0_15 = arith.constant 0 : index
    %23 = vector.load %arg6[%c0_14, %c0_15] : memref<256x32xbf16, #tpu.memory_space<vmem>>, vector<256x32xbf16>
    tpu.vector_store %arg6[%c0_14, %c0_15], %22 {strides = array<i32>} : memref<256x32xbf16, #tpu.memory_space<vmem>>, vector<256x32xbf16>,
    return
  }
  func.func @transform_0(%arg0: i32) -> (i32, i32) {
    %c0_i32 = arith.constant 0 : i32
    %c0_i32_0 = arith.constant 0 : i32
    return %arg0, %c0_i32 : i32, i32
  }
  func.func @transform_1(%arg0: i32) -> (i32, i32) {
    %c0_i32 = arith.constant 0 : i32
    %c0_i32_0 = arith.constant 0 : i32
    %c0_i32_1 = arith.constant 0 : i32
    return %c0_i32, %c0_i32_0 : i32, i32
  }
  func.func @transform_2(%arg0: i32) -> (i32, i32) {
    %c0_i32 = arith.constant 0 : i32
    %c0_i32_0 = arith.constant 0 : i32
    %c0_i32_1 = arith.constant 0 : i32
    return %c0_i32, %c0_i32_0 : i32, i32
  }
  func.func @transform_3(%arg0: i32) -> (i32, i32) {
    %c0_i32 = arith.constant 0 : i32
    %c0_i32_0 = arith.constant 0 : i32
    %c0_i32_1 = arith.constant 0 : i32
    return %c0_i32, %c0_i32_0 : i32, i32
  }
  func.func @transform_4(%arg0: i32) -> (i32, i32) {
    %c0_i32 = arith.constant 0 : i32
    %c0_i32_0 = arith.constant 0 : i32
    %c0_i32_1 = arith.constant 0 : i32
    return %c0_i32, %c0_i32_0 : i32, i32
  }
  func.func @transform_5(%arg0: i32) -> (i32, i32) {
    %c0_i32 = arith.constant 0 : i32
    %c0_i32_0 = arith.constant 0 : i32
    return %arg0, %c0_i32 : i32, i32
  }
}

module attributes {stable_mosaic.version = 11 : i64} {
  func.func @_mm_shift_act_x2_kernel(%arg0: i32, %arg1: memref<256x288xbf16, #tpu.memory_space<vmem>>, %arg2: memref<288x64xbf16, #tpu.memory_space<vmem>>, %arg3: memref<1x64xf32, #tpu.memory_space<vmem>>, %arg4: memref<64x64xbf16, #tpu.memory_space<vmem>>, %arg5: memref<1x64xf32, #tpu.memory_space<vmem>>, %arg6: memref<256x64xbf16, #tpu.memory_space<vmem>>) attributes {dimension_semantics = [#tpu.dimension_semantics<parallel>], iteration_bounds = array<i64: 3>, scalar_prefetch = 0 : i64, scratch_operands = 0 : i64, tpu.core_type = #tpu.core_type<tc>, window_params = [{transform_indices = @transform_0, window_bounds = array<i64: 256, 288>}, {pipeline_mode = #tpu.pipeline_mode<synchronous>, transform_indices = @transform_1, window_bounds = array<i64: 288, 64>}, {pipeline_mode = #tpu.pipeline_mode<synchronous>, transform_indices = @transform_2, window_bounds = array<i64: 1, 64>}, {pipeline_mode = #tpu.pipeline_mode<synchronous>, transform_indices = @transform_3, window_bounds = array<i64: 64, 64>}, {pipeline_mode = #tpu.pipeline_mode<synchronous>, transform_indices = @transform_4, window_bounds = array<i64: 1, 64>}, {transform_indices = @transform_5, window_bounds = array<i64: 256, 64>}]} {
    %c0 = arith.constant 0 : index
    %c0_0 = arith.constant 0 : index
    %0 = vector.load %arg1[%c0, %c0_0] : memref<256x288xbf16, #tpu.memory_space<vmem>>, vector<256x288xbf16>
    %c0_1 = arith.constant 0 : index
    %c0_2 = arith.constant 0 : index
    %1 = vector.load %arg2[%c0_1, %c0_2] : memref<288x64xbf16, #tpu.memory_space<vmem>>, vector<288x64xbf16>
    %cst = arith.constant dense<0.000000e+00> : vector<256x64xf32>
    %2 = tpu.matmul %0, %1, %cst {dimension_numbers = #tpu.dot_dimension_numbers<[1], [0], [0], [1], [0, 0, 1, 1], [], []>} : vector<256x288xbf16>, vector<288x64xbf16>, vector<256x64xf32> -> vector<256x64xf32>
    %c0_3 = arith.constant 0 : index
    %c0_4 = arith.constant 0 : index
    %3 = vector.load %arg3[%c0_3, %c0_4] : memref<1x64xf32, #tpu.memory_space<vmem>>, vector<1x64xf32>
    %4 = vector.broadcast %3 : vector<1x64xf32> to vector<256x64xf32>
    %5 = arith.addf %2, %4 : vector<256x64xf32>
    %cst_5 = arith.constant 0.000000e+00 : f32
    %6 = vector.broadcast %cst_5 : f32 to vector<256x64xf32>
    %7 = arith.cmpf oge, %5, %6 : vector<256x64xf32>
    %cst_6 = arith.constant 2.000000e-01 : f32
    %8 = vector.broadcast %cst_6 : f32 to vector<256x64xf32>
    %9 = arith.mulf %8, %5 : vector<256x64xf32>
    %10 = arith.select %7, %5, %9 : vector<256x64xi1>, vector<256x64xf32>
    %11 = arith.truncf %10 : vector<256x64xf32> to vector<256x64xbf16>
    %c0_7 = arith.constant 0 : index
    %c0_8 = arith.constant 0 : index
    %12 = vector.load %arg4[%c0_7, %c0_8] : memref<64x64xbf16, #tpu.memory_space<vmem>>, vector<64x64xbf16>
    %cst_9 = arith.constant dense<0.000000e+00> : vector<256x64xf32>
    %13 = tpu.matmul %11, %12, %cst_9 {dimension_numbers = #tpu.dot_dimension_numbers<[1], [0], [0], [1], [0, 0, 1, 1], [], []>} : vector<256x64xbf16>, vector<64x64xbf16>, vector<256x64xf32> -> vector<256x64xf32>
    %c0_10 = arith.constant 0 : index
    %c0_11 = arith.constant 0 : index
    %14 = vector.load %arg5[%c0_10, %c0_11] : memref<1x64xf32, #tpu.memory_space<vmem>>, vector<1x64xf32>
    %15 = vector.broadcast %14 : vector<1x64xf32> to vector<256x64xf32>
    %16 = arith.addf %13, %15 : vector<256x64xf32>
    %cst_12 = arith.constant 0.000000e+00 : f32
    %17 = vector.broadcast %cst_12 : f32 to vector<256x64xf32>
    %18 = arith.cmpf oge, %16, %17 : vector<256x64xf32>
    %cst_13 = arith.constant 2.000000e-01 : f32
    %19 = vector.broadcast %cst_13 : f32 to vector<256x64xf32>
    %20 = arith.mulf %19, %16 : vector<256x64xf32>
    %21 = arith.select %18, %16, %20 : vector<256x64xi1>, vector<256x64xf32>
    %22 = arith.truncf %21 : vector<256x64xf32> to vector<256x64xbf16>
    %c0_14 = arith.constant 0 : index
    %c0_15 = arith.constant 0 : index
    %23 = vector.load %arg6[%c0_14, %c0_15] : memref<256x64xbf16, #tpu.memory_space<vmem>>, vector<256x64xbf16>
    tpu.vector_store %arg6[%c0_14, %c0_15], %22 {strides = array<i32>} : memref<256x64xbf16, #tpu.memory_space<vmem>>, vector<256x64xbf16>,
    return
  }
  func.func @transform_0(%arg0: i32) -> (i32, i32) {
    %c0_i32 = arith.constant 0 : i32
    %c0_i32_0 = arith.constant 0 : i32
    return %arg0, %c0_i32 : i32, i32
  }
  func.func @transform_1(%arg0: i32) -> (i32, i32) {
    %c0_i32 = arith.constant 0 : i32
    %c0_i32_0 = arith.constant 0 : i32
    %c0_i32_1 = arith.constant 0 : i32
    return %c0_i32, %c0_i32_0 : i32, i32
  }
  func.func @transform_2(%arg0: i32) -> (i32, i32) {
    %c0_i32 = arith.constant 0 : i32
    %c0_i32_0 = arith.constant 0 : i32
    %c0_i32_1 = arith.constant 0 : i32
    return %c0_i32, %c0_i32_0 : i32, i32
  }
  func.func @transform_3(%arg0: i32) -> (i32, i32) {
    %c0_i32 = arith.constant 0 : i32
    %c0_i32_0 = arith.constant 0 : i32
    %c0_i32_1 = arith.constant 0 : i32
    return %c0_i32, %c0_i32_0 : i32, i32
  }
  func.func @transform_4(%arg0: i32) -> (i32, i32) {
    %c0_i32 = arith.constant 0 : i32
    %c0_i32_0 = arith.constant 0 : i32
    %c0_i32_1 = arith.constant 0 : i32
    return %c0_i32, %c0_i32_0 : i32, i32
  }
  func.func @transform_5(%arg0: i32) -> (i32, i32) {
    %c0_i32 = arith.constant 0 : i32
    %c0_i32_0 = arith.constant 0 : i32
    return %arg0, %c0_i32 : i32, i32
  }
}

module attributes {stable_mosaic.version = 11 : i64} {
  func.func @_mm_shift_act_x2_kernel(%arg0: i32, %arg1: memref<256x576xbf16, #tpu.memory_space<vmem>>, %arg2: memref<576x64xbf16, #tpu.memory_space<vmem>>, %arg3: memref<1x64xf32, #tpu.memory_space<vmem>>, %arg4: memref<64x64xbf16, #tpu.memory_space<vmem>>, %arg5: memref<1x64xf32, #tpu.memory_space<vmem>>, %arg6: memref<256x64xbf16, #tpu.memory_space<vmem>>) attributes {dimension_semantics = [#tpu.dimension_semantics<parallel>], iteration_bounds = array<i64: 2>, scalar_prefetch = 0 : i64, scratch_operands = 0 : i64, tpu.core_type = #tpu.core_type<tc>, window_params = [{transform_indices = @transform_0, window_bounds = array<i64: 256, 576>}, {pipeline_mode = #tpu.pipeline_mode<synchronous>, transform_indices = @transform_1, window_bounds = array<i64: 576, 64>}, {pipeline_mode = #tpu.pipeline_mode<synchronous>, transform_indices = @transform_2, window_bounds = array<i64: 1, 64>}, {pipeline_mode = #tpu.pipeline_mode<synchronous>, transform_indices = @transform_3, window_bounds = array<i64: 64, 64>}, {pipeline_mode = #tpu.pipeline_mode<synchronous>, transform_indices = @transform_4, window_bounds = array<i64: 1, 64>}, {transform_indices = @transform_5, window_bounds = array<i64: 256, 64>}]} {
    %c0 = arith.constant 0 : index
    %c0_0 = arith.constant 0 : index
    %0 = vector.load %arg1[%c0, %c0_0] : memref<256x576xbf16, #tpu.memory_space<vmem>>, vector<256x576xbf16>
    %c0_1 = arith.constant 0 : index
    %c0_2 = arith.constant 0 : index
    %1 = vector.load %arg2[%c0_1, %c0_2] : memref<576x64xbf16, #tpu.memory_space<vmem>>, vector<576x64xbf16>
    %cst = arith.constant dense<0.000000e+00> : vector<256x64xf32>
    %2 = tpu.matmul %0, %1, %cst {dimension_numbers = #tpu.dot_dimension_numbers<[1], [0], [0], [1], [0, 0, 1, 1], [], []>} : vector<256x576xbf16>, vector<576x64xbf16>, vector<256x64xf32> -> vector<256x64xf32>
    %c0_3 = arith.constant 0 : index
    %c0_4 = arith.constant 0 : index
    %3 = vector.load %arg3[%c0_3, %c0_4] : memref<1x64xf32, #tpu.memory_space<vmem>>, vector<1x64xf32>
    %4 = vector.broadcast %3 : vector<1x64xf32> to vector<256x64xf32>
    %5 = arith.addf %2, %4 : vector<256x64xf32>
    %cst_5 = arith.constant 0.000000e+00 : f32
    %6 = vector.broadcast %cst_5 : f32 to vector<256x64xf32>
    %7 = arith.cmpf oge, %5, %6 : vector<256x64xf32>
    %cst_6 = arith.constant 2.000000e-01 : f32
    %8 = vector.broadcast %cst_6 : f32 to vector<256x64xf32>
    %9 = arith.mulf %8, %5 : vector<256x64xf32>
    %10 = arith.select %7, %5, %9 : vector<256x64xi1>, vector<256x64xf32>
    %11 = arith.truncf %10 : vector<256x64xf32> to vector<256x64xbf16>
    %c0_7 = arith.constant 0 : index
    %c0_8 = arith.constant 0 : index
    %12 = vector.load %arg4[%c0_7, %c0_8] : memref<64x64xbf16, #tpu.memory_space<vmem>>, vector<64x64xbf16>
    %cst_9 = arith.constant dense<0.000000e+00> : vector<256x64xf32>
    %13 = tpu.matmul %11, %12, %cst_9 {dimension_numbers = #tpu.dot_dimension_numbers<[1], [0], [0], [1], [0, 0, 1, 1], [], []>} : vector<256x64xbf16>, vector<64x64xbf16>, vector<256x64xf32> -> vector<256x64xf32>
    %c0_10 = arith.constant 0 : index
    %c0_11 = arith.constant 0 : index
    %14 = vector.load %arg5[%c0_10, %c0_11] : memref<1x64xf32, #tpu.memory_space<vmem>>, vector<1x64xf32>
    %15 = vector.broadcast %14 : vector<1x64xf32> to vector<256x64xf32>
    %16 = arith.addf %13, %15 : vector<256x64xf32>
    %cst_12 = arith.constant 0.000000e+00 : f32
    %17 = vector.broadcast %cst_12 : f32 to vector<256x64xf32>
    %18 = arith.cmpf oge, %16, %17 : vector<256x64xf32>
    %cst_13 = arith.constant 2.000000e-01 : f32
    %19 = vector.broadcast %cst_13 : f32 to vector<256x64xf32>
    %20 = arith.mulf %19, %16 : vector<256x64xf32>
    %21 = arith.select %18, %16, %20 : vector<256x64xi1>, vector<256x64xf32>
    %22 = arith.truncf %21 : vector<256x64xf32> to vector<256x64xbf16>
    %c0_14 = arith.constant 0 : index
    %c0_15 = arith.constant 0 : index
    %23 = vector.load %arg6[%c0_14, %c0_15] : memref<256x64xbf16, #tpu.memory_space<vmem>>, vector<256x64xbf16>
    tpu.vector_store %arg6[%c0_14, %c0_15], %22 {strides = array<i32>} : memref<256x64xbf16, #tpu.memory_space<vmem>>, vector<256x64xbf16>,
    return
  }
  func.func @transform_0(%arg0: i32) -> (i32, i32) {
    %c0_i32 = arith.constant 0 : i32
    %c0_i32_0 = arith.constant 0 : i32
    return %arg0, %c0_i32 : i32, i32
  }
  func.func @transform_1(%arg0: i32) -> (i32, i32) {
    %c0_i32 = arith.constant 0 : i32
    %c0_i32_0 = arith.constant 0 : i32
    %c0_i32_1 = arith.constant 0 : i32
    return %c0_i32, %c0_i32_0 : i32, i32
  }
  func.func @transform_2(%arg0: i32) -> (i32, i32) {
    %c0_i32 = arith.constant 0 : i32
    %c0_i32_0 = arith.constant 0 : i32
    %c0_i32_1 = arith.constant 0 : i32
    return %c0_i32, %c0_i32_0 : i32, i32
  }
  func.func @transform_3(%arg0: i32) -> (i32, i32) {
    %c0_i32 = arith.constant 0 : i32
    %c0_i32_0 = arith.constant 0 : i32
    %c0_i32_1 = arith.constant 0 : i32
    return %c0_i32, %c0_i32_0 : i32, i32
  }
  func.func @transform_4(%arg0: i32) -> (i32, i32) {
    %c0_i32 = arith.constant 0 : i32
    %c0_i32_0 = arith.constant 0 : i32
    %c0_i32_1 = arith.constant 0 : i32
    return %c0_i32, %c0_i32_0 : i32, i32
  }
  func.func @transform_5(%arg0: i32) -> (i32, i32) {
    %c0_i32 = arith.constant 0 : i32
    %c0_i32_0 = arith.constant 0 : i32
    return %arg0, %c0_i32 : i32, i32
  }
}

module attributes {stable_mosaic.version = 11 : i64} {
  func.func @_mm_shift_act_x2_kernel(%arg0: i32, %arg1: memref<128x576xbf16, #tpu.memory_space<vmem>>, %arg2: memref<576x128xbf16, #tpu.memory_space<vmem>>, %arg3: memref<1x128xf32, #tpu.memory_space<vmem>>, %arg4: memref<128x128xbf16, #tpu.memory_space<vmem>>, %arg5: memref<1x128xf32, #tpu.memory_space<vmem>>, %arg6: memref<128x128xbf16, #tpu.memory_space<vmem>>) attributes {dimension_semantics = [#tpu.dimension_semantics<parallel>], iteration_bounds = array<i64: 1>, scalar_prefetch = 0 : i64, scratch_operands = 0 : i64, tpu.core_type = #tpu.core_type<tc>, window_params = [{transform_indices = @transform_0, window_bounds = array<i64: 128, 576>}, {pipeline_mode = #tpu.pipeline_mode<synchronous>, transform_indices = @transform_1, window_bounds = array<i64: 576, 128>}, {pipeline_mode = #tpu.pipeline_mode<synchronous>, transform_indices = @transform_2, window_bounds = array<i64: 1, 128>}, {pipeline_mode = #tpu.pipeline_mode<synchronous>, transform_indices = @transform_3, window_bounds = array<i64: 128, 128>}, {pipeline_mode = #tpu.pipeline_mode<synchronous>, transform_indices = @transform_4, window_bounds = array<i64: 1, 128>}, {transform_indices = @transform_5, window_bounds = array<i64: 128, 128>}]} {
    %c0 = arith.constant 0 : index
    %c0_0 = arith.constant 0 : index
    %0 = vector.load %arg1[%c0, %c0_0] : memref<128x576xbf16, #tpu.memory_space<vmem>>, vector<128x576xbf16>
    %c0_1 = arith.constant 0 : index
    %c0_2 = arith.constant 0 : index
    %1 = vector.load %arg2[%c0_1, %c0_2] : memref<576x128xbf16, #tpu.memory_space<vmem>>, vector<576x128xbf16>
    %cst = arith.constant dense<0.000000e+00> : vector<128x128xf32>
    %2 = tpu.matmul %0, %1, %cst {dimension_numbers = #tpu.dot_dimension_numbers<[1], [0], [0], [1], [0, 0, 1, 1], [], []>} : vector<128x576xbf16>, vector<576x128xbf16>, vector<128x128xf32> -> vector<128x128xf32>
    %c0_3 = arith.constant 0 : index
    %c0_4 = arith.constant 0 : index
    %3 = vector.load %arg3[%c0_3, %c0_4] : memref<1x128xf32, #tpu.memory_space<vmem>>, vector<1x128xf32>
    %4 = vector.broadcast %3 : vector<1x128xf32> to vector<128x128xf32>
    %5 = arith.addf %2, %4 : vector<128x128xf32>
    %cst_5 = arith.constant 0.000000e+00 : f32
    %6 = vector.broadcast %cst_5 : f32 to vector<128x128xf32>
    %7 = arith.cmpf oge, %5, %6 : vector<128x128xf32>
    %cst_6 = arith.constant 2.000000e-01 : f32
    %8 = vector.broadcast %cst_6 : f32 to vector<128x128xf32>
    %9 = arith.mulf %8, %5 : vector<128x128xf32>
    %10 = arith.select %7, %5, %9 : vector<128x128xi1>, vector<128x128xf32>
    %11 = arith.truncf %10 : vector<128x128xf32> to vector<128x128xbf16>
    %c0_7 = arith.constant 0 : index
    %c0_8 = arith.constant 0 : index
    %12 = vector.load %arg4[%c0_7, %c0_8] : memref<128x128xbf16, #tpu.memory_space<vmem>>, vector<128x128xbf16>
    %cst_9 = arith.constant dense<0.000000e+00> : vector<128x128xf32>
    %13 = tpu.matmul %11, %12, %cst_9 {dimension_numbers = #tpu.dot_dimension_numbers<[1], [0], [0], [1], [0, 0, 1, 1], [], []>} : vector<128x128xbf16>, vector<128x128xbf16>, vector<128x128xf32> -> vector<128x128xf32>
    %c0_10 = arith.constant 0 : index
    %c0_11 = arith.constant 0 : index
    %14 = vector.load %arg5[%c0_10, %c0_11] : memref<1x128xf32, #tpu.memory_space<vmem>>, vector<1x128xf32>
    %15 = vector.broadcast %14 : vector<1x128xf32> to vector<128x128xf32>
    %16 = arith.addf %13, %15 : vector<128x128xf32>
    %cst_12 = arith.constant 0.000000e+00 : f32
    %17 = vector.broadcast %cst_12 : f32 to vector<128x128xf32>
    %18 = arith.cmpf oge, %16, %17 : vector<128x128xf32>
    %cst_13 = arith.constant 2.000000e-01 : f32
    %19 = vector.broadcast %cst_13 : f32 to vector<128x128xf32>
    %20 = arith.mulf %19, %16 : vector<128x128xf32>
    %21 = arith.select %18, %16, %20 : vector<128x128xi1>, vector<128x128xf32>
    %22 = arith.truncf %21 : vector<128x128xf32> to vector<128x128xbf16>
    %c0_14 = arith.constant 0 : index
    %c0_15 = arith.constant 0 : index
    %23 = vector.load %arg6[%c0_14, %c0_15] : memref<128x128xbf16, #tpu.memory_space<vmem>>, vector<128x128xbf16>
    tpu.vector_store %arg6[%c0_14, %c0_15], %22 {strides = array<i32>} : memref<128x128xbf16, #tpu.memory_space<vmem>>, vector<128x128xbf16>,
    return
  }
  func.func @transform_0(%arg0: i32) -> (i32, i32) {
    %c0_i32 = arith.constant 0 : i32
    %c0_i32_0 = arith.constant 0 : i32
    return %arg0, %c0_i32 : i32, i32
  }
  func.func @transform_1(%arg0: i32) -> (i32, i32) {
    %c0_i32 = arith.constant 0 : i32
    %c0_i32_0 = arith.constant 0 : i32
    %c0_i32_1 = arith.constant 0 : i32
    return %c0_i32, %c0_i32_0 : i32, i32
  }
  func.func @transform_2(%arg0: i32) -> (i32, i32) {
    %c0_i32 = arith.constant 0 : i32
    %c0_i32_0 = arith.constant 0 : i32
    %c0_i32_1 = arith.constant 0 : i32
    return %c0_i32, %c0_i32_0 : i32, i32
  }
  func.func @transform_3(%arg0: i32) -> (i32, i32) {
    %c0_i32 = arith.constant 0 : i32
    %c0_i32_0 = arith.constant 0 : i32
    %c0_i32_1 = arith.constant 0 : i32
    return %c0_i32, %c0_i32_0 : i32, i32
  }
  func.func @transform_4(%arg0: i32) -> (i32, i32) {
    %c0_i32 = arith.constant 0 : i32
    %c0_i32_0 = arith.constant 0 : i32
    %c0_i32_1 = arith.constant 0 : i32
    return %c0_i32, %c0_i32_0 : i32, i32
  }
  func.func @transform_5(%arg0: i32) -> (i32, i32) {
    %c0_i32 = arith.constant 0 : i32
    %c0_i32_0 = arith.constant 0 : i32
    return %arg0, %c0_i32 : i32, i32
  }
}

module attributes {stable_mosaic.version = 11 : i64} {
  func.func @_mm_shift_act_kernel(%arg0: i32, %arg1: i32, %arg2: memref<32x1152xbf16, #tpu.memory_space<vmem>>, %arg3: memref<1152x128xbf16, #tpu.memory_space<vmem>>, %arg4: memref<1x128xf32, #tpu.memory_space<vmem>>, %arg5: memref<32x128xbf16, #tpu.memory_space<vmem>>) attributes {dimension_semantics = [#tpu.dimension_semantics<parallel>, #tpu.dimension_semantics<parallel>], iteration_bounds = array<i64: 1, 1>, scalar_prefetch = 0 : i64, scratch_operands = 0 : i64, tpu.core_type = #tpu.core_type<tc>, window_params = [{transform_indices = @transform_0, window_bounds = array<i64: 32, 1152>}, {transform_indices = @transform_1, window_bounds = array<i64: 1152, 128>}, {transform_indices = @transform_2, window_bounds = array<i64: 1, 128>}, {transform_indices = @transform_3, window_bounds = array<i64: 32, 128>}]} {
    %c0 = arith.constant 0 : index
    %c0_0 = arith.constant 0 : index
    %0 = vector.load %arg2[%c0, %c0_0] : memref<32x1152xbf16, #tpu.memory_space<vmem>>, vector<32x1152xbf16>
    %c0_1 = arith.constant 0 : index
    %c0_2 = arith.constant 0 : index
    %1 = vector.load %arg3[%c0_1, %c0_2] : memref<1152x128xbf16, #tpu.memory_space<vmem>>, vector<1152x128xbf16>
    %cst = arith.constant dense<0.000000e+00> : vector<32x128xf32>
    %2 = tpu.matmul %0, %1, %cst {dimension_numbers = #tpu.dot_dimension_numbers<[1], [0], [0], [1], [0, 0, 1, 1], [], []>} : vector<32x1152xbf16>, vector<1152x128xbf16>, vector<32x128xf32> -> vector<32x128xf32>
    %c0_3 = arith.constant 0 : index
    %c0_4 = arith.constant 0 : index
    %3 = vector.load %arg4[%c0_3, %c0_4] : memref<1x128xf32, #tpu.memory_space<vmem>>, vector<1x128xf32>
    %4 = vector.broadcast %3 : vector<1x128xf32> to vector<32x128xf32>
    %5 = arith.addf %2, %4 : vector<32x128xf32>
    %cst_5 = arith.constant 0.000000e+00 : f32
    %6 = vector.broadcast %cst_5 : f32 to vector<32x128xf32>
    %7 = arith.cmpf oge, %5, %6 : vector<32x128xf32>
    %cst_6 = arith.constant 2.000000e-01 : f32
    %8 = vector.broadcast %cst_6 : f32 to vector<32x128xf32>
    %9 = arith.mulf %8, %5 : vector<32x128xf32>
    %10 = arith.select %7, %5, %9 : vector<32x128xi1>, vector<32x128xf32>
    %11 = arith.truncf %10 : vector<32x128xf32> to vector<32x128xbf16>
    %c0_7 = arith.constant 0 : index
    %c0_8 = arith.constant 0 : index
    %12 = vector.load %arg5[%c0_7, %c0_8] : memref<32x128xbf16, #tpu.memory_space<vmem>>, vector<32x128xbf16>
    tpu.vector_store %arg5[%c0_7, %c0_8], %11 {strides = array<i32>} : memref<32x128xbf16, #tpu.memory_space<vmem>>, vector<32x128xbf16>,
    return
  }
  func.func @transform_0(%arg0: i32, %arg1: i32) -> (i32, i32) {
    %c0_i32 = arith.constant 0 : i32
    %c0_i32_0 = arith.constant 0 : i32
    return %arg0, %c0_i32 : i32, i32
  }
  func.func @transform_1(%arg0: i32, %arg1: i32) -> (i32, i32) {
    %c0_i32 = arith.constant 0 : i32
    %c0_i32_0 = arith.constant 0 : i32
    return %c0_i32, %arg1 : i32, i32
  }
  func.func @transform_2(%arg0: i32, %arg1: i32) -> (i32, i32) {
    %c0_i32 = arith.constant 0 : i32
    %c0_i32_0 = arith.constant 0 : i32
    return %c0_i32, %arg1 : i32, i32
  }
  func.func @transform_3(%arg0: i32, %arg1: i32) -> (i32, i32) {
    %c0_i32 = arith.constant 0 : i32
    return %arg0, %arg1 : i32, i32
  }
}

module attributes {stable_mosaic.version = 11 : i64} {
  func.func @_mm_shift_act_kernel(%arg0: i32, %arg1: i32, %arg2: memref<8x1152xbf16, #tpu.memory_space<vmem>>, %arg3: memref<1152x128xbf16, #tpu.memory_space<vmem>>, %arg4: memref<1x128xf32, #tpu.memory_space<vmem>>, %arg5: memref<8x128xbf16, #tpu.memory_space<vmem>>) attributes {dimension_semantics = [#tpu.dimension_semantics<parallel>, #tpu.dimension_semantics<parallel>], iteration_bounds = array<i64: 1, 1>, scalar_prefetch = 0 : i64, scratch_operands = 0 : i64, tpu.core_type = #tpu.core_type<tc>, window_params = [{transform_indices = @transform_0, window_bounds = array<i64: 8, 1152>}, {transform_indices = @transform_1, window_bounds = array<i64: 1152, 128>}, {transform_indices = @transform_2, window_bounds = array<i64: 1, 128>}, {transform_indices = @transform_3, window_bounds = array<i64: 8, 128>}]} {
    %c0 = arith.constant 0 : index
    %c0_0 = arith.constant 0 : index
    %0 = vector.load %arg2[%c0, %c0_0] : memref<8x1152xbf16, #tpu.memory_space<vmem>>, vector<8x1152xbf16>
    %c0_1 = arith.constant 0 : index
    %c0_2 = arith.constant 0 : index
    %1 = vector.load %arg3[%c0_1, %c0_2] : memref<1152x128xbf16, #tpu.memory_space<vmem>>, vector<1152x128xbf16>
    %cst = arith.constant dense<0.000000e+00> : vector<8x128xf32>
    %2 = tpu.matmul %0, %1, %cst {dimension_numbers = #tpu.dot_dimension_numbers<[1], [0], [0], [1], [0, 0, 1, 1], [], []>} : vector<8x1152xbf16>, vector<1152x128xbf16>, vector<8x128xf32> -> vector<8x128xf32>
    %c0_3 = arith.constant 0 : index
    %c0_4 = arith.constant 0 : index
    %3 = vector.load %arg4[%c0_3, %c0_4] : memref<1x128xf32, #tpu.memory_space<vmem>>, vector<1x128xf32>
    %4 = vector.broadcast %3 : vector<1x128xf32> to vector<8x128xf32>
    %5 = arith.addf %2, %4 : vector<8x128xf32>
    %cst_5 = arith.constant 0.000000e+00 : f32
    %6 = vector.broadcast %cst_5 : f32 to vector<8x128xf32>
    %7 = arith.cmpf oge, %5, %6 : vector<8x128xf32>
    %cst_6 = arith.constant 2.000000e-01 : f32
    %8 = vector.broadcast %cst_6 : f32 to vector<8x128xf32>
    %9 = arith.mulf %8, %5 : vector<8x128xf32>
    %10 = arith.select %7, %5, %9 : vector<8x128xi1>, vector<8x128xf32>
    %11 = arith.truncf %10 : vector<8x128xf32> to vector<8x128xbf16>
    %c0_7 = arith.constant 0 : index
    %c0_8 = arith.constant 0 : index
    %12 = vector.load %arg5[%c0_7, %c0_8] : memref<8x128xbf16, #tpu.memory_space<vmem>>, vector<8x128xbf16>
    tpu.vector_store %arg5[%c0_7, %c0_8], %11 {strides = array<i32>} : memref<8x128xbf16, #tpu.memory_space<vmem>>, vector<8x128xbf16>,
    return
  }
  func.func @transform_0(%arg0: i32, %arg1: i32) -> (i32, i32) {
    %c0_i32 = arith.constant 0 : i32
    %c0_i32_0 = arith.constant 0 : i32
    return %arg0, %c0_i32 : i32, i32
  }
  func.func @transform_1(%arg0: i32, %arg1: i32) -> (i32, i32) {
    %c0_i32 = arith.constant 0 : i32
    %c0_i32_0 = arith.constant 0 : i32
    return %c0_i32, %arg1 : i32, i32
  }
  func.func @transform_2(%arg0: i32, %arg1: i32) -> (i32, i32) {
    %c0_i32 = arith.constant 0 : i32
    %c0_i32_0 = arith.constant 0 : i32
    return %c0_i32, %arg1 : i32, i32
  }
  func.func @transform_3(%arg0: i32, %arg1: i32) -> (i32, i32) {
    %c0_i32 = arith.constant 0 : i32
    return %arg0, %arg1 : i32, i32
  }
}

module attributes {stable_mosaic.version = 11 : i64} {
  func.func @_mm_shift_act_kernel(%arg0: i32, %arg1: i32, %arg2: memref<2x1152xbf16, #tpu.memory_space<vmem>>, %arg3: memref<1152x128xbf16, #tpu.memory_space<vmem>>, %arg4: memref<1x128xf32, #tpu.memory_space<vmem>>, %arg5: memref<2x128xf32, #tpu.memory_space<vmem>>) attributes {dimension_semantics = [#tpu.dimension_semantics<parallel>, #tpu.dimension_semantics<parallel>], iteration_bounds = array<i64: 1, 2>, scalar_prefetch = 0 : i64, scratch_operands = 0 : i64, tpu.core_type = #tpu.core_type<tc>, window_params = [{transform_indices = @transform_0, window_bounds = array<i64: 2, 1152>}, {transform_indices = @transform_1, window_bounds = array<i64: 1152, 128>}, {transform_indices = @transform_2, window_bounds = array<i64: 1, 128>}, {transform_indices = @transform_3, window_bounds = array<i64: 2, 128>}]} {
    %c0 = arith.constant 0 : index
    %c0_0 = arith.constant 0 : index
    %0 = vector.load %arg2[%c0, %c0_0] : memref<2x1152xbf16, #tpu.memory_space<vmem>>, vector<2x1152xbf16>
    %c0_1 = arith.constant 0 : index
    %c0_2 = arith.constant 0 : index
    %1 = vector.load %arg3[%c0_1, %c0_2] : memref<1152x128xbf16, #tpu.memory_space<vmem>>, vector<1152x128xbf16>
    %cst = arith.constant dense<0.000000e+00> : vector<2x128xf32>
    %2 = tpu.matmul %0, %1, %cst {dimension_numbers = #tpu.dot_dimension_numbers<[1], [0], [0], [1], [0, 0, 1, 1], [], []>} : vector<2x1152xbf16>, vector<1152x128xbf16>, vector<2x128xf32> -> vector<2x128xf32>
    %c0_3 = arith.constant 0 : index
    %c0_4 = arith.constant 0 : index
    %3 = vector.load %arg4[%c0_3, %c0_4] : memref<1x128xf32, #tpu.memory_space<vmem>>, vector<1x128xf32>
    %4 = vector.broadcast %3 : vector<1x128xf32> to vector<2x128xf32>
    %5 = arith.addf %2, %4 : vector<2x128xf32>
    %6 = math.tanh %5 : vector<2x128xf32>
    %c0_5 = arith.constant 0 : index
    %c0_6 = arith.constant 0 : index
    %7 = vector.load %arg5[%c0_5, %c0_6] : memref<2x128xf32, #tpu.memory_space<vmem>>, vector<2x128xf32>
    tpu.vector_store %arg5[%c0_5, %c0_6], %6 {strides = array<i32>} : memref<2x128xf32, #tpu.memory_space<vmem>>, vector<2x128xf32>,
    return
  }
  func.func @transform_0(%arg0: i32, %arg1: i32) -> (i32, i32) {
    %c0_i32 = arith.constant 0 : i32
    %c0_i32_0 = arith.constant 0 : i32
    return %arg0, %c0_i32 : i32, i32
  }
  func.func @transform_1(%arg0: i32, %arg1: i32) -> (i32, i32) {
    %c0_i32 = arith.constant 0 : i32
    %c0_i32_0 = arith.constant 0 : i32
    return %c0_i32, %arg1 : i32, i32
  }
  func.func @transform_2(%arg0: i32, %arg1: i32) -> (i32, i32) {
    %c0_i32 = arith.constant 0 : i32
    %c0_i32_0 = arith.constant 0 : i32
    return %c0_i32, %arg1 : i32, i32
  }
  func.func @transform_3(%arg0: i32, %arg1: i32) -> (i32, i32) {
    %c0_i32 = arith.constant 0 : i32
    return %arg0, %arg1 : i32, i32
  }
}

</mosaic_0001>

<bundles_post_ra>
// kernel: _lambda_.9
= control target key start
LH: loop header
LB: loop body
LE: loop exit
PB: predicated region body
PF: predicated region fallthrough
CT: control target
= control target key end

     0   :  { %s2699_s12 = smov 0   ;;  %s2701_s13 = smov 0   ;;  %s3279_s0 = inlined_call_operand.vmem [shape: bf16[9800,144], index: 0, kind: input, shape index: {}]   ;;  %s3280_s1 = inlined_call_operand.vmem [shape: bf16[144,16], index: 1, kind: input, shape index: {}]   ;;  %s3281_s2 = inlined_call_operand.vmem [shape: f32[1,16], index: 2, kind: input, shape index: {}]   ;;  %s3282_s3 = inlined_call_operand.vmem [shape: bf16[9800,16], index: 3, kind: output, shape index: {}]  }
   0x1   :  { %s2703_s14 = smov 0   ;;  %s2705_s15 = smov 0  }
   0x2   :  { %s2707_s16 = smov 0  }
   0x3 LB: > { %s2080_s17 = sadd.s32 4294967295, %s2644_s16   ;;  %s25_s18 = sadd.s32 1, %s2640_s15  ;;  %s2644_s16 = sphi %s2707_s16, %s13_s16   ;;  %s2640_s15 = sphi %s2705_s15, %s3290_s15   ;;  %s2636_s14 = sphi %s2703_s14, %s3289_s14   ;;  %s2632_s13 = sphi %s2701_s13, %s3288_s13   ;;  %s2628_s12 = sphi %s2699_s12, %s3287_s12  }
   0x4   : > { %p27_p0 = scmp.ge.s32.totalorder %s25_s18, 20  ;;  %s112_s19 = sadd.s32 1, %s2632_s13 }
   0x5   : > { %p122_p1 = scmp.ne.s32.totalorder %s2632_s13, %s2628_s12  ;;  %p123_p2 = scmp.eq.s32.totalorder %s2080_s17, 19 }
   0x6   : > { %s3292_s18 = smov (%p27_p0, %s25_s18), 0  ;;  %p2086_p4 = scmp.ge.s32.totalorder %s2644_s16, 1 }
   0x7   : > { %p2731_p3 = por %p123_p2, %p122_p1  ;;  %s107_s21 = ssub.s32 %s2640_s15, %s3292_s18 }
   0x8   : > { %p180_p5 = scmp.lt.s32.totalorder %s2644_s16, 21  ;;  %p110_p6 = scmp.eq.s32.totalorder %s107_s21, 0 }
   0xa   : > { %p181_p7 = pnand %p2086_p4, %p180_p5 }
   0xb   : > { %s2740_s22 = scalar_select %p110_p6, %s2632_s13, %s112_s19  }
   0xc   : > { %184 = sbr.rel (%p181_p7) target bundleno = 483 (0x1e3), region = 32  ;;  %v2469_v0 = vld [vmem:[%s3280_s1] sm:$0xff] (!%p181_p7)   ;;  %v2678_v1 = vmov (!%p181_p7), 0   ;;  %s2746_s25 = sshll.u32 (!%p181_p7), %s2636_s14, 6  ;;  %v2470_v2 = vld [vmem:[%s3280_s1 + $0x8] sm:$0xff] (!%p181_p7)   ;;  %v2471_v3 = vld [vmem:[%s3280_s1 + $0x10] sm:$0xff] (!%p181_p7)  }
   0xd   : > { %774 = vmatprep.subr.bf16.mxu0 (!%p181_p7), %v2678_v1  ;;  %2346 = vmatprep.subr.bf16.mxu1 (!%p181_p7), %v2678_v1  ;;  %p222_p8 = scmp.lt.s32.totalorder (!%p181_p7), %s2746_s25, 1224  ;;  %v2472_v4 = vld [vmem:[%s3280_s1 + $0x18] sm:$0xff] (!%p181_p7)   ;;  %vm677_vm0 = vcmask (!%p181_p7), 130048   ;;  %v2473_v7 = vld [vmem:[%s3280_s1 + $0x20] sm:$0xff] (!%p181_p7)   ;;  %v2474_v8 = vld [vmem:[%s3280_s1 + $0x28] sm:$0xff] (!%p181_p7)   ;;  %vm1511_vm3 = vcmask (!%p181_p7), 125952  }
   0xe   : > { %775 = vmatpush1.bf16.msra.mxu0 (!%p181_p7), %v2469_v0  ;;  %2355 = vmatpush1.bf16.msra.mxu1 (!%p181_p7), %v2469_v0  ;;  %v2475_v9 = vld [vmem:[%s3280_s1 + $0x30] sm:$0xff] (!%p181_p7)   ;;  %v2476_v10 = vld [vmem:[%s3280_s1 + $0x38] sm:$0xff] (!%p181_p7)   ;;  %v2477_v11 = vld [vmem:[%s3280_s1 + $0x40] sm:$0xff] (!%p181_p7)  }
   0xf   : > { %776 = vmatprep.subr.bf16.mxu0 (!%p181_p7), %v2678_v1  ;;  %2347 = vmatprep.subr.bf16.mxu1 (!%p181_p7), %v2678_v1 }
  0x12   : > { %777 = vmatpush1.bf16.msra.mxu0 (!%p181_p7), %v2470_v2  ;;  %2356 = vmatpush1.bf16.msra.mxu1 (!%p181_p7), %v2470_v2 }
  0x13   : > { %s223_s28 = scalar_select %p222_p8, %s2746_s25, 1224  ;;  %778 = vmatprep.subr.bf16.mxu0 %v2678_v1  ;;  %2348 = vmatprep.subr.bf16.mxu1 %v2678_v1 }
  0x14   : > { %s1584_s6 = ssub.s32 (%p2731_p3), 1225, %s2746_s25 }
  0x15   : > { %s2278_s4 = sshll.u32 %s223_s28, 3  ;;  %p1585_p9 = scmp.lt.s32.totalorder (%p2731_p3), %s1584_s6, 64 }
  0x16   : > { %s2759_s7 = scalar_lea.vmem %s3279_s0, %s2278_s4  ;;  %779 = vmatpush1.bf16.msra.mxu0 %v2471_v3  ;;  %2357 = vmatpush1.bf16.msra.mxu1 %v2471_v3  ;;  %s213_s4 = sand.u32 1, %s2628_s12  }
  0x17   : > { %v2480_v5 = vld [vmem:[%s2759_s7 + $0x4] ss:$8 sps:$4 sm:$0xff]   ;;  %780 = vmatprep.subr.bf16.mxu0 %v2678_v1  ;;  %2349 = vmatprep.subr.bf16.mxu1 %v2678_v1  ;;  %v2478_v12 = vld [vmem:[%s2759_s7] ss:$8 sps:$4 sm:$0xff]   ;;  %v2484_v14 = vld [vmem:[%s2759_s7 + $0x14] ss:$8 sps:$4 sm:$0xff]  }
  0x18   : > { %v2483_v6 = vld [vmem:[%s2759_s7 + $0x104] ss:$8 sps:$4 sm:$0xff]   ;;  %2165 = vmatprep.mubr.msk.bf16.mxu0 %vm677_vm0, %v2480_v5  ;;  %v2481_v13 = vld [vmem:[%s2759_s7 + $0x100] ss:$8 sps:$4 sm:$0xff]   ;;  %v2486_v15 = vld [vmem:[%s2759_s7 + $0x114] ss:$8 sps:$4 sm:$0xff]  }
  0x19   : > { %2181 = vmatprep.mubr.msk.bf16.mxu1 %vm677_vm0, %v2483_v6  ;;  %v2488_v16 = vld [vmem:[%s2759_s7 + $0x10] ss:$8 sps:$4 sm:$0xff]   ;;  %v2490_v18 = vld [vmem:[%s2759_s7 + $0x24] ss:$8 sps:$4 sm:$0xff]   ;;  %v2494_v20 = vld [vmem:[%s2759_s7 + $0x20] ss:$8 sps:$4 sm:$0xff]  }
  0x1a   : > { %781 = vmatpush1.bf16.msra.mxu0 %v2472_v4  ;;  %2358 = vmatpush1.bf16.msra.mxu1 %v2472_v4  ;;  %v2489_v17 = vld [vmem:[%s2759_s7 + $0x110] ss:$8 sps:$4 sm:$0xff]   ;;  %v2492_v19 = vld [vmem:[%s2759_s7 + $0x124] ss:$8 sps:$4 sm:$0xff]   ;;  %v2495_v21 = vld [vmem:[%s2759_s7 + $0x120] ss:$8 sps:$4 sm:$0xff]  }
  0x1b   : > { %782 = vmatprep.subr.bf16.mxu0 %v2678_v1  ;;  %2350 = vmatprep.subr.bf16.mxu1 %v2678_v1  ;;  %v2496_v22 = vld [vmem:[%s2759_s7 + $0x34] ss:$8 sps:$4 sm:$0xff]   ;;  %v2500_v24 = vld [vmem:[%s2759_s7 + $0x30] ss:$8 sps:$4 sm:$0xff]   ;;  %v2502_v26 = vld [vmem:[%s2759_s7 + $0x44] ss:$8 sps:$4 sm:$0xff]  }
  0x1c   : > { %v2498_v23 = vld [vmem:[%s2759_s7 + $0x134] ss:$8 sps:$4 sm:$0xff]   ;;  %v2501_v25 = vld [vmem:[%s2759_s7 + $0x130] ss:$8 sps:$4 sm:$0xff]   ;;  %v2504_v27 = vld [vmem:[%s2759_s7 + $0x144] ss:$8 sps:$4 sm:$0xff]  }
  0x1d   : > { %v2506_v28 = vld [vmem:[%s2759_s7 + $0x40] ss:$8 sps:$4 sm:$0xff]   ;;  %v2508_v30 = vld [vmem:[%s2759_s7 + $0x54] ss:$8 sps:$4 sm:$0xff]   ;;  %v2512_v32 = vld [vmem:[%s2759_s7 + $0x50] ss:$8 sps:$4 sm:$0xff]  }
  0x1e   : > { %783 = vmatpush1.bf16.msra.mxu0 %v2473_v7  ;;  %2359 = vmatpush1.bf16.msra.mxu1 %v2473_v7  ;;  %v2507_v29 = vld [vmem:[%s2759_s7 + $0x140] ss:$8 sps:$4 sm:$0xff]   ;;  %v2510_v31 = vld [vmem:[%s2759_s7 + $0x154] ss:$8 sps:$4 sm:$0xff]   ;;  %v2513_v33 = vld [vmem:[%s2759_s7 + $0x150] ss:$8 sps:$4 sm:$0xff]  }
  0x1f   : > { %784 = vmatprep.subr.bf16.mxu0 %v2678_v1  ;;  %2351 = vmatprep.subr.bf16.mxu1 %v2678_v1  ;;  %v2514_v34 = vld [vmem:[%s2759_s7 + $0x64] ss:$8 sps:$4 sm:$0xff]   ;;  %v2518_v36 = vld [vmem:[%s2759_s7 + $0x60] ss:$8 sps:$4 sm:$0xff]   ;;  %v2520_v38 = vld [vmem:[%s2759_s7 + $0x74] ss:$8 sps:$4 sm:$0xff]  }
  0x20   : > { %v2516_v35 = vld [vmem:[%s2759_s7 + $0x164] ss:$8 sps:$4 sm:$0xff]   ;;  %v2519_v37 = vld [vmem:[%s2759_s7 + $0x160] ss:$8 sps:$4 sm:$0xff]   ;;  %v2522_v39 = vld [vmem:[%s2759_s7 + $0x174] ss:$8 sps:$4 sm:$0xff]  }
  0x21   : > { %v2524_v40 = vld [vmem:[%s2759_s7 + $0x70] ss:$8 sps:$4 sm:$0xff]   ;;  %v2526_v42 = vld [vmem:[%s2759_s7 + $0x84] ss:$8 sps:$4 sm:$0xff]   ;;  %v2530_v44 = vld [vmem:[%s2759_s7 + $0x80] ss:$8 sps:$4 sm:$0xff]  }
  0x22   : > { %785 = vmatpush1.bf16.msra.mxu0 %v2474_v8  ;;  %2360 = vmatpush1.bf16.msra.mxu1 %v2474_v8  ;;  %v2525_v41 = vld [vmem:[%s2759_s7 + $0x170] ss:$8 sps:$4 sm:$0xff]   ;;  %v2528_v43 = vld [vmem:[%s2759_s7 + $0x184] ss:$8 sps:$4 sm:$0xff]   ;;  %v2531_v45 = vld [vmem:[%s2759_s7 + $0x180] ss:$8 sps:$4 sm:$0xff]  }
  0x23   : > { %786 = vmatprep.subr.bf16.mxu0 %v2678_v1  ;;  %2352 = vmatprep.subr.bf16.mxu1 %v2678_v1  ;;  %v2532_v46 = vld [vmem:[%s2759_s7 + $0x94] ss:$8 sps:$4 sm:$0xff]   ;;  %v2536_v48 = vld [vmem:[%s2759_s7 + $0x90] ss:$8 sps:$4 sm:$0xff]   ;;  %v2538_v50 = vld [vmem:[%s2759_s7 + $0xa4] ss:$8 sps:$4 sm:$0xff]  }
  0x24   : > { %v2534_v47 = vld [vmem:[%s2759_s7 + $0x194] ss:$8 sps:$4 sm:$0xff]   ;;  %v2537_v49 = vld [vmem:[%s2759_s7 + $0x190] ss:$8 sps:$4 sm:$0xff]   ;;  %v2540_v51 = vld [vmem:[%s2759_s7 + $0x1a4] ss:$8 sps:$4 sm:$0xff]  }
  0x25   : > { %v2542_v52 = vld [vmem:[%s2759_s7 + $0xa0] ss:$8 sps:$4 sm:$0xff]   ;;  %v2544_v54 = vld [vmem:[%s2759_s7 + $0xb4] ss:$8 sps:$4 sm:$0xff]   ;;  %v2548_v56 = vld [vmem:[%s2759_s7 + $0xb0] ss:$8 sps:$4 sm:$0xff]  }
  0x26   : > { %787 = vmatpush1.bf16.msra.mxu0 %v2475_v9  ;;  %2361 = vmatpush1.bf16.msra.mxu1 %v2475_v9  ;;  %v2543_v53 = vld [vmem:[%s2759_s7 + $0x1a0] ss:$8 sps:$4 sm:$0xff]   ;;  %v2546_v55 = vld [vmem:[%s2759_s7 + $0x1b4] ss:$8 sps:$4 sm:$0xff]   ;;  %v2549_v57 = vld [vmem:[%s2759_s7 + $0x1b0] ss:$8 sps:$4 sm:$0xff]  }
  0x27   : > { %788 = vmatprep.subr.bf16.mxu0 %v2678_v1  ;;  %2353 = vmatprep.subr.bf16.mxu1 %v2678_v1  ;;  %v2550_v58 = vld [vmem:[%s2759_s7 + $0xc4] ss:$8 sps:$4 sm:$0xff]   ;;  %v2554_v60 = vld [vmem:[%s2759_s7 + $0xc0] ss:$8 sps:$4 sm:$0xff]   ;;  %v2556_v62 = vld [vmem:[%s2759_s7 + $0xd4] ss:$8 sps:$4 sm:$0xff]  }
  0x28   : > { %v2552_v59 = vld [vmem:[%s2759_s7 + $0x1c4] ss:$8 sps:$4 sm:$0xff]   ;;  %v2555_v61 = vld [vmem:[%s2759_s7 + $0x1c0] ss:$8 sps:$4 sm:$0xff]   ;;  %v2558_v63 = vld [vmem:[%s2759_s7 + $0x1d4] ss:$8 sps:$4 sm:$0xff]  }
  0x29   : > { %v2560_v0 = vld [vmem:[%s2759_s7 + $0xd0] ss:$8 sps:$4 sm:$0xff]   ;;  %v2562_v2 = vld [vmem:[%s2759_s7 + $0xe4] ss:$8 sps:$4 sm:$0xff]   ;;  %v2566_v4 = vld [vmem:[%s2759_s7 + $0xe0] ss:$8 sps:$4 sm:$0xff]  }
  0x2a   : > { %789 = vmatpush1.bf16.msra.mxu0 %v2476_v10  ;;  %2362 = vmatpush1.bf16.msra.mxu1 %v2476_v10  ;;  %v2564_v3 = vld [vmem:[%s2759_s7 + $0x1e4] ss:$8 sps:$4 sm:$0xff]   ;;  %v2567_v5 = vld [vmem:[%s2759_s7 + $0x1e0] ss:$8 sps:$4 sm:$0xff]   ;;  %v2568_v6 = vld [vmem:[%s2759_s7 + $0xf4] ss:$8 sps:$4 sm:$0xff]  }
  0x2b   : > { %790 = vmatprep.subr.bf16.mxu0 %v2678_v1  ;;  %2354 = vmatprep.subr.bf16.mxu1 %v2678_v1  ;;  %v2561_v1 = vld [vmem:[%s2759_s7 + $0x1d0] ss:$8 sps:$4 sm:$0xff]   ;;  %v2570_v7 = vld [vmem:[%s2759_s7 + $0x1f4] ss:$8 sps:$4 sm:$0xff]   ;;  %v2878_v10 = vld [vmem:[%s3281_s2] ss:$0 sm:$0xff] }
  0x2c   : > { %v2572_v8 = vld [vmem:[%s2759_s7 + $0xf0] ss:$8 sps:$4 sm:$0xff]   ;;  %s2087_s5 = sshll.u32 %s213_s4, 8 }
  0x2d   : > { %v2573_v9 = vld [vmem:[%s2759_s7 + $0x1f0] ss:$8 sps:$4 sm:$0xff]   ;;  %s2885_s12 = scalar_lea.vmem [#allocation2], %s2087_s5   ;;  %s2343_s7 = sshll.u32 (%p2731_p3), %s2636_s14, 8 }
  0x2e   : > { %791 = vmatpush1.bf16.msra.mxu0 %v2477_v11  ;;  %2363 = vmatpush1.bf16.msra.mxu1 %v2477_v11  ;;  %s3082_s10 = scalar_lea.vmem (%p2731_p3), %s3282_s3, %s2343_s7  }
  0x31   : > { %807 = vmatmul.mubr.bf16.vlgmr.msra.gmra.mrb[0].mxu0 %v2478_v12  ;;  %935 = vmatmul.mubr.bf16.vlgmr.msra.gmra.mrb[0].mxu1 %v2481_v13 }
  0x32   : > { %2166 = vmatprep.mubr.msk.bf16.mxu0 %vm677_vm0, %v2484_v14  ;;  %2182 = vmatprep.mubr.msk.bf16.mxu1 %vm677_vm0, %v2486_v15 }
  0x39   : > { %815 = vmatmul.mubr.bf16.gmra.mrb[4].mxu0 %v2488_v16  ;;  %943 = vmatmul.mubr.bf16.gmra.mrb[4].mxu1 %v2489_v17 }
  0x3a   : > { %2167 = vmatprep.mubr.msk.bf16.mxu0 %vm677_vm0, %v2490_v18  ;;  %2183 = vmatprep.mubr.msk.bf16.mxu1 %vm677_vm0, %v2492_v19 }
  0x41   : > { %823 = vmatmul.mubr.bf16.gmra.mrb[8].mxu0 %v2494_v20  ;;  %951 = vmatmul.mubr.bf16.gmra.mrb[8].mxu1 %v2495_v21 }
  0x42   : > { %2168 = vmatprep.mubr.msk.bf16.mxu0 %vm677_vm0, %v2496_v22  ;;  %2184 = vmatprep.mubr.msk.bf16.mxu1 %vm677_vm0, %v2498_v23 }
  0x49   : > { %831 = vmatmul.mubr.bf16.gmra.mrb[12].mxu0 %v2500_v24  ;;  %959 = vmatmul.mubr.bf16.gmra.mrb[12].mxu1 %v2501_v25 }
  0x4a   : > { %2169 = vmatprep.mubr.msk.bf16.mxu0 %vm677_vm0, %v2502_v26  ;;  %2185 = vmatprep.mubr.msk.bf16.mxu1 %vm677_vm0, %v2504_v27 }
  0x51   : > { %839 = vmatmul.mubr.bf16.gmra.mrb[16].mxu0 %v2506_v28  ;;  %967 = vmatmul.mubr.bf16.gmra.mrb[16].mxu1 %v2507_v29 }
  0x52   : > { %2170 = vmatprep.mubr.msk.bf16.mxu0 %vm677_vm0, %v2508_v30  ;;  %2186 = vmatprep.mubr.msk.bf16.mxu1 %vm677_vm0, %v2510_v31 }
  0x59   : > { %847 = vmatmul.mubr.bf16.gmra.mrb[20].mxu0 %v2512_v32  ;;  %975 = vmatmul.mubr.bf16.gmra.mrb[20].mxu1 %v2513_v33 }
  0x5a   : > { %2171 = vmatprep.mubr.msk.bf16.mxu0 %vm677_vm0, %v2514_v34  ;;  %2187 = vmatprep.mubr.msk.bf16.mxu1 %vm677_vm0, %v2516_v35 }
  0x61   : > { %855 = vmatmul.mubr.bf16.gmra.mrb[24].mxu0 %v2518_v36  ;;  %983 = vmatmul.mubr.bf16.gmra.mrb[24].mxu1 %v2519_v37 }
  0x62   : > { %2172 = vmatprep.mubr.msk.bf16.mxu0 %vm677_vm0, %v2520_v38  ;;  %2188 = vmatprep.mubr.msk.bf16.mxu1 %vm677_vm0, %v2522_v39 }
  0x69   : > { %863 = vmatmul.mubr.bf16.gmra.mrb[28].mxu0 %v2524_v40  ;;  %991 = vmatmul.mubr.bf16.gmra.mrb[28].mxu1 %v2525_v41 }
  0x6a   : > { %2173 = vmatprep.mubr.msk.bf16.mxu0 %vm677_vm0, %v2526_v42  ;;  %2189 = vmatprep.mubr.msk.bf16.mxu1 %vm677_vm0, %v2528_v43 }
  0x71   : > { %871 = vmatmul.mubr.bf16.gmra.mrb[32].mxu0 %v2530_v44  ;;  %999 = vmatmul.mubr.bf16.gmra.mrb[32].mxu1 %v2531_v45 }
  0x72   : > { %2174 = vmatprep.mubr.msk.bf16.mxu0 %vm677_vm0, %v2532_v46  ;;  %2190 = vmatprep.mubr.msk.bf16.mxu1 %vm677_vm0, %v2534_v47 }
  0x79   : > { %879 = vmatmul.mubr.bf16.gmra.mrb[36].mxu0 %v2536_v48  ;;  %1007 = vmatmul.mubr.bf16.gmra.mrb[36].mxu1 %v2537_v49 }
  0x7a   : > { %2175 = vmatprep.mubr.msk.bf16.mxu0 %vm677_vm0, %v2538_v50  ;;  %2191 = vmatprep.mubr.msk.bf16.mxu1 %vm677_vm0, %v2540_v51 }
  0x81   : > { %887 = vmatmul.mubr.bf16.gmra.mrb[40].mxu0 %v2542_v52  ;;  %1015 = vmatmul.mubr.bf16.gmra.mrb[40].mxu1 %v2543_v53 }
  0x82   : > { %2176 = vmatprep.mubr.msk.bf16.mxu0 %vm677_vm0, %v2544_v54  ;;  %2192 = vmatprep.mubr.msk.bf16.mxu1 %vm677_vm0, %v2546_v55 }
  0x89   : > { %895 = vmatmul.mubr.bf16.gmra.mrb[44].mxu0 %v2548_v56  ;;  %1023 = vmatmul.mubr.bf16.gmra.mrb[44].mxu1 %v2549_v57 }
  0x8a   : > { %2177 = vmatprep.mubr.msk.bf16.mxu0 %vm677_vm0, %v2550_v58  ;;  %2193 = vmatprep.mubr.msk.bf16.mxu1 %vm677_vm0, %v2552_v59 }
  0x91   : > { %903 = vmatmul.mubr.bf16.gmra.mrb[48].mxu0 %v2554_v60  ;;  %1031 = vmatmul.mubr.bf16.gmra.mrb[48].mxu1 %v2555_v61 }
  0x92   : > { %2178 = vmatprep.mubr.msk.bf16.mxu0 %vm677_vm0, %v2556_v62  ;;  %2194 = vmatprep.mubr.msk.bf16.mxu1 %vm677_vm0, %v2558_v63 }
  0x99   : > { %911 = vmatmul.mubr.bf16.gmra.mrb[52].mxu0 %v2560_v0  ;;  %1039 = vmatmul.mubr.bf16.gmra.mrb[52].mxu1 %v2561_v1 }
  0x9a   : > { %2179 = vmatprep.mubr.msk.bf16.mxu0 %vm677_vm0, %v2562_v2  ;;  %2195 = vmatprep.mubr.msk.bf16.mxu1 %vm677_vm0, %v2564_v3 }
  0xa1   : > { %919 = vmatmul.mubr.bf16.gmra.mrb[56].mxu0 %v2566_v4  ;;  %1047 = vmatmul.mubr.bf16.gmra.mrb[56].mxu1 %v2567_v5 }
  0xa2   : > { %2180 = vmatprep.mubr.msk.bf16.mxu0 %vm677_vm0, %v2568_v6  ;;  %2196 = vmatprep.mubr.msk.bf16.mxu1 %vm677_vm0, %v2570_v7 }
  0xa9   : > { %927 = vmatmul.mubr.bf16.gmra.mrb[60].mxu0 %v2572_v8  ;;  %1055 = vmatmul.mubr.bf16.gmra.mrb[60].mxu1 %v2573_v9 }
 0x104   : > { %v808_v11 = vpop.f32.mrb[0].mxu0  ;;  %v936_v12 = vpop.f32.mrb[0].mxu1 }
 0x105   : > { %v809_v13 = vadd.f32 %v2878_v10, %v808_v11  ;;  %v937_v14 = vadd.f32 %v2878_v10, %v936_v12  ;;  %v810_v15 = vpop.f32.mrb[1].mxu0  ;;  %v938_v16 = vpop.f32.mrb[1].mxu1 }
 0x106   : > { %v811_v17 = vpop.f32.mrb[2].mxu0  ;;  %v939_v18 = vpop.f32.mrb[2].mxu1 }
 0x107   : > { %vm1063_vm1 = vcmp.ge.f32.partialorder %v809_v13, 0.0  ;;  %v1127_v19 = vmul.f32 0.2, %v809_v13  ;;  %vm1095_vm2 = vcmp.ge.f32.partialorder %v937_v14, 0.0  ;;  %v1159_v20 = vmul.f32 0.2, %v937_v14 }
 0x108   : > { %v812_v21 = vadd.f32 %v2878_v10, %v811_v17  ;;  %v940_v22 = vadd.f32 %v2878_v10, %v939_v18  ;;  %v813_v23 = vpop.f32.mrb[3].mxu0  ;;  %v941_v24 = vpop.f32.mrb[3].mxu1 }
 0x109   : > { %v1191_v25 = vsel %vm1063_vm1, %v809_v13, %v1127_v19  ;;  %v1223_v26 = vsel %vm1095_vm2, %v937_v14, %v1159_v20 }
 0x10a   : > { %v2279_v27 = vpack.c.bf16 %v1191_v25, %v1191_v25  ;;  %v2311_v28 = vpack.c.bf16 %v1223_v26, %v1223_v26  ;;  %vm1064_vm4 = vcmp.ge.f32.partialorder %v812_v21, 0.0  ;;  %v1128_v29 = vmul.f32 0.2, %v812_v21 }
 0x10b   : > { %vm1096_vm5 = vcmp.ge.f32.partialorder %v940_v22, 0.0  ;;  %v1160_v30 = vmul.f32 0.2, %v940_v22 }
 0x10c   : > { %1512 = vst.msk [vmem:[%s2885_s12] sm:$0xf] %vm1511_vm3, %v2279_v27  ;;  %1544 = vst.msk [vmem:[%s2885_s12 + $0x80] sm:$0xf] %vm1511_vm3, %v2311_v28  ;;  %v1192_v31 = vsel %vm1064_vm4, %v812_v21, %v1128_v29  ;;  %v816_v32 = vpop.f32.mrb[4].mxu0  ;;  %v944_v33 = vpop.f32.mrb[4].mxu1 }
 0x10d   : > { %v2280_v34 = vpack.c.bf16 %v1192_v31, %v1192_v31  ;;  %v1224_v35 = vsel %vm1096_vm5, %v940_v22, %v1160_v30  ;;  %v817_v36 = vadd.f32 %v2878_v10, %v816_v32  ;;  %v945_v37 = vadd.f32 %v2878_v10, %v944_v33  ;;  %v818_v38 = vpop.f32.mrb[5].mxu0  ;;  %v946_v39 = vpop.f32.mrb[5].mxu1 }
 0x10e   : > { %v2312_v40 = vpack.c.bf16 %v1224_v35, %v1224_v35  ;;  %v819_v41 = vpop.f32.mrb[6].mxu0  ;;  %v947_v42 = vpop.f32.mrb[6].mxu1 }
 0x10f   : > { %1513 = vst.msk [vmem:[%s2885_s12 + $0x4] sm:$0xf] %vm1511_vm3, %v2280_v34  ;;  %vm1065_vm6 = vcmp.ge.f32.partialorder %v817_v36, 0.0  ;;  %v1129_v43 = vmul.f32 0.2, %v817_v36  ;;  %vm1097_vm7 = vcmp.ge.f32.partialorder %v945_v37, 0.0  ;;  %v820_v45 = vadd.f32 %v2878_v10, %v819_v41 }
 0x110   : > { %v1161_v44 = vmul.f32 0.2, %v945_v37  ;;  %1545 = vst.msk [vmem:[%s2885_s12 + $0x84] sm:$0xf] %vm1511_vm3, %v2312_v40  ;;  %v948_v46 = vadd.f32 %v2878_v10, %v947_v42  ;;  %v821_v47 = vpop.f32.mrb[7].mxu0  ;;  %v949_v48 = vpop.f32.mrb[7].mxu1 }
 0x111   : > { %v1193_v49 = vsel %vm1065_vm6, %v817_v36, %v1129_v43  ;;  %vm1066_vm8 = vcmp.ge.f32.partialorder %v820_v45, 0.0  ;;  %v1130_v53 = vmul.f32 0.2, %v820_v45 }
 0x112   : > { %v1225_v50 = vsel %vm1097_vm7, %v945_v37, %v1161_v44  ;;  %v2281_v51 = vpack.c.bf16 %v1193_v49, %v1193_v49  ;;  %vm1098_vm9 = vcmp.ge.f32.partialorder %v948_v46, 0.0  ;;  %v1162_v54 = vmul.f32 0.2, %v948_v46 }
 0x113   : > { %v2313_v52 = vpack.c.bf16 %v1225_v50, %v1225_v50  ;;  %v1194_v55 = vsel %vm1066_vm8, %v820_v45, %v1130_v53 }
 0x114   : > { %1514 = vst.msk [vmem:[%s2885_s12 + $0x8] sm:$0xf] %vm1511_vm3, %v2281_v51  ;;  %v824_v56 = vpop.f32.mrb[8].mxu0  ;;  %v952_v57 = vpop.f32.mrb[8].mxu1  ;;  %v2282_v58 = vpack.c.bf16 %v1194_v55, %v1194_v55  ;;  %v1226_v59 = vsel %vm1098_vm9, %v948_v46, %v1162_v54 }
 0x115   : > { %1546 = vst.msk [vmem:[%s2885_s12 + $0x88] sm:$0xf] %vm1511_vm3, %v2313_v52  ;;  %v825_v60 = vadd.f32 %v2878_v10, %v824_v56  ;;  %v953_v61 = vadd.f32 %v2878_v10, %v952_v57  ;;  %v826_v62 = vpop.f32.mrb[9].mxu0  ;;  %v954_v63 = vpop.f32.mrb[9].mxu1  ;;  %v2314_v0 = vpack.c.bf16 %v1226_v59, %v1226_v59 }
 0x116   : > { %v827_v1 = vpop.f32.mrb[10].mxu0  ;;  %v955_v2 = vpop.f32.mrb[10].mxu1  ;;  %1515 = vst.msk [vmem:[%s2885_s12 + $0xc] sm:$0xf] %vm1511_vm3, %v2282_v58 }
 0x117   : > { %vm1067_vm10 = vcmp.ge.f32.partialorder %v825_v60, 0.0  ;;  %v1131_v3 = vmul.f32 0.2, %v825_v60  ;;  %vm1099_vm11 = vcmp.ge.f32.partialorder %v953_v61, 0.0  ;;  %v1163_v4 = vmul.f32 0.2, %v953_v61 }
 0x118   : > { %1547 = vst.msk [vmem:[%s2885_s12 + $0x8c] sm:$0xf] %vm1511_vm3, %v2314_v0  ;;  %v828_v5 = vadd.f32 %v2878_v10, %v827_v1  ;;  %v956_v6 = vadd.f32 %v2878_v10, %v955_v2  ;;  %v829_v7 = vpop.f32.mrb[11].mxu0  ;;  %v957_v8 = vpop.f32.mrb[11].mxu1 }
 0x119   : > { %v1195_v9 = vsel %vm1067_vm10, %v825_v60, %v1131_v3  ;;  %v1227_v11 = vsel %vm1099_vm11, %v953_v61, %v1163_v4 }
 0x11a   : > { %v2283_v12 = vpack.c.bf16 %v1195_v9, %v1195_v9  ;;  %v2315_v13 = vpack.c.bf16 %v1227_v11, %v1227_v11  ;;  %vm1068_vm12 = vcmp.ge.f32.partialorder %v828_v5, 0.0  ;;  %v1132_v14 = vmul.f32 0.2, %v828_v5 }
 0x11b   : > { %vm1100_vm13 = vcmp.ge.f32.partialorder %v956_v6, 0.0  ;;  %v1164_v15 = vmul.f32 0.2, %v956_v6 }
 0x11c   : > { %1516 = vst.msk [vmem:[%s2885_s12 + $0x10] sm:$0xf] %vm1511_vm3, %v2283_v12  ;;  %1548 = vst.msk [vmem:[%s2885_s12 + $0x90] sm:$0xf] %vm1511_vm3, %v2315_v13  ;;  %v1196_v16 = vsel %vm1068_vm12, %v828_v5, %v1132_v14  ;;  %v832_v17 = vpop.f32.mrb[12].mxu0  ;;  %v960_v18 = vpop.f32.mrb[12].mxu1 }
 0x11d   : > { %v2284_v19 = vpack.c.bf16 %v1196_v16, %v1196_v16  ;;  %v1228_v20 = vsel %vm1100_vm13, %v956_v6, %v1164_v15  ;;  %v833_v21 = vadd.f32 %v2878_v10, %v832_v17  ;;  %v961_v22 = vadd.f32 %v2878_v10, %v960_v18  ;;  %v834_v23 = vpop.f32.mrb[13].mxu0  ;;  %v962_v24 = vpop.f32.mrb[13].mxu1 }
 0x11e   : > { %v2316_v25 = vpack.c.bf16 %v1228_v20, %v1228_v20  ;;  %v835_v26 = vpop.f32.mrb[14].mxu0  ;;  %v963_v27 = vpop.f32.mrb[14].mxu1 }
 0x11f   : > { %1517 = vst.msk [vmem:[%s2885_s12 + $0x14] sm:$0xf] %vm1511_vm3, %v2284_v19  ;;  %vm1069_vm14 = vcmp.ge.f32.partialorder %v833_v21, 0.0  ;;  %v1133_v28 = vmul.f32 0.2, %v833_v21  ;;  %vm1101_vm15 = vcmp.ge.f32.partialorder %v961_v22, 0.0  ;;  %v836_v30 = vadd.f32 %v2878_v10, %v835_v26 }
 0x120   : > { %v1165_v29 = vmul.f32 0.2, %v961_v22  ;;  %1549 = vst.msk [vmem:[%s2885_s12 + $0x94] sm:$0xf] %vm1511_vm3, %v2316_v25  ;;  %v964_v31 = vadd.f32 %v2878_v10, %v963_v27  ;;  %v837_v32 = vpop.f32.mrb[15].mxu0  ;;  %v965_v33 = vpop.f32.mrb[15].mxu1 }
 0x121   : > { %v1197_v34 = vsel %vm1069_vm14, %v833_v21, %v1133_v28  ;;  %vm1070_vm0 = vcmp.ge.f32.partialorder %v836_v30, 0.0  ;;  %v1134_v38 = vmul.f32 0.2, %v836_v30 }
 0x122   : > { %v1229_v35 = vsel %vm1101_vm15, %v961_v22, %v1165_v29  ;;  %v2285_v36 = vpack.c.bf16 %v1197_v34, %v1197_v34  ;;  %vm1102_vm1 = vcmp.ge.f32.partialorder %v964_v31, 0.0  ;;  %v1166_v39 = vmul.f32 0.2, %v964_v31 }
 0x123   : > { %v2317_v37 = vpack.c.bf16 %v1229_v35, %v1229_v35  ;;  %v1198_v40 = vsel %vm1070_vm0, %v836_v30, %v1134_v38 }
 0x124   : > { %1518 = vst.msk [vmem:[%s2885_s12 + $0x18] sm:$0xf] %vm1511_vm3, %v2285_v36  ;;  %v840_v41 = vpop.f32.mrb[16].mxu0  ;;  %v968_v42 = vpop.f32.mrb[16].mxu1  ;;  %v2286_v43 = vpack.c.bf16 %v1198_v40, %v1198_v40  ;;  %v1230_v44 = vsel %vm1102_vm1, %v964_v31, %v1166_v39 }
 0x125   : > { %1550 = vst.msk [vmem:[%s2885_s12 + $0x98] sm:$0xf] %vm1511_vm3, %v2317_v37  ;;  %v841_v45 = vadd.f32 %v2878_v10, %v840_v41  ;;  %v969_v46 = vadd.f32 %v2878_v10, %v968_v42  ;;  %v842_v47 = vpop.f32.mrb[17].mxu0  ;;  %v970_v48 = vpop.f32.mrb[17].mxu1  ;;  %v2318_v49 = vpack.c.bf16 %v1230_v44, %v1230_v44 }
 0x126   : > { %v843_v50 = vpop.f32.mrb[18].mxu0  ;;  %v971_v51 = vpop.f32.mrb[18].mxu1  ;;  %1519 = vst.msk [vmem:[%s2885_s12 + $0x1c] sm:$0xf] %vm1511_vm3, %v2286_v43 }
 0x127   : > { %vm1071_vm2 = vcmp.ge.f32.partialorder %v841_v45, 0.0  ;;  %v1135_v52 = vmul.f32 0.2, %v841_v45  ;;  %vm1103_vm4 = vcmp.ge.f32.partialorder %v969_v46, 0.0  ;;  %v1167_v53 = vmul.f32 0.2, %v969_v46 }
 0x128   : > { %1551 = vst.msk [vmem:[%s2885_s12 + $0x9c] sm:$0xf] %vm1511_vm3, %v2318_v49  ;;  %v844_v54 = vadd.f32 %v2878_v10, %v843_v50  ;;  %v972_v55 = vadd.f32 %v2878_v10, %v971_v51  ;;  %v845_v56 = vpop.f32.mrb[19].mxu0  ;;  %v973_v57 = vpop.f32.mrb[19].mxu1 }
 0x129   : > { %v1199_v58 = vsel %vm1071_vm2, %v841_v45, %v1135_v52  ;;  %v1231_v59 = vsel %vm1103_vm4, %v969_v46, %v1167_v53 }
 0x12a   : > { %v2287_v60 = vpack.c.bf16 %v1199_v58, %v1199_v58  ;;  %v2319_v61 = vpack.c.bf16 %v1231_v59, %v1231_v59  ;;  %vm1072_vm5 = vcmp.ge.f32.partialorder %v844_v54, 0.0  ;;  %v1136_v62 = vmul.f32 0.2, %v844_v54 }
 0x12b   : > { %vm1104_vm6 = vcmp.ge.f32.partialorder %v972_v55, 0.0  ;;  %v1168_v63 = vmul.f32 0.2, %v972_v55 }
 0x12c   : > { %1520 = vst.msk [vmem:[%s2885_s12 + $0x20] sm:$0xf] %vm1511_vm3, %v2287_v60  ;;  %1552 = vst.msk [vmem:[%s2885_s12 + $0xa0] sm:$0xf] %vm1511_vm3, %v2319_v61  ;;  %v1200_v0 = vsel %vm1072_vm5, %v844_v54, %v1136_v62  ;;  %v848_v1 = vpop.f32.mrb[20].mxu0  ;;  %v976_v2 = vpop.f32.mrb[20].mxu1 }
 0x12d   : > { %v2288_v3 = vpack.c.bf16 %v1200_v0, %v1200_v0  ;;  %v1232_v4 = vsel %vm1104_vm6, %v972_v55, %v1168_v63  ;;  %v849_v5 = vadd.f32 %v2878_v10, %v848_v1  ;;  %v977_v6 = vadd.f32 %v2878_v10, %v976_v2  ;;  %v850_v7 = vpop.f32.mrb[21].mxu0  ;;  %v978_v8 = vpop.f32.mrb[21].mxu1 }
 0x12e   : > { %v2320_v9 = vpack.c.bf16 %v1232_v4, %v1232_v4  ;;  %v851_v11 = vpop.f32.mrb[22].mxu0  ;;  %v979_v12 = vpop.f32.mrb[22].mxu1 }
 0x12f   : > { %1521 = vst.msk [vmem:[%s2885_s12 + $0x24] sm:$0xf] %vm1511_vm3, %v2288_v3  ;;  %vm1073_vm7 = vcmp.ge.f32.partialorder %v849_v5, 0.0  ;;  %v1137_v13 = vmul.f32 0.2, %v849_v5  ;;  %vm1105_vm8 = vcmp.ge.f32.partialorder %v977_v6, 0.0  ;;  %v852_v15 = vadd.f32 %v2878_v10, %v851_v11 }
 0x130   : > { %v1169_v14 = vmul.f32 0.2, %v977_v6  ;;  %1553 = vst.msk [vmem:[%s2885_s12 + $0xa4] sm:$0xf] %vm1511_vm3, %v2320_v9  ;;  %v980_v16 = vadd.f32 %v2878_v10, %v979_v12  ;;  %v853_v17 = vpop.f32.mrb[23].mxu0  ;;  %v981_v18 = vpop.f32.mrb[23].mxu1 }
 0x131   : > { %v1201_v19 = vsel %vm1073_vm7, %v849_v5, %v1137_v13  ;;  %vm1074_vm9 = vcmp.ge.f32.partialorder %v852_v15, 0.0  ;;  %v1138_v23 = vmul.f32 0.2, %v852_v15 }
 0x132   : > { %v1233_v20 = vsel %vm1105_vm8, %v977_v6, %v1169_v14  ;;  %v2289_v21 = vpack.c.bf16 %v1201_v19, %v1201_v19  ;;  %vm1106_vm10 = vcmp.ge.f32.partialorder %v980_v16, 0.0  ;;  %v1170_v24 = vmul.f32 0.2, %v980_v16 }
 0x133   : > { %v2321_v22 = vpack.c.bf16 %v1233_v20, %v1233_v20  ;;  %v1202_v25 = vsel %vm1074_vm9, %v852_v15, %v1138_v23 }
 0x134   : > { %1522 = vst.msk [vmem:[%s2885_s12 + $0x28] sm:$0xf] %vm1511_vm3, %v2289_v21  ;;  %v856_v26 = vpop.f32.mrb[24].mxu0  ;;  %v984_v27 = vpop.f32.mrb[24].mxu1  ;;  %v2290_v28 = vpack.c.bf16 %v1202_v25, %v1202_v25  ;;  %v1234_v29 = vsel %vm1106_vm10, %v980_v16, %v1170_v24 }
 0x135   : > { %1554 = vst.msk [vmem:[%s2885_s12 + $0xa8] sm:$0xf] %vm1511_vm3, %v2321_v22  ;;  %v857_v30 = vadd.f32 %v2878_v10, %v856_v26  ;;  %v985_v31 = vadd.f32 %v2878_v10, %v984_v27  ;;  %v858_v32 = vpop.f32.mrb[25].mxu0  ;;  %v986_v33 = vpop.f32.mrb[25].mxu1  ;;  %v2322_v34 = vpack.c.bf16 %v1234_v29, %v1234_v29 }
 0x136   : > { %v859_v35 = vpop.f32.mrb[26].mxu0  ;;  %v987_v36 = vpop.f32.mrb[26].mxu1  ;;  %1523 = vst.msk [vmem:[%s2885_s12 + $0x2c] sm:$0xf] %vm1511_vm3, %v2290_v28 }
 0x137   : > { %vm1075_vm11 = vcmp.ge.f32.partialorder %v857_v30, 0.0  ;;  %v1139_v37 = vmul.f32 0.2, %v857_v30  ;;  %vm1107_vm12 = vcmp.ge.f32.partialorder %v985_v31, 0.0  ;;  %v1171_v38 = vmul.f32 0.2, %v985_v31 }
 0x138   : > { %1555 = vst.msk [vmem:[%s2885_s12 + $0xac] sm:$0xf] %vm1511_vm3, %v2322_v34  ;;  %v860_v39 = vadd.f32 %v2878_v10, %v859_v35  ;;  %v988_v40 = vadd.f32 %v2878_v10, %v987_v36  ;;  %v861_v41 = vpop.f32.mrb[27].mxu0  ;;  %v989_v42 = vpop.f32.mrb[27].mxu1 }
 0x139   : > { %v1203_v43 = vsel %vm1075_vm11, %v857_v30, %v1139_v37  ;;  %v1235_v44 = vsel %vm1107_vm12, %v985_v31, %v1171_v38 }
 0x13a   : > { %v2291_v45 = vpack.c.bf16 %v1203_v43, %v1203_v43  ;;  %v2323_v46 = vpack.c.bf16 %v1235_v44, %v1235_v44  ;;  %vm1076_vm13 = vcmp.ge.f32.partialorder %v860_v39, 0.0  ;;  %v1140_v47 = vmul.f32 0.2, %v860_v39 }
 0x13b   : > { %vm1108_vm14 = vcmp.ge.f32.partialorder %v988_v40, 0.0  ;;  %v1172_v48 = vmul.f32 0.2, %v988_v40 }
 0x13c   : > { %1524 = vst.msk [vmem:[%s2885_s12 + $0x30] sm:$0xf] %vm1511_vm3, %v2291_v45  ;;  %1556 = vst.msk [vmem:[%s2885_s12 + $0xb0] sm:$0xf] %vm1511_vm3, %v2323_v46  ;;  %v1204_v49 = vsel %vm1076_vm13, %v860_v39, %v1140_v47  ;;  %v864_v50 = vpop.f32.mrb[28].mxu0  ;;  %v992_v51 = vpop.f32.mrb[28].mxu1 }
 0x13d   : > { %v2292_v52 = vpack.c.bf16 %v1204_v49, %v1204_v49  ;;  %v1236_v53 = vsel %vm1108_vm14, %v988_v40, %v1172_v48  ;;  %v865_v54 = vadd.f32 %v2878_v10, %v864_v50  ;;  %v993_v55 = vadd.f32 %v2878_v10, %v992_v51  ;;  %v866_v56 = vpop.f32.mrb[29].mxu0  ;;  %v994_v57 = vpop.f32.mrb[29].mxu1 }
 0x13e   : > { %v2324_v58 = vpack.c.bf16 %v1236_v53, %v1236_v53  ;;  %v867_v59 = vpop.f32.mrb[30].mxu0  ;;  %v995_v60 = vpop.f32.mrb[30].mxu1 }
 0x13f   : > { %1525 = vst.msk [vmem:[%s2885_s12 + $0x34] sm:$0xf] %vm1511_vm3, %v2292_v52  ;;  %vm1077_vm15 = vcmp.ge.f32.partialorder %v865_v54, 0.0  ;;  %v1141_v61 = vmul.f32 0.2, %v865_v54  ;;  %vm1109_vm0 = vcmp.ge.f32.partialorder %v993_v55, 0.0  ;;  %v868_v63 = vadd.f32 %v2878_v10, %v867_v59 }
 0x140   : > { %v1173_v62 = vmul.f32 0.2, %v993_v55  ;;  %1557 = vst.msk [vmem:[%s2885_s12 + $0xb4] sm:$0xf] %vm1511_vm3, %v2324_v58  ;;  %v996_v0 = vadd.f32 %v2878_v10, %v995_v60  ;;  %v869_v1 = vpop.f32.mrb[31].mxu0  ;;  %v997_v2 = vpop.f32.mrb[31].mxu1 }
 0x141   : > { %v1205_v3 = vsel %vm1077_vm15, %v865_v54, %v1141_v61  ;;  %vm1078_vm1 = vcmp.ge.f32.partialorder %v868_v63, 0.0  ;;  %v1142_v7 = vmul.f32 0.2, %v868_v63 }
 0x142   : > { %v1237_v4 = vsel %vm1109_vm0, %v993_v55, %v1173_v62  ;;  %v2293_v5 = vpack.c.bf16 %v1205_v3, %v1205_v3  ;;  %vm1110_vm2 = vcmp.ge.f32.partialorder %v996_v0, 0.0  ;;  %v1174_v8 = vmul.f32 0.2, %v996_v0 }
 0x143   : > { %v2325_v6 = vpack.c.bf16 %v1237_v4, %v1237_v4  ;;  %v1206_v9 = vsel %vm1078_vm1, %v868_v63, %v1142_v7 }
 0x144   : > { %1526 = vst.msk [vmem:[%s2885_s12 + $0x38] sm:$0xf] %vm1511_vm3, %v2293_v5  ;;  %v872_v11 = vpop.f32.mrb[32].mxu0  ;;  %v1000_v12 = vpop.f32.mrb[32].mxu1  ;;  %v2294_v13 = vpack.c.bf16 %v1206_v9, %v1206_v9  ;;  %v1238_v14 = vsel %vm1110_vm2, %v996_v0, %v1174_v8 }
 0x145   : > { %1558 = vst.msk [vmem:[%s2885_s12 + $0xb8] sm:$0xf] %vm1511_vm3, %v2325_v6  ;;  %v873_v15 = vadd.f32 %v2878_v10, %v872_v11  ;;  %v1001_v16 = vadd.f32 %v2878_v10, %v1000_v12  ;;  %v874_v17 = vpop.f32.mrb[33].mxu0  ;;  %v1002_v18 = vpop.f32.mrb[33].mxu1  ;;  %v2326_v19 = vpack.c.bf16 %v1238_v14, %v1238_v14 }
 0x146   : > { %v875_v20 = vpop.f32.mrb[34].mxu0  ;;  %v1003_v21 = vpop.f32.mrb[34].mxu1  ;;  %1527 = vst.msk [vmem:[%s2885_s12 + $0x3c] sm:$0xf] %vm1511_vm3, %v2294_v13 }
 0x147   : > { %vm1079_vm4 = vcmp.ge.f32.partialorder %v873_v15, 0.0  ;;  %v1143_v22 = vmul.f32 0.2, %v873_v15  ;;  %vm1111_vm5 = vcmp.ge.f32.partialorder %v1001_v16, 0.0  ;;  %v1175_v23 = vmul.f32 0.2, %v1001_v16 }
 0x148   : > { %1559 = vst.msk [vmem:[%s2885_s12 + $0xbc] sm:$0xf] %vm1511_vm3, %v2326_v19  ;;  %v876_v24 = vadd.f32 %v2878_v10, %v875_v20  ;;  %v1004_v25 = vadd.f32 %v2878_v10, %v1003_v21  ;;  %v877_v26 = vpop.f32.mrb[35].mxu0  ;;  %v1005_v27 = vpop.f32.mrb[35].mxu1 }
 0x149   : > { %v1207_v28 = vsel %vm1079_vm4, %v873_v15, %v1143_v22  ;;  %v1239_v29 = vsel %vm1111_vm5, %v1001_v16, %v1175_v23 }
 0x14a   : > { %v2295_v30 = vpack.c.bf16 %v1207_v28, %v1207_v28  ;;  %v2327_v31 = vpack.c.bf16 %v1239_v29, %v1239_v29  ;;  %vm1080_vm6 = vcmp.ge.f32.partialorder %v876_v24, 0.0  ;;  %v1144_v32 = vmul.f32 0.2, %v876_v24 }
 0x14b   : > { %vm1112_vm7 = vcmp.ge.f32.partialorder %v1004_v25, 0.0  ;;  %v1176_v33 = vmul.f32 0.2, %v1004_v25 }
 0x14c   : > { %1528 = vst.msk [vmem:[%s2885_s12 + $0x40] sm:$0xf] %vm1511_vm3, %v2295_v30  ;;  %1560 = vst.msk [vmem:[%s2885_s12 + $0xc0] sm:$0xf] %vm1511_vm3, %v2327_v31  ;;  %v1208_v34 = vsel %vm1080_vm6, %v876_v24, %v1144_v32  ;;  %v880_v35 = vpop.f32.mrb[36].mxu0  ;;  %v1008_v36 = vpop.f32.mrb[36].mxu1 }
 0x14d   : > { %v2296_v37 = vpack.c.bf16 %v1208_v34, %v1208_v34  ;;  %v1240_v38 = vsel %vm1112_vm7, %v1004_v25, %v1176_v33  ;;  %v881_v39 = vadd.f32 %v2878_v10, %v880_v35  ;;  %v1009_v40 = vadd.f32 %v2878_v10, %v1008_v36  ;;  %v882_v41 = vpop.f32.mrb[37].mxu0  ;;  %v1010_v42 = vpop.f32.mrb[37].mxu1 }
 0x14e   : > { %v2328_v43 = vpack.c.bf16 %v1240_v38, %v1240_v38  ;;  %v883_v44 = vpop.f32.mrb[38].mxu0  ;;  %v1011_v45 = vpop.f32.mrb[38].mxu1 }
 0x14f   : > { %1529 = vst.msk [vmem:[%s2885_s12 + $0x44] sm:$0xf] %vm1511_vm3, %v2296_v37  ;;  %vm1081_vm8 = vcmp.ge.f32.partialorder %v881_v39, 0.0  ;;  %v1145_v46 = vmul.f32 0.2, %v881_v39  ;;  %vm1113_vm9 = vcmp.ge.f32.partialorder %v1009_v40, 0.0  ;;  %v884_v48 = vadd.f32 %v2878_v10, %v883_v44 }
 0x150   : > { %v1177_v47 = vmul.f32 0.2, %v1009_v40  ;;  %1561 = vst.msk [vmem:[%s2885_s12 + $0xc4] sm:$0xf] %vm1511_vm3, %v2328_v43  ;;  %v1012_v49 = vadd.f32 %v2878_v10, %v1011_v45  ;;  %v885_v50 = vpop.f32.mrb[39].mxu0  ;;  %v1013_v51 = vpop.f32.mrb[39].mxu1 }
 0x151   : > { %v1209_v52 = vsel %vm1081_vm8, %v881_v39, %v1145_v46  ;;  %vm1082_vm10 = vcmp.ge.f32.partialorder %v884_v48, 0.0  ;;  %v1146_v56 = vmul.f32 0.2, %v884_v48 }
 0x152   : > { %v1241_v53 = vsel %vm1113_vm9, %v1009_v40, %v1177_v47  ;;  %v2297_v54 = vpack.c.bf16 %v1209_v52, %v1209_v52  ;;  %vm1114_vm11 = vcmp.ge.f32.partialorder %v1012_v49, 0.0  ;;  %v1178_v57 = vmul.f32 0.2, %v1012_v49 }
 0x153   : > { %v2329_v55 = vpack.c.bf16 %v1241_v53, %v1241_v53  ;;  %v1210_v58 = vsel %vm1082_vm10, %v884_v48, %v1146_v56 }
 0x154   : > { %1530 = vst.msk [vmem:[%s2885_s12 + $0x48] sm:$0xf] %vm1511_vm3, %v2297_v54  ;;  %v888_v59 = vpop.f32.mrb[40].mxu0  ;;  %v1016_v60 = vpop.f32.mrb[40].mxu1  ;;  %v2298_v61 = vpack.c.bf16 %v1210_v58, %v1210_v58  ;;  %v1242_v62 = vsel %vm1114_vm11, %v1012_v49, %v1178_v57 }
 0x155   : > { %1562 = vst.msk [vmem:[%s2885_s12 + $0xc8] sm:$0xf] %vm1511_vm3, %v2329_v55  ;;  %v889_v63 = vadd.f32 %v2878_v10, %v888_v59  ;;  %v1017_v0 = vadd.f32 %v2878_v10, %v1016_v60  ;;  %v890_v1 = vpop.f32.mrb[41].mxu0  ;;  %v1018_v2 = vpop.f32.mrb[41].mxu1  ;;  %v2330_v3 = vpack.c.bf16 %v1242_v62, %v1242_v62 }
 0x156   : > { %v891_v4 = vpop.f32.mrb[42].mxu0  ;;  %v1019_v5 = vpop.f32.mrb[42].mxu1  ;;  %1531 = vst.msk [vmem:[%s2885_s12 + $0x4c] sm:$0xf] %vm1511_vm3, %v2298_v61 }
 0x157   : > { %vm1083_vm12 = vcmp.ge.f32.partialorder %v889_v63, 0.0  ;;  %v1147_v6 = vmul.f32 0.2, %v889_v63  ;;  %vm1115_vm13 = vcmp.ge.f32.partialorder %v1017_v0, 0.0  ;;  %v1179_v7 = vmul.f32 0.2, %v1017_v0 }
 0x158   : > { %1563 = vst.msk [vmem:[%s2885_s12 + $0xcc] sm:$0xf] %vm1511_vm3, %v2330_v3  ;;  %v892_v8 = vadd.f32 %v2878_v10, %v891_v4  ;;  %v1020_v9 = vadd.f32 %v2878_v10, %v1019_v5  ;;  %v893_v11 = vpop.f32.mrb[43].mxu0  ;;  %v1021_v12 = vpop.f32.mrb[43].mxu1 }
 0x159   : > { %v1211_v13 = vsel %vm1083_vm12, %v889_v63, %v1147_v6  ;;  %v1243_v14 = vsel %vm1115_vm13, %v1017_v0, %v1179_v7 }
 0x15a   : > { %v2299_v15 = vpack.c.bf16 %v1211_v13, %v1211_v13  ;;  %v2331_v16 = vpack.c.bf16 %v1243_v14, %v1243_v14  ;;  %vm1084_vm14 = vcmp.ge.f32.partialorder %v892_v8, 0.0  ;;  %v1148_v17 = vmul.f32 0.2, %v892_v8 }
 0x15b   : > { %vm1116_vm15 = vcmp.ge.f32.partialorder %v1020_v9, 0.0  ;;  %v1180_v18 = vmul.f32 0.2, %v1020_v9 }
 0x15c   : > { %1532 = vst.msk [vmem:[%s2885_s12 + $0x50] sm:$0xf] %vm1511_vm3, %v2299_v15  ;;  %1564 = vst.msk [vmem:[%s2885_s12 + $0xd0] sm:$0xf] %vm1511_vm3, %v2331_v16  ;;  %v1212_v19 = vsel %vm1084_vm14, %v892_v8, %v1148_v17  ;;  %v896_v20 = vpop.f32.mrb[44].mxu0  ;;  %v1024_v21 = vpop.f32.mrb[44].mxu1 }
 0x15d   : > { %v2300_v22 = vpack.c.bf16 %v1212_v19, %v1212_v19  ;;  %v1244_v23 = vsel %vm1116_vm15, %v1020_v9, %v1180_v18  ;;  %v897_v24 = vadd.f32 %v2878_v10, %v896_v20  ;;  %v1025_v25 = vadd.f32 %v2878_v10, %v1024_v21  ;;  %v898_v26 = vpop.f32.mrb[45].mxu0  ;;  %v1026_v27 = vpop.f32.mrb[45].mxu1 }
 0x15e   : > { %v2332_v28 = vpack.c.bf16 %v1244_v23, %v1244_v23  ;;  %v899_v29 = vpop.f32.mrb[46].mxu0  ;;  %v1027_v30 = vpop.f32.mrb[46].mxu1 }
 0x15f   : > { %1533 = vst.msk [vmem:[%s2885_s12 + $0x54] sm:$0xf] %vm1511_vm3, %v2300_v22  ;;  %vm1085_vm0 = vcmp.ge.f32.partialorder %v897_v24, 0.0  ;;  %v1149_v31 = vmul.f32 0.2, %v897_v24  ;;  %vm1117_vm1 = vcmp.ge.f32.partialorder %v1025_v25, 0.0  ;;  %v900_v33 = vadd.f32 %v2878_v10, %v899_v29 }
 0x160   : > { %v1181_v32 = vmul.f32 0.2, %v1025_v25  ;;  %1565 = vst.msk [vmem:[%s2885_s12 + $0xd4] sm:$0xf] %vm1511_vm3, %v2332_v28  ;;  %v1028_v34 = vadd.f32 %v2878_v10, %v1027_v30  ;;  %v901_v35 = vpop.f32.mrb[47].mxu0  ;;  %v1029_v36 = vpop.f32.mrb[47].mxu1 }
 0x161   : > { %v1213_v37 = vsel %vm1085_vm0, %v897_v24, %v1149_v31  ;;  %vm1086_vm2 = vcmp.ge.f32.partialorder %v900_v33, 0.0  ;;  %v1150_v41 = vmul.f32 0.2, %v900_v33 }
 0x162   : > { %v1245_v38 = vsel %vm1117_vm1, %v1025_v25, %v1181_v32  ;;  %v2301_v39 = vpack.c.bf16 %v1213_v37, %v1213_v37  ;;  %vm1118_vm4 = vcmp.ge.f32.partialorder %v1028_v34, 0.0  ;;  %v1182_v42 = vmul.f32 0.2, %v1028_v34 }
 0x163   : > { %v2333_v40 = vpack.c.bf16 %v1245_v38, %v1245_v38  ;;  %v1214_v43 = vsel %vm1086_vm2, %v900_v33, %v1150_v41 }
 0x164   : > { %1534 = vst.msk [vmem:[%s2885_s12 + $0x58] sm:$0xf] %vm1511_vm3, %v2301_v39  ;;  %v904_v44 = vpop.f32.mrb[48].mxu0  ;;  %v1032_v45 = vpop.f32.mrb[48].mxu1  ;;  %v2302_v46 = vpack.c.bf16 %v1214_v43, %v1214_v43  ;;  %v1246_v47 = vsel %vm1118_vm4, %v1028_v34, %v1182_v42 }
 0x165   : > { %1566 = vst.msk [vmem:[%s2885_s12 + $0xd8] sm:$0xf] %vm1511_vm3, %v2333_v40  ;;  %v905_v48 = vadd.f32 %v2878_v10, %v904_v44  ;;  %v1033_v49 = vadd.f32 %v2878_v10, %v1032_v45  ;;  %v906_v50 = vpop.f32.mrb[49].mxu0  ;;  %v1034_v51 = vpop.f32.mrb[49].mxu1  ;;  %v2334_v52 = vpack.c.bf16 %v1246_v47, %v1246_v47 }
 0x166   : > { %v907_v53 = vpop.f32.mrb[50].mxu0  ;;  %v1035_v54 = vpop.f32.mrb[50].mxu1  ;;  %1535 = vst.msk [vmem:[%s2885_s12 + $0x5c] sm:$0xf] %vm1511_vm3, %v2302_v46 }
 0x167   : > { %vm1087_vm5 = vcmp.ge.f32.partialorder %v905_v48, 0.0  ;;  %v1151_v55 = vmul.f32 0.2, %v905_v48  ;;  %vm1119_vm6 = vcmp.ge.f32.partialorder %v1033_v49, 0.0  ;;  %v1183_v56 = vmul.f32 0.2, %v1033_v49 }
 0x168   : > { %1567 = vst.msk [vmem:[%s2885_s12 + $0xdc] sm:$0xf] %vm1511_vm3, %v2334_v52  ;;  %v908_v57 = vadd.f32 %v2878_v10, %v907_v53  ;;  %v1036_v58 = vadd.f32 %v2878_v10, %v1035_v54  ;;  %v909_v59 = vpop.f32.mrb[51].mxu0  ;;  %v1037_v60 = vpop.f32.mrb[51].mxu1 }
 0x169   : > { %v1215_v61 = vsel %vm1087_vm5, %v905_v48, %v1151_v55  ;;  %v1247_v62 = vsel %vm1119_vm6, %v1033_v49, %v1183_v56 }
 0x16a   : > { %v2303_v63 = vpack.c.bf16 %v1215_v61, %v1215_v61  ;;  %v2335_v0 = vpack.c.bf16 %v1247_v62, %v1247_v62  ;;  %vm1088_vm7 = vcmp.ge.f32.partialorder %v908_v57, 0.0  ;;  %v1152_v1 = vmul.f32 0.2, %v908_v57 }
 0x16b   : > { %vm1120_vm8 = vcmp.ge.f32.partialorder %v1036_v58, 0.0  ;;  %v1184_v2 = vmul.f32 0.2, %v1036_v58 }
 0x16c   : > { %1536 = vst.msk [vmem:[%s2885_s12 + $0x60] sm:$0xf] %vm1511_vm3, %v2303_v63  ;;  %1568 = vst.msk [vmem:[%s2885_s12 + $0xe0] sm:$0xf] %vm1511_vm3, %v2335_v0  ;;  %v1216_v3 = vsel %vm1088_vm7, %v908_v57, %v1152_v1  ;;  %v912_v4 = vpop.f32.mrb[52].mxu0  ;;  %v1040_v5 = vpop.f32.mrb[52].mxu1 }
 0x16d   : > { %v2304_v6 = vpack.c.bf16 %v1216_v3, %v1216_v3  ;;  %v1248_v7 = vsel %vm1120_vm8, %v1036_v58, %v1184_v2  ;;  %v913_v8 = vadd.f32 %v2878_v10, %v912_v4  ;;  %v1041_v9 = vadd.f32 %v2878_v10, %v1040_v5  ;;  %v914_v11 = vpop.f32.mrb[53].mxu0  ;;  %v1042_v12 = vpop.f32.mrb[53].mxu1 }
 0x16e   : > { %v2336_v13 = vpack.c.bf16 %v1248_v7, %v1248_v7  ;;  %v915_v14 = vpop.f32.mrb[54].mxu0  ;;  %v1043_v15 = vpop.f32.mrb[54].mxu1 }
 0x16f   : > { %1537 = vst.msk [vmem:[%s2885_s12 + $0x64] sm:$0xf] %vm1511_vm3, %v2304_v6  ;;  %vm1089_vm9 = vcmp.ge.f32.partialorder %v913_v8, 0.0  ;;  %v1153_v16 = vmul.f32 0.2, %v913_v8  ;;  %vm1121_vm10 = vcmp.ge.f32.partialorder %v1041_v9, 0.0  ;;  %v916_v18 = vadd.f32 %v2878_v10, %v915_v14 }
 0x170   : > { %v1185_v17 = vmul.f32 0.2, %v1041_v9  ;;  %1569 = vst.msk [vmem:[%s2885_s12 + $0xe4] sm:$0xf] %vm1511_vm3, %v2336_v13  ;;  %v1044_v19 = vadd.f32 %v2878_v10, %v1043_v15  ;;  %v917_v20 = vpop.f32.mrb[55].mxu0  ;;  %v1045_v21 = vpop.f32.mrb[55].mxu1 }
 0x171   : > { %v1217_v22 = vsel %vm1089_vm9, %v913_v8, %v1153_v16  ;;  %vm1090_vm11 = vcmp.ge.f32.partialorder %v916_v18, 0.0  ;;  %v1154_v26 = vmul.f32 0.2, %v916_v18 }
 0x172   : > { %v1249_v23 = vsel %vm1121_vm10, %v1041_v9, %v1185_v17  ;;  %v2305_v24 = vpack.c.bf16 %v1217_v22, %v1217_v22  ;;  %vm1122_vm12 = vcmp.ge.f32.partialorder %v1044_v19, 0.0  ;;  %v1186_v27 = vmul.f32 0.2, %v1044_v19 }
 0x173   : > { %v2337_v25 = vpack.c.bf16 %v1249_v23, %v1249_v23  ;;  %v1218_v28 = vsel %vm1090_vm11, %v916_v18, %v1154_v26 }
 0x174   : > { %1538 = vst.msk [vmem:[%s2885_s12 + $0x68] sm:$0xf] %vm1511_vm3, %v2305_v24  ;;  %v920_v29 = vpop.f32.mrb[56].mxu0  ;;  %v1048_v30 = vpop.f32.mrb[56].mxu1  ;;  %v2306_v31 = vpack.c.bf16 %v1218_v28, %v1218_v28  ;;  %v1250_v32 = vsel %vm1122_vm12, %v1044_v19, %v1186_v27 }
 0x175   : > { %1570 = vst.msk [vmem:[%s2885_s12 + $0xe8] sm:$0xf] %vm1511_vm3, %v2337_v25  ;;  %v921_v33 = vadd.f32 %v2878_v10, %v920_v29  ;;  %v1049_v34 = vadd.f32 %v2878_v10, %v1048_v30  ;;  %v922_v35 = vpop.f32.mrb[57].mxu0  ;;  %v1050_v36 = vpop.f32.mrb[57].mxu1  ;;  %v2338_v37 = vpack.c.bf16 %v1250_v32, %v1250_v32 }
 0x176   : > { %v923_v38 = vpop.f32.mrb[58].mxu0  ;;  %v1051_v39 = vpop.f32.mrb[58].mxu1  ;;  %1539 = vst.msk [vmem:[%s2885_s12 + $0x6c] sm:$0xf] %vm1511_vm3, %v2306_v31 }
 0x177   : > { %vm1091_vm13 = vcmp.ge.f32.partialorder %v921_v33, 0.0  ;;  %v1155_v40 = vmul.f32 0.2, %v921_v33  ;;  %vm1123_vm14 = vcmp.ge.f32.partialorder %v1049_v34, 0.0  ;;  %v1187_v41 = vmul.f32 0.2, %v1049_v34 }
 0x178   : > { %1571 = vst.msk [vmem:[%s2885_s12 + $0xec] sm:$0xf] %vm1511_vm3, %v2338_v37  ;;  %v924_v42 = vadd.f32 %v2878_v10, %v923_v38  ;;  %v1052_v43 = vadd.f32 %v2878_v10, %v1051_v39  ;;  %v925_v44 = vpop.f32.mrb[59].mxu0  ;;  %v1053_v45 = vpop.f32.mrb[59].mxu1 }
 0x179   : > { %v1219_v46 = vsel %vm1091_vm13, %v921_v33, %v1155_v40  ;;  %v1251_v47 = vsel %vm1123_vm14, %v1049_v34, %v1187_v41 }
 0x17a   : > { %v2307_v48 = vpack.c.bf16 %v1219_v46, %v1219_v46  ;;  %v2339_v49 = vpack.c.bf16 %v1251_v47, %v1251_v47  ;;  %vm1092_vm15 = vcmp.ge.f32.partialorder %v924_v42, 0.0  ;;  %v1156_v50 = vmul.f32 0.2, %v924_v42 }
 0x17b   : > { %vm1124_vm0 = vcmp.ge.f32.partialorder %v1052_v43, 0.0  ;;  %v1188_v51 = vmul.f32 0.2, %v1052_v43 }
 0x17c   : > { %1540 = vst.msk [vmem:[%s2885_s12 + $0x70] sm:$0xf] %vm1511_vm3, %v2307_v48  ;;  %1572 = vst.msk [vmem:[%s2885_s12 + $0xf0] sm:$0xf] %vm1511_vm3, %v2339_v49  ;;  %v1220_v52 = vsel %vm1092_vm15, %v924_v42, %v1156_v50  ;;  %v928_v53 = vpop.f32.mrb[60].mxu0  ;;  %v1056_v54 = vpop.f32.mrb[60].mxu1 }
 0x17d   : > { %v2308_v55 = vpack.c.bf16 %v1220_v52, %v1220_v52  ;;  %v1252_v56 = vsel %vm1124_vm0, %v1052_v43, %v1188_v51  ;;  %v929_v57 = vadd.f32 %v2878_v10, %v928_v53  ;;  %v1057_v58 = vadd.f32 %v2878_v10, %v1056_v54  ;;  %v930_v59 = vpop.f32.mrb[61].mxu0  ;;  %v1058_v60 = vpop.f32.mrb[61].mxu1 }
 0x17e   : > { %v2340_v61 = vpack.c.bf16 %v1252_v56, %v1252_v56  ;;  %v931_v62 = vpop.f32.mrb[62].mxu0  ;;  %v1059_v63 = vpop.f32.mrb[62].mxu1 }
 0x17f   : > { %1541 = vst.msk [vmem:[%s2885_s12 + $0x74] sm:$0xf] %vm1511_vm3, %v2308_v55  ;;  %vm1093_vm1 = vcmp.ge.f32.partialorder %v929_v57, 0.0  ;;  %v1157_v0 = vmul.f32 0.2, %v929_v57  ;;  %vm1125_vm2 = vcmp.ge.f32.partialorder %v1057_v58, 0.0  ;;  %v932_v2 = vadd.f32 %v2878_v10, %v931_v62 }
 0x180   : > { %v1189_v1 = vmul.f32 0.2, %v1057_v58  ;;  %1573 = vst.msk [vmem:[%s2885_s12 + $0xf4] sm:$0xf] %vm1511_vm3, %v2340_v61  ;;  %v1060_v3 = vadd.f32 %v2878_v10, %v1059_v63  ;;  %v933_v4 = vpop.f32.mrb[63].mxu0  ;;  %v1061_v5 = vpop.f32.mrb[63].mxu1 }
 0x181   : > { %v1221_v6 = vsel %vm1093_vm1, %v929_v57, %v1157_v0  ;;  %vm1094_vm4 = vcmp.ge.f32.partialorder %v932_v2, 0.0  ;;  %v1158_v11 = vmul.f32 0.2, %v932_v2  ;;  %1582 = sbr.rel (!%p2731_p3) target bundleno = 483 (0x1e3), region = 36 }
 0x182   : > { %v1253_v7 = vsel %vm1125_vm2, %v1057_v58, %v1189_v1  ;;  %v2309_v8 = vpack.c.bf16 %v1221_v6, %v1221_v6  ;;  %vm1126_vm5 = vcmp.ge.f32.partialorder %v1060_v3, 0.0  ;;  %v1190_v12 = vmul.f32 0.2, %v1060_v3 }
 0x183   : > { %v2341_v9 = vpack.c.bf16 %v1253_v7, %v1253_v7  ;;  %v1222_v13 = vsel %vm1094_vm4, %v932_v2, %v1158_v11 }
 0x184   : > { %1542 = vst.msk [vmem:[%s2885_s12 + $0x78] sm:$0xf] %vm1511_vm3, %v2309_v8  ;;  %v2310_v14 = vpack.c.bf16 %v1222_v13, %v1222_v13  ;;  %v1254_v15 = vsel %vm1126_vm5, %v1060_v3, %v1190_v12 }
 0x185   : > { %1574 = vst.msk [vmem:[%s2885_s12 + $0xf8] sm:$0xf] %vm1511_vm3, %v2341_v9  ;;  %v2342_v10 = vpack.c.bf16 %v1254_v15, %v1254_v15 }
 0x186   : > { %1543 = vst.msk [vmem:[%s2885_s12 + $0x7c] sm:$0xf] %vm1511_vm3, %v2310_v14 }
 0x187   : > { %1575 = vst.msk [vmem:[%s2885_s12 + $0xfc] sm:$0xf] %vm1511_vm3, %v2342_v10 }
 0x188   : > { %s3294_s6 = smov (!%p1585_p9, %s1584_s6), 64 }
 0x189   : > { %s2263_s11 = sshll.u32 %s3294_s6, 6 }
 0x18a   : > { %p2266_p10 = scmp.eq.s32.totalorder %s2263_s11, 0 }
 0x18b   : > { %s3088_s17 = sshrl.u32 (!%p2266_p10), %s3294_s6, 6 }
 0x18c   : > { %1594 = sbr.rel (%p2266_p10) target bundleno = 483 (0x1e3), region = 40  ;;  %p2267_p11 = scmp.le.s32.totalorder (!%p2266_p10), %s3088_s17, 0 }
 0x193   : > { %2010 = sbr.rel (%p2267_p11) target bundleno = 462 (0x1ce), region = 118  ;;  %s3284_s14 = smov (!%p2267_p11), %s3082_s10 }
 0x194   : > { %s3285_s20 = smov (!%p2267_p11), %s2885_s12  ;;  %s3097_s25 = smov (!%p2267_p11), 0  }
 0x195   : > { %s3099_s19 = smov (!%p2267_p11), 0  }
 0x19a LB: >> { %v1610_v16 = vld [vmem:[%s2652_s20] sm:$0xf]  ;;  %v1612_v17 = vld [vmem:[%s2652_s20 + $0x4] sm:$0xf]  ;;  %v1614_v18 = vld [vmem:[%s2652_s20 + $0x8] sm:$0xf]  ;;  %s2660_s19 = sphi %s3099_s19, %s1604_s19   ;;  %s2656_s25 = sphi %s3097_s25, %s3286_s25   ;;  %s2652_s20 = sphi %s3285_s20, %s1743_s20   ;;  %s2648_s14 = sphi %s3284_s14, %s1744_s14  }
 0x19b   : >> { %1611 = vst [vmem:[%s2648_s14] sm:$0xf] %v1610_v16  ;;  %1613 = vst [vmem:[%s2648_s14 + $0x4] sm:$0xf] %v1612_v17  ;;  %v1616_v19 = vld [vmem:[%s2652_s20 + $0xc] sm:$0xf]  ;;  %s1738_s21 = sadd.s32 1, %s2656_s25 }
 0x19c   : >> { %1615 = vst [vmem:[%s2648_s14 + $0x8] sm:$0xf] %v1614_v18  ;;  %v1618_v20 = vld [vmem:[%s2652_s20 + $0x10] sm:$0xf]  ;;  %v1620_v21 = vld [vmem:[%s2652_s20 + $0x14] sm:$0xf]  ;;  %p1739_p12 = scmp.ge.s32.totalorder %s1738_s21, %s3088_s17 }
 0x19d   : >> { %1617 = vst [vmem:[%s2648_s14 + $0xc] sm:$0xf] %v1616_v19  ;;  %1619 = vst [vmem:[%s2648_s14 + $0x10] sm:$0xf] %v1618_v20  ;;  %v1622_v22 = vld [vmem:[%s2652_s20 + $0x18] sm:$0xf] }
 0x19e   : >> { %1621 = vst [vmem:[%s2648_s14 + $0x14] sm:$0xf] %v1620_v21  ;;  %v1624_v23 = vld [vmem:[%s2652_s20 + $0x1c] sm:$0xf]  ;;  %v1626_v24 = vld [vmem:[%s2652_s20 + $0x20] sm:$0xf] }
 0x19f   : >> { %1623 = vst [vmem:[%s2648_s14 + $0x18] sm:$0xf] %v1622_v22  ;;  %1625 = vst [vmem:[%s2648_s14 + $0x1c] sm:$0xf] %v1624_v23  ;;  %v1628_v25 = vld [vmem:[%s2652_s20 + $0x24] sm:$0xf] }
 0x1a0   : >> { %1627 = vst [vmem:[%s2648_s14 + $0x20] sm:$0xf] %v1626_v24  ;;  %v1630_v26 = vld [vmem:[%s2652_s20 + $0x28] sm:$0xf]  ;;  %v1632_v27 = vld [vmem:[%s2652_s20 + $0x2c] sm:$0xf] }
 0x1a1   : >> { %1629 = vst [vmem:[%s2648_s14 + $0x24] sm:$0xf] %v1628_v25  ;;  %1631 = vst [vmem:[%s2648_s14 + $0x28] sm:$0xf] %v1630_v26  ;;  %v1634_v28 = vld [vmem:[%s2652_s20 + $0x30] sm:$0xf] }
 0x1a2   : >> { %1633 = vst [vmem:[%s2648_s14 + $0x2c] sm:$0xf] %v1632_v27  ;;  %v1636_v29 = vld [vmem:[%s2652_s20 + $0x34] sm:$0xf]  ;;  %v1638_v30 = vld [vmem:[%s2652_s20 + $0x38] sm:$0xf] }
 0x1a3   : >> { %1635 = vst [vmem:[%s2648_s14 + $0x30] sm:$0xf] %v1634_v28  ;;  %1637 = vst [vmem:[%s2648_s14 + $0x34] sm:$0xf] %v1636_v29  ;;  %v1640_v31 = vld [vmem:[%s2652_s20 + $0x3c] sm:$0xf] }
 0x1a4   : >> { %1639 = vst [vmem:[%s2648_s14 + $0x38] sm:$0xf] %v1638_v30  ;;  %v1642_v32 = vld [vmem:[%s2652_s20 + $0x40] sm:$0xf]  ;;  %v1644_v33 = vld [vmem:[%s2652_s20 + $0x44] sm:$0xf] }
 0x1a5   : >> { %1641 = vst [vmem:[%s2648_s14 + $0x3c] sm:$0xf] %v1640_v31  ;;  %1643 = vst [vmem:[%s2648_s14 + $0x40] sm:$0xf] %v1642_v32  ;;  %v1646_v34 = vld [vmem:[%s2652_s20 + $0x48] sm:$0xf] }
 0x1a6   : >> { %1645 = vst [vmem:[%s2648_s14 + $0x44] sm:$0xf] %v1644_v33  ;;  %v1648_v35 = vld [vmem:[%s2652_s20 + $0x4c] sm:$0xf]  ;;  %v1650_v36 = vld [vmem:[%s2652_s20 + $0x50] sm:$0xf] }
 0x1a7   : >> { %1647 = vst [vmem:[%s2648_s14 + $0x48] sm:$0xf] %v1646_v34  ;;  %1649 = vst [vmem:[%s2648_s14 + $0x4c] sm:$0xf] %v1648_v35  ;;  %v1652_v37 = vld [vmem:[%s2652_s20 + $0x54] sm:$0xf] }
 0x1a8   : >> { %1651 = vst [vmem:[%s2648_s14 + $0x50] sm:$0xf] %v1650_v36  ;;  %v1654_v38 = vld [vmem:[%s2652_s20 + $0x58] sm:$0xf]  ;;  %v1656_v39 = vld [vmem:[%s2652_s20 + $0x5c] sm:$0xf] }
 0x1a9   : >> { %1653 = vst [vmem:[%s2648_s14 + $0x54] sm:$0xf] %v1652_v37  ;;  %1655 = vst [vmem:[%s2648_s14 + $0x58] sm:$0xf] %v1654_v38  ;;  %v1658_v40 = vld [vmem:[%s2652_s20 + $0x60] sm:$0xf] }
 0x1aa   : >> { %1657 = vst [vmem:[%s2648_s14 + $0x5c] sm:$0xf] %v1656_v39  ;;  %v1660_v41 = vld [vmem:[%s2652_s20 + $0x64] sm:$0xf]  ;;  %v1662_v42 = vld [vmem:[%s2652_s20 + $0x68] sm:$0xf] }
 0x1ab   : >> { %1659 = vst [vmem:[%s2648_s14 + $0x60] sm:$0xf] %v1658_v40  ;;  %1661 = vst [vmem:[%s2648_s14 + $0x64] sm:$0xf] %v1660_v41  ;;  %v1664_v43 = vld [vmem:[%s2652_s20 + $0x6c] sm:$0xf] }
 0x1ac   : >> { %1663 = vst [vmem:[%s2648_s14 + $0x68] sm:$0xf] %v1662_v42  ;;  %v1666_v44 = vld [vmem:[%s2652_s20 + $0x70] sm:$0xf]  ;;  %v1668_v45 = vld [vmem:[%s2652_s20 + $0x74] sm:$0xf] }
 0x1ad   : >> { %1665 = vst [vmem:[%s2648_s14 + $0x6c] sm:$0xf] %v1664_v43  ;;  %1667 = vst [vmem:[%s2648_s14 + $0x70] sm:$0xf] %v1666_v44  ;;  %v1670_v46 = vld [vmem:[%s2652_s20 + $0x78] sm:$0xf] }
 0x1ae   : >> { %1669 = vst [vmem:[%s2648_s14 + $0x74] sm:$0xf] %v1668_v45  ;;  %v1672_v47 = vld [vmem:[%s2652_s20 + $0x7c] sm:$0xf]  ;;  %v1674_v48 = vld [vmem:[%s2652_s20 + $0x80] sm:$0xf] }
 0x1af   : >> { %1671 = vst [vmem:[%s2648_s14 + $0x78] sm:$0xf] %v1670_v46  ;;  %1673 = vst [vmem:[%s2648_s14 + $0x7c] sm:$0xf] %v1672_v47  ;;  %v1676_v49 = vld [vmem:[%s2652_s20 + $0x84] sm:$0xf] }
 0x1b0   : >> { %1675 = vst [vmem:[%s2648_s14 + $0x80] sm:$0xf] %v1674_v48  ;;  %v1678_v50 = vld [vmem:[%s2652_s20 + $0x88] sm:$0xf]  ;;  %v1680_v51 = vld [vmem:[%s2652_s20 + $0x8c] sm:$0xf] }
 0x1b1   : >> { %1677 = vst [vmem:[%s2648_s14 + $0x84] sm:$0xf] %v1676_v49  ;;  %1679 = vst [vmem:[%s2648_s14 + $0x88] sm:$0xf] %v1678_v50  ;;  %v1682_v52 = vld [vmem:[%s2652_s20 + $0x90] sm:$0xf] }
 0x1b2   : >> { %1681 = vst [vmem:[%s2648_s14 + $0x8c] sm:$0xf] %v1680_v51  ;;  %v1684_v53 = vld [vmem:[%s2652_s20 + $0x94] sm:$0xf]  ;;  %v1686_v54 = vld [vmem:[%s2652_s20 + $0x98] sm:$0xf] }
 0x1b3   : >> { %1683 = vst [vmem:[%s2648_s14 + $0x90] sm:$0xf] %v1682_v52  ;;  %1685 = vst [vmem:[%s2648_s14 + $0x94] sm:$0xf] %v1684_v53  ;;  %v1688_v55 = vld [vmem:[%s2652_s20 + $0x9c] sm:$0xf] }
 0x1b4   : >> { %1687 = vst [vmem:[%s2648_s14 + $0x98] sm:$0xf] %v1686_v54  ;;  %v1690_v56 = vld [vmem:[%s2652_s20 + $0xa0] sm:$0xf]  ;;  %v1692_v57 = vld [vmem:[%s2652_s20 + $0xa4] sm:$0xf] }
 0x1b5   : >> { %1689 = vst [vmem:[%s2648_s14 + $0x9c] sm:$0xf] %v1688_v55  ;;  %1691 = vst [vmem:[%s2648_s14 + $0xa0] sm:$0xf] %v1690_v56  ;;  %v1694_v58 = vld [vmem:[%s2652_s20 + $0xa8] sm:$0xf] }
 0x1b6   : >> { %1693 = vst [vmem:[%s2648_s14 + $0xa4] sm:$0xf] %v1692_v57  ;;  %v1696_v59 = vld [vmem:[%s2652_s20 + $0xac] sm:$0xf]  ;;  %v1698_v60 = vld [vmem:[%s2652_s20 + $0xb0] sm:$0xf] }
 0x1b7   : >> { %1695 = vst [vmem:[%s2648_s14 + $0xa8] sm:$0xf] %v1694_v58  ;;  %1697 = vst [vmem:[%s2648_s14 + $0xac] sm:$0xf] %v1696_v59  ;;  %v1700_v61 = vld [vmem:[%s2652_s20 + $0xb4] sm:$0xf] }
 0x1b8   : >> { %1699 = vst [vmem:[%s2648_s14 + $0xb0] sm:$0xf] %v1698_v60  ;;  %v1702_v62 = vld [vmem:[%s2652_s20 + $0xb8] sm:$0xf]  ;;  %v1704_v63 = vld [vmem:[%s2652_s20 + $0xbc] sm:$0xf] }
 0x1b9   : >> { %1701 = vst [vmem:[%s2648_s14 + $0xb4] sm:$0xf] %v1700_v61  ;;  %1703 = vst [vmem:[%s2648_s14 + $0xb8] sm:$0xf] %v1702_v62  ;;  %v1706_v0 = vld [vmem:[%s2652_s20 + $0xc0] sm:$0xf] }
 0x1ba   : >> { %1705 = vst [vmem:[%s2648_s14 + $0xbc] sm:$0xf] %v1704_v63  ;;  %v1708_v1 = vld [vmem:[%s2652_s20 + $0xc4] sm:$0xf]  ;;  %v1710_v2 = vld [vmem:[%s2652_s20 + $0xc8] sm:$0xf] }
 0x1bb   : >> { %1707 = vst [vmem:[%s2648_s14 + $0xc0] sm:$0xf] %v1706_v0  ;;  %1709 = vst [vmem:[%s2648_s14 + $0xc4] sm:$0xf] %v1708_v1  ;;  %v1712_v3 = vld [vmem:[%s2652_s20 + $0xcc] sm:$0xf] }
 0x1bc   : >> { %1711 = vst [vmem:[%s2648_s14 + $0xc8] sm:$0xf] %v1710_v2  ;;  %v1714_v4 = vld [vmem:[%s2652_s20 + $0xd0] sm:$0xf]  ;;  %v1716_v5 = vld [vmem:[%s2652_s20 + $0xd4] sm:$0xf] }
 0x1bd   : >> { %1713 = vst [vmem:[%s2648_s14 + $0xcc] sm:$0xf] %v1712_v3  ;;  %1715 = vst [vmem:[%s2648_s14 + $0xd0] sm:$0xf] %v1714_v4  ;;  %v1718_v6 = vld [vmem:[%s2652_s20 + $0xd8] sm:$0xf] }
 0x1be   : >> { %1717 = vst [vmem:[%s2648_s14 + $0xd4] sm:$0xf] %v1716_v5  ;;  %v1720_v7 = vld [vmem:[%s2652_s20 + $0xdc] sm:$0xf]  ;;  %v1722_v8 = vld [vmem:[%s2652_s20 + $0xe0] sm:$0xf] }
 0x1bf   : >> { %1719 = vst [vmem:[%s2648_s14 + $0xd8] sm:$0xf] %v1718_v6  ;;  %1721 = vst [vmem:[%s2648_s14 + $0xdc] sm:$0xf] %v1720_v7  ;;  %v1724_v9 = vld [vmem:[%s2652_s20 + $0xe4] sm:$0xf] }
 0x1c0   : >> { %1723 = vst [vmem:[%s2648_s14 + $0xe0] sm:$0xf] %v1722_v8  ;;  %v1726_v11 = vld [vmem:[%s2652_s20 + $0xe8] sm:$0xf]  ;;  %v1728_v12 = vld [vmem:[%s2652_s20 + $0xec] sm:$0xf] }
 0x1c1   : >> { %1725 = vst [vmem:[%s2648_s14 + $0xe4] sm:$0xf] %v1724_v9  ;;  %1727 = vst [vmem:[%s2648_s14 + $0xe8] sm:$0xf] %v1726_v11  ;;  %v1730_v13 = vld [vmem:[%s2652_s20 + $0xf0] sm:$0xf] }
 0x1c2   : >> { %1729 = vst [vmem:[%s2648_s14 + $0xec] sm:$0xf] %v1728_v12  ;;  %v1732_v14 = vld [vmem:[%s2652_s20 + $0xf4] sm:$0xf]  ;;  %v1734_v15 = vld [vmem:[%s2652_s20 + $0xf8] sm:$0xf] }
 0x1c3   : >> { %1731 = vst [vmem:[%s2648_s14 + $0xf0] sm:$0xf] %v1730_v13  ;;  %1733 = vst [vmem:[%s2648_s14 + $0xf4] sm:$0xf] %v1732_v14  ;;  %v1736_v10 = vld [vmem:[%s2652_s20 + $0xfc] sm:$0xf] }
 0x1c4   : >> { %1735 = vst [vmem:[%s2648_s14 + $0xf8] sm:$0xf] %v1734_v15  ;;  %1737 = vst [vmem:[%s2648_s14 + $0xfc] sm:$0xf] %v1736_v10  ;;  %s3296_s21 = smov (%p1739_p12, %s1738_s21), 0  ;;  %s1604_s19 = sadd.s32 1, %s2660_s19  }
 0x1c5   : >> { %s2268_s23 = sshll.u32 %s3296_s21, 8  ;;  %p1603_p13 = scmp.ge.s32.totalorder %s1604_s19, %s3088_s17 }
 0x1c6   : >> { %s1743_s20 = scalar_lea.vmem %s2885_s12, %s2268_s23 [#allocation2]   ;;  %s1744_s14 = scalar_lea.vmem %s3082_s10, %s2268_s23  }
 0x1c7   : >> { %s3286_s25 = smov %s3296_s21  ;;  %1606 = sbr.rel (!%p1603_p13) target bundleno = 410 (0x19a), region = 124 }
 0x1ce PF: > { %s3256_s24 = sand.u32 63, %s3294_s6   ;;  %s2344_s26 = sshll.u32 %s3088_s17, 8 }
 0x1cf   : > { %s1749_s27 = scalar_lea.vmem %s2885_s12, %s2344_s26 [#allocation2]   ;;  %s1751_s28 = scalar_lea.vmem %s3082_s10, %s2344_s26  }
 0x1d0   : > { %p2273_p0 = scmp.le.s32.totalorder %s3256_s24, 0 }
 0x1d1   : > { %s2662_s29 = smov (!%p2273_p0), %s1751_s28   ;;  %s2666_s30 = smov (!%p2273_p0), %s1749_s27  }
 0x1d2   : > { %2024 = sbr.rel (%p2273_p0) target bundleno = 483 (0x1e3), region = 129  ;;  %s2670_s4 = smov (!%p2273_p0), 0  }
 0x1d3   : > { %s2674_s5 = smov (!%p2273_p0), 0  }
 0x1d9 LB: >> { %v1761_v16 = vld [vmem:[%s2668_s30] sm:$0xf]  ;;  %s1763_s6 = sadd.s32 1, %s2672_s4  ;;  %s1755_s5 = sadd.s32 1, %s2676_s5   ;;  %s2676_s5 = sphi %s2674_s5, %s1755_s5   ;;  %s2672_s4 = sphi %s2670_s4, %s2671_s4   ;;  %s2668_s30 = sphi %s2666_s30, %s1768_s30   ;;  %s2664_s29 = sphi %s2662_s29, %s1769_s29  }
 0x1da   : >> { %1762 = vst [vmem:[%s2664_s29] sm:$0xf] %v1761_v16  ;;  %p1764_p1 = scmp.ge.s32.totalorder %s1763_s6, %s3256_s24  ;;  %p1754_p2 = scmp.ge.s32.totalorder %s1755_s5, %s3256_s24 }
 0x1dc   : >> { %s3298_s6 = smov (%p1764_p1, %s1763_s6), 0  ;;  %1757 = sbr.rel (!%p1754_p2) target bundleno = 473 (0x1d9), region = 135 }
 0x1dd   : >> { %s2274_s12 = sshll.u32 %s3298_s6, 2  ;;  %s2671_s4 = smov %s3298_s6  }
 0x1de   : >> { %s1768_s30 = scalar_lea.vmem %s1749_s27, %s2274_s12 [#allocation2]   ;;  %s1769_s29 = scalar_lea.vmem %s1751_s28, %s2274_s12  }
 0x1e3 PF: > { %s13_s16 = sadd.s32 1, %s2644_s16   ;;  %s3287_s12 = smov %s2632_s13 }
 0x1e4   : > { %p10_p3 = scmp.ge.s32.totalorder %s13_s16, 22   ;;  %s3288_s13 = smov %s2740_s22 }
 0x1e5   : > { %s3289_s14 = smov %s2640_s15  ;;  %s3290_s15 = smov %s3292_s18 }
 0x1e6   :  { %12 = sbr.rel (!%p10_p3) target bundleno = 3 (0x3), region = 146 }

// kernel: _lambda_.10
= control target key start
LH: loop header
LB: loop body
LE: loop exit
PB: predicated region body
PF: predicated region fallthrough
CT: control target
= control target key end

     0   :  { %s2169_s18 = smov 0   ;;  %s2171_s19 = smov 0   ;;  %s2617_s0 = inlined_call_operand.vmem [shape: bf16[2450,144], index: 0, kind: input, shape index: {}]   ;;  %s2618_s1 = inlined_call_operand.vmem [shape: bf16[144,32], index: 1, kind: input, shape index: {}]   ;;  %s2619_s2 = inlined_call_operand.vmem [shape: f32[1,32], index: 2, kind: input, shape index: {}]   ;;  %s2620_s3 = inlined_call_operand.vmem [shape: bf16[32,32], index: 3, kind: input, shape index: {}]   ;;  %s2621_s4 = inlined_call_operand.vmem [shape: f32[1,32], index: 4, kind: input, shape index: {}]   ;;  %s2622_s5 = inlined_call_operand.vmem [shape: bf16[2450,32], index: 5, kind: output, shape index: {}]  }
   0x1   :  { %s2173_s20 = smov 0  }
   0x2 LB: > { %s2182_s21 = sadd.s32 4294967295, %s2104_s20   ;;  %s2184_s22 = sadd.s32 1, %s2104_s20   ;;  %s2104_s20 = sphi %s2173_s20, %s2629_s20   ;;  %s2100_s19 = sphi %s2171_s19, %s2628_s19   ;;  %s2096_s18 = sphi %s2169_s18, %s2627_s18  }
   0x3   : > { %s129_s23 = ssub.s32 %s2104_s20, %s2184_s22  ;;  %s132_s24 = sadd.s32 1, %s2100_s19 }
   0x4   : > { %p130_p0 = scmp.eq.s32.totalorder %s129_s23, 0  ;;  %p142_p1 = scmp.ne.s32.totalorder %s2100_s19, %s2096_s18 }
   0x5   : > { %p143_p2 = scmp.eq.s32.totalorder %s2182_s21, 9  ;;  %p1663_p3 = scmp.ge.s32.totalorder %s2104_s20, 1 }
   0x6   : > { %s2192_s25 = scalar_select %p130_p0, %s2100_s19, %s132_s24  }
   0x7   : > { %p2194_p4 = por %p143_p2, %p142_p1  ;;  %p199_p5 = scmp.lt.s32.totalorder %s2104_s20, 11 }
   0x9   : > { %p200_p6 = pnand %p1663_p3, %p199_p5 }
   0xa   : > { %v1991_v0 = vld [vmem:[%s2618_s1] sm:$0xff] (!%p200_p6)   ;;  %v2138_v1 = vmov (!%p200_p6), 0   ;;  %s2202_s29 = sshll.u32 (!%p200_p6), %s2182_s21, 5  ;;  %v1992_v2 = vld [vmem:[%s2618_s1 + $0x8] sm:$0xff] (!%p200_p6)   ;;  %v1993_v3 = vld [vmem:[%s2618_s1 + $0x10] sm:$0xff] (!%p200_p6)   ;;  %vm510_vm0 = vcmask (!%p200_p6), 130048  }
   0xb   : > { %203 = sbr.rel (%p200_p6) target bundleno = 665 (0x299), region = 40  ;;  %559 = vmatprep.subr.bf16.mxu0 (!%p200_p6), %v2138_v1  ;;  %1884 = vmatprep.subr.bf16.mxu1 (!%p200_p6), %v2138_v1  ;;  %p238_p7 = scmp.lt.s32.totalorder (!%p200_p6), %s2202_s29, 306  ;;  %v1994_v4 = vld [vmem:[%s2618_s1 + $0x18] sm:$0xff] (!%p200_p6)   ;;  %v1995_v6 = vld [vmem:[%s2618_s1 + $0x20] sm:$0xff] (!%p200_p6)   ;;  %v1996_v7 = vld [vmem:[%s2618_s1 + $0x28] sm:$0xff] (!%p200_p6)   ;;  %vm855_vm5 = vcmask (!%p200_p6), 261120  }
   0xc   : > { %560 = vmatpush1.bf16.msra.mxu0 (!%p200_p6), %v1991_v0  ;;  %1893 = vmatpush1.bf16.msra.mxu1 (!%p200_p6), %v1991_v0  ;;  %v1997_v8 = vld [vmem:[%s2618_s1 + $0x30] sm:$0xff] (!%p200_p6)   ;;  %v1998_v10 = vld [vmem:[%s2618_s1 + $0x38] sm:$0xff] (!%p200_p6)   ;;  %v1999_v11 = vld [vmem:[%s2618_s1 + $0x40] sm:$0xff] (!%p200_p6)   ;;  %s229_s16 = sand.u32 (!%p200_p6), 1, %s2096_s18  }
   0xd   : > { %561 = vmatprep.subr.bf16.mxu0 (!%p200_p6), %v2138_v1  ;;  %1885 = vmatprep.subr.bf16.mxu1 (!%p200_p6), %v2138_v1  ;;  %v2048_v42 = vld [vmem:[%s2620_s3] sm:$0xff] (!%p200_p6)   ;;  %v2049_v43 = vld [vmem:[%s2620_s3 + $0x8] sm:$0xff] (!%p200_p6)   ;;  %s1664_s17 = sshll.u32 (!%p200_p6), %s229_s16, 7 }
   0xe   : > { %v2292_v44 = vld [vmem:[%s2619_s2] ss:$0 sm:$0xff] (!%p200_p6)  ;;  %s2388_s18 = scalar_lea.vmem (!%p200_p6), [#allocation2], %s1664_s17  }
  0x10   : > { %562 = vmatpush1.bf16.msra.mxu0 (!%p200_p6), %v1992_v2  ;;  %1894 = vmatpush1.bf16.msra.mxu1 (!%p200_p6), %v1992_v2 }
  0x11   : > { %563 = vmatprep.subr.bf16.mxu0 (!%p200_p6), %v2138_v1  ;;  %1886 = vmatprep.subr.bf16.mxu1 (!%p200_p6), %v2138_v1 }
  0x12   : > { %s239_s7 = scalar_select %p238_p7, %s2202_s29, 306 }
  0x13   : > { %s1330_s20 = ssub.s32 (%p2194_p4), 307, %s2202_s29  ;;  %s1827_s23 = sshll.u32 (%p2194_p4), %s2182_s21, 7 }
  0x14   : > { %s1794_s10 = sshll.u32 %s239_s7, 3  ;;  %564 = vmatpush1.bf16.msra.mxu0 %v1993_v3  ;;  %1895 = vmatpush1.bf16.msra.mxu1 %v1993_v3  ;;  %p1331_p8 = scmp.lt.s32.totalorder (%p2194_p4), %s1330_s20, 32 }
  0x15   : > { %s2215_s13 = scalar_lea.vmem %s2617_s0, %s1794_s10  ;;  %565 = vmatprep.subr.bf16.mxu0 %v2138_v1  ;;  %1887 = vmatprep.subr.bf16.mxu1 %v2138_v1  ;;  %s2489_s28 = scalar_lea.vmem (%p2194_p4), %s2622_s5, %s1827_s23  }
  0x16   : > { %v2002_v5 = vld [vmem:[%s2215_s13 + $0x4] ss:$8 sps:$4 sm:$0xff]   ;;  %v2000_v12 = vld [vmem:[%s2215_s13] ss:$8 sps:$4 sm:$0xff]   ;;  %v2003_v14 = vld [vmem:[%s2215_s13 + $0x14] ss:$8 sps:$4 sm:$0xff]  }
  0x17   : > { %1710 = vmatprep.mubr.msk.bf16.mxu0 %vm510_vm0, %v2002_v5  ;;  %v2032_v9 = vld [vmem:[%s2215_s13 + $0xc4] ss:$8 sps:$4 sm:$0xff]   ;;  %v2030_v13 = vld [vmem:[%s2215_s13 + $0xc0] ss:$8 sps:$4 sm:$0xff]   ;;  %v2036_v15 = vld [vmem:[%s2215_s13 + $0xd4] ss:$8 sps:$4 sm:$0xff]  }
  0x18   : > { %566 = vmatpush1.bf16.msra.mxu0 %v1994_v4  ;;  %1896 = vmatpush1.bf16.msra.mxu1 %v1994_v4  ;;  %v2005_v16 = vld [vmem:[%s2215_s13 + $0x10] ss:$8 sps:$4 sm:$0xff]   ;;  %v2006_v18 = vld [vmem:[%s2215_s13 + $0x24] ss:$8 sps:$4 sm:$0xff]   ;;  %v2008_v20 = vld [vmem:[%s2215_s13 + $0x20] ss:$8 sps:$4 sm:$0xff]  }
  0x19   : > { %567 = vmatprep.subr.bf16.mxu0 %v2138_v1  ;;  %1888 = vmatprep.subr.bf16.mxu1 %v2138_v1  ;;  %v2038_v17 = vld [vmem:[%s2215_s13 + $0xd0] ss:$8 sps:$4 sm:$0xff]   ;;  %v2042_v19 = vld [vmem:[%s2215_s13 + $0xe4] ss:$8 sps:$4 sm:$0xff]   ;;  %v2044_v21 = vld [vmem:[%s2215_s13 + $0xe0] ss:$8 sps:$4 sm:$0xff]  }
  0x1a   : > { %1722 = vmatprep.mubr.msk.bf16.mxu1 %vm510_vm0, %v2032_v9  ;;  %v2009_v22 = vld [vmem:[%s2215_s13 + $0x34] ss:$8 sps:$4 sm:$0xff]   ;;  %v2011_v24 = vld [vmem:[%s2215_s13 + $0x30] ss:$8 sps:$4 sm:$0xff]   ;;  %v2012_v26 = vld [vmem:[%s2215_s13 + $0x44] ss:$8 sps:$4 sm:$0xff]  }
  0x1b   : > { %v2045_v23 = vld [vmem:[%s2215_s13 + $0xf4] ss:$8 sps:$4 sm:$0xff]   ;;  %v2047_v25 = vld [vmem:[%s2215_s13 + $0xf0] ss:$8 sps:$4 sm:$0xff]   ;;  %v2014_v27 = vld [vmem:[%s2215_s13 + $0x40] ss:$8 sps:$4 sm:$0xff]  }
  0x1c   : > { %568 = vmatpush1.bf16.msra.mxu0 %v1995_v6  ;;  %1897 = vmatpush1.bf16.msra.mxu1 %v1995_v6  ;;  %v2015_v28 = vld [vmem:[%s2215_s13 + $0x54] ss:$8 sps:$4 sm:$0xff]   ;;  %v2017_v29 = vld [vmem:[%s2215_s13 + $0x50] ss:$8 sps:$4 sm:$0xff]   ;;  %v2018_v30 = vld [vmem:[%s2215_s13 + $0x64] ss:$8 sps:$4 sm:$0xff]  }
  0x1d   : > { %569 = vmatprep.subr.bf16.mxu0 %v2138_v1  ;;  %1889 = vmatprep.subr.bf16.mxu1 %v2138_v1  ;;  %v2020_v31 = vld [vmem:[%s2215_s13 + $0x60] ss:$8 sps:$4 sm:$0xff]   ;;  %v2021_v32 = vld [vmem:[%s2215_s13 + $0x74] ss:$8 sps:$4 sm:$0xff]   ;;  %v2023_v33 = vld [vmem:[%s2215_s13 + $0x70] ss:$8 sps:$4 sm:$0xff]  }
  0x1e   : > { %v2024_v34 = vld [vmem:[%s2215_s13 + $0x84] ss:$8 sps:$4 sm:$0xff]   ;;  %v2026_v35 = vld [vmem:[%s2215_s13 + $0x80] ss:$8 sps:$4 sm:$0xff]   ;;  %v2027_v36 = vld [vmem:[%s2215_s13 + $0x94] ss:$8 sps:$4 sm:$0xff]  }
  0x1f   : > { %v2029_v37 = vld [vmem:[%s2215_s13 + $0x90] ss:$8 sps:$4 sm:$0xff]   ;;  %v2033_v38 = vld [vmem:[%s2215_s13 + $0xa4] ss:$8 sps:$4 sm:$0xff]   ;;  %v2035_v39 = vld [vmem:[%s2215_s13 + $0xa0] ss:$8 sps:$4 sm:$0xff]  }
  0x20   : > { %570 = vmatpush1.bf16.msra.mxu0 %v1996_v7  ;;  %1898 = vmatpush1.bf16.msra.mxu1 %v1996_v7  ;;  %v2039_v40 = vld [vmem:[%s2215_s13 + $0xb4] ss:$8 sps:$4 sm:$0xff]   ;;  %v2041_v41 = vld [vmem:[%s2215_s13 + $0xb0] ss:$8 sps:$4 sm:$0xff]  }
  0x21   : > { %571 = vmatprep.subr.bf16.mxu0 %v2138_v1  ;;  %1890 = vmatprep.subr.bf16.mxu1 %v2138_v1 }
  0x24   : > { %572 = vmatpush1.bf16.msra.mxu0 %v1997_v8  ;;  %1899 = vmatpush1.bf16.msra.mxu1 %v1997_v8 }
  0x25   : > { %573 = vmatprep.subr.bf16.mxu0 %v2138_v1  ;;  %1891 = vmatprep.subr.bf16.mxu1 %v2138_v1 }
  0x28   : > { %574 = vmatpush1.bf16.msra.mxu0 %v1998_v10  ;;  %1900 = vmatpush1.bf16.msra.mxu1 %v1998_v10 }
  0x29   : > { %575 = vmatprep.subr.bf16.mxu0 %v2138_v1  ;;  %1892 = vmatprep.subr.bf16.mxu1 %v2138_v1 }
  0x2c   : > { %576 = vmatpush1.bf16.msra.mxu0 %v1999_v11  ;;  %1901 = vmatpush1.bf16.msra.mxu1 %v1999_v11 }
  0x2d   : > { %1848 = vmatprep.subr.bf16.mxu1 %v2048_v42 }
  0x2f   : > { %592 = vmatmul.mubr.bf16.vlgmr.msra.gmra.mrb[0].mxu0 %v2000_v12  ;;  %688 = vmatmul.mubr.bf16.vlgmr.msra.gmra.mrb[0].mxu1 %v2030_v13 }
  0x30   : > { %1711 = vmatprep.mubr.msk.bf16.mxu0 %vm510_vm0, %v2003_v14  ;;  %1723 = vmatprep.mubr.msk.bf16.mxu1 %vm510_vm0, %v2036_v15 }
  0x31   : > { %1849 = vmatpush3.bf16.msra.mxu1 %v2048_v42 }
  0x32   : > { %1850 = vmatprep.subr.bf16.mxu1 %v2049_v43 }
  0x35   : > { %1851 = vmatpush3.bf16.msra.mxu1 %v2049_v43 }
  0x37   : > { %600 = vmatmul.mubr.bf16.gmra.mrb[4].mxu0 %v2005_v16  ;;  %696 = vmatmul.mubr.bf16.gmra.mrb[4].mxu1 %v2038_v17 }
  0x38   : > { %1712 = vmatprep.mubr.msk.bf16.mxu0 %vm510_vm0, %v2006_v18  ;;  %1724 = vmatprep.mubr.msk.bf16.mxu1 %vm510_vm0, %v2042_v19 }
  0x3f   : > { %608 = vmatmul.mubr.bf16.gmra.mrb[8].mxu0 %v2008_v20  ;;  %704 = vmatmul.mubr.bf16.gmra.mrb[8].mxu1 %v2044_v21 }
  0x40   : > { %1713 = vmatprep.mubr.msk.bf16.mxu0 %vm510_vm0, %v2009_v22  ;;  %1725 = vmatprep.mubr.msk.bf16.mxu1 %vm510_vm0, %v2045_v23 }
  0x47   : > { %616 = vmatmul.mubr.bf16.gmra.mrb[12].mxu0 %v2011_v24  ;;  %712 = vmatmul.mubr.bf16.gmra.mrb[12].mxu1 %v2047_v25 }
  0x48   : > { %1714 = vmatprep.mubr.msk.bf16.mxu0 %vm510_vm0, %v2012_v26 }
  0x4f   : > { %624 = vmatmul.mubr.bf16.gmra.mrb[16].mxu0 %v2014_v27 }
  0x50   : > { %1715 = vmatprep.mubr.msk.bf16.mxu0 %vm510_vm0, %v2015_v28 }
  0x57   : > { %632 = vmatmul.mubr.bf16.gmra.mrb[20].mxu0 %v2017_v29 }
  0x58   : > { %1716 = vmatprep.mubr.msk.bf16.mxu0 %vm510_vm0, %v2018_v30 }
  0x5f   : > { %640 = vmatmul.mubr.bf16.gmra.mrb[24].mxu0 %v2020_v31 }
  0x60   : > { %1717 = vmatprep.mubr.msk.bf16.mxu0 %vm510_vm0, %v2021_v32 }
  0x67   : > { %648 = vmatmul.mubr.bf16.gmra.mrb[28].mxu0 %v2023_v33 }
  0x68   : > { %1718 = vmatprep.mubr.msk.bf16.mxu0 %vm510_vm0, %v2024_v34 }
  0x6f   : > { %656 = vmatmul.mubr.bf16.gmra.mrb[32].mxu0 %v2026_v35 }
  0x70   : > { %1719 = vmatprep.mubr.msk.bf16.mxu0 %vm510_vm0, %v2027_v36 }
  0x77   : > { %664 = vmatmul.mubr.bf16.gmra.mrb[36].mxu0 %v2029_v37 }
  0x78   : > { %1720 = vmatprep.mubr.msk.bf16.mxu0 %vm510_vm0, %v2033_v38 }
  0x7f   : > { %672 = vmatmul.mubr.bf16.gmra.mrb[40].mxu0 %v2035_v39 }
  0x80   : > { %1721 = vmatprep.mubr.msk.bf16.mxu0 %vm510_vm0, %v2039_v40 }
  0x87   : > { %680 = vmatmul.mubr.bf16.gmra.mrb[44].mxu0 %v2041_v41 }
 0x102   : > { %v593_v45 = vpop.f32.mrb[0].mxu0  ;;  %v689_v46 = vpop.f32.mrb[0].mxu1 }
 0x103   : > { %v594_v47 = vadd.f32 %v2292_v44, %v593_v45  ;;  %v595_v48 = vpop.f32.mrb[1].mxu0  ;;  %v690_v49 = vadd.f32 %v2292_v44, %v689_v46  ;;  %v691_v50 = vpop.f32.mrb[1].mxu1 }
 0x104   : > { %v596_v51 = vpop.f32.mrb[2].mxu0  ;;  %v692_v52 = vpop.f32.mrb[2].mxu1 }
 0x105   : > { %v752_v53 = vmul.f32 0.2, %v594_v47  ;;  %v597_v54 = vadd.f32 %v2292_v44, %v596_v51  ;;  %v598_v55 = vpop.f32.mrb[3].mxu0  ;;  %vm744_vm1 = vcmp.ge.f32.partialorder %v690_v49, 0.0  ;;  %v694_v56 = vpop.f32.mrb[3].mxu1  ;;  %vm720_vm2 = vcmp.ge.f32.partialorder %v594_v47, 0.0 }
 0x106   : > { %v776_v57 = vmul.f32 0.2, %v690_v49  ;;  %v693_v58 = vadd.f32 %v2292_v44, %v692_v52 }
 0x107   : > { %vm721_vm3 = vcmp.ge.f32.partialorder %v597_v54, 0.0  ;;  %v753_v59 = vmul.f32 0.2, %v597_v54  ;;  %v784_v62 = vsel %vm720_vm2, %v594_v47, %v752_v53 }
 0x108   : > { %v2298_v60 = vsel %vm744_vm1, %v690_v49, %v776_v57  ;;  %vm745_vm4 = vcmp.ge.f32.partialorder %v693_v58, 0.0  ;;  %v777_v61 = vmul.f32 0.2, %v693_v58 }
 0x109   : > { %v785_v63 = vsel %vm721_vm3, %v597_v54, %v753_v59 }
 0x10a   : > { %v816_v0 = vpack.c.bf16 %v785_v63, %v784_v62  ;;  %v601_v1 = vpop.f32.mrb[4].mxu0  ;;  %v2300_v2 = vsel %vm745_vm4, %v693_v58, %v777_v61  ;;  %v697_v3 = vpop.f32.mrb[4].mxu1 }
 0x10b   : > { %v602_v4 = vadd.f32 %v2292_v44, %v601_v1  ;;  %v603_v5 = vpop.f32.mrb[5].mxu0  ;;  %v828_v6 = vpack.c.bf16 %v2300_v2, %v2298_v60  ;;  %v698_v7 = vadd.f32 %v2292_v44, %v697_v3  ;;  %v699_v8 = vpop.f32.mrb[5].mxu1 }
 0x10c   : > { %v604_v9 = vpop.f32.mrb[6].mxu0  ;;  %1852 = vmatprep.mubr.msk.bf16.mxu1 %vm855_vm5, %v816_v0  ;;  %v700_v10 = vpop.f32.mrb[6].mxu1 }
 0x10d   : > { %v754_v11 = vmul.f32 0.2, %v602_v4  ;;  %v605_v12 = vadd.f32 %v2292_v44, %v604_v9  ;;  %v606_v13 = vpop.f32.mrb[7].mxu0  ;;  %vm746_vm6 = vcmp.ge.f32.partialorder %v698_v7, 0.0  ;;  %v702_v14 = vpop.f32.mrb[7].mxu1  ;;  %vm722_vm7 = vcmp.ge.f32.partialorder %v602_v4, 0.0 }
 0x10e   : > { %v778_v15 = vmul.f32 0.2, %v698_v7  ;;  %v701_v16 = vadd.f32 %v2292_v44, %v700_v10 }
 0x10f   : > { %vm723_vm8 = vcmp.ge.f32.partialorder %v605_v12, 0.0  ;;  %v755_v17 = vmul.f32 0.2, %v605_v12  ;;  %v786_v20 = vsel %vm722_vm7, %v602_v4, %v754_v11 }
 0x110   : > { %v2309_v18 = vsel %vm746_vm6, %v698_v7, %v778_v15  ;;  %vm747_vm9 = vcmp.ge.f32.partialorder %v701_v16, 0.0  ;;  %v779_v19 = vmul.f32 0.2, %v701_v16 }
 0x111   : > { %v787_v21 = vsel %vm723_vm8, %v605_v12, %v755_v17 }
 0x112   : > { %v817_v22 = vpack.c.bf16 %v787_v21, %v786_v20  ;;  %v609_v23 = vpop.f32.mrb[8].mxu0  ;;  %v2311_v24 = vsel %vm747_vm9, %v701_v16, %v779_v19  ;;  %v705_v25 = vpop.f32.mrb[8].mxu1 }
 0x113   : > { %v610_v26 = vadd.f32 %v2292_v44, %v609_v23  ;;  %v611_v27 = vpop.f32.mrb[9].mxu0  ;;  %v829_v28 = vpack.c.bf16 %v2311_v24, %v2309_v18  ;;  %v706_v29 = vadd.f32 %v2292_v44, %v705_v25  ;;  %v707_v30 = vpop.f32.mrb[9].mxu1 }
 0x114   : > { %v612_v31 = vpop.f32.mrb[10].mxu0  ;;  %1853 = vmatmul.mubr.msk.bf16.vlgmr.msra.gmra.mrb[16].mxu1 %vm855_vm5, %v817_v22  ;;  %v708_v32 = vpop.f32.mrb[10].mxu1 }
 0x115   : > { %v756_v33 = vmul.f32 0.2, %v610_v26  ;;  %v613_v34 = vadd.f32 %v2292_v44, %v612_v31  ;;  %v614_v35 = vpop.f32.mrb[11].mxu0  ;;  %vm748_vm10 = vcmp.ge.f32.partialorder %v706_v29, 0.0  ;;  %v710_v36 = vpop.f32.mrb[11].mxu1  ;;  %vm724_vm11 = vcmp.ge.f32.partialorder %v610_v26, 0.0 }
 0x116   : > { %v780_v37 = vmul.f32 0.2, %v706_v29  ;;  %v709_v38 = vadd.f32 %v2292_v44, %v708_v32 }
 0x117   : > { %vm725_vm12 = vcmp.ge.f32.partialorder %v613_v34, 0.0  ;;  %v757_v39 = vmul.f32 0.2, %v613_v34  ;;  %v788_v42 = vsel %vm724_vm11, %v610_v26, %v756_v33 }
 0x118   : > { %v2320_v40 = vsel %vm748_vm10, %v706_v29, %v780_v37  ;;  %vm749_vm13 = vcmp.ge.f32.partialorder %v709_v38, 0.0  ;;  %v781_v41 = vmul.f32 0.2, %v709_v38 }
 0x119   : > { %v789_v43 = vsel %vm725_vm12, %v613_v34, %v757_v39 }
 0x11a   : > { %v818_v45 = vpack.c.bf16 %v789_v43, %v788_v42  ;;  %v617_v46 = vpop.f32.mrb[12].mxu0  ;;  %v2322_v47 = vsel %vm749_vm13, %v709_v38, %v781_v41  ;;  %v713_v48 = vpop.f32.mrb[12].mxu1 }
 0x11b   : > { %v618_v49 = vadd.f32 %v2292_v44, %v617_v46  ;;  %v619_v50 = vpop.f32.mrb[13].mxu0  ;;  %v830_v51 = vpack.c.bf16 %v2322_v47, %v2320_v40  ;;  %v714_v52 = vadd.f32 %v2292_v44, %v713_v48  ;;  %v715_v53 = vpop.f32.mrb[13].mxu1 }
 0x11c   : > { %v620_v54 = vpop.f32.mrb[14].mxu0  ;;  %1856 = vmatprep.mubr.msk.bf16.mxu1 %vm855_vm5, %v818_v45  ;;  %v716_v55 = vpop.f32.mrb[14].mxu1 }
 0x11d   : > { %v758_v56 = vmul.f32 0.2, %v618_v49  ;;  %v621_v57 = vadd.f32 %v2292_v44, %v620_v54  ;;  %v622_v58 = vpop.f32.mrb[15].mxu0  ;;  %vm750_vm14 = vcmp.ge.f32.partialorder %v714_v52, 0.0  ;;  %v718_v59 = vpop.f32.mrb[15].mxu1  ;;  %vm726_vm15 = vcmp.ge.f32.partialorder %v618_v49, 0.0 }
 0x11e   : > { %v782_v61 = vmul.f32 0.2, %v714_v52  ;;  %v717_v62 = vadd.f32 %v2292_v44, %v716_v55 }
 0x11f   : > { %vm727_vm0 = vcmp.ge.f32.partialorder %v621_v57, 0.0  ;;  %v759_v63 = vmul.f32 0.2, %v621_v57  ;;  %v790_v3 = vsel %vm726_vm15, %v618_v49, %v758_v56 }
 0x120   : > { %v2331_v0 = vsel %vm750_vm14, %v714_v52, %v782_v61  ;;  %vm751_vm1 = vcmp.ge.f32.partialorder %v717_v62, 0.0  ;;  %v783_v1 = vmul.f32 0.2, %v717_v62 }
 0x121   : > { %v791_v4 = vsel %vm727_vm0, %v621_v57, %v759_v63 }
 0x122   : > { %v819_v5 = vpack.c.bf16 %v791_v4, %v790_v3  ;;  %v625_v7 = vpop.f32.mrb[16].mxu0  ;;  %v2333_v8 = vsel %vm751_vm1, %v717_v62, %v783_v1 }
 0x123   : > { %v626_v9 = vadd.f32 %v2292_v44, %v625_v7  ;;  %v627_v10 = vpop.f32.mrb[17].mxu0  ;;  %v831_v11 = vpack.c.bf16 %v2333_v8, %v2331_v0 }
 0x124   : > { %v628_v12 = vpop.f32.mrb[18].mxu0  ;;  %1857 = vmatmul.mubr.msk.bf16.gmra.mrb[20].mxu1 %vm855_vm5, %v819_v5 }
 0x125   : > { %v760_v13 = vmul.f32 0.2, %v626_v9  ;;  %v629_v14 = vadd.f32 %v2292_v44, %v628_v12  ;;  %v630_v15 = vpop.f32.mrb[19].mxu0  ;;  %vm728_vm2 = vcmp.ge.f32.partialorder %v626_v9, 0.0 }
 0x127   : > { %vm729_vm3 = vcmp.ge.f32.partialorder %v629_v14, 0.0  ;;  %v761_v16 = vmul.f32 0.2, %v629_v14  ;;  %v792_v17 = vsel %vm728_vm2, %v626_v9, %v760_v13 }
 0x129   : > { %v793_v19 = vsel %vm729_vm3, %v629_v14, %v761_v16 }
 0x12a   : > { %v820_v20 = vpack.c.bf16 %v793_v19, %v792_v17  ;;  %v633_v21 = vpop.f32.mrb[20].mxu0 }
 0x12b   : > { %v634_v22 = vadd.f32 %v2292_v44, %v633_v21  ;;  %v635_v23 = vpop.f32.mrb[21].mxu0 }
 0x12c   : > { %v636_v25 = vpop.f32.mrb[22].mxu0  ;;  %1860 = vmatprep.mubr.msk.bf16.mxu1 %vm855_vm5, %v820_v20 }
 0x12d   : > { %v762_v26 = vmul.f32 0.2, %v634_v22  ;;  %v637_v27 = vadd.f32 %v2292_v44, %v636_v25  ;;  %v638_v29 = vpop.f32.mrb[23].mxu0  ;;  %vm730_vm4 = vcmp.ge.f32.partialorder %v634_v22, 0.0 }
 0x12f   : > { %vm731_vm6 = vcmp.ge.f32.partialorder %v637_v27, 0.0  ;;  %v763_v30 = vmul.f32 0.2, %v637_v27  ;;  %v794_v31 = vsel %vm730_vm4, %v634_v22, %v762_v26  ;;  %vm1289_vm4 = vcmask 257024  }
 0x131   : > { %v795_v32 = vsel %vm731_vm6, %v637_v27, %v763_v30 }
 0x132   : > { %v821_v33 = vpack.c.bf16 %v795_v32, %v794_v31  ;;  %v641_v34 = vpop.f32.mrb[24].mxu0 }
 0x133   : > { %v642_v35 = vadd.f32 %v2292_v44, %v641_v34  ;;  %v643_v36 = vpop.f32.mrb[25].mxu0 }
 0x134   : > { %v644_v37 = vpop.f32.mrb[26].mxu0  ;;  %1861 = vmatmul.mubr.msk.bf16.gmra.mrb[24].mxu1 %vm855_vm5, %v821_v33 }
 0x135   : > { %v764_v38 = vmul.f32 0.2, %v642_v35  ;;  %v645_v39 = vadd.f32 %v2292_v44, %v644_v37  ;;  %v646_v41 = vpop.f32.mrb[27].mxu0  ;;  %vm732_vm7 = vcmp.ge.f32.partialorder %v642_v35, 0.0 }
 0x137   : > { %vm733_vm8 = vcmp.ge.f32.partialorder %v645_v39, 0.0  ;;  %v765_v42 = vmul.f32 0.2, %v645_v39  ;;  %v796_v43 = vsel %vm732_vm7, %v642_v35, %v764_v38 }
 0x139   : > { %v797_v45 = vsel %vm733_vm8, %v645_v39, %v765_v42 }
 0x13a   : > { %v822_v46 = vpack.c.bf16 %v797_v45, %v796_v43  ;;  %v649_v48 = vpop.f32.mrb[28].mxu0 }
 0x13b   : > { %v650_v49 = vadd.f32 %v2292_v44, %v649_v48  ;;  %v651_v50 = vpop.f32.mrb[29].mxu0 }
 0x13c   : > { %v652_v52 = vpop.f32.mrb[30].mxu0  ;;  %1864 = vmatprep.mubr.msk.bf16.mxu1 %vm855_vm5, %v822_v46 }
 0x13d   : > { %v766_v53 = vmul.f32 0.2, %v650_v49  ;;  %v653_v54 = vadd.f32 %v2292_v44, %v652_v52  ;;  %v654_v55 = vpop.f32.mrb[31].mxu0  ;;  %vm734_vm9 = vcmp.ge.f32.partialorder %v650_v49, 0.0 }
 0x13f   : > { %vm735_vm10 = vcmp.ge.f32.partialorder %v653_v54, 0.0  ;;  %v767_v56 = vmul.f32 0.2, %v653_v54  ;;  %v798_v57 = vsel %vm734_vm9, %v650_v49, %v766_v53 }
 0x141   : > { %v799_v58 = vsel %vm735_vm10, %v653_v54, %v767_v56 }
 0x142   : > { %v823_v59 = vpack.c.bf16 %v799_v58, %v798_v57  ;;  %v657_v61 = vpop.f32.mrb[32].mxu0 }
 0x143   : > { %v658_v62 = vadd.f32 %v2292_v44, %v657_v61  ;;  %v659_v63 = vpop.f32.mrb[33].mxu0 }
 0x144   : > { %v660_v1 = vpop.f32.mrb[34].mxu0  ;;  %1865 = vmatmul.mubr.msk.bf16.gmra.mrb[28].mxu1 %vm855_vm5, %v823_v59 }
 0x145   : > { %v768_v3 = vmul.f32 0.2, %v658_v62  ;;  %v661_v4 = vadd.f32 %v2292_v44, %v660_v1  ;;  %v662_v5 = vpop.f32.mrb[35].mxu0  ;;  %vm736_vm11 = vcmp.ge.f32.partialorder %v658_v62, 0.0 }
 0x147   : > { %vm737_vm12 = vcmp.ge.f32.partialorder %v661_v4, 0.0  ;;  %v769_v7 = vmul.f32 0.2, %v661_v4  ;;  %v800_v9 = vsel %vm736_vm11, %v658_v62, %v768_v3 }
 0x149   : > { %v801_v10 = vsel %vm737_vm12, %v661_v4, %v769_v7 }
 0x14a   : > { %v824_v12 = vpack.c.bf16 %v801_v10, %v800_v9  ;;  %v665_v13 = vpop.f32.mrb[36].mxu0 }
 0x14b   : > { %v666_v14 = vadd.f32 %v2292_v44, %v665_v13  ;;  %v667_v15 = vpop.f32.mrb[37].mxu0 }
 0x14c   : > { %v668_v16 = vpop.f32.mrb[38].mxu0  ;;  %1868 = vmatprep.mubr.msk.bf16.mxu1 %vm855_vm5, %v824_v12 }
 0x14d   : > { %v770_v17 = vmul.f32 0.2, %v666_v14  ;;  %v669_v19 = vadd.f32 %v2292_v44, %v668_v16  ;;  %v670_v20 = vpop.f32.mrb[39].mxu0  ;;  %vm738_vm13 = vcmp.ge.f32.partialorder %v666_v14, 0.0 }
 0x14f   : > { %vm739_vm14 = vcmp.ge.f32.partialorder %v669_v19, 0.0  ;;  %v771_v21 = vmul.f32 0.2, %v669_v19  ;;  %v802_v22 = vsel %vm738_vm13, %v666_v14, %v770_v17 }
 0x151   : > { %v803_v23 = vsel %vm739_vm14, %v669_v19, %v771_v21 }
 0x152   : > { %v825_v25 = vpack.c.bf16 %v803_v23, %v802_v22  ;;  %v673_v26 = vpop.f32.mrb[40].mxu0 }
 0x153   : > { %v674_v27 = vadd.f32 %v2292_v44, %v673_v26  ;;  %v675_v29 = vpop.f32.mrb[41].mxu0 }
 0x154   : > { %v676_v30 = vpop.f32.mrb[42].mxu0  ;;  %1869 = vmatmul.mubr.msk.bf16.gmra.mrb[32].mxu1 %vm855_vm5, %v825_v25 }
 0x155   : > { %v772_v31 = vmul.f32 0.2, %v674_v27  ;;  %v677_v32 = vadd.f32 %v2292_v44, %v676_v30  ;;  %v678_v33 = vpop.f32.mrb[43].mxu0  ;;  %vm740_vm15 = vcmp.ge.f32.partialorder %v674_v27, 0.0 }
 0x157   : > { %vm741_vm0 = vcmp.ge.f32.partialorder %v677_v32, 0.0  ;;  %v773_v34 = vmul.f32 0.2, %v677_v32  ;;  %v804_v35 = vsel %vm740_vm15, %v674_v27, %v772_v31 }
 0x159   : > { %v805_v36 = vsel %vm741_vm0, %v677_v32, %v773_v34 }
 0x15a   : > { %v826_v37 = vpack.c.bf16 %v805_v36, %v804_v35  ;;  %v681_v38 = vpop.f32.mrb[44].mxu0 }
 0x15b   : > { %v682_v39 = vadd.f32 %v2292_v44, %v681_v38  ;;  %v683_v41 = vpop.f32.mrb[45].mxu0 }
 0x15c   : > { %v684_v42 = vpop.f32.mrb[46].mxu0  ;;  %1872 = vmatprep.mubr.msk.bf16.mxu1 %vm855_vm5, %v826_v37 }
 0x15d   : > { %v774_v43 = vmul.f32 0.2, %v682_v39  ;;  %v685_v45 = vadd.f32 %v2292_v44, %v684_v42  ;;  %v686_v46 = vpop.f32.mrb[47].mxu0  ;;  %vm742_vm1 = vcmp.ge.f32.partialorder %v682_v39, 0.0  ;;  %v2381_v44 = vld [vmem:[%s2621_s4] ss:$0 sm:$0xff] }
 0x15f   : > { %vm743_vm2 = vcmp.ge.f32.partialorder %v685_v45, 0.0  ;;  %v775_v48 = vmul.f32 0.2, %v685_v45  ;;  %v806_v49 = vsel %vm742_vm1, %v682_v39, %v774_v43 }
 0x161   : > { %v807_v50 = vsel %vm743_vm2, %v685_v45, %v775_v48 }
 0x162   : > { %v827_v52 = vpack.c.bf16 %v807_v50, %v806_v49 }
 0x164   : > { %1873 = vmatmul.mubr.msk.bf16.gmra.mrb[36].mxu1 %vm855_vm5, %v827_v52 }
 0x165   : > { %1876 = vmatprep.mubr.msk.bf16.mxu1 %vm855_vm5, %v828_v6 }
 0x16c   : > { %1877 = vmatmul.mubr.msk.bf16.gmra.mrb[40].mxu1 %vm855_vm5, %v829_v28 }
 0x16d   : > { %1880 = vmatprep.mubr.msk.bf16.mxu1 %vm855_vm5, %v830_v51 }
 0x174   : > { %1881 = vmatmul.mubr.msk.bf16.gmra.mrb[44].mxu1 %vm855_vm5, %v831_v11 }
 0x1e7   : > { %v1854_v60 = vpop.f32.mrb[16].mxu1 }
 0x1e8   : > { %v947_v2 = vadd.f32 %v1854_v60, %v2381_v44  ;;  %v938_v6 = vpop.f32.mrb[17].mxu1 }
 0x1e9   : > { %v939_v18 = vadd.f32 %v2381_v44, %v938_v6  ;;  %v1855_v24 = vpop.f32.mrb[18].mxu1 }
 0x1ea   : > { %vm1067_vm3 = vcmp.ge.f32.partialorder %v947_v2, 0.0  ;;  %v1099_v28 = vmul.f32 0.2, %v947_v2  ;;  %v950_v40 = vadd.f32 %v1855_v24, %v2381_v44  ;;  %v941_v47 = vpop.f32.mrb[19].mxu1 }
 0x1eb   : > { %vm1065_vm5 = vcmp.ge.f32.partialorder %v939_v18, 0.0  ;;  %v1097_v51 = vmul.f32 0.2, %v939_v18  ;;  %v942_v0 = vadd.f32 %v2381_v44, %v941_v47 }
 0x1ec   : > { %v1131_v8 = vsel %vm1067_vm3, %v947_v2, %v1099_v28  ;;  %vm1068_vm6 = vcmp.ge.f32.partialorder %v950_v40, 0.0  ;;  %v1100_v11 = vmul.f32 0.2, %v950_v40 }
 0x1ed   : > { %v1797_v53 = vpack.c.bf16 %v1131_v8, %v1131_v8  ;;  %v1129_v54 = vsel %vm1065_vm5, %v939_v18, %v1097_v51  ;;  %vm1066_vm7 = vcmp.ge.f32.partialorder %v942_v0, 0.0  ;;  %v1098_v55 = vmul.f32 0.2, %v942_v0 }
 0x1ee   : > { %v1795_v56 = vpack.c.bf16 %v1129_v54, %v1129_v54  ;;  %v1132_v57 = vsel %vm1068_vm6, %v950_v40, %v1100_v11 }
 0x1ef   : > { %1292 = vst.msk [vmem:[%s2388_s18 + $0x8] sm:$0xf] %vm1289_vm4, %v1797_v53  ;;  %v1798_v58 = vpack.c.bf16 %v1132_v57, %v1132_v57  ;;  %v1130_v59 = vsel %vm1066_vm7, %v942_v0, %v1098_v55 }
 0x1f0   : > { %1290 = vst.msk [vmem:[%s2388_s18] sm:$0xf] %vm1289_vm4, %v1795_v56  ;;  %v1796_v61 = vpack.c.bf16 %v1130_v59, %v1130_v59 }
 0x1f1   : > { %1293 = vst.msk [vmem:[%s2388_s18 + $0xc] sm:$0xf] %vm1289_vm4, %v1798_v58 }
 0x1f2   : > { %1291 = vst.msk [vmem:[%s2388_s18 + $0x4] sm:$0xf] %vm1289_vm4, %v1796_v61 }
 0x1f7   : > { %v1858_v62 = vpop.f32.mrb[20].mxu1 }
 0x1f8   : > { %v963_v63 = vadd.f32 %v1858_v62, %v2381_v44  ;;  %v954_v1 = vpop.f32.mrb[21].mxu1 }
 0x1f9   : > { %v955_v3 = vadd.f32 %v2381_v44, %v954_v1  ;;  %v1859_v4 = vpop.f32.mrb[22].mxu1 }
 0x1fa   : > { %vm1071_vm8 = vcmp.ge.f32.partialorder %v963_v63, 0.0  ;;  %v1103_v5 = vmul.f32 0.2, %v963_v63  ;;  %v966_v7 = vadd.f32 %v1859_v4, %v2381_v44  ;;  %v957_v9 = vpop.f32.mrb[23].mxu1 }
 0x1fb   : > { %vm1069_vm9 = vcmp.ge.f32.partialorder %v955_v3, 0.0  ;;  %v1101_v10 = vmul.f32 0.2, %v955_v3  ;;  %v958_v12 = vadd.f32 %v2381_v44, %v957_v9 }
 0x1fc   : > { %v1135_v13 = vsel %vm1071_vm8, %v963_v63, %v1103_v5  ;;  %vm1072_vm10 = vcmp.ge.f32.partialorder %v966_v7, 0.0  ;;  %v1104_v14 = vmul.f32 0.2, %v966_v7 }
 0x1fd   : > { %v1801_v15 = vpack.c.bf16 %v1135_v13, %v1135_v13  ;;  %v1133_v16 = vsel %vm1069_vm9, %v955_v3, %v1101_v10  ;;  %vm1070_vm11 = vcmp.ge.f32.partialorder %v958_v12, 0.0  ;;  %v1102_v17 = vmul.f32 0.2, %v958_v12 }
 0x1fe   : > { %v1799_v19 = vpack.c.bf16 %v1133_v16, %v1133_v16  ;;  %v1136_v20 = vsel %vm1072_vm10, %v966_v7, %v1104_v14 }
 0x1ff   : > { %1296 = vst.msk [vmem:[%s2388_s18 + $0x18] sm:$0xf] %vm1289_vm4, %v1801_v15  ;;  %v1802_v21 = vpack.c.bf16 %v1136_v20, %v1136_v20  ;;  %v1134_v22 = vsel %vm1070_vm11, %v958_v12, %v1102_v17 }
 0x200   : > { %1294 = vst.msk [vmem:[%s2388_s18 + $0x10] sm:$0xf] %vm1289_vm4, %v1799_v19  ;;  %v1800_v23 = vpack.c.bf16 %v1134_v22, %v1134_v22 }
 0x201   : > { %1297 = vst.msk [vmem:[%s2388_s18 + $0x1c] sm:$0xf] %vm1289_vm4, %v1802_v21 }
 0x202   : > { %1295 = vst.msk [vmem:[%s2388_s18 + $0x14] sm:$0xf] %vm1289_vm4, %v1800_v23 }
 0x207   : > { %v1862_v25 = vpop.f32.mrb[24].mxu1 }
 0x208   : > { %v979_v26 = vadd.f32 %v1862_v25, %v2381_v44  ;;  %v970_v27 = vpop.f32.mrb[25].mxu1 }
 0x209   : > { %v971_v29 = vadd.f32 %v2381_v44, %v970_v27  ;;  %v1863_v30 = vpop.f32.mrb[26].mxu1 }
 0x20a   : > { %vm1075_vm12 = vcmp.ge.f32.partialorder %v979_v26, 0.0  ;;  %v1107_v31 = vmul.f32 0.2, %v979_v26  ;;  %v982_v32 = vadd.f32 %v1863_v30, %v2381_v44  ;;  %v973_v33 = vpop.f32.mrb[27].mxu1 }
 0x20b   : > { %vm1073_vm13 = vcmp.ge.f32.partialorder %v971_v29, 0.0  ;;  %v1105_v34 = vmul.f32 0.2, %v971_v29  ;;  %v974_v35 = vadd.f32 %v2381_v44, %v973_v33 }
 0x20c   : > { %v1139_v36 = vsel %vm1075_vm12, %v979_v26, %v1107_v31  ;;  %vm1076_vm14 = vcmp.ge.f32.partialorder %v982_v32, 0.0  ;;  %v1108_v37 = vmul.f32 0.2, %v982_v32 }
 0x20d   : > { %v1805_v38 = vpack.c.bf16 %v1139_v36, %v1139_v36  ;;  %v1137_v39 = vsel %vm1073_vm13, %v971_v29, %v1105_v34  ;;  %vm1074_vm15 = vcmp.ge.f32.partialorder %v974_v35, 0.0  ;;  %v1106_v41 = vmul.f32 0.2, %v974_v35 }
 0x20e   : > { %v1803_v42 = vpack.c.bf16 %v1137_v39, %v1137_v39  ;;  %v1140_v43 = vsel %vm1076_vm14, %v982_v32, %v1108_v37 }
 0x20f   : > { %1300 = vst.msk [vmem:[%s2388_s18 + $0x28] sm:$0xf] %vm1289_vm4, %v1805_v38  ;;  %v1806_v45 = vpack.c.bf16 %v1140_v43, %v1140_v43  ;;  %v1138_v46 = vsel %vm1074_vm15, %v974_v35, %v1106_v41 }
 0x210   : > { %1298 = vst.msk [vmem:[%s2388_s18 + $0x20] sm:$0xf] %vm1289_vm4, %v1803_v42  ;;  %v1804_v48 = vpack.c.bf16 %v1138_v46, %v1138_v46 }
 0x211   : > { %1301 = vst.msk [vmem:[%s2388_s18 + $0x2c] sm:$0xf] %vm1289_vm4, %v1806_v45 }
 0x212   : > { %1299 = vst.msk [vmem:[%s2388_s18 + $0x24] sm:$0xf] %vm1289_vm4, %v1804_v48 }
 0x217   : > { %v1866_v49 = vpop.f32.mrb[28].mxu1 }
 0x218   : > { %v995_v50 = vadd.f32 %v1866_v49, %v2381_v44  ;;  %v986_v52 = vpop.f32.mrb[29].mxu1 }
 0x219   : > { %v987_v60 = vadd.f32 %v2381_v44, %v986_v52  ;;  %v1867_v2 = vpop.f32.mrb[30].mxu1 }
 0x21a   : > { %vm1079_vm0 = vcmp.ge.f32.partialorder %v995_v50, 0.0  ;;  %v1111_v6 = vmul.f32 0.2, %v995_v50  ;;  %v998_v18 = vadd.f32 %v1867_v2, %v2381_v44  ;;  %v989_v24 = vpop.f32.mrb[31].mxu1 }
 0x21b   : > { %vm1077_vm1 = vcmp.ge.f32.partialorder %v987_v60, 0.0  ;;  %v1109_v28 = vmul.f32 0.2, %v987_v60  ;;  %v990_v40 = vadd.f32 %v2381_v44, %v989_v24 }
 0x21c   : > { %v1143_v47 = vsel %vm1079_vm0, %v995_v50, %v1111_v6  ;;  %vm1080_vm2 = vcmp.ge.f32.partialorder %v998_v18, 0.0  ;;  %v1112_v51 = vmul.f32 0.2, %v998_v18 }
 0x21d   : > { %v1809_v0 = vpack.c.bf16 %v1143_v47, %v1143_v47  ;;  %v1141_v8 = vsel %vm1077_vm1, %v987_v60, %v1109_v28  ;;  %vm1078_vm3 = vcmp.ge.f32.partialorder %v990_v40, 0.0  ;;  %v1110_v11 = vmul.f32 0.2, %v990_v40 }
 0x21e   : > { %v1807_v53 = vpack.c.bf16 %v1141_v8, %v1141_v8  ;;  %v1144_v54 = vsel %vm1080_vm2, %v998_v18, %v1112_v51 }
 0x21f   : > { %1304 = vst.msk [vmem:[%s2388_s18 + $0x38] sm:$0xf] %vm1289_vm4, %v1809_v0  ;;  %v1810_v55 = vpack.c.bf16 %v1144_v54, %v1144_v54  ;;  %v1142_v56 = vsel %vm1078_vm3, %v990_v40, %v1110_v11 }
 0x220   : > { %1302 = vst.msk [vmem:[%s2388_s18 + $0x30] sm:$0xf] %vm1289_vm4, %v1807_v53  ;;  %v1808_v57 = vpack.c.bf16 %v1142_v56, %v1142_v56 }
 0x221   : > { %1305 = vst.msk [vmem:[%s2388_s18 + $0x3c] sm:$0xf] %vm1289_vm4, %v1810_v55 }
 0x222   : > { %1303 = vst.msk [vmem:[%s2388_s18 + $0x34] sm:$0xf] %vm1289_vm4, %v1808_v57 }
 0x227   : > { %v1870_v58 = vpop.f32.mrb[32].mxu1 }
 0x228   : > { %v1011_v59 = vadd.f32 %v1870_v58, %v2381_v44  ;;  %v1002_v61 = vpop.f32.mrb[33].mxu1 }
 0x229   : > { %v1003_v62 = vadd.f32 %v2381_v44, %v1002_v61  ;;  %v1871_v63 = vpop.f32.mrb[34].mxu1 }
 0x22a   : > { %vm1083_vm5 = vcmp.ge.f32.partialorder %v1011_v59, 0.0  ;;  %v1115_v1 = vmul.f32 0.2, %v1011_v59  ;;  %v1014_v3 = vadd.f32 %v1871_v63, %v2381_v44  ;;  %v1005_v4 = vpop.f32.mrb[35].mxu1 }
 0x22b   : > { %vm1081_vm6 = vcmp.ge.f32.partialorder %v1003_v62, 0.0  ;;  %v1113_v5 = vmul.f32 0.2, %v1003_v62  ;;  %v1006_v7 = vadd.f32 %v2381_v44, %v1005_v4 }
 0x22c   : > { %v1147_v9 = vsel %vm1083_vm5, %v1011_v59, %v1115_v1  ;;  %vm1084_vm7 = vcmp.ge.f32.partialorder %v1014_v3, 0.0  ;;  %v1116_v10 = vmul.f32 0.2, %v1014_v3 }
 0x22d   : > { %v1813_v12 = vpack.c.bf16 %v1147_v9, %v1147_v9  ;;  %v1145_v13 = vsel %vm1081_vm6, %v1003_v62, %v1113_v5  ;;  %vm1082_vm8 = vcmp.ge.f32.partialorder %v1006_v7, 0.0  ;;  %v1114_v14 = vmul.f32 0.2, %v1006_v7 }
 0x22e   : > { %v1811_v15 = vpack.c.bf16 %v1145_v13, %v1145_v13  ;;  %v1148_v16 = vsel %vm1084_vm7, %v1014_v3, %v1116_v10 }
 0x22f   : > { %1308 = vst.msk [vmem:[%s2388_s18 + $0x48] sm:$0xf] %vm1289_vm4, %v1813_v12  ;;  %v1814_v17 = vpack.c.bf16 %v1148_v16, %v1148_v16  ;;  %v1146_v19 = vsel %vm1082_vm8, %v1006_v7, %v1114_v14 }
 0x230   : > { %1306 = vst.msk [vmem:[%s2388_s18 + $0x40] sm:$0xf] %vm1289_vm4, %v1811_v15  ;;  %v1812_v20 = vpack.c.bf16 %v1146_v19, %v1146_v19 }
 0x231   : > { %1309 = vst.msk [vmem:[%s2388_s18 + $0x4c] sm:$0xf] %vm1289_vm4, %v1814_v17 }
 0x232   : > { %1307 = vst.msk [vmem:[%s2388_s18 + $0x44] sm:$0xf] %vm1289_vm4, %v1812_v20 }
 0x237   : > { %v1874_v21 = vpop.f32.mrb[36].mxu1 }
 0x238   : > { %v1027_v22 = vadd.f32 %v1874_v21, %v2381_v44  ;;  %v1018_v23 = vpop.f32.mrb[37].mxu1 }
 0x239   : > { %v1019_v25 = vadd.f32 %v2381_v44, %v1018_v23  ;;  %v1875_v26 = vpop.f32.mrb[38].mxu1 }
 0x23a   : > { %vm1087_vm9 = vcmp.ge.f32.partialorder %v1027_v22, 0.0  ;;  %v1119_v27 = vmul.f32 0.2, %v1027_v22  ;;  %v1030_v29 = vadd.f32 %v1875_v26, %v2381_v44  ;;  %v1021_v30 = vpop.f32.mrb[39].mxu1 }
 0x23b   : > { %vm1085_vm10 = vcmp.ge.f32.partialorder %v1019_v25, 0.0  ;;  %v1117_v31 = vmul.f32 0.2, %v1019_v25  ;;  %v1022_v32 = vadd.f32 %v2381_v44, %v1021_v30 }
 0x23c   : > { %v1151_v33 = vsel %vm1087_vm9, %v1027_v22, %v1119_v27  ;;  %vm1088_vm11 = vcmp.ge.f32.partialorder %v1030_v29, 0.0  ;;  %v1120_v34 = vmul.f32 0.2, %v1030_v29 }
 0x23d   : > { %v1817_v35 = vpack.c.bf16 %v1151_v33, %v1151_v33  ;;  %v1149_v36 = vsel %vm1085_vm10, %v1019_v25, %v1117_v31  ;;  %vm1086_vm12 = vcmp.ge.f32.partialorder %v1022_v32, 0.0  ;;  %v1118_v37 = vmul.f32 0.2, %v1022_v32 }
 0x23e   : > { %v1815_v38 = vpack.c.bf16 %v1149_v36, %v1149_v36  ;;  %v1152_v39 = vsel %vm1088_vm11, %v1030_v29, %v1120_v34 }
 0x23f   : > { %1312 = vst.msk [vmem:[%s2388_s18 + $0x58] sm:$0xf] %vm1289_vm4, %v1817_v35  ;;  %v1818_v41 = vpack.c.bf16 %v1152_v39, %v1152_v39  ;;  %v1150_v42 = vsel %vm1086_vm12, %v1022_v32, %v1118_v37  ;;  %v1878_v43 = vpop.f32.mrb[40].mxu1 }
 0x240   : > { %1310 = vst.msk [vmem:[%s2388_s18 + $0x50] sm:$0xf] %vm1289_vm4, %v1815_v38  ;;  %v1816_v45 = vpack.c.bf16 %v1150_v42, %v1150_v42  ;;  %v1043_v46 = vadd.f32 %v1878_v43, %v2381_v44  ;;  %v1034_v48 = vpop.f32.mrb[41].mxu1 }
 0x241   : > { %1313 = vst.msk [vmem:[%s2388_s18 + $0x5c] sm:$0xf] %vm1289_vm4, %v1818_v41  ;;  %v1035_v49 = vadd.f32 %v2381_v44, %v1034_v48  ;;  %v1879_v50 = vpop.f32.mrb[42].mxu1 }
 0x242   : > { %1311 = vst.msk [vmem:[%s2388_s18 + $0x54] sm:$0xf] %vm1289_vm4, %v1816_v45  ;;  %vm1091_vm13 = vcmp.ge.f32.partialorder %v1043_v46, 0.0  ;;  %v1123_v52 = vmul.f32 0.2, %v1043_v46  ;;  %v1046_v60 = vadd.f32 %v1879_v50, %v2381_v44  ;;  %v1037_v2 = vpop.f32.mrb[43].mxu1 }
 0x243   : > { %vm1089_vm14 = vcmp.ge.f32.partialorder %v1035_v49, 0.0  ;;  %v1121_v6 = vmul.f32 0.2, %v1035_v49  ;;  %v1038_v18 = vadd.f32 %v2381_v44, %v1037_v2 }
 0x244   : > { %v1155_v24 = vsel %vm1091_vm13, %v1043_v46, %v1123_v52  ;;  %vm1092_vm15 = vcmp.ge.f32.partialorder %v1046_v60, 0.0  ;;  %v1124_v28 = vmul.f32 0.2, %v1046_v60 }
 0x245   : > { %v1821_v40 = vpack.c.bf16 %v1155_v24, %v1155_v24  ;;  %v1153_v47 = vsel %vm1089_vm14, %v1035_v49, %v1121_v6  ;;  %vm1090_vm0 = vcmp.ge.f32.partialorder %v1038_v18, 0.0  ;;  %v1122_v51 = vmul.f32 0.2, %v1038_v18 }
 0x246   : > { %v1819_v0 = vpack.c.bf16 %v1153_v47, %v1153_v47  ;;  %v1156_v8 = vsel %vm1092_vm15, %v1046_v60, %v1124_v28 }
 0x247   : > { %1316 = vst.msk [vmem:[%s2388_s18 + $0x68] sm:$0xf] %vm1289_vm4, %v1821_v40  ;;  %v1822_v11 = vpack.c.bf16 %v1156_v8, %v1156_v8  ;;  %v1154_v53 = vsel %vm1090_vm0, %v1038_v18, %v1122_v51  ;;  %v1882_v54 = vpop.f32.mrb[44].mxu1 }
 0x248   : > { %1314 = vst.msk [vmem:[%s2388_s18 + $0x60] sm:$0xf] %vm1289_vm4, %v1819_v0  ;;  %v1820_v55 = vpack.c.bf16 %v1154_v53, %v1154_v53  ;;  %v1059_v56 = vadd.f32 %v1882_v54, %v2381_v44  ;;  %v1050_v57 = vpop.f32.mrb[45].mxu1 }
 0x249   : > { %1317 = vst.msk [vmem:[%s2388_s18 + $0x6c] sm:$0xf] %vm1289_vm4, %v1822_v11  ;;  %v1051_v58 = vadd.f32 %v2381_v44, %v1050_v57  ;;  %v1883_v59 = vpop.f32.mrb[46].mxu1 }
 0x24a   : > { %1315 = vst.msk [vmem:[%s2388_s18 + $0x64] sm:$0xf] %vm1289_vm4, %v1820_v55  ;;  %vm1095_vm1 = vcmp.ge.f32.partialorder %v1059_v56, 0.0  ;;  %v1127_v61 = vmul.f32 0.2, %v1059_v56  ;;  %v1062_v62 = vadd.f32 %v1883_v59, %v2381_v44  ;;  %v1053_v63 = vpop.f32.mrb[47].mxu1 }
 0x24b   : > { %vm1093_vm2 = vcmp.ge.f32.partialorder %v1051_v58, 0.0  ;;  %v1125_v1 = vmul.f32 0.2, %v1051_v58  ;;  %v1054_v3 = vadd.f32 %v2381_v44, %v1053_v63 }
 0x24c   : > { %v1159_v4 = vsel %vm1095_vm1, %v1059_v56, %v1127_v61  ;;  %vm1096_vm3 = vcmp.ge.f32.partialorder %v1062_v62, 0.0  ;;  %v1128_v5 = vmul.f32 0.2, %v1062_v62  ;;  %1328 = sbr.rel (!%p2194_p4) target bundleno = 665 (0x299), region = 44 }
 0x24d   : > { %v1825_v7 = vpack.c.bf16 %v1159_v4, %v1159_v4  ;;  %v1157_v9 = vsel %vm1093_vm2, %v1051_v58, %v1125_v1  ;;  %vm1094_vm5 = vcmp.ge.f32.partialorder %v1054_v3, 0.0  ;;  %v1126_v10 = vmul.f32 0.2, %v1054_v3 }
 0x24e   : > { %v1823_v12 = vpack.c.bf16 %v1157_v9, %v1157_v9  ;;  %v1160_v13 = vsel %vm1096_vm3, %v1062_v62, %v1128_v5 }
 0x24f   : > { %1320 = vst.msk [vmem:[%s2388_s18 + $0x78] sm:$0xf] %vm1289_vm4, %v1825_v7  ;;  %v1826_v14 = vpack.c.bf16 %v1160_v13, %v1160_v13  ;;  %v1158_v15 = vsel %vm1094_vm5, %v1054_v3, %v1126_v10 }
 0x250   : > { %1318 = vst.msk [vmem:[%s2388_s18 + $0x70] sm:$0xf] %vm1289_vm4, %v1823_v12  ;;  %v1824_v16 = vpack.c.bf16 %v1158_v15, %v1158_v15 }
 0x251   : > { %1321 = vst.msk [vmem:[%s2388_s18 + $0x7c] sm:$0xf] %vm1289_vm4, %v1826_v14 }
 0x252   : > { %1319 = vst.msk [vmem:[%s2388_s18 + $0x74] sm:$0xf] %vm1289_vm4, %v1824_v16 }
 0x253   : > { %s2631_s20 = smov (!%p1331_p8, %s1330_s20), 32 }
 0x254   : > { %s1779_s30 = sshll.u32 %s2631_s20, 6 }
 0x255   : > { %p1782_p9 = scmp.eq.s32.totalorder %s1779_s30, 0 }
 0x256   : > { %s2495_s6 = sshrl.u32 (!%p1782_p9), %s2631_s20, 5 }
 0x257   : > { %1339 = sbr.rel (%p1782_p9) target bundleno = 665 (0x299), region = 48  ;;  %p1783_p10 = scmp.le.s32.totalorder (!%p1782_p9), %s2495_s6, 0 }
 0x25e   : > { %1616 = sbr.rel (%p1783_p10) target bundleno = 644 (0x284), region = 120  ;;  %s2624_s21 = smov (!%p1783_p10), %s2489_s28 }
 0x25f   : > { %s2625_s26 = smov (!%p1783_p10), %s2388_s18  ;;  %s2504_s29 = smov (!%p1783_p10), 0  }
 0x260   : > { %s2506_s7 = smov (!%p1783_p10), 0  }
 0x265 LB: >> { %v1355_v44 = vld [vmem:[%s2112_s26] sm:$0xf]  ;;  %v1357_v17 = vld [vmem:[%s2112_s26 + $0x4] sm:$0xf]  ;;  %v1359_v19 = vld [vmem:[%s2112_s26 + $0x8] sm:$0xf]  ;;  %s2120_s7 = sphi %s2506_s7, %s1349_s7   ;;  %s2116_s29 = sphi %s2504_s29, %s2626_s29   ;;  %s2112_s26 = sphi %s2625_s26, %s1424_s26   ;;  %s2108_s21 = sphi %s2624_s21, %s1425_s21  }
 0x266   : >> { %1356 = vst [vmem:[%s2108_s21] sm:$0xf] %v1355_v44  ;;  %1358 = vst [vmem:[%s2108_s21 + $0x4] sm:$0xf] %v1357_v17  ;;  %v1361_v20 = vld [vmem:[%s2112_s26 + $0xc] sm:$0xf]  ;;  %s1419_s8 = sadd.s32 1, %s2116_s29 }
 0x267   : >> { %1360 = vst [vmem:[%s2108_s21 + $0x8] sm:$0xf] %v1359_v19  ;;  %v1363_v21 = vld [vmem:[%s2112_s26 + $0x10] sm:$0xf]  ;;  %v1365_v22 = vld [vmem:[%s2112_s26 + $0x14] sm:$0xf]  ;;  %p1420_p11 = scmp.ge.s32.totalorder %s1419_s8, %s2495_s6 }
 0x268   : >> { %1362 = vst [vmem:[%s2108_s21 + $0xc] sm:$0xf] %v1361_v20  ;;  %1364 = vst [vmem:[%s2108_s21 + $0x10] sm:$0xf] %v1363_v21  ;;  %v1367_v23 = vld [vmem:[%s2112_s26 + $0x18] sm:$0xf] }
 0x269   : >> { %1366 = vst [vmem:[%s2108_s21 + $0x14] sm:$0xf] %v1365_v22  ;;  %v1369_v25 = vld [vmem:[%s2112_s26 + $0x1c] sm:$0xf]  ;;  %v1371_v26 = vld [vmem:[%s2112_s26 + $0x20] sm:$0xf] }
 0x26a   : >> { %1368 = vst [vmem:[%s2108_s21 + $0x18] sm:$0xf] %v1367_v23  ;;  %1370 = vst [vmem:[%s2108_s21 + $0x1c] sm:$0xf] %v1369_v25  ;;  %v1373_v27 = vld [vmem:[%s2112_s26 + $0x24] sm:$0xf] }
 0x26b   : >> { %1372 = vst [vmem:[%s2108_s21 + $0x20] sm:$0xf] %v1371_v26  ;;  %v1375_v29 = vld [vmem:[%s2112_s26 + $0x28] sm:$0xf]  ;;  %v1377_v30 = vld [vmem:[%s2112_s26 + $0x2c] sm:$0xf] }
 0x26c   : >> { %1374 = vst [vmem:[%s2108_s21 + $0x24] sm:$0xf] %v1373_v27  ;;  %1376 = vst [vmem:[%s2108_s21 + $0x28] sm:$0xf] %v1375_v29  ;;  %v1379_v31 = vld [vmem:[%s2112_s26 + $0x30] sm:$0xf] }
 0x26d   : >> { %1378 = vst [vmem:[%s2108_s21 + $0x2c] sm:$0xf] %v1377_v30  ;;  %v1381_v32 = vld [vmem:[%s2112_s26 + $0x34] sm:$0xf]  ;;  %v1383_v33 = vld [vmem:[%s2112_s26 + $0x38] sm:$0xf] }
 0x26e   : >> { %1380 = vst [vmem:[%s2108_s21 + $0x30] sm:$0xf] %v1379_v31  ;;  %1382 = vst [vmem:[%s2108_s21 + $0x34] sm:$0xf] %v1381_v32  ;;  %v1385_v34 = vld [vmem:[%s2112_s26 + $0x3c] sm:$0xf] }
 0x26f   : >> { %1384 = vst [vmem:[%s2108_s21 + $0x38] sm:$0xf] %v1383_v33  ;;  %v1387_v35 = vld [vmem:[%s2112_s26 + $0x40] sm:$0xf]  ;;  %v1389_v36 = vld [vmem:[%s2112_s26 + $0x44] sm:$0xf] }
 0x270   : >> { %1386 = vst [vmem:[%s2108_s21 + $0x3c] sm:$0xf] %v1385_v34  ;;  %1388 = vst [vmem:[%s2108_s21 + $0x40] sm:$0xf] %v1387_v35  ;;  %v1391_v37 = vld [vmem:[%s2112_s26 + $0x48] sm:$0xf] }
 0x271   : >> { %1390 = vst [vmem:[%s2108_s21 + $0x44] sm:$0xf] %v1389_v36  ;;  %v1393_v38 = vld [vmem:[%s2112_s26 + $0x4c] sm:$0xf]  ;;  %v1395_v39 = vld [vmem:[%s2112_s26 + $0x50] sm:$0xf] }
 0x272   : >> { %1392 = vst [vmem:[%s2108_s21 + $0x48] sm:$0xf] %v1391_v37  ;;  %1394 = vst [vmem:[%s2108_s21 + $0x4c] sm:$0xf] %v1393_v38  ;;  %v1397_v41 = vld [vmem:[%s2112_s26 + $0x54] sm:$0xf] }
 0x273   : >> { %1396 = vst [vmem:[%s2108_s21 + $0x50] sm:$0xf] %v1395_v39  ;;  %v1399_v42 = vld [vmem:[%s2112_s26 + $0x58] sm:$0xf]  ;;  %v1401_v43 = vld [vmem:[%s2112_s26 + $0x5c] sm:$0xf] }
 0x274   : >> { %1398 = vst [vmem:[%s2108_s21 + $0x54] sm:$0xf] %v1397_v41  ;;  %1400 = vst [vmem:[%s2108_s21 + $0x58] sm:$0xf] %v1399_v42  ;;  %v1403_v45 = vld [vmem:[%s2112_s26 + $0x60] sm:$0xf] }
 0x275   : >> { %1402 = vst [vmem:[%s2108_s21 + $0x5c] sm:$0xf] %v1401_v43  ;;  %v1405_v46 = vld [vmem:[%s2112_s26 + $0x64] sm:$0xf]  ;;  %v1407_v48 = vld [vmem:[%s2112_s26 + $0x68] sm:$0xf] }
 0x276   : >> { %1404 = vst [vmem:[%s2108_s21 + $0x60] sm:$0xf] %v1403_v45  ;;  %1406 = vst [vmem:[%s2108_s21 + $0x64] sm:$0xf] %v1405_v46  ;;  %v1409_v49 = vld [vmem:[%s2112_s26 + $0x6c] sm:$0xf] }
 0x277   : >> { %1408 = vst [vmem:[%s2108_s21 + $0x68] sm:$0xf] %v1407_v48  ;;  %v1411_v50 = vld [vmem:[%s2112_s26 + $0x70] sm:$0xf]  ;;  %v1413_v52 = vld [vmem:[%s2112_s26 + $0x74] sm:$0xf] }
 0x278   : >> { %1410 = vst [vmem:[%s2108_s21 + $0x6c] sm:$0xf] %v1409_v49  ;;  %1412 = vst [vmem:[%s2108_s21 + $0x70] sm:$0xf] %v1411_v50  ;;  %v1415_v60 = vld [vmem:[%s2112_s26 + $0x78] sm:$0xf] }
 0x279   : >> { %1414 = vst [vmem:[%s2108_s21 + $0x74] sm:$0xf] %v1413_v52  ;;  %v1417_v2 = vld [vmem:[%s2112_s26 + $0x7c] sm:$0xf]  ;;  %1416 = vst [vmem:[%s2108_s21 + $0x78] sm:$0xf] %v1415_v60 }
 0x27a   : >> { %1418 = vst [vmem:[%s2108_s21 + $0x7c] sm:$0xf] %v1417_v2  ;;  %s2633_s8 = smov (%p1420_p11, %s1419_s8), 0  ;;  %s1349_s7 = sadd.s32 1, %s2120_s7  }
 0x27b   : >> { %s1784_s9 = sshll.u32 %s2633_s8, 7  ;;  %p1348_p12 = scmp.ge.s32.totalorder %s1349_s7, %s2495_s6 }
 0x27c   : >> { %s1424_s26 = scalar_lea.vmem %s2388_s18, %s1784_s9 [#allocation2]   ;;  %s1425_s21 = scalar_lea.vmem %s2489_s28, %s1784_s9  }
 0x27d   : >> { %s2626_s29 = smov %s2633_s8  ;;  %1351 = sbr.rel (!%p1348_p12) target bundleno = 613 (0x265), region = 126 }
 0x284 PF: > { %s2599_s10 = sand.u32 31, %s2631_s20   ;;  %s1828_s11 = sshll.u32 %s2495_s6, 7 }
 0x285   : > { %s1430_s12 = scalar_lea.vmem %s2388_s18, %s1828_s11 [#allocation2]   ;;  %s1432_s14 = scalar_lea.vmem %s2489_s28, %s1828_s11  }
 0x286   : > { %p1789_p13 = scmp.le.s32.totalorder %s2599_s10, 0 }
 0x287   : > { %s2122_s13 = smov (!%p1789_p13), %s1432_s14   ;;  %s2126_s15 = smov (!%p1789_p13), %s1430_s12  }
 0x288   : > { %1630 = sbr.rel (%p1789_p13) target bundleno = 665 (0x299), region = 131  ;;  %s2130_s16 = smov (!%p1789_p13), 0  }
 0x289   : > { %s2134_s17 = smov (!%p1789_p13), 0  }
 0x28f LB: >> { %v1442_v6 = vld [vmem:[%s2128_s15] sm:$0xf]  ;;  %s1444_s20 = sadd.s32 1, %s2132_s16  ;;  %s1436_s17 = sadd.s32 1, %s2136_s17   ;;  %s2136_s17 = sphi %s2134_s17, %s1436_s17   ;;  %s2132_s16 = sphi %s2130_s16, %s2131_s16   ;;  %s2128_s15 = sphi %s2126_s15, %s1449_s15   ;;  %s2124_s13 = sphi %s2122_s13, %s1450_s13  }
 0x290   : >> { %1443 = vst [vmem:[%s2124_s13] sm:$0xf] %v1442_v6  ;;  %p1445_p0 = scmp.ge.s32.totalorder %s1444_s20, %s2599_s10  ;;  %p1435_p1 = scmp.ge.s32.totalorder %s1436_s17, %s2599_s10 }
 0x292   : >> { %s2635_s20 = smov (%p1445_p0, %s1444_s20), 0  ;;  %1438 = sbr.rel (!%p1435_p1) target bundleno = 655 (0x28f), region = 137 }
 0x293   : >> { %s1790_s18 = sshll.u32 %s2635_s20, 2  ;;  %s2131_s16 = smov %s2635_s20  }
 0x294   : >> { %s1449_s15 = scalar_lea.vmem %s1430_s12, %s1790_s18 [#allocation2]   ;;  %s1450_s13 = scalar_lea.vmem %s1432_s14, %s1790_s18  }
 0x299 PF: > { %p12_p2 = scmp.ge.s32.totalorder %s2184_s22, 12   ;;  %s2627_s18 = smov %s2100_s19 }
 0x29a   : > { %s2628_s19 = smov %s2192_s25  ;;  %s2629_s20 = smov %s2184_s22 }
 0x29b   :  { %14 = sbr.rel (!%p12_p2) target bundleno = 2 (0x2), region = 148 }

// kernel: _lambda_.11
= control target key start
LH: loop header
LB: loop body
LE: loop exit
PB: predicated region body
PF: predicated region fallthrough
CT: control target
= control target key end

     0   :  { %s2724_s18 = smov 0   ;;  %s2726_s19 = smov 0   ;;  %s3257_s0 = inlined_call_operand.vmem [shape: bf16[2450,288], index: 0, kind: input, shape index: {}]   ;;  %s3258_s1 = inlined_call_operand.vmem [shape: bf16[288,32], index: 1, kind: input, shape index: {}]   ;;  %s3259_s2 = inlined_call_operand.vmem [shape: f32[1,32], index: 2, kind: input, shape index: {}]   ;;  %s3260_s3 = inlined_call_operand.vmem [shape: bf16[32,32], index: 3, kind: input, shape index: {}]   ;;  %s3261_s4 = inlined_call_operand.vmem [shape: f32[1,32], index: 4, kind: input, shape index: {}]   ;;  %s3262_s5 = inlined_call_operand.vmem [shape: bf16[2450,32], index: 5, kind: output, shape index: {}]  }
   0x1   :  { %s2728_s20 = smov 0  }
   0x2 LB: > { %s2737_s21 = sadd.s32 4294967295, %s2660_s20   ;;  %s2739_s22 = sadd.s32 1, %s2660_s20   ;;  %s2660_s20 = sphi %s2728_s20, %s3269_s20   ;;  %s2656_s19 = sphi %s2726_s19, %s3268_s19   ;;  %s2652_s18 = sphi %s2724_s18, %s3267_s18  }
   0x3   : > { %s129_s23 = ssub.s32 %s2660_s20, %s2739_s22  ;;  %s132_s24 = sadd.s32 1, %s2656_s19 }
   0x4   : > { %p130_p0 = scmp.eq.s32.totalorder %s129_s23, 0  ;;  %p142_p1 = scmp.ne.s32.totalorder %s2656_s19, %s2652_s18 }
   0x5   : > { %p143_p2 = scmp.eq.s32.totalorder %s2737_s21, 9  ;;  %p2023_p3 = scmp.ge.s32.totalorder %s2660_s20, 1 }
   0x6   : > { %s2747_s25 = scalar_select %p130_p0, %s2656_s19, %s132_s24  }
   0x7   : > { %p2749_p4 = por %p143_p2, %p142_p1  ;;  %p199_p5 = scmp.lt.s32.totalorder %s2660_s20, 11 }
   0x9   : > { %p200_p6 = pnand %p2023_p3, %p199_p5 }
   0xa   : > { %v2522_v0 = vld [vmem:[%s3258_s1 + $0x40] sm:$0xff] (!%p200_p6)   ;;  %s2757_s29 = sshll.u32 (!%p200_p6), %s2737_s21, 5  ;;  %v2524_v2 = vld [vmem:[%s3258_s1 + $0x48] sm:$0xff] (!%p200_p6)   ;;  %v2526_v4 = vld [vmem:[%s3258_s1 + $0x50] sm:$0xff] (!%p200_p6)   ;;  %vm710_vm0 = vcmask (!%p200_p6), 261120   ;;  %s229_s16 = sand.u32 (!%p200_p6), 1, %s2652_s18  }
   0xb   : > { %203 = sbr.rel (%p200_p6) target bundleno = 682 (0x2aa), region = 40  ;;  %v2523_v1 = vld [vmem:[%s3258_s1] sm:$0xff] (!%p200_p6)   ;;  %2213 = vmatprep.subr.bf16.mxu0 (!%p200_p6), %v2522_v0  ;;  %v2525_v3 = vld [vmem:[%s3258_s1 + $0x8] sm:$0xff] (!%p200_p6)   ;;  %p238_p7 = scmp.lt.s32.totalorder (!%p200_p6), %s2757_s29, 306  ;;  %v2527_v5 = vld [vmem:[%s3258_s1 + $0x10] sm:$0xff] (!%p200_p6)  }
   0xc   : > { %2214 = vmatpush3.bf16.msra.mxu0 (!%p200_p6), %v2523_v1  ;;  %v2528_v6 = vld [vmem:[%s3258_s1 + $0x58] sm:$0xff] (!%p200_p6)   ;;  %v2530_v8 = vld [vmem:[%s3258_s1 + $0x60] sm:$0xff] (!%p200_p6)   ;;  %v2532_v11 = vld [vmem:[%s3258_s1 + $0x68] sm:$0xff] (!%p200_p6)   ;;  %s2024_s17 = sshll.u32 (!%p200_p6), %s229_s16, 7 }
   0xd   : > { %2215 = vmatprep.subr.bf16.mxu0 (!%p200_p6), %v2524_v2  ;;  %v2529_v7 = vld [vmem:[%s3258_s1 + $0x18] sm:$0xff] (!%p200_p6)   ;;  %v2531_v9 = vld [vmem:[%s3258_s1 + $0x20] sm:$0xff] (!%p200_p6)   ;;  %v2533_v12 = vld [vmem:[%s3258_s1 + $0x28] sm:$0xff] (!%p200_p6)   ;;  %s3028_s18 = scalar_lea.vmem (!%p200_p6), [#allocation2], %s2024_s17  }
   0xe   : > { %v2537_v10 = vld [vmem:[%s3258_s1 + $0x80] sm:$0xff] (!%p200_p6)   ;;  %v2534_v13 = vld [vmem:[%s3258_s1 + $0x70] sm:$0xff] (!%p200_p6)   ;;  %v2542_v15 = vld [vmem:[%s3258_s1 + $0x88] sm:$0xff] (!%p200_p6)  }
   0xf   : > { %2361 = vmatprep.subr.bf16.mxu1 (!%p200_p6), %v2537_v10  ;;  %v2535_v18 = vld [vmem:[%s3258_s1 + $0x30] sm:$0xff] (!%p200_p6)   ;;  %v2536_v19 = vld [vmem:[%s3258_s1 + $0x78] sm:$0xff] (!%p200_p6)   ;;  %v2604_v61 = vld [vmem:[%s3260_s3] sm:$0xff] (!%p200_p6)  }
  0x10   : > { %2216 = vmatpush3.bf16.msra.mxu0 (!%p200_p6), %v2525_v3  ;;  %2362 = vmatpush3.bf16.msra.mxu1 (!%p200_p6), %v2537_v10  ;;  %v2538_v21 = vld [vmem:[%s3258_s1 + $0x38] sm:$0xff] (!%p200_p6)   ;;  %v2605_v63 = vld [vmem:[%s3260_s3 + $0x8] sm:$0xff] (!%p200_p6)  }
  0x11   : > { %2217 = vmatprep.subr.bf16.mxu0 (!%p200_p6), %v2526_v4  ;;  %2363 = vmatprep.subr.bf16.mxu1 (!%p200_p6), %v2542_v15 }
  0x12   : > { %s239_s15 = scalar_select %p238_p7, %s2757_s29, 306 }
  0x13   : > { %s1690_s20 = ssub.s32 (%p2749_p4), 307, %s2757_s29  ;;  %s2210_s23 = sshll.u32 (%p2749_p4), %s2737_s21, 7 }
  0x14   : > { %2218 = vmatpush3.bf16.msra.mxu0 %v2527_v5  ;;  %s2433_s24 = smul.u32 12, %s239_s15  ;;  %2364 = vmatpush3.bf16.msra.mxu1 %v2542_v15  ;;  %p1691_p8 = scmp.lt.s32.totalorder (%p2749_p4), %s1690_s20, 32 }
  0x15   : > { %2219 = vmatprep.subr.bf16.mxu0 %v2528_v6  ;;  %2397 = vmatprep.subr.bf16.mxu1 %v2604_v61  ;;  %s3129_s28 = scalar_lea.vmem (%p2749_p4), %s3262_s5, %s2210_s23  }
  0x16   : > { %s2794_s11 = scalar_lea.vmem %s3257_s0, %s2433_s24 }
  0x17   : > { %v2541_v14 = vld [vmem:[%s2794_s11 + $0x4] ss:$12 sps:$4 sm:$0xff]   ;;  %v2543_v16 = vld [vmem:[%s2794_s11 + $0x8] ss:$12 sps:$4 sm:$0xff]   ;;  %v2544_v17 = vld [vmem:[%s2794_s11 + $0x20] ss:$12 sps:$4 sm:$0xff]  }
  0x18   : > { %2220 = vmatpush3.bf16.msra.mxu0 %v2529_v7  ;;  %791 = vmatprep.mubr.bf16.mxu0 %v2541_v14  ;;  %v2551_v20 = vld [vmem:[%s2794_s11 + $0x38] ss:$12 sps:$4 sm:$0xff]   ;;  %v2539_v22 = vld [vmem:[%s2794_s11] ss:$12 sps:$4 sm:$0xff]   ;;  %v2552_v23 = vld [vmem:[%s2794_s11 + $0x50] ss:$12 sps:$4 sm:$0xff]  }
  0x19   : > { %2221 = vmatprep.subr.bf16.mxu0 %v2530_v8  ;;  %2365 = vmatprep.mubr.msk.bf16.mxu1 %vm710_vm0, %v2543_v16  ;;  %v2559_v24 = vld [vmem:[%s2794_s11 + $0x68] ss:$12 sps:$4 sm:$0xff]   ;;  %v2547_v26 = vld [vmem:[%s2794_s11 + $0x18] ss:$12 sps:$4 sm:$0xff]   ;;  %v2560_v27 = vld [vmem:[%s2794_s11 + $0x80] ss:$12 sps:$4 sm:$0xff]  }
  0x1a   : > { %2366 = vmatmul.mubr.msk.bf16.vlgmr.msra.gmra.mrb[0].mxu1 %vm710_vm0, %v2544_v17  ;;  %v2545_v25 = vld [vmem:[%s2794_s11 + $0x1c] ss:$12 sps:$4 sm:$0xff]   ;;  %v2567_v28 = vld [vmem:[%s2794_s11 + $0x98] ss:$12 sps:$4 sm:$0xff]   ;;  %v2548_v29 = vld [vmem:[%s2794_s11 + $0x34] ss:$12 sps:$4 sm:$0xff]  }
  0x1b   : > { %2369 = vmatprep.mubr.msk.bf16.mxu1 %vm710_vm0, %v2551_v20  ;;  %v2550_v30 = vld [vmem:[%s2794_s11 + $0x30] ss:$12 sps:$4 sm:$0xff]   ;;  %v2575_v32 = vld [vmem:[%s2794_s11 + $0xc8] ss:$12 sps:$4 sm:$0xff]   ;;  %v2553_v33 = vld [vmem:[%s2794_s11 + $0x4c] ss:$12 sps:$4 sm:$0xff]   ;;  %2398 = vmatpush3.bf16.msra.mxu1 %v2604_v61 }
  0x1c   : > { %2222 = vmatpush3.bf16.msra.mxu0 %v2531_v9  ;;  %v2568_v31 = vld [vmem:[%s2794_s11 + $0xb0] ss:$12 sps:$4 sm:$0xff]   ;;  %v2555_v34 = vld [vmem:[%s2794_s11 + $0x48] ss:$12 sps:$4 sm:$0xff]   ;;  %v2576_v35 = vld [vmem:[%s2794_s11 + $0xe0] ss:$12 sps:$4 sm:$0xff]   ;;  %2399 = vmatprep.subr.bf16.mxu1 %v2605_v63 }
  0x1d   : > { %2223 = vmatprep.subr.bf16.mxu0 %v2532_v11  ;;  %v2583_v36 = vld [vmem:[%s2794_s11 + $0xf8] ss:$12 sps:$4 sm:$0xff]   ;;  %v2584_v38 = vld [vmem:[%s2794_s11 + $0x110] ss:$12 sps:$4 sm:$0xff]   ;;  %v2558_v39 = vld [vmem:[%s2794_s11 + $0x60] ss:$12 sps:$4 sm:$0xff]  }
  0x1e   : > { %v2556_v37 = vld [vmem:[%s2794_s11 + $0x64] ss:$12 sps:$4 sm:$0xff]   ;;  %v2591_v40 = vld [vmem:[%s2794_s11 + $0x128] ss:$12 sps:$4 sm:$0xff]   ;;  %v2592_v42 = vld [vmem:[%s2794_s11 + $0x140] ss:$12 sps:$4 sm:$0xff]  }
  0x1f   : > { %v2561_v41 = vld [vmem:[%s2794_s11 + $0x7c] ss:$12 sps:$4 sm:$0xff]   ;;  %v2563_v43 = vld [vmem:[%s2794_s11 + $0x78] ss:$12 sps:$4 sm:$0xff]   ;;  %v2564_v45 = vld [vmem:[%s2794_s11 + $0x94] ss:$12 sps:$4 sm:$0xff]   ;;  %2400 = vmatpush3.bf16.msra.mxu1 %v2605_v63 }
  0x20   : > { %2224 = vmatpush3.bf16.msra.mxu0 %v2533_v12  ;;  %v2599_v44 = vld [vmem:[%s2794_s11 + $0x158] ss:$12 sps:$4 sm:$0xff]   ;;  %v2600_v46 = vld [vmem:[%s2794_s11 + $0x170] ss:$12 sps:$4 sm:$0xff]   ;;  %v2571_v49 = vld [vmem:[%s2794_s11 + $0xa8] ss:$12 sps:$4 sm:$0xff]  }
  0x21   : > { %2225 = vmatprep.subr.bf16.mxu0 %v2534_v13  ;;  %v2566_v47 = vld [vmem:[%s2794_s11 + $0x90] ss:$12 sps:$4 sm:$0xff]   ;;  %v2569_v48 = vld [vmem:[%s2794_s11 + $0xac] ss:$12 sps:$4 sm:$0xff]   ;;  %v2580_v54 = vld [vmem:[%s2794_s11 + $0xf4] ss:$12 sps:$4 sm:$0xff]  }
  0x22   : > { %2370 = vmatmul.mubr.msk.bf16.gmra.mrb[4].mxu1 %vm710_vm0, %v2552_v23  ;;  %v2572_v50 = vld [vmem:[%s2794_s11 + $0xc4] ss:$12 sps:$4 sm:$0xff]   ;;  %v2574_v51 = vld [vmem:[%s2794_s11 + $0xc0] ss:$12 sps:$4 sm:$0xff]   ;;  %v2577_v52 = vld [vmem:[%s2794_s11 + $0xdc] ss:$12 sps:$4 sm:$0xff]  }
  0x23   : > { %2373 = vmatprep.mubr.msk.bf16.mxu1 %vm710_vm0, %v2559_v24  ;;  %v2579_v53 = vld [vmem:[%s2794_s11 + $0xd8] ss:$12 sps:$4 sm:$0xff]   ;;  %v2582_v55 = vld [vmem:[%s2794_s11 + $0xf0] ss:$12 sps:$4 sm:$0xff]   ;;  %v2587_v57 = vld [vmem:[%s2794_s11 + $0x108] ss:$12 sps:$4 sm:$0xff]  }
  0x24   : > { %2226 = vmatpush3.bf16.msra.mxu0 %v2535_v18  ;;  %v2585_v56 = vld [vmem:[%s2794_s11 + $0x10c] ss:$12 sps:$4 sm:$0xff]   ;;  %v2588_v58 = vld [vmem:[%s2794_s11 + $0x124] ss:$12 sps:$4 sm:$0xff]   ;;  %v2593_v60 = vld [vmem:[%s2794_s11 + $0x13c] ss:$12 sps:$4 sm:$0xff]  }
  0x25   : > { %2227 = vmatprep.subr.bf16.mxu0 %v2536_v19  ;;  %v2590_v59 = vld [vmem:[%s2794_s11 + $0x120] ss:$12 sps:$4 sm:$0xff]   ;;  %v2595_v62 = vld [vmem:[%s2794_s11 + $0x138] ss:$12 sps:$4 sm:$0xff]   ;;  %v2598_v1 = vld [vmem:[%s2794_s11 + $0x150] ss:$12 sps:$4 sm:$0xff]  }
  0x26   : > { %v2596_v0 = vld [vmem:[%s2794_s11 + $0x154] ss:$12 sps:$4 sm:$0xff]   ;;  %v2601_v2 = vld [vmem:[%s2794_s11 + $0x16c] ss:$12 sps:$4 sm:$0xff]  }
  0x27   : > { %v2603_v3 = vld [vmem:[%s2794_s11 + $0x168] ss:$12 sps:$4 sm:$0xff]   ;;  %v2892_v12 = vld [vmem:[%s3259_s2] ss:$0 sm:$0xff] }
  0x28   : > { %2228 = vmatpush3.bf16.msra.mxu0 %v2538_v21 }
  0x2a   : > { %2374 = vmatmul.mubr.msk.bf16.gmra.mrb[8].mxu1 %vm710_vm0, %v2560_v27 }
  0x2b   : > { %792 = vmatmul.mubr.bf16.vlgmr.msra.gmra.mrb[0].mxu0 %v2539_v22  ;;  %2377 = vmatprep.mubr.msk.bf16.mxu1 %vm710_vm0, %v2567_v28 }
  0x2c   : > { %799 = vmatprep.mubr.bf16.mxu0 %v2545_v25 }
  0x32   : > { %2378 = vmatmul.mubr.msk.bf16.gmra.mrb[12].mxu1 %vm710_vm0, %v2568_v31 }
  0x33   : > { %800 = vmatmul.mubr.bf16.gmra.mrb[4].mxu0 %v2547_v26  ;;  %2381 = vmatprep.mubr.msk.bf16.mxu1 %vm710_vm0, %v2575_v32 }
  0x34   : > { %807 = vmatprep.mubr.bf16.mxu0 %v2548_v29 }
  0x3a   : > { %2382 = vmatmul.mubr.msk.bf16.gmra.mrb[16].mxu1 %vm710_vm0, %v2576_v35 }
  0x3b   : > { %808 = vmatmul.mubr.bf16.gmra.mrb[8].mxu0 %v2550_v30  ;;  %2385 = vmatprep.mubr.msk.bf16.mxu1 %vm710_vm0, %v2583_v36 }
  0x3c   : > { %815 = vmatprep.mubr.bf16.mxu0 %v2553_v33 }
  0x42   : > { %2386 = vmatmul.mubr.msk.bf16.gmra.mrb[20].mxu1 %vm710_vm0, %v2584_v38 }
  0x43   : > { %816 = vmatmul.mubr.bf16.gmra.mrb[12].mxu0 %v2555_v34  ;;  %2389 = vmatprep.mubr.msk.bf16.mxu1 %vm710_vm0, %v2591_v40 }
  0x44   : > { %823 = vmatprep.mubr.bf16.mxu0 %v2556_v37 }
  0x4a   : > { %2390 = vmatmul.mubr.msk.bf16.gmra.mrb[24].mxu1 %vm710_vm0, %v2592_v42 }
  0x4b   : > { %824 = vmatmul.mubr.bf16.gmra.mrb[16].mxu0 %v2558_v39  ;;  %2393 = vmatprep.mubr.msk.bf16.mxu1 %vm710_vm0, %v2599_v44 }
  0x4c   : > { %831 = vmatprep.mubr.bf16.mxu0 %v2561_v41 }
  0x52   : > { %2394 = vmatmul.mubr.msk.bf16.gmra.mrb[28].mxu1 %vm710_vm0, %v2600_v46 }
  0x53   : > { %832 = vmatmul.mubr.bf16.gmra.mrb[20].mxu0 %v2563_v43 }
  0x54   : > { %839 = vmatprep.mubr.bf16.mxu0 %v2564_v45 }
  0x5b   : > { %840 = vmatmul.mubr.bf16.gmra.mrb[24].mxu0 %v2566_v47 }
  0x5c   : > { %847 = vmatprep.mubr.bf16.mxu0 %v2569_v48 }
  0x63   : > { %848 = vmatmul.mubr.bf16.gmra.mrb[28].mxu0 %v2571_v49 }
  0x64   : > { %855 = vmatprep.mubr.bf16.mxu0 %v2572_v50 }
  0x6b   : > { %856 = vmatmul.mubr.bf16.gmra.mrb[32].mxu0 %v2574_v51 }
  0x6c   : > { %863 = vmatprep.mubr.bf16.mxu0 %v2577_v52 }
  0x73   : > { %864 = vmatmul.mubr.bf16.gmra.mrb[36].mxu0 %v2579_v53 }
  0x74   : > { %871 = vmatprep.mubr.bf16.mxu0 %v2580_v54 }
  0x7b   : > { %872 = vmatmul.mubr.bf16.gmra.mrb[40].mxu0 %v2582_v55 }
  0x7c   : > { %879 = vmatprep.mubr.bf16.mxu0 %v2585_v56 }
  0x83   : > { %880 = vmatmul.mubr.bf16.gmra.mrb[44].mxu0 %v2587_v57 }
  0x84   : > { %887 = vmatprep.mubr.bf16.mxu0 %v2588_v58 }
  0x8b   : > { %888 = vmatmul.mubr.bf16.gmra.mrb[48].mxu0 %v2590_v59 }
  0x8c   : > { %895 = vmatprep.mubr.bf16.mxu0 %v2593_v60 }
  0x93   : > { %896 = vmatmul.mubr.bf16.gmra.mrb[52].mxu0 %v2595_v62 }
  0x94   : > { %903 = vmatprep.mubr.bf16.mxu0 %v2596_v0 }
  0x9b   : > { %904 = vmatmul.mubr.bf16.gmra.mrb[56].mxu0 %v2598_v1 }
  0x9c   : > { %911 = vmatprep.mubr.bf16.mxu0 %v2601_v2 }
  0xa3   : > { %912 = vmatmul.mubr.bf16.gmra.mrb[60].mxu0 %v2603_v3 }
  0xed   : > { %v2367_v4 = vpop.f32.mrb[0].mxu1 }
  0xee   : > { %v954_v5 = vpop.f32.mrb[1].mxu1 }
  0xef   : > { %v2368_v6 = vpop.f32.mrb[2].mxu1 }
  0xf0   : > { %v957_v7 = vpop.f32.mrb[3].mxu1 }
  0xf5   : > { %v2887_v8 = vpop.f32.mrb[4].mxu1 }
  0xf6   : > { %v970_v10 = vpop.f32.mrb[5].mxu1 }
  0xf7   : > { %v2894_v13 = vpop.f32.mrb[6].mxu1 }
  0xf8   : > { %v973_v16 = vpop.f32.mrb[7].mxu1 }
  0xfd   : > { %v2898_v22 = vpop.f32.mrb[8].mxu1 }
  0xfe   : > { %v2229_v9 = vpop.f32.mrb[0].mxu0  ;;  %v2900_v26 = vpop.f32.mrb[9].mxu1 }
  0xff   : > { %v2230_v11 = vpop.f32.mrb[1].mxu0  ;;  %v2902_v28 = vpop.f32.mrb[10].mxu1 }
 0x100   : > { %v2231_v14 = vadd.f32 %v2230_v11, %v2229_v9  ;;  %v2232_v15 = vpop.f32.mrb[2].mxu0  ;;  %v2904_v32 = vpop.f32.mrb[11].mxu1 }
 0x101   : > { %v2233_v17 = vpop.f32.mrb[3].mxu0 }
 0x102   : > { %v2234_v18 = vadd.f32 %v2233_v17, %v2232_v15  ;;  %v794_v19 = vadd.f32 %v2231_v14, %v2892_v12 }
 0x104   : > { %v955_v20 = vadd.f32 %v954_v5, %v794_v19  ;;  %v797_v21 = vadd.f32 %v2234_v18, %v2892_v12 }
 0x105   : > { %v2909_v41 = vpop.f32.mrb[12].mxu1 }
 0x106   : > { %v1113_v23 = vmul.f32 0.2, %v955_v20  ;;  %v958_v24 = vadd.f32 %v957_v7, %v797_v21  ;;  %v2235_v25 = vpop.f32.mrb[4].mxu0  ;;  %vm1081_vm1 = vcmp.ge.f32.partialorder %v955_v20, 0.0  ;;  %v2911_v45 = vpop.f32.mrb[13].mxu1 }
 0x107   : > { %v2236_v27 = vpop.f32.mrb[5].mxu0  ;;  %v2913_v47 = vpop.f32.mrb[14].mxu1 }
 0x108   : > { %vm1082_vm2 = vcmp.ge.f32.partialorder %v958_v24, 0.0  ;;  %v1114_v29 = vmul.f32 0.2, %v958_v24  ;;  %v2237_v30 = vadd.f32 %v2236_v27, %v2235_v25  ;;  %v2238_v31 = vpop.f32.mrb[6].mxu0  ;;  %v1145_v34 = vsel %vm1081_vm1, %v955_v20, %v1113_v23  ;;  %v2915_v51 = vpop.f32.mrb[15].mxu1 }
 0x109   : > { %v2239_v33 = vpop.f32.mrb[7].mxu0 }
 0x10a   : > { %v1146_v35 = vsel %vm1082_vm2, %v958_v24, %v1114_v29  ;;  %v802_v36 = vadd.f32 %v2237_v30, %v2892_v12  ;;  %v2240_v37 = vadd.f32 %v2239_v33, %v2238_v31 }
 0x10b   : > { %v1177_v38 = vpack.c.bf16 %v1146_v35, %v1145_v34 }
 0x10c   : > { %v963_v39 = vadd.f32 %v2367_v4, %v802_v36  ;;  %v805_v40 = vadd.f32 %v2240_v37, %v2892_v12 }
 0x10d   : > { %2401 = vmatprep.mubr.msk.bf16.mxu1 %vm710_vm0, %v1177_v38  ;;  %v2920_v60 = vpop.f32.mrb[16].mxu1 }
 0x10e   : > { %v1115_v42 = vmul.f32 0.2, %v963_v39  ;;  %v966_v43 = vadd.f32 %v2368_v6, %v805_v40  ;;  %v2241_v44 = vpop.f32.mrb[8].mxu0  ;;  %vm1083_vm3 = vcmp.ge.f32.partialorder %v963_v39, 0.0  ;;  %v2922_v0 = vpop.f32.mrb[17].mxu1 }
 0x10f   : > { %v2242_v46 = vpop.f32.mrb[9].mxu0  ;;  %v2924_v2 = vpop.f32.mrb[18].mxu1 }
 0x110   : > { %vm1084_vm4 = vcmp.ge.f32.partialorder %v966_v43, 0.0  ;;  %v1116_v48 = vmul.f32 0.2, %v966_v43  ;;  %v2243_v49 = vadd.f32 %v2242_v46, %v2241_v44  ;;  %v2244_v50 = vpop.f32.mrb[10].mxu0  ;;  %v1147_v53 = vsel %vm1083_vm3, %v963_v39, %v1115_v42  ;;  %v2926_v6 = vpop.f32.mrb[19].mxu1 }
 0x111   : > { %v2245_v52 = vpop.f32.mrb[11].mxu0 }
 0x112   : > { %v1148_v54 = vsel %vm1084_vm4, %v966_v43, %v1116_v48  ;;  %v2246_v55 = vadd.f32 %v2245_v52, %v2244_v50  ;;  %v810_v56 = vadd.f32 %v2243_v49, %v2892_v12 }
 0x113   : > { %v1178_v57 = vpack.c.bf16 %v1148_v54, %v1147_v53 }
 0x114   : > { %v971_v58 = vadd.f32 %v970_v10, %v810_v56  ;;  %v813_v59 = vadd.f32 %v2246_v55, %v2892_v12 }
 0x115   : > { %2402 = vmatmul.mubr.msk.bf16.vlgmr.msra.gmra.mrb[32].mxu1 %vm710_vm0, %v1178_v57  ;;  %v2932_v18 = vpop.f32.mrb[20].mxu1 }
 0x116   : > { %v1117_v61 = vmul.f32 0.2, %v971_v58  ;;  %v974_v62 = vadd.f32 %v973_v16, %v813_v59  ;;  %v2247_v63 = vpop.f32.mrb[12].mxu0  ;;  %vm1085_vm5 = vcmp.ge.f32.partialorder %v971_v58, 0.0  ;;  %v2935_v23 = vpop.f32.mrb[21].mxu1 }
 0x117   : > { %v2248_v1 = vpop.f32.mrb[13].mxu0  ;;  %v2937_v25 = vpop.f32.mrb[22].mxu1 }
 0x118   : > { %vm1086_vm6 = vcmp.ge.f32.partialorder %v974_v62, 0.0  ;;  %v1118_v3 = vmul.f32 0.2, %v974_v62  ;;  %v2249_v4 = vadd.f32 %v2248_v1, %v2247_v63  ;;  %v2250_v5 = vpop.f32.mrb[14].mxu0  ;;  %v1149_v9 = vsel %vm1085_vm5, %v971_v58, %v1117_v61  ;;  %v2939_v30 = vpop.f32.mrb[23].mxu1 }
 0x119   : > { %v2251_v7 = vpop.f32.mrb[15].mxu0 }
 0x11a   : > { %v1150_v10 = vsel %vm1086_vm6, %v974_v62, %v1118_v3  ;;  %v818_v11 = vadd.f32 %v2249_v4, %v2892_v12  ;;  %v2252_v14 = vadd.f32 %v2251_v7, %v2250_v5 }
 0x11b   : > { %v1179_v15 = vpack.c.bf16 %v1150_v10, %v1149_v9 }
 0x11c   : > { %v979_v16 = vadd.f32 %v2887_v8, %v818_v11  ;;  %v821_v17 = vadd.f32 %v2252_v14, %v2892_v12 }
 0x11d   : > { %2405 = vmatprep.mubr.msk.bf16.mxu1 %vm710_vm0, %v1179_v15  ;;  %v2945_v39 = vpop.f32.mrb[24].mxu1 }
 0x11e   : > { %v1119_v19 = vmul.f32 0.2, %v979_v16  ;;  %v982_v20 = vadd.f32 %v2894_v13, %v821_v17  ;;  %v2253_v21 = vpop.f32.mrb[16].mxu0  ;;  %vm1087_vm7 = vcmp.ge.f32.partialorder %v979_v16, 0.0  ;;  %v2948_v44 = vpop.f32.mrb[25].mxu1 }
 0x11f   : > { %v2254_v24 = vpop.f32.mrb[17].mxu0  ;;  %v2950_v48 = vpop.f32.mrb[26].mxu1 }
 0x120   : > { %vm1088_vm8 = vcmp.ge.f32.partialorder %v982_v20, 0.0  ;;  %v1120_v27 = vmul.f32 0.2, %v982_v20  ;;  %v2255_v29 = vadd.f32 %v2254_v24, %v2253_v21  ;;  %v2256_v8 = vpop.f32.mrb[18].mxu0  ;;  %v1151_v35 = vsel %vm1087_vm7, %v979_v16, %v1119_v19  ;;  %v2952_v52 = vpop.f32.mrb[27].mxu1 }
 0x121   : > { %v2257_v31 = vpop.f32.mrb[19].mxu0 }
 0x122   : > { %v2258_v33 = vadd.f32 %v2257_v31, %v2256_v8  ;;  %v826_v34 = vadd.f32 %v2255_v29, %v2892_v12  ;;  %v1152_v36 = vsel %vm1088_vm8, %v982_v20, %v1120_v27 }
 0x123   : > { %v1180_v13 = vpack.c.bf16 %v1152_v36, %v1151_v35 }
 0x124   : > { %v987_v37 = vadd.f32 %v2900_v26, %v826_v34  ;;  %v829_v38 = vadd.f32 %v2258_v33, %v2892_v12 }
 0x125   : > { %2406 = vmatmul.mubr.msk.bf16.gmra.mrb[36].mxu1 %vm710_vm0, %v1180_v13  ;;  %v2958_v61 = vpop.f32.mrb[28].mxu1 }
 0x126   : > { %v1121_v40 = vmul.f32 0.2, %v987_v37  ;;  %v990_v42 = vadd.f32 %v2904_v32, %v829_v38  ;;  %v2259_v43 = vpop.f32.mrb[20].mxu0  ;;  %vm1089_vm9 = vcmp.ge.f32.partialorder %v987_v37, 0.0  ;;  %v2961_v3 = vpop.f32.mrb[29].mxu1 }
 0x127   : > { %v2260_v46 = vpop.f32.mrb[21].mxu0  ;;  %v2963_v5 = vpop.f32.mrb[30].mxu1 }
 0x128   : > { %vm1090_vm10 = vcmp.ge.f32.partialorder %v990_v42, 0.0  ;;  %v1122_v49 = vmul.f32 0.2, %v990_v42  ;;  %v2261_v50 = vadd.f32 %v2260_v46, %v2259_v43  ;;  %v2262_v26 = vpop.f32.mrb[22].mxu0  ;;  %v1153_v54 = vsel %vm1089_vm9, %v987_v37, %v1121_v40  ;;  %v2965_v10 = vpop.f32.mrb[31].mxu1 }
 0x129   : > { %v2263_v53 = vpop.f32.mrb[23].mxu0 }
 0x12a   : > { %v1154_v55 = vsel %vm1090_vm10, %v990_v42, %v1122_v49  ;;  %v834_v56 = vadd.f32 %v2261_v50, %v2892_v12  ;;  %v2264_v57 = vadd.f32 %v2263_v53, %v2262_v26 }
 0x12b   : > { %v1181_v32 = vpack.c.bf16 %v1154_v55, %v1153_v54 }
 0x12c   : > { %v995_v58 = vadd.f32 %v2898_v22, %v834_v56  ;;  %v837_v59 = vadd.f32 %v2264_v57, %v2892_v12 }
 0x12d   : > { %2409 = vmatprep.mubr.msk.bf16.mxu1 %vm710_vm0, %v1181_v32 }
 0x12e   : > { %v1123_v62 = vmul.f32 0.2, %v995_v58  ;;  %v998_v63 = vadd.f32 %v2902_v28, %v837_v59  ;;  %v2265_v1 = vpop.f32.mrb[24].mxu0  ;;  %vm1091_vm11 = vcmp.ge.f32.partialorder %v995_v58, 0.0 }
 0x12f   : > { %v2266_v4 = vpop.f32.mrb[25].mxu0 }
 0x130   : > { %vm1092_vm12 = vcmp.ge.f32.partialorder %v998_v63, 0.0  ;;  %v1124_v7 = vmul.f32 0.2, %v998_v63  ;;  %v2267_v9 = vadd.f32 %v2266_v4, %v2265_v1  ;;  %v2268_v22 = vpop.f32.mrb[26].mxu0  ;;  %v1155_v16 = vsel %vm1091_vm11, %v995_v58, %v1123_v62 }
 0x131   : > { %v2269_v11 = vpop.f32.mrb[27].mxu0 }
 0x132   : > { %v2270_v14 = vadd.f32 %v2269_v11, %v2268_v22  ;;  %v842_v15 = vadd.f32 %v2267_v9, %v2892_v12  ;;  %v1156_v17 = vsel %vm1092_vm12, %v998_v63, %v1124_v7 }
 0x133   : > { %v1182_v28 = vpack.c.bf16 %v1156_v17, %v1155_v16 }
 0x134   : > { %v1003_v19 = vadd.f32 %v2911_v45, %v842_v15  ;;  %v845_v20 = vadd.f32 %v2270_v14, %v2892_v12 }
 0x135   : > { %2410 = vmatmul.mubr.msk.bf16.gmra.mrb[40].mxu1 %vm710_vm0, %v1182_v28 }
 0x136   : > { %v1125_v21 = vmul.f32 0.2, %v1003_v19  ;;  %v1006_v24 = vadd.f32 %v2915_v51, %v845_v20  ;;  %v2271_v27 = vpop.f32.mrb[28].mxu0  ;;  %vm1093_vm13 = vcmp.ge.f32.partialorder %v1003_v19, 0.0 }
 0x137   : > { %v2272_v29 = vpop.f32.mrb[29].mxu0 }
 0x138   : > { %vm1094_vm14 = vcmp.ge.f32.partialorder %v1006_v24, 0.0  ;;  %v1126_v8 = vmul.f32 0.2, %v1006_v24  ;;  %v2273_v31 = vadd.f32 %v2272_v29, %v2271_v27  ;;  %v2274_v33 = vpop.f32.mrb[30].mxu0  ;;  %v1157_v35 = vsel %vm1093_vm13, %v1003_v19, %v1125_v21 }
 0x139   : > { %v2275_v34 = vpop.f32.mrb[31].mxu0 }
 0x13a   : > { %v1158_v36 = vsel %vm1094_vm14, %v1006_v24, %v1126_v8  ;;  %v850_v13 = vadd.f32 %v2273_v31, %v2892_v12  ;;  %v2276_v45 = vadd.f32 %v2275_v34, %v2274_v33 }
 0x13b   : > { %v1183_v37 = vpack.c.bf16 %v1158_v36, %v1157_v35 }
 0x13c   : > { %v1011_v38 = vadd.f32 %v2909_v41, %v850_v13  ;;  %v853_v40 = vadd.f32 %v2276_v45, %v2892_v12 }
 0x13d   : > { %2413 = vmatprep.mubr.msk.bf16.mxu1 %vm710_vm0, %v1183_v37 }
 0x13e   : > { %v1127_v51 = vmul.f32 0.2, %v1011_v38  ;;  %v1014_v42 = vadd.f32 %v2913_v47, %v853_v40  ;;  %v2277_v43 = vpop.f32.mrb[32].mxu0  ;;  %vm1095_vm15 = vcmp.ge.f32.partialorder %v1011_v38, 0.0 }
 0x13f   : > { %v2278_v46 = vpop.f32.mrb[33].mxu0 }
 0x140   : > { %vm1096_vm1 = vcmp.ge.f32.partialorder %v1014_v42, 0.0  ;;  %v1128_v49 = vmul.f32 0.2, %v1014_v42  ;;  %v2279_v50 = vadd.f32 %v2278_v46, %v2277_v43  ;;  %v2280_v26 = vpop.f32.mrb[34].mxu0  ;;  %v1159_v56 = vsel %vm1095_vm15, %v1011_v38, %v1127_v51 }
 0x141   : > { %v2281_v53 = vpop.f32.mrb[35].mxu0 }
 0x142   : > { %v2282_v54 = vadd.f32 %v2281_v53, %v2280_v26  ;;  %v858_v55 = vadd.f32 %v2279_v50, %v2892_v12  ;;  %v1160_v41 = vsel %vm1096_vm1, %v1014_v42, %v1128_v49 }
 0x143   : > { %v1184_v57 = vpack.c.bf16 %v1160_v41, %v1159_v56 }
 0x144   : > { %v1019_v32 = vadd.f32 %v2922_v0, %v858_v55  ;;  %v861_v58 = vadd.f32 %v2282_v54, %v2892_v12 }
 0x145   : > { %2414 = vmatmul.mubr.msk.bf16.gmra.mrb[44].mxu1 %vm710_vm0, %v1184_v57 }
 0x146   : > { %v1129_v47 = vmul.f32 0.2, %v1019_v32  ;;  %v1022_v59 = vadd.f32 %v2926_v6, %v861_v58  ;;  %v2283_v62 = vpop.f32.mrb[36].mxu0  ;;  %vm1097_vm2 = vcmp.ge.f32.partialorder %v1019_v32, 0.0 }
 0x147   : > { %v2284_v63 = vpop.f32.mrb[37].mxu0 }
 0x148   : > { %vm1098_vm3 = vcmp.ge.f32.partialorder %v1022_v59, 0.0  ;;  %v1130_v1 = vmul.f32 0.2, %v1022_v59  ;;  %v2285_v4 = vadd.f32 %v2284_v63, %v2283_v62  ;;  %v2286_v7 = vpop.f32.mrb[38].mxu0  ;;  %v1161_v22 = vsel %vm1097_vm2, %v1019_v32, %v1129_v47 }
 0x149   : > { %v2287_v9 = vpop.f32.mrb[39].mxu0 }
 0x14a   : > { %v1162_v11 = vsel %vm1098_vm3, %v1022_v59, %v1130_v1  ;;  %v866_v14 = vadd.f32 %v2285_v4, %v2892_v12  ;;  %v2288_v0 = vadd.f32 %v2287_v9, %v2286_v7 }
 0x14b   : > { %v1185_v15 = vpack.c.bf16 %v1162_v11, %v1161_v22 }
 0x14c   : > { %v1027_v16 = vadd.f32 %v2920_v60, %v866_v14  ;;  %v869_v17 = vadd.f32 %v2288_v0, %v2892_v12 }
 0x14d   : > { %2417 = vmatprep.mubr.msk.bf16.mxu1 %vm710_vm0, %v1185_v15 }
 0x14e   : > { %v1131_v6 = vmul.f32 0.2, %v1027_v16  ;;  %v1030_v28 = vadd.f32 %v2924_v2, %v869_v17  ;;  %v2289_v19 = vpop.f32.mrb[40].mxu0  ;;  %vm1099_vm4 = vcmp.ge.f32.partialorder %v1027_v16, 0.0 }
 0x14f   : > { %v2290_v20 = vpop.f32.mrb[41].mxu0 }
 0x150   : > { %vm1100_vm5 = vcmp.ge.f32.partialorder %v1030_v28, 0.0  ;;  %v1132_v21 = vmul.f32 0.2, %v1030_v28  ;;  %v2291_v24 = vadd.f32 %v2290_v20, %v2289_v19  ;;  %v2292_v27 = vpop.f32.mrb[42].mxu0  ;;  %v1163_v33 = vsel %vm1099_vm4, %v1027_v16, %v1131_v6 }
 0x151   : > { %v2293_v29 = vpop.f32.mrb[43].mxu0  ;;  %vm1649_vm4 = vcmask 257024  }
 0x152   : > { %v2294_v8 = vadd.f32 %v2293_v29, %v2292_v27  ;;  %v874_v31 = vadd.f32 %v2291_v24, %v2892_v12  ;;  %v1164_v60 = vsel %vm1100_vm5, %v1030_v28, %v1132_v21 }
 0x153   : > { %v1186_v34 = vpack.c.bf16 %v1164_v60, %v1163_v33 }
 0x154   : > { %v1035_v35 = vadd.f32 %v2935_v23, %v874_v31  ;;  %v877_v36 = vadd.f32 %v2294_v8, %v2892_v12 }
 0x155   : > { %2418 = vmatmul.mubr.msk.bf16.gmra.mrb[48].mxu1 %vm710_vm0, %v1186_v34 }
 0x156   : > { %v1133_v2 = vmul.f32 0.2, %v1035_v35  ;;  %v1038_v13 = vadd.f32 %v2939_v30, %v877_v36  ;;  %v2295_v45 = vpop.f32.mrb[44].mxu0  ;;  %vm1101_vm6 = vcmp.ge.f32.partialorder %v1035_v35, 0.0 }
 0x157   : > { %v2296_v37 = vpop.f32.mrb[45].mxu0 }
 0x158   : > { %vm1102_vm7 = vcmp.ge.f32.partialorder %v1038_v13, 0.0  ;;  %v1134_v38 = vmul.f32 0.2, %v1038_v13  ;;  %v2297_v40 = vadd.f32 %v2296_v37, %v2295_v45  ;;  %v2298_v51 = vpop.f32.mrb[46].mxu0  ;;  %v1165_v43 = vsel %vm1101_vm6, %v1035_v35, %v1133_v2 }
 0x159   : > { %v2299_v42 = vpop.f32.mrb[47].mxu0 }
 0x15a   : > { %v1166_v46 = vsel %vm1102_vm7, %v1038_v13, %v1134_v38  ;;  %v882_v49 = vadd.f32 %v2297_v40, %v2892_v12  ;;  %v2300_v23 = vadd.f32 %v2299_v42, %v2298_v51 }
 0x15b   : > { %v1187_v50 = vpack.c.bf16 %v1166_v46, %v1165_v43 }
 0x15c   : > { %v1043_v26 = vadd.f32 %v2932_v18, %v882_v49  ;;  %v885_v53 = vadd.f32 %v2300_v23, %v2892_v12 }
 0x15d   : > { %2421 = vmatprep.mubr.msk.bf16.mxu1 %vm710_vm0, %v1187_v50 }
 0x15e   : > { %v1135_v30 = vmul.f32 0.2, %v1043_v26  ;;  %v1046_v54 = vadd.f32 %v2937_v25, %v885_v53  ;;  %v2301_v55 = vpop.f32.mrb[48].mxu0  ;;  %vm1103_vm8 = vcmp.ge.f32.partialorder %v1043_v26, 0.0 }
 0x15f   : > { %v2302_v56 = vpop.f32.mrb[49].mxu0 }
 0x160   : > { %vm1104_vm9 = vcmp.ge.f32.partialorder %v1046_v54, 0.0  ;;  %v1136_v41 = vmul.f32 0.2, %v1046_v54  ;;  %v2303_v57 = vadd.f32 %v2302_v56, %v2301_v55  ;;  %v2304_v32 = vpop.f32.mrb[50].mxu0  ;;  %v1167_v62 = vsel %vm1103_vm8, %v1043_v26, %v1135_v30 }
 0x161   : > { %v2305_v58 = vpop.f32.mrb[51].mxu0 }
 0x162   : > { %v2306_v47 = vadd.f32 %v2305_v58, %v2304_v32  ;;  %v890_v59 = vadd.f32 %v2303_v57, %v2892_v12  ;;  %v1168_v18 = vsel %vm1104_vm9, %v1046_v54, %v1136_v41  ;;  %v3021_v57 = vld [vmem:[%s3261_s4] ss:$0 sm:$0xff] }
 0x163   : > { %v1188_v63 = vpack.c.bf16 %v1168_v18, %v1167_v62 }
 0x164   : > { %v1051_v1 = vadd.f32 %v2948_v44, %v890_v59  ;;  %v893_v4 = vadd.f32 %v2306_v47, %v2892_v12 }
 0x165   : > { %2422 = vmatmul.mubr.msk.bf16.gmra.mrb[52].mxu1 %vm710_vm0, %v1188_v63 }
 0x166   : > { %v1137_v25 = vmul.f32 0.2, %v1051_v1  ;;  %v1054_v7 = vadd.f32 %v2952_v52, %v893_v4  ;;  %v2307_v9 = vpop.f32.mrb[52].mxu0  ;;  %vm1105_vm10 = vcmp.ge.f32.partialorder %v1051_v1, 0.0 }
 0x167   : > { %v2308_v22 = vpop.f32.mrb[53].mxu0 }
 0x168   : > { %vm1106_vm11 = vcmp.ge.f32.partialorder %v1054_v7, 0.0  ;;  %v1138_v11 = vmul.f32 0.2, %v1054_v7  ;;  %v2309_v14 = vadd.f32 %v2308_v22, %v2307_v9  ;;  %v2310_v0 = vpop.f32.mrb[54].mxu0  ;;  %v1169_v16 = vsel %vm1105_vm10, %v1051_v1, %v1137_v25 }
 0x169   : > { %v2311_v15 = vpop.f32.mrb[55].mxu0 }
 0x16a   : > { %v1170_v17 = vsel %vm1106_vm11, %v1054_v7, %v1138_v11  ;;  %v898_v6 = vadd.f32 %v2309_v14, %v2892_v12  ;;  %v2312_v44 = vadd.f32 %v2311_v15, %v2310_v0 }
 0x16b   : > { %v1189_v28 = vpack.c.bf16 %v1170_v17, %v1169_v16 }
 0x16c   : > { %v1059_v19 = vadd.f32 %v2945_v39, %v898_v6  ;;  %v901_v20 = vadd.f32 %v2312_v44, %v2892_v12 }
 0x16d   : > { %2425 = vmatprep.mubr.msk.bf16.mxu1 %vm710_vm0, %v1189_v28 }
 0x16e   : > { %v1139_v52 = vmul.f32 0.2, %v1059_v19  ;;  %v1062_v21 = vadd.f32 %v2950_v48, %v901_v20  ;;  %v2313_v24 = vpop.f32.mrb[56].mxu0  ;;  %vm1107_vm12 = vcmp.ge.f32.partialorder %v1059_v19, 0.0 }
 0x16f   : > { %v2314_v27 = vpop.f32.mrb[57].mxu0 }
 0x170   : > { %vm1108_vm13 = vcmp.ge.f32.partialorder %v1062_v21, 0.0  ;;  %v1140_v29 = vmul.f32 0.2, %v1062_v21  ;;  %v2315_v8 = vadd.f32 %v2314_v27, %v2313_v24  ;;  %v2316_v31 = vpop.f32.mrb[58].mxu0  ;;  %v1171_v35 = vsel %vm1107_vm12, %v1059_v19, %v1139_v52 }
 0x171   : > { %v2317_v33 = vpop.f32.mrb[59].mxu0 }
 0x172   : > { %v2318_v60 = vadd.f32 %v2317_v33, %v2316_v31  ;;  %v906_v34 = vadd.f32 %v2315_v8, %v2892_v12  ;;  %v1172_v39 = vsel %vm1108_vm13, %v1062_v21, %v1140_v29 }
 0x173   : > { %v1190_v36 = vpack.c.bf16 %v1172_v39, %v1171_v35 }
 0x174   : > { %v1067_v2 = vadd.f32 %v2961_v3, %v906_v34  ;;  %v909_v13 = vadd.f32 %v2318_v60, %v2892_v12 }
 0x175   : > { %2426 = vmatmul.mubr.msk.bf16.gmra.mrb[56].mxu1 %vm710_vm0, %v1190_v36 }
 0x176   : > { %v1141_v48 = vmul.f32 0.2, %v1067_v2  ;;  %v1070_v45 = vadd.f32 %v2965_v10, %v909_v13  ;;  %v2319_v37 = vpop.f32.mrb[60].mxu0  ;;  %vm1109_vm14 = vcmp.ge.f32.partialorder %v1067_v2, 0.0 }
 0x177   : > { %v2320_v38 = vpop.f32.mrb[61].mxu0 }
 0x178   : > { %vm1110_vm15 = vcmp.ge.f32.partialorder %v1070_v45, 0.0  ;;  %v1142_v40 = vmul.f32 0.2, %v1070_v45  ;;  %v2321_v51 = vadd.f32 %v2320_v38, %v2319_v37  ;;  %v2322_v42 = vpop.f32.mrb[62].mxu0  ;;  %v1173_v46 = vsel %vm1109_vm14, %v1067_v2, %v1141_v48 }
 0x179   : > { %v2323_v43 = vpop.f32.mrb[63].mxu0 }
 0x17a   : > { %v1174_v49 = vsel %vm1110_vm15, %v1070_v45, %v1142_v40  ;;  %v914_v23 = vadd.f32 %v2321_v51, %v2892_v12  ;;  %v2324_v3 = vadd.f32 %v2323_v43, %v2322_v42 }
 0x17b   : > { %v1191_v50 = vpack.c.bf16 %v1174_v49, %v1173_v46 }
 0x17c   : > { %v1075_v26 = vadd.f32 %v2958_v61, %v914_v23  ;;  %v917_v53 = vadd.f32 %v2324_v3, %v2892_v12 }
 0x17d   : > { %2429 = vmatprep.mubr.msk.bf16.mxu1 %vm710_vm0, %v1191_v50 }
 0x17e   : > { %v1143_v10 = vmul.f32 0.2, %v1075_v26  ;;  %v1078_v30 = vadd.f32 %v2963_v5, %v917_v53  ;;  %vm1111_vm1 = vcmp.ge.f32.partialorder %v1075_v26, 0.0 }
 0x180   : > { %vm1112_vm2 = vcmp.ge.f32.partialorder %v1078_v30, 0.0  ;;  %v1144_v54 = vmul.f32 0.2, %v1078_v30  ;;  %v1175_v55 = vsel %vm1111_vm1, %v1075_v26, %v1143_v10 }
 0x182   : > { %v1176_v56 = vsel %vm1112_vm2, %v1078_v30, %v1144_v54 }
 0x183   : > { %v1192_v41 = vpack.c.bf16 %v1176_v56, %v1175_v55 }
 0x185   : > { %2430 = vmatmul.mubr.msk.bf16.gmra.mrb[60].mxu1 %vm710_vm0, %v1192_v41 }
 0x1e8   : > { %v2403_v12 = vpop.f32.mrb[32].mxu1 }
 0x1e9   : > { %v1307_v61 = vadd.f32 %v2403_v12, %v3021_v57  ;;  %v1298_v32 = vpop.f32.mrb[33].mxu1 }
 0x1ea   : > { %v1299_v5 = vadd.f32 %v3021_v57, %v1298_v32  ;;  %v2404_v58 = vpop.f32.mrb[34].mxu1 }
 0x1eb   : > { %vm1427_vm3 = vcmp.ge.f32.partialorder %v1307_v61, 0.0  ;;  %v1459_v47 = vmul.f32 0.2, %v1307_v61  ;;  %v1310_v59 = vadd.f32 %v2404_v58, %v3021_v57  ;;  %v1301_v62 = vpop.f32.mrb[35].mxu1 }
 0x1ec   : > { %vm1425_vm0 = vcmp.ge.f32.partialorder %v1299_v5, 0.0  ;;  %v1457_v18 = vmul.f32 0.2, %v1299_v5  ;;  %v1302_v63 = vadd.f32 %v3021_v57, %v1301_v62 }
 0x1ed   : > { %v1491_v1 = vsel %vm1427_vm3, %v1307_v61, %v1459_v47  ;;  %vm1428_vm5 = vcmp.ge.f32.partialorder %v1310_v59, 0.0  ;;  %v1460_v4 = vmul.f32 0.2, %v1310_v59 }
 0x1ee   : > { %v2180_v25 = vpack.c.bf16 %v1491_v1, %v1491_v1  ;;  %v1489_v7 = vsel %vm1425_vm0, %v1299_v5, %v1457_v18  ;;  %vm1426_vm6 = vcmp.ge.f32.partialorder %v1302_v63, 0.0  ;;  %v1458_v9 = vmul.f32 0.2, %v1302_v63 }
 0x1ef   : > { %v2178_v22 = vpack.c.bf16 %v1489_v7, %v1489_v7  ;;  %v1492_v11 = vsel %vm1428_vm5, %v1310_v59, %v1460_v4 }
 0x1f0   : > { %1652 = vst.msk [vmem:[%s3028_s18 + $0x8] sm:$0xf] %vm1649_vm4, %v2180_v25  ;;  %v2181_v14 = vpack.c.bf16 %v1492_v11, %v1492_v11  ;;  %v1490_v0 = vsel %vm1426_vm6, %v1302_v63, %v1458_v9 }
 0x1f1   : > { %1650 = vst.msk [vmem:[%s3028_s18] sm:$0xf] %vm1649_vm4, %v2178_v22  ;;  %v2179_v15 = vpack.c.bf16 %v1490_v0, %v1490_v0 }
 0x1f2   : > { %1653 = vst.msk [vmem:[%s3028_s18 + $0xc] sm:$0xf] %vm1649_vm4, %v2181_v14 }
 0x1f3   : > { %1651 = vst.msk [vmem:[%s3028_s18 + $0x4] sm:$0xf] %vm1649_vm4, %v2179_v15 }
 0x1f8   : > { %v2407_v16 = vpop.f32.mrb[36].mxu1 }
 0x1f9   : > { %v1323_v17 = vadd.f32 %v2407_v16, %v3021_v57  ;;  %v1314_v6 = vpop.f32.mrb[37].mxu1 }
 0x1fa   : > { %v1315_v44 = vadd.f32 %v3021_v57, %v1314_v6  ;;  %v2408_v28 = vpop.f32.mrb[38].mxu1 }
 0x1fb   : > { %vm1431_vm7 = vcmp.ge.f32.partialorder %v1323_v17, 0.0  ;;  %v1463_v19 = vmul.f32 0.2, %v1323_v17  ;;  %v1326_v20 = vadd.f32 %v2408_v28, %v3021_v57  ;;  %v1317_v52 = vpop.f32.mrb[39].mxu1 }
 0x1fc   : > { %vm1429_vm8 = vcmp.ge.f32.partialorder %v1315_v44, 0.0  ;;  %v1461_v21 = vmul.f32 0.2, %v1315_v44  ;;  %v1318_v24 = vadd.f32 %v3021_v57, %v1317_v52 }
 0x1fd   : > { %v1495_v27 = vsel %vm1431_vm7, %v1323_v17, %v1463_v19  ;;  %vm1432_vm9 = vcmp.ge.f32.partialorder %v1326_v20, 0.0  ;;  %v1464_v29 = vmul.f32 0.2, %v1326_v20 }
 0x1fe   : > { %v2184_v8 = vpack.c.bf16 %v1495_v27, %v1495_v27  ;;  %v1493_v31 = vsel %vm1429_vm8, %v1315_v44, %v1461_v21  ;;  %vm1430_vm10 = vcmp.ge.f32.partialorder %v1318_v24, 0.0  ;;  %v1462_v33 = vmul.f32 0.2, %v1318_v24 }
 0x1ff   : > { %v2182_v60 = vpack.c.bf16 %v1493_v31, %v1493_v31  ;;  %v1496_v34 = vsel %vm1432_vm9, %v1326_v20, %v1464_v29 }
 0x200   : > { %1656 = vst.msk [vmem:[%s3028_s18 + $0x18] sm:$0xf] %vm1649_vm4, %v2184_v8  ;;  %v2185_v35 = vpack.c.bf16 %v1496_v34, %v1496_v34  ;;  %v1494_v39 = vsel %vm1430_vm10, %v1318_v24, %v1462_v33 }
 0x201   : > { %1654 = vst.msk [vmem:[%s3028_s18 + $0x10] sm:$0xf] %vm1649_vm4, %v2182_v60  ;;  %v2183_v36 = vpack.c.bf16 %v1494_v39, %v1494_v39 }
 0x202   : > { %1657 = vst.msk [vmem:[%s3028_s18 + $0x1c] sm:$0xf] %vm1649_vm4, %v2185_v35 }
 0x203   : > { %1655 = vst.msk [vmem:[%s3028_s18 + $0x14] sm:$0xf] %vm1649_vm4, %v2183_v36 }
 0x208   : > { %v2411_v2 = vpop.f32.mrb[40].mxu1 }
 0x209   : > { %v1339_v13 = vadd.f32 %v2411_v2, %v3021_v57  ;;  %v1330_v48 = vpop.f32.mrb[41].mxu1 }
 0x20a   : > { %v1331_v45 = vadd.f32 %v3021_v57, %v1330_v48  ;;  %v2412_v37 = vpop.f32.mrb[42].mxu1 }
 0x20b   : > { %vm1435_vm11 = vcmp.ge.f32.partialorder %v1339_v13, 0.0  ;;  %v1467_v38 = vmul.f32 0.2, %v1339_v13  ;;  %v1342_v40 = vadd.f32 %v2412_v37, %v3021_v57  ;;  %v1333_v51 = vpop.f32.mrb[43].mxu1 }
 0x20c   : > { %vm1433_vm12 = vcmp.ge.f32.partialorder %v1331_v45, 0.0  ;;  %v1465_v42 = vmul.f32 0.2, %v1331_v45  ;;  %v1334_v43 = vadd.f32 %v3021_v57, %v1333_v51 }
 0x20d   : > { %v1499_v46 = vsel %vm1435_vm11, %v1339_v13, %v1467_v38  ;;  %vm1436_vm13 = vcmp.ge.f32.partialorder %v1342_v40, 0.0  ;;  %v1468_v49 = vmul.f32 0.2, %v1342_v40 }
 0x20e   : > { %v2188_v23 = vpack.c.bf16 %v1499_v46, %v1499_v46  ;;  %v1497_v3 = vsel %vm1433_vm12, %v1331_v45, %v1465_v42  ;;  %vm1434_vm14 = vcmp.ge.f32.partialorder %v1334_v43, 0.0  ;;  %v1466_v50 = vmul.f32 0.2, %v1334_v43 }
 0x20f   : > { %v2186_v26 = vpack.c.bf16 %v1497_v3, %v1497_v3  ;;  %v1500_v53 = vsel %vm1436_vm13, %v1342_v40, %v1468_v49 }
 0x210   : > { %1660 = vst.msk [vmem:[%s3028_s18 + $0x28] sm:$0xf] %vm1649_vm4, %v2188_v23  ;;  %v2189_v10 = vpack.c.bf16 %v1500_v53, %v1500_v53  ;;  %v1498_v30 = vsel %vm1434_vm14, %v1334_v43, %v1466_v50 }
 0x211   : > { %1658 = vst.msk [vmem:[%s3028_s18 + $0x20] sm:$0xf] %vm1649_vm4, %v2186_v26  ;;  %v2187_v54 = vpack.c.bf16 %v1498_v30, %v1498_v30 }
 0x212   : > { %1661 = vst.msk [vmem:[%s3028_s18 + $0x2c] sm:$0xf] %vm1649_vm4, %v2189_v10 }
 0x213   : > { %1659 = vst.msk [vmem:[%s3028_s18 + $0x24] sm:$0xf] %vm1649_vm4, %v2187_v54 }
 0x218   : > { %v2415_v55 = vpop.f32.mrb[44].mxu1 }
 0x219   : > { %v1355_v56 = vadd.f32 %v2415_v55, %v3021_v57  ;;  %v1346_v41 = vpop.f32.mrb[45].mxu1 }
 0x21a   : > { %v1347_v12 = vadd.f32 %v3021_v57, %v1346_v41  ;;  %v2416_v61 = vpop.f32.mrb[46].mxu1 }
 0x21b   : > { %vm1439_vm15 = vcmp.ge.f32.partialorder %v1355_v56, 0.0  ;;  %v1471_v32 = vmul.f32 0.2, %v1355_v56  ;;  %v1358_v5 = vadd.f32 %v2416_v61, %v3021_v57  ;;  %v1349_v58 = vpop.f32.mrb[47].mxu1 }
 0x21c   : > { %vm1437_vm1 = vcmp.ge.f32.partialorder %v1347_v12, 0.0  ;;  %v1469_v47 = vmul.f32 0.2, %v1347_v12  ;;  %v1350_v59 = vadd.f32 %v3021_v57, %v1349_v58 }
 0x21d   : > { %v1503_v62 = vsel %vm1439_vm15, %v1355_v56, %v1471_v32  ;;  %vm1440_vm2 = vcmp.ge.f32.partialorder %v1358_v5, 0.0  ;;  %v1472_v18 = vmul.f32 0.2, %v1358_v5 }
 0x21e   : > { %v2192_v63 = vpack.c.bf16 %v1503_v62, %v1503_v62  ;;  %v1501_v1 = vsel %vm1437_vm1, %v1347_v12, %v1469_v47  ;;  %vm1438_vm3 = vcmp.ge.f32.partialorder %v1350_v59, 0.0  ;;  %v1470_v4 = vmul.f32 0.2, %v1350_v59 }
 0x21f   : > { %v2190_v25 = vpack.c.bf16 %v1501_v1, %v1501_v1  ;;  %v1504_v7 = vsel %vm1440_vm2, %v1358_v5, %v1472_v18 }
 0x220   : > { %1664 = vst.msk [vmem:[%s3028_s18 + $0x38] sm:$0xf] %vm1649_vm4, %v2192_v63  ;;  %v2193_v9 = vpack.c.bf16 %v1504_v7, %v1504_v7  ;;  %v1502_v22 = vsel %vm1438_vm3, %v1350_v59, %v1470_v4 }
 0x221   : > { %1662 = vst.msk [vmem:[%s3028_s18 + $0x30] sm:$0xf] %vm1649_vm4, %v2190_v25  ;;  %v2191_v11 = vpack.c.bf16 %v1502_v22, %v1502_v22 }
 0x222   : > { %1665 = vst.msk [vmem:[%s3028_s18 + $0x3c] sm:$0xf] %vm1649_vm4, %v2193_v9 }
 0x223   : > { %1663 = vst.msk [vmem:[%s3028_s18 + $0x34] sm:$0xf] %vm1649_vm4, %v2191_v11 }
 0x228   : > { %v2419_v14 = vpop.f32.mrb[48].mxu1 }
 0x229   : > { %v1371_v0 = vadd.f32 %v2419_v14, %v3021_v57  ;;  %v1362_v15 = vpop.f32.mrb[49].mxu1 }
 0x22a   : > { %v1363_v16 = vadd.f32 %v3021_v57, %v1362_v15  ;;  %v2420_v17 = vpop.f32.mrb[50].mxu1 }
 0x22b   : > { %vm1443_vm0 = vcmp.ge.f32.partialorder %v1371_v0, 0.0  ;;  %v1475_v6 = vmul.f32 0.2, %v1371_v0  ;;  %v1374_v44 = vadd.f32 %v2420_v17, %v3021_v57  ;;  %v1365_v28 = vpop.f32.mrb[51].mxu1 }
 0x22c   : > { %vm1441_vm5 = vcmp.ge.f32.partialorder %v1363_v16, 0.0  ;;  %v1473_v19 = vmul.f32 0.2, %v1363_v16  ;;  %v1366_v20 = vadd.f32 %v3021_v57, %v1365_v28 }
 0x22d   : > { %v1507_v52 = vsel %vm1443_vm0, %v1371_v0, %v1475_v6  ;;  %vm1444_vm6 = vcmp.ge.f32.partialorder %v1374_v44, 0.0  ;;  %v1476_v21 = vmul.f32 0.2, %v1374_v44 }
 0x22e   : > { %v2196_v24 = vpack.c.bf16 %v1507_v52, %v1507_v52  ;;  %v1505_v27 = vsel %vm1441_vm5, %v1363_v16, %v1473_v19  ;;  %vm1442_vm7 = vcmp.ge.f32.partialorder %v1366_v20, 0.0  ;;  %v1474_v29 = vmul.f32 0.2, %v1366_v20 }
 0x22f   : > { %v2194_v8 = vpack.c.bf16 %v1505_v27, %v1505_v27  ;;  %v1508_v31 = vsel %vm1444_vm6, %v1374_v44, %v1476_v21 }
 0x230   : > { %1668 = vst.msk [vmem:[%s3028_s18 + $0x48] sm:$0xf] %vm1649_vm4, %v2196_v24  ;;  %v2197_v33 = vpack.c.bf16 %v1508_v31, %v1508_v31  ;;  %v1506_v60 = vsel %vm1442_vm7, %v1366_v20, %v1474_v29 }
 0x231   : > { %1666 = vst.msk [vmem:[%s3028_s18 + $0x40] sm:$0xf] %vm1649_vm4, %v2194_v8  ;;  %v2195_v34 = vpack.c.bf16 %v1506_v60, %v1506_v60 }
 0x232   : > { %1669 = vst.msk [vmem:[%s3028_s18 + $0x4c] sm:$0xf] %vm1649_vm4, %v2197_v33 }
 0x233   : > { %1667 = vst.msk [vmem:[%s3028_s18 + $0x44] sm:$0xf] %vm1649_vm4, %v2195_v34 }
 0x238   : > { %v2423_v35 = vpop.f32.mrb[52].mxu1 }
 0x239   : > { %v1387_v39 = vadd.f32 %v2423_v35, %v3021_v57  ;;  %v1378_v36 = vpop.f32.mrb[53].mxu1 }
 0x23a   : > { %v1379_v2 = vadd.f32 %v3021_v57, %v1378_v36  ;;  %v2424_v13 = vpop.f32.mrb[54].mxu1 }
 0x23b   : > { %vm1447_vm8 = vcmp.ge.f32.partialorder %v1387_v39, 0.0  ;;  %v1479_v48 = vmul.f32 0.2, %v1387_v39  ;;  %v1390_v45 = vadd.f32 %v2424_v13, %v3021_v57  ;;  %v1381_v37 = vpop.f32.mrb[55].mxu1 }
 0x23c   : > { %vm1445_vm9 = vcmp.ge.f32.partialorder %v1379_v2, 0.0  ;;  %v1477_v38 = vmul.f32 0.2, %v1379_v2  ;;  %v1382_v40 = vadd.f32 %v3021_v57, %v1381_v37 }
 0x23d   : > { %v1511_v51 = vsel %vm1447_vm8, %v1387_v39, %v1479_v48  ;;  %vm1448_vm10 = vcmp.ge.f32.partialorder %v1390_v45, 0.0  ;;  %v1480_v42 = vmul.f32 0.2, %v1390_v45 }
 0x23e   : > { %v2200_v43 = vpack.c.bf16 %v1511_v51, %v1511_v51  ;;  %v1509_v46 = vsel %vm1445_vm9, %v1379_v2, %v1477_v38  ;;  %vm1446_vm11 = vcmp.ge.f32.partialorder %v1382_v40, 0.0  ;;  %v1478_v49 = vmul.f32 0.2, %v1382_v40 }
 0x23f   : > { %v2198_v23 = vpack.c.bf16 %v1509_v46, %v1509_v46  ;;  %v1512_v3 = vsel %vm1448_vm10, %v1390_v45, %v1480_v42 }
 0x240   : > { %1672 = vst.msk [vmem:[%s3028_s18 + $0x58] sm:$0xf] %vm1649_vm4, %v2200_v43  ;;  %v2201_v50 = vpack.c.bf16 %v1512_v3, %v1512_v3  ;;  %v1510_v26 = vsel %vm1446_vm11, %v1382_v40, %v1478_v49 }
 0x241   : > { %1670 = vst.msk [vmem:[%s3028_s18 + $0x50] sm:$0xf] %vm1649_vm4, %v2198_v23  ;;  %v2199_v53 = vpack.c.bf16 %v1510_v26, %v1510_v26 }
 0x242   : > { %1673 = vst.msk [vmem:[%s3028_s18 + $0x5c] sm:$0xf] %vm1649_vm4, %v2201_v50 }
 0x243   : > { %1671 = vst.msk [vmem:[%s3028_s18 + $0x54] sm:$0xf] %vm1649_vm4, %v2199_v53 }
 0x248   : > { %v2427_v10 = vpop.f32.mrb[56].mxu1 }
 0x249   : > { %v1403_v30 = vadd.f32 %v2427_v10, %v3021_v57  ;;  %v1394_v54 = vpop.f32.mrb[57].mxu1 }
 0x24a   : > { %v1395_v55 = vadd.f32 %v3021_v57, %v1394_v54  ;;  %v2428_v56 = vpop.f32.mrb[58].mxu1 }
 0x24b   : > { %vm1451_vm12 = vcmp.ge.f32.partialorder %v1403_v30, 0.0  ;;  %v1483_v41 = vmul.f32 0.2, %v1403_v30  ;;  %v1406_v12 = vadd.f32 %v2428_v56, %v3021_v57  ;;  %v1397_v61 = vpop.f32.mrb[59].mxu1 }
 0x24c   : > { %vm1449_vm13 = vcmp.ge.f32.partialorder %v1395_v55, 0.0  ;;  %v1481_v32 = vmul.f32 0.2, %v1395_v55  ;;  %v1398_v5 = vadd.f32 %v3021_v57, %v1397_v61 }
 0x24d   : > { %v1515_v58 = vsel %vm1451_vm12, %v1403_v30, %v1483_v41  ;;  %vm1452_vm14 = vcmp.ge.f32.partialorder %v1406_v12, 0.0  ;;  %v1484_v47 = vmul.f32 0.2, %v1406_v12 }
 0x24e   : > { %v2204_v59 = vpack.c.bf16 %v1515_v58, %v1515_v58  ;;  %v1513_v62 = vsel %vm1449_vm13, %v1395_v55, %v1481_v32  ;;  %vm1450_vm15 = vcmp.ge.f32.partialorder %v1398_v5, 0.0  ;;  %v1482_v18 = vmul.f32 0.2, %v1398_v5 }
 0x24f   : > { %v2202_v63 = vpack.c.bf16 %v1513_v62, %v1513_v62  ;;  %v1516_v1 = vsel %vm1452_vm14, %v1406_v12, %v1484_v47 }
 0x250   : > { %1676 = vst.msk [vmem:[%s3028_s18 + $0x68] sm:$0xf] %vm1649_vm4, %v2204_v59  ;;  %v2205_v4 = vpack.c.bf16 %v1516_v1, %v1516_v1  ;;  %v1514_v25 = vsel %vm1450_vm15, %v1398_v5, %v1482_v18 }
 0x251   : > { %1674 = vst.msk [vmem:[%s3028_s18 + $0x60] sm:$0xf] %vm1649_vm4, %v2202_v63  ;;  %v2203_v7 = vpack.c.bf16 %v1514_v25, %v1514_v25 }
 0x252   : > { %1677 = vst.msk [vmem:[%s3028_s18 + $0x6c] sm:$0xf] %vm1649_vm4, %v2205_v4 }
 0x253   : > { %1675 = vst.msk [vmem:[%s3028_s18 + $0x64] sm:$0xf] %vm1649_vm4, %v2203_v7 }
 0x258   : > { %v2431_v9 = vpop.f32.mrb[60].mxu1 }
 0x259   : > { %v1419_v22 = vadd.f32 %v2431_v9, %v3021_v57  ;;  %v1410_v11 = vpop.f32.mrb[61].mxu1 }
 0x25a   : > { %v1411_v14 = vadd.f32 %v3021_v57, %v1410_v11  ;;  %v2432_v0 = vpop.f32.mrb[62].mxu1 }
 0x25b   : > { %vm1455_vm1 = vcmp.ge.f32.partialorder %v1419_v22, 0.0  ;;  %v1487_v15 = vmul.f32 0.2, %v1419_v22  ;;  %v1422_v16 = vadd.f32 %v2432_v0, %v3021_v57  ;;  %v1413_v17 = vpop.f32.mrb[63].mxu1 }
 0x25c   : > { %vm1453_vm2 = vcmp.ge.f32.partialorder %v1411_v14, 0.0  ;;  %v1485_v6 = vmul.f32 0.2, %v1411_v14  ;;  %v1414_v44 = vadd.f32 %v3021_v57, %v1413_v17 }
 0x25d   : > { %v1519_v28 = vsel %vm1455_vm1, %v1419_v22, %v1487_v15  ;;  %vm1456_vm3 = vcmp.ge.f32.partialorder %v1422_v16, 0.0  ;;  %v1488_v19 = vmul.f32 0.2, %v1422_v16  ;;  %1688 = sbr.rel (!%p2749_p4) target bundleno = 682 (0x2aa), region = 44 }
 0x25e   : > { %v2208_v20 = vpack.c.bf16 %v1519_v28, %v1519_v28  ;;  %v1517_v52 = vsel %vm1453_vm2, %v1411_v14, %v1485_v6  ;;  %vm1454_vm0 = vcmp.ge.f32.partialorder %v1414_v44, 0.0  ;;  %v1486_v21 = vmul.f32 0.2, %v1414_v44 }
 0x25f   : > { %v2206_v24 = vpack.c.bf16 %v1517_v52, %v1517_v52  ;;  %v1520_v27 = vsel %vm1456_vm3, %v1422_v16, %v1488_v19 }
 0x260   : > { %1680 = vst.msk [vmem:[%s3028_s18 + $0x78] sm:$0xf] %vm1649_vm4, %v2208_v20  ;;  %v2209_v29 = vpack.c.bf16 %v1520_v27, %v1520_v27  ;;  %v1518_v8 = vsel %vm1454_vm0, %v1414_v44, %v1486_v21 }
 0x261   : > { %1678 = vst.msk [vmem:[%s3028_s18 + $0x70] sm:$0xf] %vm1649_vm4, %v2206_v24  ;;  %v2207_v31 = vpack.c.bf16 %v1518_v8, %v1518_v8 }
 0x262   : > { %1681 = vst.msk [vmem:[%s3028_s18 + $0x7c] sm:$0xf] %vm1649_vm4, %v2209_v29 }
 0x263   : > { %1679 = vst.msk [vmem:[%s3028_s18 + $0x74] sm:$0xf] %vm1649_vm4, %v2207_v31 }
 0x264   : > { %s3271_s20 = smov (!%p1691_p8, %s1690_s20), 32 }
 0x265   : > { %s2163_s30 = sshll.u32 %s3271_s20, 6 }
 0x266   : > { %p2166_p9 = scmp.eq.s32.totalorder %s2163_s30, 0 }
 0x267   : > { %s3135_s6 = sshrl.u32 (!%p2166_p9), %s3271_s20, 5 }
 0x268   : > { %1699 = sbr.rel (%p2166_p9) target bundleno = 682 (0x2aa), region = 48  ;;  %p2167_p10 = scmp.le.s32.totalorder (!%p2166_p9), %s3135_s6, 0 }
 0x26f   : > { %1976 = sbr.rel (%p2167_p10) target bundleno = 661 (0x295), region = 120  ;;  %s3264_s21 = smov (!%p2167_p10), %s3129_s28 }
 0x270   : > { %s3265_s26 = smov (!%p2167_p10), %s3028_s18  ;;  %s3144_s29 = smov (!%p2167_p10), 0  }
 0x271   : > { %s3146_s7 = smov (!%p2167_p10), 0  }
 0x276 LB: >> { %v1715_v57 = vld [vmem:[%s2668_s26] sm:$0xf]  ;;  %v1717_v33 = vld [vmem:[%s2668_s26 + $0x4] sm:$0xf]  ;;  %v1719_v60 = vld [vmem:[%s2668_s26 + $0x8] sm:$0xf]  ;;  %s2676_s7 = sphi %s3146_s7, %s1709_s7   ;;  %s2672_s29 = sphi %s3144_s29, %s3266_s29   ;;  %s2668_s26 = sphi %s3265_s26, %s1784_s26   ;;  %s2664_s21 = sphi %s3264_s21, %s1785_s21  }
 0x277   : >> { %1716 = vst [vmem:[%s2664_s21] sm:$0xf] %v1715_v57  ;;  %1718 = vst [vmem:[%s2664_s21 + $0x4] sm:$0xf] %v1717_v33  ;;  %v1721_v34 = vld [vmem:[%s2668_s26 + $0xc] sm:$0xf]  ;;  %s1779_s8 = sadd.s32 1, %s2672_s29 }
 0x278   : >> { %1720 = vst [vmem:[%s2664_s21 + $0x8] sm:$0xf] %v1719_v60  ;;  %v1723_v35 = vld [vmem:[%s2668_s26 + $0x10] sm:$0xf]  ;;  %v1725_v39 = vld [vmem:[%s2668_s26 + $0x14] sm:$0xf]  ;;  %p1780_p11 = scmp.ge.s32.totalorder %s1779_s8, %s3135_s6 }
 0x279   : >> { %1722 = vst [vmem:[%s2664_s21 + $0xc] sm:$0xf] %v1721_v34  ;;  %1724 = vst [vmem:[%s2664_s21 + $0x10] sm:$0xf] %v1723_v35  ;;  %v1727_v36 = vld [vmem:[%s2668_s26 + $0x18] sm:$0xf] }
 0x27a   : >> { %1726 = vst [vmem:[%s2664_s21 + $0x14] sm:$0xf] %v1725_v39  ;;  %v1729_v2 = vld [vmem:[%s2668_s26 + $0x1c] sm:$0xf]  ;;  %v1731_v13 = vld [vmem:[%s2668_s26 + $0x20] sm:$0xf] }
 0x27b   : >> { %1728 = vst [vmem:[%s2664_s21 + $0x18] sm:$0xf] %v1727_v36  ;;  %1730 = vst [vmem:[%s2664_s21 + $0x1c] sm:$0xf] %v1729_v2  ;;  %v1733_v48 = vld [vmem:[%s2668_s26 + $0x24] sm:$0xf] }
 0x27c   : >> { %1732 = vst [vmem:[%s2664_s21 + $0x20] sm:$0xf] %v1731_v13  ;;  %v1735_v45 = vld [vmem:[%s2668_s26 + $0x28] sm:$0xf]  ;;  %v1737_v37 = vld [vmem:[%s2668_s26 + $0x2c] sm:$0xf] }
 0x27d   : >> { %1734 = vst [vmem:[%s2664_s21 + $0x24] sm:$0xf] %v1733_v48  ;;  %1736 = vst [vmem:[%s2664_s21 + $0x28] sm:$0xf] %v1735_v45  ;;  %v1739_v38 = vld [vmem:[%s2668_s26 + $0x30] sm:$0xf] }
 0x27e   : >> { %1738 = vst [vmem:[%s2664_s21 + $0x2c] sm:$0xf] %v1737_v37  ;;  %v1741_v40 = vld [vmem:[%s2668_s26 + $0x34] sm:$0xf]  ;;  %v1743_v51 = vld [vmem:[%s2668_s26 + $0x38] sm:$0xf] }
 0x27f   : >> { %1740 = vst [vmem:[%s2664_s21 + $0x30] sm:$0xf] %v1739_v38  ;;  %1742 = vst [vmem:[%s2664_s21 + $0x34] sm:$0xf] %v1741_v40  ;;  %v1745_v42 = vld [vmem:[%s2668_s26 + $0x3c] sm:$0xf] }
 0x280   : >> { %1744 = vst [vmem:[%s2664_s21 + $0x38] sm:$0xf] %v1743_v51  ;;  %v1747_v43 = vld [vmem:[%s2668_s26 + $0x40] sm:$0xf]  ;;  %v1749_v46 = vld [vmem:[%s2668_s26 + $0x44] sm:$0xf] }
 0x281   : >> { %1746 = vst [vmem:[%s2664_s21 + $0x3c] sm:$0xf] %v1745_v42  ;;  %1748 = vst [vmem:[%s2664_s21 + $0x40] sm:$0xf] %v1747_v43  ;;  %v1751_v49 = vld [vmem:[%s2668_s26 + $0x48] sm:$0xf] }
 0x282   : >> { %1750 = vst [vmem:[%s2664_s21 + $0x44] sm:$0xf] %v1749_v46  ;;  %v1753_v23 = vld [vmem:[%s2668_s26 + $0x4c] sm:$0xf]  ;;  %v1755_v3 = vld [vmem:[%s2668_s26 + $0x50] sm:$0xf] }
 0x283   : >> { %1752 = vst [vmem:[%s2664_s21 + $0x48] sm:$0xf] %v1751_v49  ;;  %1754 = vst [vmem:[%s2664_s21 + $0x4c] sm:$0xf] %v1753_v23  ;;  %v1757_v50 = vld [vmem:[%s2668_s26 + $0x54] sm:$0xf] }
 0x284   : >> { %1756 = vst [vmem:[%s2664_s21 + $0x50] sm:$0xf] %v1755_v3  ;;  %v1759_v26 = vld [vmem:[%s2668_s26 + $0x58] sm:$0xf]  ;;  %v1761_v53 = vld [vmem:[%s2668_s26 + $0x5c] sm:$0xf] }
 0x285   : >> { %1758 = vst [vmem:[%s2664_s21 + $0x54] sm:$0xf] %v1757_v50  ;;  %1760 = vst [vmem:[%s2664_s21 + $0x58] sm:$0xf] %v1759_v26  ;;  %v1763_v10 = vld [vmem:[%s2668_s26 + $0x60] sm:$0xf] }
 0x286   : >> { %1762 = vst [vmem:[%s2664_s21 + $0x5c] sm:$0xf] %v1761_v53  ;;  %v1765_v30 = vld [vmem:[%s2668_s26 + $0x64] sm:$0xf]  ;;  %v1767_v54 = vld [vmem:[%s2668_s26 + $0x68] sm:$0xf] }
 0x287   : >> { %1764 = vst [vmem:[%s2664_s21 + $0x60] sm:$0xf] %v1763_v10  ;;  %1766 = vst [vmem:[%s2664_s21 + $0x64] sm:$0xf] %v1765_v30  ;;  %v1769_v55 = vld [vmem:[%s2668_s26 + $0x6c] sm:$0xf] }
 0x288   : >> { %1768 = vst [vmem:[%s2664_s21 + $0x68] sm:$0xf] %v1767_v54  ;;  %v1771_v56 = vld [vmem:[%s2668_s26 + $0x70] sm:$0xf]  ;;  %v1773_v41 = vld [vmem:[%s2668_s26 + $0x74] sm:$0xf] }
 0x289   : >> { %1770 = vst [vmem:[%s2664_s21 + $0x6c] sm:$0xf] %v1769_v55  ;;  %1772 = vst [vmem:[%s2664_s21 + $0x70] sm:$0xf] %v1771_v56  ;;  %v1775_v12 = vld [vmem:[%s2668_s26 + $0x78] sm:$0xf] }
 0x28a   : >> { %1774 = vst [vmem:[%s2664_s21 + $0x74] sm:$0xf] %v1773_v41  ;;  %v1777_v61 = vld [vmem:[%s2668_s26 + $0x7c] sm:$0xf]  ;;  %1776 = vst [vmem:[%s2664_s21 + $0x78] sm:$0xf] %v1775_v12 }
 0x28b   : >> { %1778 = vst [vmem:[%s2664_s21 + $0x7c] sm:$0xf] %v1777_v61  ;;  %s3273_s8 = smov (%p1780_p11, %s1779_s8), 0  ;;  %s1709_s7 = sadd.s32 1, %s2676_s7  }
 0x28c   : >> { %s2168_s9 = sshll.u32 %s3273_s8, 7  ;;  %p1708_p12 = scmp.ge.s32.totalorder %s1709_s7, %s3135_s6 }
 0x28d   : >> { %s1784_s26 = scalar_lea.vmem %s3028_s18, %s2168_s9 [#allocation2]   ;;  %s1785_s21 = scalar_lea.vmem %s3129_s28, %s2168_s9  }
 0x28e   : >> { %s3266_s29 = smov %s3273_s8  ;;  %1711 = sbr.rel (!%p1708_p12) target bundleno = 630 (0x276), region = 126 }
 0x295 PF: > { %s3239_s10 = sand.u32 31, %s3271_s20   ;;  %s2211_s12 = sshll.u32 %s3135_s6, 7 }
 0x296   : > { %s1790_s13 = scalar_lea.vmem %s3028_s18, %s2211_s12 [#allocation2]   ;;  %s1792_s14 = scalar_lea.vmem %s3129_s28, %s2211_s12  }
 0x297   : > { %p2173_p13 = scmp.le.s32.totalorder %s3239_s10, 0 }
 0x298   : > { %s2678_s11 = smov (!%p2173_p13), %s1792_s14   ;;  %s2682_s15 = smov (!%p2173_p13), %s1790_s13  }
 0x299   : > { %1990 = sbr.rel (%p2173_p13) target bundleno = 682 (0x2aa), region = 131  ;;  %s2686_s16 = smov (!%p2173_p13), 0  }
 0x29a   : > { %s2690_s17 = smov (!%p2173_p13), 0  }
 0x2a0 LB: >> { %v1802_v32 = vld [vmem:[%s2684_s15] sm:$0xf]  ;;  %s1804_s20 = sadd.s32 1, %s2688_s16  ;;  %s1796_s17 = sadd.s32 1, %s2692_s17   ;;  %s2692_s17 = sphi %s2690_s17, %s1796_s17   ;;  %s2688_s16 = sphi %s2686_s16, %s2687_s16   ;;  %s2684_s15 = sphi %s2682_s15, %s1809_s15   ;;  %s2680_s11 = sphi %s2678_s11, %s1810_s11  }
 0x2a1   : >> { %1803 = vst [vmem:[%s2680_s11] sm:$0xf] %v1802_v32  ;;  %p1805_p0 = scmp.ge.s32.totalorder %s1804_s20, %s3239_s10  ;;  %p1795_p1 = scmp.ge.s32.totalorder %s1796_s17, %s3239_s10 }
 0x2a3   : >> { %s3275_s20 = smov (%p1805_p0, %s1804_s20), 0  ;;  %1798 = sbr.rel (!%p1795_p1) target bundleno = 672 (0x2a0), region = 137 }
 0x2a4   : >> { %s2174_s18 = sshll.u32 %s3275_s20, 2  ;;  %s2687_s16 = smov %s3275_s20  }
 0x2a5   : >> { %s1809_s15 = scalar_lea.vmem %s1790_s13, %s2174_s18 [#allocation2]   ;;  %s1810_s11 = scalar_lea.vmem %s1792_s14, %s2174_s18  }
 0x2aa PF: > { %p12_p2 = scmp.ge.s32.totalorder %s2739_s22, 12   ;;  %s3267_s18 = smov %s2656_s19 }
 0x2ab   : > { %s3268_s19 = smov %s2747_s25  ;;  %s3269_s20 = smov %s2739_s22 }
 0x2ac   :  { %14 = sbr.rel (!%p12_p2) target bundleno = 2 (0x2), region = 148 }

// kernel: _lambda_.12
= control target key start
LH: loop header
LB: loop body
LE: loop exit
PB: predicated region body
PF: predicated region fallthrough
CT: control target
= control target key end

     0   :  { %s2751_s18 = smov 0   ;;  %s2753_s19 = smov 0   ;;  %s3290_s0 = inlined_call_operand.vmem [shape: bf16[648,288], index: 0, kind: input, shape index: {}]   ;;  %s3291_s1 = inlined_call_operand.vmem [shape: bf16[288,64], index: 1, kind: input, shape index: {}]   ;;  %s3292_s2 = inlined_call_operand.vmem [shape: f32[1,64], index: 2, kind: input, shape index: {}]   ;;  %s3293_s3 = inlined_call_operand.vmem [shape: bf16[64,64], index: 3, kind: input, shape index: {}]   ;;  %s3294_s4 = inlined_call_operand.vmem [shape: f32[1,64], index: 4, kind: input, shape index: {}]   ;;  %s3295_s5 = inlined_call_operand.vmem [shape: bf16[648,64], index: 5, kind: output, shape index: {}]  }
   0x1   :  { %s2755_s20 = smov 0  }
   0x2 LB: > { %s2764_s21 = sadd.s32 4294967295, %s2687_s20   ;;  %s2766_s22 = sadd.s32 1, %s2687_s20   ;;  %s2687_s20 = sphi %s2755_s20, %s3302_s20   ;;  %s2683_s19 = sphi %s2753_s19, %s3301_s19   ;;  %s2679_s18 = sphi %s2751_s18, %s3300_s18  }
   0x3   : > { %s129_s23 = ssub.s32 %s2687_s20, %s2766_s22  ;;  %s132_s24 = sadd.s32 1, %s2683_s19 }
   0x4   : > { %p130_p0 = scmp.eq.s32.totalorder %s129_s23, 0  ;;  %p142_p1 = scmp.ne.s32.totalorder %s2683_s19, %s2679_s18 }
   0x5   : > { %p143_p2 = scmp.eq.s32.totalorder %s2764_s21, 2  ;;  %p2040_p3 = scmp.ge.s32.totalorder %s2687_s20, 1 }
   0x6   : > { %s2774_s25 = scalar_select %p130_p0, %s2683_s19, %s132_s24  }
   0x7   : > { %p2776_p4 = por %p143_p2, %p142_p1  ;;  %p199_p5 = scmp.lt.s32.totalorder %s2687_s20, 4 }
   0x9   : > { %p200_p6 = pnand %p2040_p3, %p199_p5 }
   0xa   : > { %v2547_v0 = vld [vmem:[%s3291_s1 + $0x40] sm:$0xff] (!%p200_p6)   ;;  %s2784_s29 = sshll.u32 (!%p200_p6), %s2764_s21, 5  ;;  %v2549_v2 = vld [vmem:[%s3291_s1 + $0x48] sm:$0xff] (!%p200_p6)   ;;  %v2551_v4 = vld [vmem:[%s3291_s1 + $0x50] sm:$0xff] (!%p200_p6)   ;;  %vm710_vm0 = vcmask (!%p200_p6), 261120   ;;  %vm1232_vm3 = vcmask (!%p200_p6), 523264  }
   0xb   : > { %203 = sbr.rel (%p200_p6) target bundleno = 682 (0x2aa), region = 40  ;;  %v2548_v1 = vld [vmem:[%s3291_s1] sm:$0xff] (!%p200_p6)   ;;  %2232 = vmatprep.subr.bf16.mxu0 (!%p200_p6), %v2547_v0  ;;  %v2550_v3 = vld [vmem:[%s3291_s1 + $0x8] sm:$0xff] (!%p200_p6)   ;;  %p238_p7 = scmp.lt.s32.totalorder (!%p200_p6), %s2784_s29, 80  ;;  %v2552_v5 = vld [vmem:[%s3291_s1 + $0x10] sm:$0xff] (!%p200_p6)  }
   0xc   : > { %2233 = vmatpush3.bf16.msra.mxu0 (!%p200_p6), %v2548_v1  ;;  %v2553_v6 = vld [vmem:[%s3291_s1 + $0x58] sm:$0xff] (!%p200_p6)   ;;  %v2555_v8 = vld [vmem:[%s3291_s1 + $0x60] sm:$0xff] (!%p200_p6)   ;;  %v2557_v11 = vld [vmem:[%s3291_s1 + $0x68] sm:$0xff] (!%p200_p6)  }
   0xd   : > { %2234 = vmatprep.subr.bf16.mxu0 (!%p200_p6), %v2549_v2  ;;  %v2554_v7 = vld [vmem:[%s3291_s1 + $0x18] sm:$0xff] (!%p200_p6)   ;;  %v2556_v9 = vld [vmem:[%s3291_s1 + $0x20] sm:$0xff] (!%p200_p6)   ;;  %v2558_v12 = vld [vmem:[%s3291_s1 + $0x28] sm:$0xff] (!%p200_p6)  }
   0xe   : > { %v2562_v10 = vld [vmem:[%s3291_s1 + $0x80] sm:$0xff] (!%p200_p6)   ;;  %v2559_v13 = vld [vmem:[%s3291_s1 + $0x70] sm:$0xff] (!%p200_p6)   ;;  %v2567_v15 = vld [vmem:[%s3291_s1 + $0x88] sm:$0xff] (!%p200_p6)  }
   0xf   : > { %2382 = vmatprep.subr.bf16.mxu1 (!%p200_p6), %v2562_v10  ;;  %v2560_v18 = vld [vmem:[%s3291_s1 + $0x30] sm:$0xff] (!%p200_p6)   ;;  %v2561_v19 = vld [vmem:[%s3291_s1 + $0x78] sm:$0xff] (!%p200_p6)   ;;  %v2629_v59 = vld [vmem:[%s3293_s3] sm:$0xff] (!%p200_p6)  }
  0x10   : > { %2235 = vmatpush3.bf16.msra.mxu0 (!%p200_p6), %v2550_v3  ;;  %2383 = vmatpush3.bf16.msra.mxu1 (!%p200_p6), %v2562_v10  ;;  %v2563_v21 = vld [vmem:[%s3291_s1 + $0x38] sm:$0xff] (!%p200_p6)   ;;  %v2630_v61 = vld [vmem:[%s3293_s3 + $0x8] sm:$0xff] (!%p200_p6)   ;;  %v2631_v63 = vld [vmem:[%s3293_s3 + $0x10] sm:$0xff] (!%p200_p6)  }
  0x11   : > { %2236 = vmatprep.subr.bf16.mxu0 (!%p200_p6), %v2551_v4  ;;  %2384 = vmatprep.subr.bf16.mxu1 (!%p200_p6), %v2567_v15  ;;  %v2632_v1 = vld [vmem:[%s3293_s3 + $0x18] sm:$0xff] (!%p200_p6)  }
  0x12   : > { %s239_s15 = scalar_select %p238_p7, %s2784_s29, 80 }
  0x13   : > { %s1707_s28 = ssub.s32 (%p2776_p4), 81, %s2784_s29  ;;  %s2229_s30 = sshll.u32 (%p2776_p4), %s2764_s21, 7 }
  0x14   : > { %2237 = vmatpush3.bf16.msra.mxu0 %v2552_v5  ;;  %s2458_s24 = smul.u32 12, %s239_s15  ;;  %2385 = vmatpush3.bf16.msra.mxu1 %v2567_v15  ;;  %p1708_p8 = scmp.lt.s32.totalorder (%p2776_p4), %s1707_s28, 32 }
  0x15   : > { %2238 = vmatprep.subr.bf16.mxu0 %v2553_v6  ;;  %2418 = vmatprep.subr.bf16.mxu1 %v2629_v59  ;;  %s3162_s8 = scalar_lea.vmem (%p2776_p4), %s3295_s5, %s2229_s30  }
  0x16   : > { %s2821_s11 = scalar_lea.vmem %s3290_s0, %s2458_s24  ;;  %s229_s24 = sand.u32 1, %s2679_s18  }
  0x17   : > { %v2566_v14 = vld [vmem:[%s2821_s11 + $0x4] ss:$12 sps:$4 sm:$0xff]   ;;  %v2568_v16 = vld [vmem:[%s2821_s11 + $0x8] ss:$12 sps:$4 sm:$0xff]   ;;  %v2569_v17 = vld [vmem:[%s2821_s11 + $0x20] ss:$12 sps:$4 sm:$0xff]  }
  0x18   : > { %2239 = vmatpush3.bf16.msra.mxu0 %v2554_v7  ;;  %791 = vmatprep.mubr.bf16.mxu0 %v2566_v14  ;;  %v2576_v20 = vld [vmem:[%s2821_s11 + $0x38] ss:$12 sps:$4 sm:$0xff]   ;;  %v2564_v22 = vld [vmem:[%s2821_s11] ss:$12 sps:$4 sm:$0xff]   ;;  %v2577_v23 = vld [vmem:[%s2821_s11 + $0x50] ss:$12 sps:$4 sm:$0xff]  }
  0x19   : > { %2240 = vmatprep.subr.bf16.mxu0 %v2555_v8  ;;  %2386 = vmatprep.mubr.msk.bf16.mxu1 %vm710_vm0, %v2568_v16  ;;  %v2584_v24 = vld [vmem:[%s2821_s11 + $0x68] ss:$12 sps:$4 sm:$0xff]   ;;  %v2572_v26 = vld [vmem:[%s2821_s11 + $0x18] ss:$12 sps:$4 sm:$0xff]   ;;  %v2585_v27 = vld [vmem:[%s2821_s11 + $0x80] ss:$12 sps:$4 sm:$0xff]  }
  0x1a   : > { %2387 = vmatmul.mubr.msk.bf16.vlgmr.msra.gmra.mrb[0].mxu1 %vm710_vm0, %v2569_v17  ;;  %v2570_v25 = vld [vmem:[%s2821_s11 + $0x1c] ss:$12 sps:$4 sm:$0xff]   ;;  %v2592_v28 = vld [vmem:[%s2821_s11 + $0x98] ss:$12 sps:$4 sm:$0xff]   ;;  %v2573_v29 = vld [vmem:[%s2821_s11 + $0x34] ss:$12 sps:$4 sm:$0xff]  }
  0x1b   : > { %2390 = vmatprep.mubr.msk.bf16.mxu1 %vm710_vm0, %v2576_v20  ;;  %v2575_v30 = vld [vmem:[%s2821_s11 + $0x30] ss:$12 sps:$4 sm:$0xff]   ;;  %v2600_v32 = vld [vmem:[%s2821_s11 + $0xc8] ss:$12 sps:$4 sm:$0xff]   ;;  %v2578_v33 = vld [vmem:[%s2821_s11 + $0x4c] ss:$12 sps:$4 sm:$0xff]   ;;  %2419 = vmatpush3.bf16.msra.mxu1 %v2629_v59 }
  0x1c   : > { %2241 = vmatpush3.bf16.msra.mxu0 %v2556_v9  ;;  %v2593_v31 = vld [vmem:[%s2821_s11 + $0xb0] ss:$12 sps:$4 sm:$0xff]   ;;  %v2580_v34 = vld [vmem:[%s2821_s11 + $0x48] ss:$12 sps:$4 sm:$0xff]   ;;  %v2601_v35 = vld [vmem:[%s2821_s11 + $0xe0] ss:$12 sps:$4 sm:$0xff]   ;;  %2420 = vmatprep.subr.bf16.mxu1 %v2630_v61 }
  0x1d   : > { %2242 = vmatprep.subr.bf16.mxu0 %v2557_v11  ;;  %v2608_v36 = vld [vmem:[%s2821_s11 + $0xf8] ss:$12 sps:$4 sm:$0xff]   ;;  %v2609_v38 = vld [vmem:[%s2821_s11 + $0x110] ss:$12 sps:$4 sm:$0xff]   ;;  %v2583_v39 = vld [vmem:[%s2821_s11 + $0x60] ss:$12 sps:$4 sm:$0xff]  }
  0x1e   : > { %v2581_v37 = vld [vmem:[%s2821_s11 + $0x64] ss:$12 sps:$4 sm:$0xff]   ;;  %v2616_v40 = vld [vmem:[%s2821_s11 + $0x128] ss:$12 sps:$4 sm:$0xff]   ;;  %v2617_v42 = vld [vmem:[%s2821_s11 + $0x140] ss:$12 sps:$4 sm:$0xff]  }
  0x1f   : > { %v2586_v41 = vld [vmem:[%s2821_s11 + $0x7c] ss:$12 sps:$4 sm:$0xff]   ;;  %v2588_v43 = vld [vmem:[%s2821_s11 + $0x78] ss:$12 sps:$4 sm:$0xff]   ;;  %v2589_v45 = vld [vmem:[%s2821_s11 + $0x94] ss:$12 sps:$4 sm:$0xff]   ;;  %2421 = vmatpush3.bf16.msra.mxu1 %v2630_v61 }
  0x20   : > { %2243 = vmatpush3.bf16.msra.mxu0 %v2558_v12  ;;  %v2624_v44 = vld [vmem:[%s2821_s11 + $0x158] ss:$12 sps:$4 sm:$0xff]   ;;  %v2625_v46 = vld [vmem:[%s2821_s11 + $0x170] ss:$12 sps:$4 sm:$0xff]   ;;  %v2596_v49 = vld [vmem:[%s2821_s11 + $0xa8] ss:$12 sps:$4 sm:$0xff]   ;;  %2422 = vmatprep.subr.bf16.mxu1 %v2631_v63 }
  0x21   : > { %2244 = vmatprep.subr.bf16.mxu0 %v2559_v13  ;;  %v2591_v47 = vld [vmem:[%s2821_s11 + $0x90] ss:$12 sps:$4 sm:$0xff]   ;;  %v2594_v48 = vld [vmem:[%s2821_s11 + $0xac] ss:$12 sps:$4 sm:$0xff]   ;;  %v2605_v54 = vld [vmem:[%s2821_s11 + $0xf4] ss:$12 sps:$4 sm:$0xff]  }
  0x22   : > { %2391 = vmatmul.mubr.msk.bf16.gmra.mrb[4].mxu1 %vm710_vm0, %v2577_v23  ;;  %v2597_v50 = vld [vmem:[%s2821_s11 + $0xc4] ss:$12 sps:$4 sm:$0xff]   ;;  %v2599_v51 = vld [vmem:[%s2821_s11 + $0xc0] ss:$12 sps:$4 sm:$0xff]   ;;  %v2602_v52 = vld [vmem:[%s2821_s11 + $0xdc] ss:$12 sps:$4 sm:$0xff]  }
  0x23   : > { %2394 = vmatprep.mubr.msk.bf16.mxu1 %vm710_vm0, %v2584_v24  ;;  %v2604_v53 = vld [vmem:[%s2821_s11 + $0xd8] ss:$12 sps:$4 sm:$0xff]   ;;  %v2607_v55 = vld [vmem:[%s2821_s11 + $0xf0] ss:$12 sps:$4 sm:$0xff]   ;;  %v2612_v57 = vld [vmem:[%s2821_s11 + $0x108] ss:$12 sps:$4 sm:$0xff]   ;;  %2423 = vmatpush3.bf16.msra.mxu1 %v2631_v63 }
  0x24   : > { %2245 = vmatpush3.bf16.msra.mxu0 %v2560_v18  ;;  %v2610_v56 = vld [vmem:[%s2821_s11 + $0x10c] ss:$12 sps:$4 sm:$0xff]   ;;  %v2613_v58 = vld [vmem:[%s2821_s11 + $0x124] ss:$12 sps:$4 sm:$0xff]   ;;  %v2618_v62 = vld [vmem:[%s2821_s11 + $0x13c] ss:$12 sps:$4 sm:$0xff]   ;;  %2424 = vmatprep.subr.bf16.mxu1 %v2632_v1 }
  0x25   : > { %2246 = vmatprep.subr.bf16.mxu0 %v2561_v19  ;;  %v2615_v60 = vld [vmem:[%s2821_s11 + $0x120] ss:$12 sps:$4 sm:$0xff]   ;;  %v2620_v0 = vld [vmem:[%s2821_s11 + $0x138] ss:$12 sps:$4 sm:$0xff]   ;;  %v2623_v3 = vld [vmem:[%s2821_s11 + $0x150] ss:$12 sps:$4 sm:$0xff]  }
  0x26   : > { %v2621_v2 = vld [vmem:[%s2821_s11 + $0x154] ss:$12 sps:$4 sm:$0xff]   ;;  %v2626_v4 = vld [vmem:[%s2821_s11 + $0x16c] ss:$12 sps:$4 sm:$0xff]   ;;  %s2041_s27 = sshll.u32 %s229_s24, 7 }
  0x27   : > { %2425 = vmatpush3.bf16.msra.mxu1 %v2632_v1  ;;  %v2628_v5 = vld [vmem:[%s2821_s11 + $0x168] ss:$12 sps:$4 sm:$0xff]   ;;  %v2925_v14 = vld [vmem:[%s3292_s2] ss:$0 sm:$0xff]  ;;  %s3061_s18 = scalar_lea.vmem [#allocation2], %s2041_s27  }
  0x28   : > { %2247 = vmatpush3.bf16.msra.mxu0 %v2563_v21 }
  0x2a   : > { %2395 = vmatmul.mubr.msk.bf16.gmra.mrb[8].mxu1 %vm710_vm0, %v2585_v27 }
  0x2b   : > { %792 = vmatmul.mubr.bf16.vlgmr.msra.gmra.mrb[0].mxu0 %v2564_v22  ;;  %2398 = vmatprep.mubr.msk.bf16.mxu1 %vm710_vm0, %v2592_v28 }
  0x2c   : > { %799 = vmatprep.mubr.bf16.mxu0 %v2570_v25 }
  0x32   : > { %2399 = vmatmul.mubr.msk.bf16.gmra.mrb[12].mxu1 %vm710_vm0, %v2593_v31 }
  0x33   : > { %800 = vmatmul.mubr.bf16.gmra.mrb[4].mxu0 %v2572_v26  ;;  %2402 = vmatprep.mubr.msk.bf16.mxu1 %vm710_vm0, %v2600_v32 }
  0x34   : > { %807 = vmatprep.mubr.bf16.mxu0 %v2573_v29 }
  0x3a   : > { %2403 = vmatmul.mubr.msk.bf16.gmra.mrb[16].mxu1 %vm710_vm0, %v2601_v35 }
  0x3b   : > { %808 = vmatmul.mubr.bf16.gmra.mrb[8].mxu0 %v2575_v30  ;;  %2406 = vmatprep.mubr.msk.bf16.mxu1 %vm710_vm0, %v2608_v36 }
  0x3c   : > { %815 = vmatprep.mubr.bf16.mxu0 %v2578_v33 }
  0x42   : > { %2407 = vmatmul.mubr.msk.bf16.gmra.mrb[20].mxu1 %vm710_vm0, %v2609_v38 }
  0x43   : > { %816 = vmatmul.mubr.bf16.gmra.mrb[12].mxu0 %v2580_v34  ;;  %2410 = vmatprep.mubr.msk.bf16.mxu1 %vm710_vm0, %v2616_v40 }
  0x44   : > { %823 = vmatprep.mubr.bf16.mxu0 %v2581_v37 }
  0x4a   : > { %2411 = vmatmul.mubr.msk.bf16.gmra.mrb[24].mxu1 %vm710_vm0, %v2617_v42 }
  0x4b   : > { %824 = vmatmul.mubr.bf16.gmra.mrb[16].mxu0 %v2583_v39  ;;  %2414 = vmatprep.mubr.msk.bf16.mxu1 %vm710_vm0, %v2624_v44 }
  0x4c   : > { %831 = vmatprep.mubr.bf16.mxu0 %v2586_v41 }
  0x52   : > { %2415 = vmatmul.mubr.msk.bf16.gmra.mrb[28].mxu1 %vm710_vm0, %v2625_v46 }
  0x53   : > { %832 = vmatmul.mubr.bf16.gmra.mrb[20].mxu0 %v2588_v43 }
  0x54   : > { %839 = vmatprep.mubr.bf16.mxu0 %v2589_v45 }
  0x5b   : > { %840 = vmatmul.mubr.bf16.gmra.mrb[24].mxu0 %v2591_v47 }
  0x5c   : > { %847 = vmatprep.mubr.bf16.mxu0 %v2594_v48 }
  0x63   : > { %848 = vmatmul.mubr.bf16.gmra.mrb[28].mxu0 %v2596_v49 }
  0x64   : > { %855 = vmatprep.mubr.bf16.mxu0 %v2597_v50 }
  0x6b   : > { %856 = vmatmul.mubr.bf16.gmra.mrb[32].mxu0 %v2599_v51 }
  0x6c   : > { %863 = vmatprep.mubr.bf16.mxu0 %v2602_v52 }
  0x73   : > { %864 = vmatmul.mubr.bf16.gmra.mrb[36].mxu0 %v2604_v53 }
  0x74   : > { %871 = vmatprep.mubr.bf16.mxu0 %v2605_v54 }
  0x7b   : > { %872 = vmatmul.mubr.bf16.gmra.mrb[40].mxu0 %v2607_v55 }
  0x7c   : > { %879 = vmatprep.mubr.bf16.mxu0 %v2610_v56 }
  0x83   : > { %880 = vmatmul.mubr.bf16.gmra.mrb[44].mxu0 %v2612_v57 }
  0x84   : > { %887 = vmatprep.mubr.bf16.mxu0 %v2613_v58 }
  0x8b   : > { %888 = vmatmul.mubr.bf16.gmra.mrb[48].mxu0 %v2615_v60 }
  0x8c   : > { %895 = vmatprep.mubr.bf16.mxu0 %v2618_v62 }
  0x93   : > { %896 = vmatmul.mubr.bf16.gmra.mrb[52].mxu0 %v2620_v0 }
  0x94   : > { %903 = vmatprep.mubr.bf16.mxu0 %v2621_v2 }
  0x9b   : > { %904 = vmatmul.mubr.bf16.gmra.mrb[56].mxu0 %v2623_v3 }
  0x9c   : > { %911 = vmatprep.mubr.bf16.mxu0 %v2626_v4 }
  0xa3   : > { %912 = vmatmul.mubr.bf16.gmra.mrb[60].mxu0 %v2628_v5 }
  0xed   : > { %v2388_v6 = vpop.f32.mrb[0].mxu1 }
  0xee   : > { %v954_v7 = vpop.f32.mrb[1].mxu1 }
  0xef   : > { %v2389_v8 = vpop.f32.mrb[2].mxu1 }
  0xf0   : > { %v957_v9 = vpop.f32.mrb[3].mxu1 }
  0xf5   : > { %v2920_v10 = vpop.f32.mrb[4].mxu1 }
  0xf6   : > { %v970_v12 = vpop.f32.mrb[5].mxu1 }
  0xf7   : > { %v2927_v15 = vpop.f32.mrb[6].mxu1 }
  0xf8   : > { %v973_v18 = vpop.f32.mrb[7].mxu1 }
  0xfd   : > { %v2931_v24 = vpop.f32.mrb[8].mxu1 }
  0xfe   : > { %v2248_v11 = vpop.f32.mrb[0].mxu0  ;;  %v2933_v28 = vpop.f32.mrb[9].mxu1 }
  0xff   : > { %v2249_v13 = vpop.f32.mrb[1].mxu0  ;;  %v2935_v30 = vpop.f32.mrb[10].mxu1 }
 0x100   : > { %v2250_v16 = vadd.f32 %v2249_v13, %v2248_v11  ;;  %v2251_v17 = vpop.f32.mrb[2].mxu0  ;;  %v2937_v34 = vpop.f32.mrb[11].mxu1 }
 0x101   : > { %v2252_v19 = vpop.f32.mrb[3].mxu0 }
 0x102   : > { %v2253_v20 = vadd.f32 %v2252_v19, %v2251_v17  ;;  %v794_v21 = vadd.f32 %v2250_v16, %v2925_v14 }
 0x104   : > { %v955_v22 = vadd.f32 %v954_v7, %v794_v21  ;;  %v797_v23 = vadd.f32 %v2253_v20, %v2925_v14 }
 0x105   : > { %v2942_v43 = vpop.f32.mrb[12].mxu1 }
 0x106   : > { %v1113_v25 = vmul.f32 0.2, %v955_v22  ;;  %v958_v26 = vadd.f32 %v957_v9, %v797_v23  ;;  %v2254_v27 = vpop.f32.mrb[4].mxu0  ;;  %vm1081_vm1 = vcmp.ge.f32.partialorder %v955_v22, 0.0  ;;  %v2944_v47 = vpop.f32.mrb[13].mxu1 }
 0x107   : > { %v2255_v29 = vpop.f32.mrb[5].mxu0  ;;  %v2946_v49 = vpop.f32.mrb[14].mxu1 }
 0x108   : > { %vm1082_vm2 = vcmp.ge.f32.partialorder %v958_v26, 0.0  ;;  %v1114_v31 = vmul.f32 0.2, %v958_v26  ;;  %v2256_v32 = vadd.f32 %v2255_v29, %v2254_v27  ;;  %v2257_v33 = vpop.f32.mrb[6].mxu0  ;;  %v1145_v36 = vsel %vm1081_vm1, %v955_v22, %v1113_v25  ;;  %v2948_v53 = vpop.f32.mrb[15].mxu1 }
 0x109   : > { %v2258_v35 = vpop.f32.mrb[7].mxu0 }
 0x10a   : > { %v1146_v37 = vsel %vm1082_vm2, %v958_v26, %v1114_v31  ;;  %v802_v38 = vadd.f32 %v2256_v32, %v2925_v14  ;;  %v2259_v39 = vadd.f32 %v2258_v35, %v2257_v33 }
 0x10b   : > { %v1177_v40 = vpack.c.bf16 %v1146_v37, %v1145_v36 }
 0x10c   : > { %v963_v41 = vadd.f32 %v2388_v6, %v802_v38  ;;  %v805_v42 = vadd.f32 %v2259_v39, %v2925_v14 }
 0x10d   : > { %2426 = vmatprep.mubr.msk.bf16.mxu1 %vm1232_vm3, %v1177_v40  ;;  %v2953_v62 = vpop.f32.mrb[16].mxu1 }
 0x10e   : > { %v1115_v44 = vmul.f32 0.2, %v963_v41  ;;  %v966_v45 = vadd.f32 %v2389_v8, %v805_v42  ;;  %v2260_v46 = vpop.f32.mrb[8].mxu0  ;;  %vm1083_vm4 = vcmp.ge.f32.partialorder %v963_v41, 0.0  ;;  %v2955_v2 = vpop.f32.mrb[17].mxu1 }
 0x10f   : > { %v2261_v48 = vpop.f32.mrb[9].mxu0  ;;  %v2957_v4 = vpop.f32.mrb[18].mxu1 }
 0x110   : > { %vm1084_vm5 = vcmp.ge.f32.partialorder %v966_v45, 0.0  ;;  %v1116_v50 = vmul.f32 0.2, %v966_v45  ;;  %v2262_v51 = vadd.f32 %v2261_v48, %v2260_v46  ;;  %v2263_v52 = vpop.f32.mrb[10].mxu0  ;;  %v1147_v55 = vsel %vm1083_vm4, %v963_v41, %v1115_v44  ;;  %v2959_v8 = vpop.f32.mrb[19].mxu1 }
 0x111   : > { %v2264_v54 = vpop.f32.mrb[11].mxu0 }
 0x112   : > { %v1148_v56 = vsel %vm1084_vm5, %v966_v45, %v1116_v50  ;;  %v2265_v57 = vadd.f32 %v2264_v54, %v2263_v52  ;;  %v810_v58 = vadd.f32 %v2262_v51, %v2925_v14 }
 0x113   : > { %v1178_v59 = vpack.c.bf16 %v1148_v56, %v1147_v55 }
 0x114   : > { %v971_v60 = vadd.f32 %v970_v12, %v810_v58  ;;  %v813_v61 = vadd.f32 %v2265_v57, %v2925_v14 }
 0x115   : > { %2427 = vmatmul.mubr.msk.bf16.vlgmr.msra.gmra.mrb[32].mxu1 %vm1232_vm3, %v1178_v59  ;;  %v2965_v20 = vpop.f32.mrb[20].mxu1 }
 0x116   : > { %v1117_v63 = vmul.f32 0.2, %v971_v60  ;;  %v974_v0 = vadd.f32 %v973_v18, %v813_v61  ;;  %v2266_v1 = vpop.f32.mrb[12].mxu0  ;;  %vm1085_vm6 = vcmp.ge.f32.partialorder %v971_v60, 0.0  ;;  %v2968_v25 = vpop.f32.mrb[21].mxu1 }
 0x117   : > { %v2267_v3 = vpop.f32.mrb[13].mxu0  ;;  %v2970_v27 = vpop.f32.mrb[22].mxu1 }
 0x118   : > { %vm1086_vm7 = vcmp.ge.f32.partialorder %v974_v0, 0.0  ;;  %v1118_v5 = vmul.f32 0.2, %v974_v0  ;;  %v2268_v6 = vadd.f32 %v2267_v3, %v2266_v1  ;;  %v2269_v7 = vpop.f32.mrb[14].mxu0  ;;  %v1149_v11 = vsel %vm1085_vm6, %v971_v60, %v1117_v63  ;;  %v2972_v32 = vpop.f32.mrb[23].mxu1 }
 0x119   : > { %v2270_v9 = vpop.f32.mrb[15].mxu0 }
 0x11a   : > { %v1150_v12 = vsel %vm1086_vm7, %v974_v0, %v1118_v5  ;;  %v818_v13 = vadd.f32 %v2268_v6, %v2925_v14  ;;  %v2271_v16 = vadd.f32 %v2270_v9, %v2269_v7 }
 0x11b   : > { %v1179_v17 = vpack.c.bf16 %v1150_v12, %v1149_v11 }
 0x11c   : > { %v979_v18 = vadd.f32 %v2920_v10, %v818_v13  ;;  %v821_v19 = vadd.f32 %v2271_v16, %v2925_v14 }
 0x11d   : > { %2430 = vmatprep.mubr.msk.bf16.mxu1 %vm1232_vm3, %v1179_v17  ;;  %v2978_v41 = vpop.f32.mrb[24].mxu1 }
 0x11e   : > { %v1119_v21 = vmul.f32 0.2, %v979_v18  ;;  %v982_v22 = vadd.f32 %v2927_v15, %v821_v19  ;;  %v2272_v23 = vpop.f32.mrb[16].mxu0  ;;  %vm1087_vm8 = vcmp.ge.f32.partialorder %v979_v18, 0.0  ;;  %v2981_v46 = vpop.f32.mrb[25].mxu1 }
 0x11f   : > { %v2273_v26 = vpop.f32.mrb[17].mxu0  ;;  %v2983_v50 = vpop.f32.mrb[26].mxu1 }
 0x120   : > { %vm1088_vm9 = vcmp.ge.f32.partialorder %v982_v22, 0.0  ;;  %v1120_v29 = vmul.f32 0.2, %v982_v22  ;;  %v2274_v31 = vadd.f32 %v2273_v26, %v2272_v23  ;;  %v2275_v10 = vpop.f32.mrb[18].mxu0  ;;  %v1151_v37 = vsel %vm1087_vm8, %v979_v18, %v1119_v21  ;;  %v2985_v54 = vpop.f32.mrb[27].mxu1 }
 0x121   : > { %v2276_v33 = vpop.f32.mrb[19].mxu0 }
 0x122   : > { %v2277_v35 = vadd.f32 %v2276_v33, %v2275_v10  ;;  %v826_v36 = vadd.f32 %v2274_v31, %v2925_v14  ;;  %v1152_v38 = vsel %vm1088_vm9, %v982_v22, %v1120_v29 }
 0x123   : > { %v1180_v15 = vpack.c.bf16 %v1152_v38, %v1151_v37 }
 0x124   : > { %v987_v39 = vadd.f32 %v2933_v28, %v826_v36  ;;  %v829_v40 = vadd.f32 %v2277_v35, %v2925_v14 }
 0x125   : > { %2431 = vmatmul.mubr.msk.bf16.gmra.mrb[36].mxu1 %vm1232_vm3, %v1180_v15  ;;  %v2991_v63 = vpop.f32.mrb[28].mxu1 }
 0x126   : > { %v1121_v42 = vmul.f32 0.2, %v987_v39  ;;  %v990_v44 = vadd.f32 %v2937_v34, %v829_v40  ;;  %v2278_v45 = vpop.f32.mrb[20].mxu0  ;;  %vm1089_vm10 = vcmp.ge.f32.partialorder %v987_v39, 0.0  ;;  %v2994_v5 = vpop.f32.mrb[29].mxu1 }
 0x127   : > { %v2279_v48 = vpop.f32.mrb[21].mxu0  ;;  %v2996_v7 = vpop.f32.mrb[30].mxu1 }
 0x128   : > { %vm1090_vm11 = vcmp.ge.f32.partialorder %v990_v44, 0.0  ;;  %v1122_v51 = vmul.f32 0.2, %v990_v44  ;;  %v2280_v52 = vadd.f32 %v2279_v48, %v2278_v45  ;;  %v2281_v28 = vpop.f32.mrb[22].mxu0  ;;  %v1153_v56 = vsel %vm1089_vm10, %v987_v39, %v1121_v42  ;;  %v2998_v12 = vpop.f32.mrb[31].mxu1 }
 0x129   : > { %v2282_v55 = vpop.f32.mrb[23].mxu0 }
 0x12a   : > { %v1154_v57 = vsel %vm1090_vm11, %v990_v44, %v1122_v51  ;;  %v834_v58 = vadd.f32 %v2280_v52, %v2925_v14  ;;  %v2283_v59 = vadd.f32 %v2282_v55, %v2281_v28 }
 0x12b   : > { %v1181_v34 = vpack.c.bf16 %v1154_v57, %v1153_v56 }
 0x12c   : > { %v995_v60 = vadd.f32 %v2931_v24, %v834_v58  ;;  %v837_v61 = vadd.f32 %v2283_v59, %v2925_v14 }
 0x12d   : > { %2434 = vmatprep.mubr.msk.bf16.mxu1 %vm1232_vm3, %v1181_v34 }
 0x12e   : > { %v1123_v0 = vmul.f32 0.2, %v995_v60  ;;  %v998_v1 = vadd.f32 %v2935_v30, %v837_v61  ;;  %v2284_v3 = vpop.f32.mrb[24].mxu0  ;;  %vm1091_vm12 = vcmp.ge.f32.partialorder %v995_v60, 0.0 }
 0x12f   : > { %v2285_v6 = vpop.f32.mrb[25].mxu0 }
 0x130   : > { %vm1092_vm13 = vcmp.ge.f32.partialorder %v998_v1, 0.0  ;;  %v1124_v9 = vmul.f32 0.2, %v998_v1  ;;  %v2286_v11 = vadd.f32 %v2285_v6, %v2284_v3  ;;  %v2287_v24 = vpop.f32.mrb[26].mxu0  ;;  %v1155_v18 = vsel %vm1091_vm12, %v995_v60, %v1123_v0 }
 0x131   : > { %v2288_v13 = vpop.f32.mrb[27].mxu0 }
 0x132   : > { %v2289_v16 = vadd.f32 %v2288_v13, %v2287_v24  ;;  %v842_v17 = vadd.f32 %v2286_v11, %v2925_v14  ;;  %v1156_v19 = vsel %vm1092_vm13, %v998_v1, %v1124_v9 }
 0x133   : > { %v1182_v30 = vpack.c.bf16 %v1156_v19, %v1155_v18 }
 0x134   : > { %v1003_v21 = vadd.f32 %v2944_v47, %v842_v17  ;;  %v845_v22 = vadd.f32 %v2289_v16, %v2925_v14 }
 0x135   : > { %2435 = vmatmul.mubr.msk.bf16.gmra.mrb[40].mxu1 %vm1232_vm3, %v1182_v30 }
 0x136   : > { %v1125_v23 = vmul.f32 0.2, %v1003_v21  ;;  %v1006_v26 = vadd.f32 %v2948_v53, %v845_v22  ;;  %v2290_v29 = vpop.f32.mrb[28].mxu0  ;;  %vm1093_vm14 = vcmp.ge.f32.partialorder %v1003_v21, 0.0 }
 0x137   : > { %v2291_v31 = vpop.f32.mrb[29].mxu0 }
 0x138   : > { %vm1094_vm15 = vcmp.ge.f32.partialorder %v1006_v26, 0.0  ;;  %v1126_v10 = vmul.f32 0.2, %v1006_v26  ;;  %v2292_v33 = vadd.f32 %v2291_v31, %v2290_v29  ;;  %v2293_v35 = vpop.f32.mrb[30].mxu0  ;;  %v1157_v37 = vsel %vm1093_vm14, %v1003_v21, %v1125_v23 }
 0x139   : > { %v2294_v36 = vpop.f32.mrb[31].mxu0 }
 0x13a   : > { %v1158_v38 = vsel %vm1094_vm15, %v1006_v26, %v1126_v10  ;;  %v850_v15 = vadd.f32 %v2292_v33, %v2925_v14  ;;  %v2295_v47 = vadd.f32 %v2294_v36, %v2293_v35 }
 0x13b   : > { %v1183_v39 = vpack.c.bf16 %v1158_v38, %v1157_v37 }
 0x13c   : > { %v1011_v40 = vadd.f32 %v2942_v43, %v850_v15  ;;  %v853_v42 = vadd.f32 %v2295_v47, %v2925_v14 }
 0x13d   : > { %2438 = vmatprep.mubr.msk.bf16.mxu1 %vm1232_vm3, %v1183_v39 }
 0x13e   : > { %v1127_v53 = vmul.f32 0.2, %v1011_v40  ;;  %v1014_v44 = vadd.f32 %v2946_v49, %v853_v42  ;;  %v2296_v45 = vpop.f32.mrb[32].mxu0  ;;  %vm1095_vm0 = vcmp.ge.f32.partialorder %v1011_v40, 0.0 }
 0x13f   : > { %v2297_v48 = vpop.f32.mrb[33].mxu0 }
 0x140   : > { %vm1096_vm1 = vcmp.ge.f32.partialorder %v1014_v44, 0.0  ;;  %v1128_v51 = vmul.f32 0.2, %v1014_v44  ;;  %v2298_v52 = vadd.f32 %v2297_v48, %v2296_v45  ;;  %v2299_v28 = vpop.f32.mrb[34].mxu0  ;;  %v1159_v58 = vsel %vm1095_vm0, %v1011_v40, %v1127_v53 }
 0x141   : > { %v2300_v55 = vpop.f32.mrb[35].mxu0 }
 0x142   : > { %v2301_v56 = vadd.f32 %v2300_v55, %v2299_v28  ;;  %v858_v57 = vadd.f32 %v2298_v52, %v2925_v14  ;;  %v1160_v43 = vsel %vm1096_vm1, %v1014_v44, %v1128_v51 }
 0x143   : > { %v1184_v59 = vpack.c.bf16 %v1160_v43, %v1159_v58 }
 0x144   : > { %v1019_v34 = vadd.f32 %v2955_v2, %v858_v57  ;;  %v861_v60 = vadd.f32 %v2301_v56, %v2925_v14 }
 0x145   : > { %2439 = vmatmul.mubr.msk.bf16.gmra.mrb[44].mxu1 %vm1232_vm3, %v1184_v59 }
 0x146   : > { %v1129_v49 = vmul.f32 0.2, %v1019_v34  ;;  %v1022_v61 = vadd.f32 %v2959_v8, %v861_v60  ;;  %v2302_v0 = vpop.f32.mrb[36].mxu0  ;;  %vm1097_vm2 = vcmp.ge.f32.partialorder %v1019_v34, 0.0 }
 0x147   : > { %v2303_v1 = vpop.f32.mrb[37].mxu0 }
 0x148   : > { %vm1098_vm4 = vcmp.ge.f32.partialorder %v1022_v61, 0.0  ;;  %v1130_v3 = vmul.f32 0.2, %v1022_v61  ;;  %v2304_v6 = vadd.f32 %v2303_v1, %v2302_v0  ;;  %v2305_v9 = vpop.f32.mrb[38].mxu0  ;;  %v1161_v24 = vsel %vm1097_vm2, %v1019_v34, %v1129_v49 }
 0x149   : > { %v2306_v11 = vpop.f32.mrb[39].mxu0 }
 0x14a   : > { %v1162_v13 = vsel %vm1098_vm4, %v1022_v61, %v1130_v3  ;;  %v866_v16 = vadd.f32 %v2304_v6, %v2925_v14  ;;  %v2307_v2 = vadd.f32 %v2306_v11, %v2305_v9 }
 0x14b   : > { %v1185_v17 = vpack.c.bf16 %v1162_v13, %v1161_v24 }
 0x14c   : > { %v1027_v18 = vadd.f32 %v2953_v62, %v866_v16  ;;  %v869_v19 = vadd.f32 %v2307_v2, %v2925_v14 }
 0x14d   : > { %2442 = vmatprep.mubr.msk.bf16.mxu1 %vm1232_vm3, %v1185_v17 }
 0x14e   : > { %v1131_v8 = vmul.f32 0.2, %v1027_v18  ;;  %v1030_v30 = vadd.f32 %v2957_v4, %v869_v19  ;;  %v2308_v21 = vpop.f32.mrb[40].mxu0  ;;  %vm1099_vm5 = vcmp.ge.f32.partialorder %v1027_v18, 0.0 }
 0x14f   : > { %v2309_v22 = vpop.f32.mrb[41].mxu0 }
 0x150   : > { %vm1100_vm6 = vcmp.ge.f32.partialorder %v1030_v30, 0.0  ;;  %v1132_v23 = vmul.f32 0.2, %v1030_v30  ;;  %v2310_v26 = vadd.f32 %v2309_v22, %v2308_v21  ;;  %v2311_v29 = vpop.f32.mrb[42].mxu0  ;;  %v1163_v35 = vsel %vm1099_vm5, %v1027_v18, %v1131_v8 }
 0x151   : > { %v2312_v31 = vpop.f32.mrb[43].mxu0  ;;  %vm1666_vm5 = vcmask 519168  }
 0x152   : > { %v2313_v10 = vadd.f32 %v2312_v31, %v2311_v29  ;;  %v874_v33 = vadd.f32 %v2310_v26, %v2925_v14  ;;  %v1164_v62 = vsel %vm1100_vm6, %v1030_v30, %v1132_v23 }
 0x153   : > { %v1186_v36 = vpack.c.bf16 %v1164_v62, %v1163_v35 }
 0x154   : > { %v1035_v37 = vadd.f32 %v2968_v25, %v874_v33  ;;  %v877_v38 = vadd.f32 %v2313_v10, %v2925_v14 }
 0x155   : > { %2443 = vmatmul.mubr.msk.bf16.gmra.mrb[48].mxu1 %vm1232_vm3, %v1186_v36 }
 0x156   : > { %v1133_v4 = vmul.f32 0.2, %v1035_v37  ;;  %v1038_v15 = vadd.f32 %v2972_v32, %v877_v38  ;;  %v2314_v47 = vpop.f32.mrb[44].mxu0  ;;  %vm1101_vm7 = vcmp.ge.f32.partialorder %v1035_v37, 0.0 }
 0x157   : > { %v2315_v39 = vpop.f32.mrb[45].mxu0 }
 0x158   : > { %vm1102_vm8 = vcmp.ge.f32.partialorder %v1038_v15, 0.0  ;;  %v1134_v40 = vmul.f32 0.2, %v1038_v15  ;;  %v2316_v42 = vadd.f32 %v2315_v39, %v2314_v47  ;;  %v2317_v53 = vpop.f32.mrb[46].mxu0  ;;  %v1165_v45 = vsel %vm1101_vm7, %v1035_v37, %v1133_v4 }
 0x159   : > { %v2318_v44 = vpop.f32.mrb[47].mxu0 }
 0x15a   : > { %v1166_v48 = vsel %vm1102_vm8, %v1038_v15, %v1134_v40  ;;  %v882_v51 = vadd.f32 %v2316_v42, %v2925_v14  ;;  %v2319_v25 = vadd.f32 %v2318_v44, %v2317_v53 }
 0x15b   : > { %v1187_v52 = vpack.c.bf16 %v1166_v48, %v1165_v45 }
 0x15c   : > { %v1043_v28 = vadd.f32 %v2965_v20, %v882_v51  ;;  %v885_v55 = vadd.f32 %v2319_v25, %v2925_v14 }
 0x15d   : > { %2446 = vmatprep.mubr.msk.bf16.mxu1 %vm1232_vm3, %v1187_v52 }
 0x15e   : > { %v1135_v32 = vmul.f32 0.2, %v1043_v28  ;;  %v1046_v56 = vadd.f32 %v2970_v27, %v885_v55  ;;  %v2320_v57 = vpop.f32.mrb[48].mxu0  ;;  %vm1103_vm9 = vcmp.ge.f32.partialorder %v1043_v28, 0.0 }
 0x15f   : > { %v2321_v58 = vpop.f32.mrb[49].mxu0 }
 0x160   : > { %vm1104_vm10 = vcmp.ge.f32.partialorder %v1046_v56, 0.0  ;;  %v1136_v43 = vmul.f32 0.2, %v1046_v56  ;;  %v2322_v59 = vadd.f32 %v2321_v58, %v2320_v57  ;;  %v2323_v34 = vpop.f32.mrb[50].mxu0  ;;  %v1167_v0 = vsel %vm1103_vm9, %v1043_v28, %v1135_v32 }
 0x161   : > { %v2324_v60 = vpop.f32.mrb[51].mxu0 }
 0x162   : > { %v2325_v49 = vadd.f32 %v2324_v60, %v2323_v34  ;;  %v890_v61 = vadd.f32 %v2322_v59, %v2925_v14  ;;  %v1168_v20 = vsel %vm1104_vm10, %v1046_v56, %v1136_v43  ;;  %v3054_v59 = vld [vmem:[%s3294_s4] ss:$0 sm:$0xff] }
 0x163   : > { %v1188_v1 = vpack.c.bf16 %v1168_v20, %v1167_v0 }
 0x164   : > { %v1051_v3 = vadd.f32 %v2981_v46, %v890_v61  ;;  %v893_v6 = vadd.f32 %v2325_v49, %v2925_v14 }
 0x165   : > { %2447 = vmatmul.mubr.msk.bf16.gmra.mrb[52].mxu1 %vm1232_vm3, %v1188_v1 }
 0x166   : > { %v1137_v27 = vmul.f32 0.2, %v1051_v3  ;;  %v1054_v9 = vadd.f32 %v2985_v54, %v893_v6  ;;  %v2326_v11 = vpop.f32.mrb[52].mxu0  ;;  %vm1105_vm11 = vcmp.ge.f32.partialorder %v1051_v3, 0.0 }
 0x167   : > { %v2327_v24 = vpop.f32.mrb[53].mxu0 }
 0x168   : > { %vm1106_vm12 = vcmp.ge.f32.partialorder %v1054_v9, 0.0  ;;  %v1138_v13 = vmul.f32 0.2, %v1054_v9  ;;  %v2328_v16 = vadd.f32 %v2327_v24, %v2326_v11  ;;  %v2329_v2 = vpop.f32.mrb[54].mxu0  ;;  %v1169_v18 = vsel %vm1105_vm11, %v1051_v3, %v1137_v27 }
 0x169   : > { %v2330_v17 = vpop.f32.mrb[55].mxu0 }
 0x16a   : > { %v1170_v19 = vsel %vm1106_vm12, %v1054_v9, %v1138_v13  ;;  %v898_v8 = vadd.f32 %v2328_v16, %v2925_v14  ;;  %v2331_v46 = vadd.f32 %v2330_v17, %v2329_v2 }
 0x16b   : > { %v1189_v30 = vpack.c.bf16 %v1170_v19, %v1169_v18 }
 0x16c   : > { %v1059_v21 = vadd.f32 %v2978_v41, %v898_v8  ;;  %v901_v22 = vadd.f32 %v2331_v46, %v2925_v14 }
 0x16d   : > { %2450 = vmatprep.mubr.msk.bf16.mxu1 %vm1232_vm3, %v1189_v30 }
 0x16e   : > { %v1139_v54 = vmul.f32 0.2, %v1059_v21  ;;  %v1062_v23 = vadd.f32 %v2983_v50, %v901_v22  ;;  %v2332_v26 = vpop.f32.mrb[56].mxu0  ;;  %vm1107_vm13 = vcmp.ge.f32.partialorder %v1059_v21, 0.0 }
 0x16f   : > { %v2333_v29 = vpop.f32.mrb[57].mxu0 }
 0x170   : > { %vm1108_vm14 = vcmp.ge.f32.partialorder %v1062_v23, 0.0  ;;  %v1140_v31 = vmul.f32 0.2, %v1062_v23  ;;  %v2334_v10 = vadd.f32 %v2333_v29, %v2332_v26  ;;  %v2335_v33 = vpop.f32.mrb[58].mxu0  ;;  %v1171_v37 = vsel %vm1107_vm13, %v1059_v21, %v1139_v54 }
 0x171   : > { %v2336_v35 = vpop.f32.mrb[59].mxu0 }
 0x172   : > { %v2337_v62 = vadd.f32 %v2336_v35, %v2335_v33  ;;  %v906_v36 = vadd.f32 %v2334_v10, %v2925_v14  ;;  %v1172_v41 = vsel %vm1108_vm14, %v1062_v23, %v1140_v31 }
 0x173   : > { %v1190_v38 = vpack.c.bf16 %v1172_v41, %v1171_v37 }
 0x174   : > { %v1067_v4 = vadd.f32 %v2994_v5, %v906_v36  ;;  %v909_v15 = vadd.f32 %v2337_v62, %v2925_v14 }
 0x175   : > { %2451 = vmatmul.mubr.msk.bf16.gmra.mrb[56].mxu1 %vm1232_vm3, %v1190_v38 }
 0x176   : > { %v1141_v50 = vmul.f32 0.2, %v1067_v4  ;;  %v1070_v47 = vadd.f32 %v2998_v12, %v909_v15  ;;  %v2338_v39 = vpop.f32.mrb[60].mxu0  ;;  %vm1109_vm15 = vcmp.ge.f32.partialorder %v1067_v4, 0.0 }
 0x177   : > { %v2339_v40 = vpop.f32.mrb[61].mxu0 }
 0x178   : > { %vm1110_vm0 = vcmp.ge.f32.partialorder %v1070_v47, 0.0  ;;  %v1142_v42 = vmul.f32 0.2, %v1070_v47  ;;  %v2340_v53 = vadd.f32 %v2339_v40, %v2338_v39  ;;  %v2341_v44 = vpop.f32.mrb[62].mxu0  ;;  %v1173_v48 = vsel %vm1109_vm15, %v1067_v4, %v1141_v50 }
 0x179   : > { %v2342_v45 = vpop.f32.mrb[63].mxu0 }
 0x17a   : > { %v1174_v51 = vsel %vm1110_vm0, %v1070_v47, %v1142_v42  ;;  %v914_v25 = vadd.f32 %v2340_v53, %v2925_v14  ;;  %v2343_v5 = vadd.f32 %v2342_v45, %v2341_v44 }
 0x17b   : > { %v1191_v52 = vpack.c.bf16 %v1174_v51, %v1173_v48 }
 0x17c   : > { %v1075_v28 = vadd.f32 %v2991_v63, %v914_v25  ;;  %v917_v55 = vadd.f32 %v2343_v5, %v2925_v14 }
 0x17d   : > { %2454 = vmatprep.mubr.msk.bf16.mxu1 %vm1232_vm3, %v1191_v52 }
 0x17e   : > { %v1143_v12 = vmul.f32 0.2, %v1075_v28  ;;  %v1078_v32 = vadd.f32 %v2996_v7, %v917_v55  ;;  %vm1111_vm1 = vcmp.ge.f32.partialorder %v1075_v28, 0.0 }
 0x180   : > { %vm1112_vm2 = vcmp.ge.f32.partialorder %v1078_v32, 0.0  ;;  %v1144_v56 = vmul.f32 0.2, %v1078_v32  ;;  %v1175_v57 = vsel %vm1111_vm1, %v1075_v28, %v1143_v12 }
 0x182   : > { %v1176_v58 = vsel %vm1112_vm2, %v1078_v32, %v1144_v56 }
 0x183   : > { %v1192_v43 = vpack.c.bf16 %v1176_v58, %v1175_v57 }
 0x185   : > { %2455 = vmatmul.mubr.msk.bf16.gmra.mrb[60].mxu1 %vm1232_vm3, %v1192_v43 }
 0x1e8   : > { %v2428_v14 = vpop.f32.mrb[32].mxu1 }
 0x1e9   : > { %v1324_v63 = vadd.f32 %v2428_v14, %v3054_v59  ;;  %v1315_v34 = vpop.f32.mrb[33].mxu1 }
 0x1ea   : > { %v1316_v7 = vadd.f32 %v3054_v59, %v1315_v34  ;;  %v2429_v60 = vpop.f32.mrb[34].mxu1 }
 0x1eb   : > { %vm1444_vm4 = vcmp.ge.f32.partialorder %v1324_v63, 0.0  ;;  %v1476_v49 = vmul.f32 0.2, %v1324_v63  ;;  %v1327_v61 = vadd.f32 %v2429_v60, %v3054_v59  ;;  %v1318_v0 = vpop.f32.mrb[35].mxu1 }
 0x1ec   : > { %vm1442_vm3 = vcmp.ge.f32.partialorder %v1316_v7, 0.0  ;;  %v1474_v20 = vmul.f32 0.2, %v1316_v7  ;;  %v1319_v1 = vadd.f32 %v3054_v59, %v1318_v0 }
 0x1ed   : > { %v1508_v3 = vsel %vm1444_vm4, %v1324_v63, %v1476_v49  ;;  %vm1445_vm6 = vcmp.ge.f32.partialorder %v1327_v61, 0.0  ;;  %v1477_v6 = vmul.f32 0.2, %v1327_v61 }
 0x1ee   : > { %v2199_v27 = vpack.c.bf16 %v1508_v3, %v1508_v3  ;;  %v1506_v9 = vsel %vm1442_vm3, %v1316_v7, %v1474_v20  ;;  %vm1443_vm7 = vcmp.ge.f32.partialorder %v1319_v1, 0.0  ;;  %v1475_v11 = vmul.f32 0.2, %v1319_v1 }
 0x1ef   : > { %v2197_v24 = vpack.c.bf16 %v1506_v9, %v1506_v9  ;;  %v1509_v13 = vsel %vm1445_vm6, %v1327_v61, %v1477_v6 }
 0x1f0   : > { %1669 = vst.msk [vmem:[%s3061_s18 + $0x8] sm:$0xf] %vm1666_vm5, %v2199_v27  ;;  %v2200_v16 = vpack.c.bf16 %v1509_v13, %v1509_v13  ;;  %v1507_v2 = vsel %vm1443_vm7, %v1319_v1, %v1475_v11 }
 0x1f1   : > { %1667 = vst.msk [vmem:[%s3061_s18] sm:$0xf] %vm1666_vm5, %v2197_v24  ;;  %v2198_v17 = vpack.c.bf16 %v1507_v2, %v1507_v2 }
 0x1f2   : > { %1670 = vst.msk [vmem:[%s3061_s18 + $0xc] sm:$0xf] %vm1666_vm5, %v2200_v16 }
 0x1f3   : > { %1668 = vst.msk [vmem:[%s3061_s18 + $0x4] sm:$0xf] %vm1666_vm5, %v2198_v17 }
 0x1f8   : > { %v2432_v18 = vpop.f32.mrb[36].mxu1 }
 0x1f9   : > { %v1340_v19 = vadd.f32 %v2432_v18, %v3054_v59  ;;  %v1331_v8 = vpop.f32.mrb[37].mxu1 }
 0x1fa   : > { %v1332_v46 = vadd.f32 %v3054_v59, %v1331_v8  ;;  %v2433_v30 = vpop.f32.mrb[38].mxu1 }
 0x1fb   : > { %vm1448_vm8 = vcmp.ge.f32.partialorder %v1340_v19, 0.0  ;;  %v1480_v21 = vmul.f32 0.2, %v1340_v19  ;;  %v1343_v22 = vadd.f32 %v2433_v30, %v3054_v59  ;;  %v1334_v54 = vpop.f32.mrb[39].mxu1 }
 0x1fc   : > { %vm1446_vm9 = vcmp.ge.f32.partialorder %v1332_v46, 0.0  ;;  %v1478_v23 = vmul.f32 0.2, %v1332_v46  ;;  %v1335_v26 = vadd.f32 %v3054_v59, %v1334_v54 }
 0x1fd   : > { %v1512_v29 = vsel %vm1448_vm8, %v1340_v19, %v1480_v21  ;;  %vm1449_vm10 = vcmp.ge.f32.partialorder %v1343_v22, 0.0  ;;  %v1481_v31 = vmul.f32 0.2, %v1343_v22 }
 0x1fe   : > { %v2203_v10 = vpack.c.bf16 %v1512_v29, %v1512_v29  ;;  %v1510_v33 = vsel %vm1446_vm9, %v1332_v46, %v1478_v23  ;;  %vm1447_vm11 = vcmp.ge.f32.partialorder %v1335_v26, 0.0  ;;  %v1479_v35 = vmul.f32 0.2, %v1335_v26 }
 0x1ff   : > { %v2201_v62 = vpack.c.bf16 %v1510_v33, %v1510_v33  ;;  %v1513_v36 = vsel %vm1449_vm10, %v1343_v22, %v1481_v31 }
 0x200   : > { %1673 = vst.msk [vmem:[%s3061_s18 + $0x18] sm:$0xf] %vm1666_vm5, %v2203_v10  ;;  %v2204_v37 = vpack.c.bf16 %v1513_v36, %v1513_v36  ;;  %v1511_v41 = vsel %vm1447_vm11, %v1335_v26, %v1479_v35 }
 0x201   : > { %1671 = vst.msk [vmem:[%s3061_s18 + $0x10] sm:$0xf] %vm1666_vm5, %v2201_v62  ;;  %v2202_v38 = vpack.c.bf16 %v1511_v41, %v1511_v41 }
 0x202   : > { %1674 = vst.msk [vmem:[%s3061_s18 + $0x1c] sm:$0xf] %vm1666_vm5, %v2204_v37 }
 0x203   : > { %1672 = vst.msk [vmem:[%s3061_s18 + $0x14] sm:$0xf] %vm1666_vm5, %v2202_v38 }
 0x208   : > { %v2436_v4 = vpop.f32.mrb[40].mxu1 }
 0x209   : > { %v1356_v15 = vadd.f32 %v2436_v4, %v3054_v59  ;;  %v1347_v50 = vpop.f32.mrb[41].mxu1 }
 0x20a   : > { %v1348_v47 = vadd.f32 %v3054_v59, %v1347_v50  ;;  %v2437_v39 = vpop.f32.mrb[42].mxu1 }
 0x20b   : > { %vm1452_vm12 = vcmp.ge.f32.partialorder %v1356_v15, 0.0  ;;  %v1484_v40 = vmul.f32 0.2, %v1356_v15  ;;  %v1359_v42 = vadd.f32 %v2437_v39, %v3054_v59  ;;  %v1350_v53 = vpop.f32.mrb[43].mxu1 }
 0x20c   : > { %vm1450_vm13 = vcmp.ge.f32.partialorder %v1348_v47, 0.0  ;;  %v1482_v44 = vmul.f32 0.2, %v1348_v47  ;;  %v1351_v45 = vadd.f32 %v3054_v59, %v1350_v53 }
 0x20d   : > { %v1516_v48 = vsel %vm1452_vm12, %v1356_v15, %v1484_v40  ;;  %vm1453_vm14 = vcmp.ge.f32.partialorder %v1359_v42, 0.0  ;;  %v1485_v51 = vmul.f32 0.2, %v1359_v42 }
 0x20e   : > { %v2207_v25 = vpack.c.bf16 %v1516_v48, %v1516_v48  ;;  %v1514_v5 = vsel %vm1450_vm13, %v1348_v47, %v1482_v44  ;;  %vm1451_vm15 = vcmp.ge.f32.partialorder %v1351_v45, 0.0  ;;  %v1483_v52 = vmul.f32 0.2, %v1351_v45 }
 0x20f   : > { %v2205_v28 = vpack.c.bf16 %v1514_v5, %v1514_v5  ;;  %v1517_v55 = vsel %vm1453_vm14, %v1359_v42, %v1485_v51 }
 0x210   : > { %1677 = vst.msk [vmem:[%s3061_s18 + $0x28] sm:$0xf] %vm1666_vm5, %v2207_v25  ;;  %v2208_v12 = vpack.c.bf16 %v1517_v55, %v1517_v55  ;;  %v1515_v32 = vsel %vm1451_vm15, %v1351_v45, %v1483_v52 }
 0x211   : > { %1675 = vst.msk [vmem:[%s3061_s18 + $0x20] sm:$0xf] %vm1666_vm5, %v2205_v28  ;;  %v2206_v56 = vpack.c.bf16 %v1515_v32, %v1515_v32 }
 0x212   : > { %1678 = vst.msk [vmem:[%s3061_s18 + $0x2c] sm:$0xf] %vm1666_vm5, %v2208_v12 }
 0x213   : > { %1676 = vst.msk [vmem:[%s3061_s18 + $0x24] sm:$0xf] %vm1666_vm5, %v2206_v56 }
 0x218   : > { %v2440_v57 = vpop.f32.mrb[44].mxu1 }
 0x219   : > { %v1372_v58 = vadd.f32 %v2440_v57, %v3054_v59  ;;  %v1363_v43 = vpop.f32.mrb[45].mxu1 }
 0x21a   : > { %v1364_v14 = vadd.f32 %v3054_v59, %v1363_v43  ;;  %v2441_v63 = vpop.f32.mrb[46].mxu1 }
 0x21b   : > { %vm1456_vm0 = vcmp.ge.f32.partialorder %v1372_v58, 0.0  ;;  %v1488_v34 = vmul.f32 0.2, %v1372_v58  ;;  %v1375_v7 = vadd.f32 %v2441_v63, %v3054_v59  ;;  %v1366_v60 = vpop.f32.mrb[47].mxu1 }
 0x21c   : > { %vm1454_vm1 = vcmp.ge.f32.partialorder %v1364_v14, 0.0  ;;  %v1486_v49 = vmul.f32 0.2, %v1364_v14  ;;  %v1367_v61 = vadd.f32 %v3054_v59, %v1366_v60 }
 0x21d   : > { %v1520_v0 = vsel %vm1456_vm0, %v1372_v58, %v1488_v34  ;;  %vm1457_vm2 = vcmp.ge.f32.partialorder %v1375_v7, 0.0  ;;  %v1489_v20 = vmul.f32 0.2, %v1375_v7 }
 0x21e   : > { %v2211_v1 = vpack.c.bf16 %v1520_v0, %v1520_v0  ;;  %v1518_v3 = vsel %vm1454_vm1, %v1364_v14, %v1486_v49  ;;  %vm1455_vm4 = vcmp.ge.f32.partialorder %v1367_v61, 0.0  ;;  %v1487_v6 = vmul.f32 0.2, %v1367_v61 }
 0x21f   : > { %v2209_v27 = vpack.c.bf16 %v1518_v3, %v1518_v3  ;;  %v1521_v9 = vsel %vm1457_vm2, %v1375_v7, %v1489_v20 }
 0x220   : > { %1681 = vst.msk [vmem:[%s3061_s18 + $0x38] sm:$0xf] %vm1666_vm5, %v2211_v1  ;;  %v2212_v11 = vpack.c.bf16 %v1521_v9, %v1521_v9  ;;  %v1519_v24 = vsel %vm1455_vm4, %v1367_v61, %v1487_v6 }
 0x221   : > { %1679 = vst.msk [vmem:[%s3061_s18 + $0x30] sm:$0xf] %vm1666_vm5, %v2209_v27  ;;  %v2210_v13 = vpack.c.bf16 %v1519_v24, %v1519_v24 }
 0x222   : > { %1682 = vst.msk [vmem:[%s3061_s18 + $0x3c] sm:$0xf] %vm1666_vm5, %v2212_v11 }
 0x223   : > { %1680 = vst.msk [vmem:[%s3061_s18 + $0x34] sm:$0xf] %vm1666_vm5, %v2210_v13 }
 0x228   : > { %v2444_v16 = vpop.f32.mrb[48].mxu1 }
 0x229   : > { %v1388_v2 = vadd.f32 %v2444_v16, %v3054_v59  ;;  %v1379_v17 = vpop.f32.mrb[49].mxu1 }
 0x22a   : > { %v1380_v18 = vadd.f32 %v3054_v59, %v1379_v17  ;;  %v2445_v19 = vpop.f32.mrb[50].mxu1 }
 0x22b   : > { %vm1460_vm3 = vcmp.ge.f32.partialorder %v1388_v2, 0.0  ;;  %v1492_v8 = vmul.f32 0.2, %v1388_v2  ;;  %v1391_v46 = vadd.f32 %v2445_v19, %v3054_v59  ;;  %v1382_v30 = vpop.f32.mrb[51].mxu1 }
 0x22c   : > { %vm1458_vm6 = vcmp.ge.f32.partialorder %v1380_v18, 0.0  ;;  %v1490_v21 = vmul.f32 0.2, %v1380_v18  ;;  %v1383_v22 = vadd.f32 %v3054_v59, %v1382_v30 }
 0x22d   : > { %v1524_v54 = vsel %vm1460_vm3, %v1388_v2, %v1492_v8  ;;  %vm1461_vm7 = vcmp.ge.f32.partialorder %v1391_v46, 0.0  ;;  %v1493_v23 = vmul.f32 0.2, %v1391_v46 }
 0x22e   : > { %v2215_v26 = vpack.c.bf16 %v1524_v54, %v1524_v54  ;;  %v1522_v29 = vsel %vm1458_vm6, %v1380_v18, %v1490_v21  ;;  %vm1459_vm8 = vcmp.ge.f32.partialorder %v1383_v22, 0.0  ;;  %v1491_v31 = vmul.f32 0.2, %v1383_v22 }
 0x22f   : > { %v2213_v10 = vpack.c.bf16 %v1522_v29, %v1522_v29  ;;  %v1525_v33 = vsel %vm1461_vm7, %v1391_v46, %v1493_v23 }
 0x230   : > { %1685 = vst.msk [vmem:[%s3061_s18 + $0x48] sm:$0xf] %vm1666_vm5, %v2215_v26  ;;  %v2216_v35 = vpack.c.bf16 %v1525_v33, %v1525_v33  ;;  %v1523_v62 = vsel %vm1459_vm8, %v1383_v22, %v1491_v31 }
 0x231   : > { %1683 = vst.msk [vmem:[%s3061_s18 + $0x40] sm:$0xf] %vm1666_vm5, %v2213_v10  ;;  %v2214_v36 = vpack.c.bf16 %v1523_v62, %v1523_v62 }
 0x232   : > { %1686 = vst.msk [vmem:[%s3061_s18 + $0x4c] sm:$0xf] %vm1666_vm5, %v2216_v35 }
 0x233   : > { %1684 = vst.msk [vmem:[%s3061_s18 + $0x44] sm:$0xf] %vm1666_vm5, %v2214_v36 }
 0x238   : > { %v2448_v37 = vpop.f32.mrb[52].mxu1 }
 0x239   : > { %v1404_v41 = vadd.f32 %v2448_v37, %v3054_v59  ;;  %v1395_v38 = vpop.f32.mrb[53].mxu1 }
 0x23a   : > { %v1396_v4 = vadd.f32 %v3054_v59, %v1395_v38  ;;  %v2449_v15 = vpop.f32.mrb[54].mxu1 }
 0x23b   : > { %vm1464_vm9 = vcmp.ge.f32.partialorder %v1404_v41, 0.0  ;;  %v1496_v50 = vmul.f32 0.2, %v1404_v41  ;;  %v1407_v47 = vadd.f32 %v2449_v15, %v3054_v59  ;;  %v1398_v39 = vpop.f32.mrb[55].mxu1 }
 0x23c   : > { %vm1462_vm10 = vcmp.ge.f32.partialorder %v1396_v4, 0.0  ;;  %v1494_v40 = vmul.f32 0.2, %v1396_v4  ;;  %v1399_v42 = vadd.f32 %v3054_v59, %v1398_v39 }
 0x23d   : > { %v1528_v53 = vsel %vm1464_vm9, %v1404_v41, %v1496_v50  ;;  %vm1465_vm11 = vcmp.ge.f32.partialorder %v1407_v47, 0.0  ;;  %v1497_v44 = vmul.f32 0.2, %v1407_v47 }
 0x23e   : > { %v2219_v45 = vpack.c.bf16 %v1528_v53, %v1528_v53  ;;  %v1526_v48 = vsel %vm1462_vm10, %v1396_v4, %v1494_v40  ;;  %vm1463_vm12 = vcmp.ge.f32.partialorder %v1399_v42, 0.0  ;;  %v1495_v51 = vmul.f32 0.2, %v1399_v42 }
 0x23f   : > { %v2217_v25 = vpack.c.bf16 %v1526_v48, %v1526_v48  ;;  %v1529_v5 = vsel %vm1465_vm11, %v1407_v47, %v1497_v44 }
 0x240   : > { %1689 = vst.msk [vmem:[%s3061_s18 + $0x58] sm:$0xf] %vm1666_vm5, %v2219_v45  ;;  %v2220_v52 = vpack.c.bf16 %v1529_v5, %v1529_v5  ;;  %v1527_v28 = vsel %vm1463_vm12, %v1399_v42, %v1495_v51 }
 0x241   : > { %1687 = vst.msk [vmem:[%s3061_s18 + $0x50] sm:$0xf] %vm1666_vm5, %v2217_v25  ;;  %v2218_v55 = vpack.c.bf16 %v1527_v28, %v1527_v28 }
 0x242   : > { %1690 = vst.msk [vmem:[%s3061_s18 + $0x5c] sm:$0xf] %vm1666_vm5, %v2220_v52 }
 0x243   : > { %1688 = vst.msk [vmem:[%s3061_s18 + $0x54] sm:$0xf] %vm1666_vm5, %v2218_v55 }
 0x248   : > { %v2452_v12 = vpop.f32.mrb[56].mxu1 }
 0x249   : > { %v1420_v32 = vadd.f32 %v2452_v12, %v3054_v59  ;;  %v1411_v56 = vpop.f32.mrb[57].mxu1 }
 0x24a   : > { %v1412_v57 = vadd.f32 %v3054_v59, %v1411_v56  ;;  %v2453_v58 = vpop.f32.mrb[58].mxu1 }
 0x24b   : > { %vm1468_vm13 = vcmp.ge.f32.partialorder %v1420_v32, 0.0  ;;  %v1500_v43 = vmul.f32 0.2, %v1420_v32  ;;  %v1423_v14 = vadd.f32 %v2453_v58, %v3054_v59  ;;  %v1414_v63 = vpop.f32.mrb[59].mxu1 }
 0x24c   : > { %vm1466_vm14 = vcmp.ge.f32.partialorder %v1412_v57, 0.0  ;;  %v1498_v34 = vmul.f32 0.2, %v1412_v57  ;;  %v1415_v7 = vadd.f32 %v3054_v59, %v1414_v63 }
 0x24d   : > { %v1532_v60 = vsel %vm1468_vm13, %v1420_v32, %v1500_v43  ;;  %vm1469_vm15 = vcmp.ge.f32.partialorder %v1423_v14, 0.0  ;;  %v1501_v49 = vmul.f32 0.2, %v1423_v14 }
 0x24e   : > { %v2223_v61 = vpack.c.bf16 %v1532_v60, %v1532_v60  ;;  %v1530_v0 = vsel %vm1466_vm14, %v1412_v57, %v1498_v34  ;;  %vm1467_vm0 = vcmp.ge.f32.partialorder %v1415_v7, 0.0  ;;  %v1499_v20 = vmul.f32 0.2, %v1415_v7 }
 0x24f   : > { %v2221_v1 = vpack.c.bf16 %v1530_v0, %v1530_v0  ;;  %v1533_v3 = vsel %vm1469_vm15, %v1423_v14, %v1501_v49 }
 0x250   : > { %1693 = vst.msk [vmem:[%s3061_s18 + $0x68] sm:$0xf] %vm1666_vm5, %v2223_v61  ;;  %v2224_v6 = vpack.c.bf16 %v1533_v3, %v1533_v3  ;;  %v1531_v27 = vsel %vm1467_vm0, %v1415_v7, %v1499_v20 }
 0x251   : > { %1691 = vst.msk [vmem:[%s3061_s18 + $0x60] sm:$0xf] %vm1666_vm5, %v2221_v1  ;;  %v2222_v9 = vpack.c.bf16 %v1531_v27, %v1531_v27 }
 0x252   : > { %1694 = vst.msk [vmem:[%s3061_s18 + $0x6c] sm:$0xf] %vm1666_vm5, %v2224_v6 }
 0x253   : > { %1692 = vst.msk [vmem:[%s3061_s18 + $0x64] sm:$0xf] %vm1666_vm5, %v2222_v9 }
 0x258   : > { %v2456_v11 = vpop.f32.mrb[60].mxu1 }
 0x259   : > { %v1436_v24 = vadd.f32 %v2456_v11, %v3054_v59  ;;  %v1427_v13 = vpop.f32.mrb[61].mxu1 }
 0x25a   : > { %v1428_v16 = vadd.f32 %v3054_v59, %v1427_v13  ;;  %v2457_v2 = vpop.f32.mrb[62].mxu1 }
 0x25b   : > { %vm1472_vm1 = vcmp.ge.f32.partialorder %v1436_v24, 0.0  ;;  %v1504_v17 = vmul.f32 0.2, %v1436_v24  ;;  %v1439_v18 = vadd.f32 %v2457_v2, %v3054_v59  ;;  %v1430_v19 = vpop.f32.mrb[63].mxu1 }
 0x25c   : > { %vm1470_vm2 = vcmp.ge.f32.partialorder %v1428_v16, 0.0  ;;  %v1502_v8 = vmul.f32 0.2, %v1428_v16  ;;  %v1431_v46 = vadd.f32 %v3054_v59, %v1430_v19 }
 0x25d   : > { %v1536_v30 = vsel %vm1472_vm1, %v1436_v24, %v1504_v17  ;;  %vm1473_vm4 = vcmp.ge.f32.partialorder %v1439_v18, 0.0  ;;  %v1505_v21 = vmul.f32 0.2, %v1439_v18  ;;  %1705 = sbr.rel (!%p2776_p4) target bundleno = 682 (0x2aa), region = 44 }
 0x25e   : > { %v2227_v22 = vpack.c.bf16 %v1536_v30, %v1536_v30  ;;  %v1534_v54 = vsel %vm1470_vm2, %v1428_v16, %v1502_v8  ;;  %vm1471_vm3 = vcmp.ge.f32.partialorder %v1431_v46, 0.0  ;;  %v1503_v23 = vmul.f32 0.2, %v1431_v46 }
 0x25f   : > { %v2225_v26 = vpack.c.bf16 %v1534_v54, %v1534_v54  ;;  %v1537_v29 = vsel %vm1473_vm4, %v1439_v18, %v1505_v21 }
 0x260   : > { %1697 = vst.msk [vmem:[%s3061_s18 + $0x78] sm:$0xf] %vm1666_vm5, %v2227_v22  ;;  %v2228_v31 = vpack.c.bf16 %v1537_v29, %v1537_v29  ;;  %v1535_v10 = vsel %vm1471_vm3, %v1431_v46, %v1503_v23 }
 0x261   : > { %1695 = vst.msk [vmem:[%s3061_s18 + $0x70] sm:$0xf] %vm1666_vm5, %v2225_v26  ;;  %v2226_v33 = vpack.c.bf16 %v1535_v10, %v1535_v10 }
 0x262   : > { %1698 = vst.msk [vmem:[%s3061_s18 + $0x7c] sm:$0xf] %vm1666_vm5, %v2228_v31 }
 0x263   : > { %1696 = vst.msk [vmem:[%s3061_s18 + $0x74] sm:$0xf] %vm1666_vm5, %v2226_v33 }
 0x264   : > { %s3304_s28 = smov (!%p1708_p8, %s1707_s28), 32 }
 0x265   : > { %s2182_s9 = sshll.u32 %s3304_s28, 6 }
 0x266   : > { %p2185_p9 = scmp.eq.s32.totalorder %s2182_s9, 0 }
 0x267   : > { %s3168_s10 = sshrl.u32 (!%p2185_p9), %s3304_s28, 5 }
 0x268   : > { %1716 = sbr.rel (%p2185_p9) target bundleno = 682 (0x2aa), region = 48  ;;  %p2186_p10 = scmp.le.s32.totalorder (!%p2185_p9), %s3168_s10, 0 }
 0x26f   : > { %1993 = sbr.rel (%p2186_p10) target bundleno = 661 (0x295), region = 120  ;;  %s3297_s21 = smov (!%p2186_p10), %s3162_s8 }
 0x270   : > { %s3298_s26 = smov (!%p2186_p10), %s3061_s18  ;;  %s3177_s29 = smov (!%p2186_p10), 0  }
 0x271   : > { %s3179_s12 = smov (!%p2186_p10), 0  }
 0x276 LB: >> { %v1732_v59 = vld [vmem:[%s2695_s26] sm:$0xf]  ;;  %v1734_v35 = vld [vmem:[%s2695_s26 + $0x4] sm:$0xf]  ;;  %v1736_v62 = vld [vmem:[%s2695_s26 + $0x8] sm:$0xf]  ;;  %s2703_s12 = sphi %s3179_s12, %s1726_s12   ;;  %s2699_s29 = sphi %s3177_s29, %s3299_s29   ;;  %s2695_s26 = sphi %s3298_s26, %s1801_s26   ;;  %s2691_s21 = sphi %s3297_s21, %s1802_s21  }
 0x277   : >> { %1733 = vst [vmem:[%s2691_s21] sm:$0xf] %v1732_v59  ;;  %1735 = vst [vmem:[%s2691_s21 + $0x4] sm:$0xf] %v1734_v35  ;;  %v1738_v36 = vld [vmem:[%s2695_s26 + $0xc] sm:$0xf]  ;;  %s1796_s13 = sadd.s32 1, %s2699_s29 }
 0x278   : >> { %1737 = vst [vmem:[%s2691_s21 + $0x8] sm:$0xf] %v1736_v62  ;;  %v1740_v37 = vld [vmem:[%s2695_s26 + $0x10] sm:$0xf]  ;;  %v1742_v41 = vld [vmem:[%s2695_s26 + $0x14] sm:$0xf]  ;;  %p1797_p11 = scmp.ge.s32.totalorder %s1796_s13, %s3168_s10 }
 0x279   : >> { %1739 = vst [vmem:[%s2691_s21 + $0xc] sm:$0xf] %v1738_v36  ;;  %1741 = vst [vmem:[%s2691_s21 + $0x10] sm:$0xf] %v1740_v37  ;;  %v1744_v38 = vld [vmem:[%s2695_s26 + $0x18] sm:$0xf] }
 0x27a   : >> { %1743 = vst [vmem:[%s2691_s21 + $0x14] sm:$0xf] %v1742_v41  ;;  %v1746_v4 = vld [vmem:[%s2695_s26 + $0x1c] sm:$0xf]  ;;  %v1748_v15 = vld [vmem:[%s2695_s26 + $0x20] sm:$0xf] }
 0x27b   : >> { %1745 = vst [vmem:[%s2691_s21 + $0x18] sm:$0xf] %v1744_v38  ;;  %1747 = vst [vmem:[%s2691_s21 + $0x1c] sm:$0xf] %v1746_v4  ;;  %v1750_v50 = vld [vmem:[%s2695_s26 + $0x24] sm:$0xf] }
 0x27c   : >> { %1749 = vst [vmem:[%s2691_s21 + $0x20] sm:$0xf] %v1748_v15  ;;  %v1752_v47 = vld [vmem:[%s2695_s26 + $0x28] sm:$0xf]  ;;  %v1754_v39 = vld [vmem:[%s2695_s26 + $0x2c] sm:$0xf] }
 0x27d   : >> { %1751 = vst [vmem:[%s2691_s21 + $0x24] sm:$0xf] %v1750_v50  ;;  %1753 = vst [vmem:[%s2691_s21 + $0x28] sm:$0xf] %v1752_v47  ;;  %v1756_v40 = vld [vmem:[%s2695_s26 + $0x30] sm:$0xf] }
 0x27e   : >> { %1755 = vst [vmem:[%s2691_s21 + $0x2c] sm:$0xf] %v1754_v39  ;;  %v1758_v42 = vld [vmem:[%s2695_s26 + $0x34] sm:$0xf]  ;;  %v1760_v53 = vld [vmem:[%s2695_s26 + $0x38] sm:$0xf] }
 0x27f   : >> { %1757 = vst [vmem:[%s2691_s21 + $0x30] sm:$0xf] %v1756_v40  ;;  %1759 = vst [vmem:[%s2691_s21 + $0x34] sm:$0xf] %v1758_v42  ;;  %v1762_v44 = vld [vmem:[%s2695_s26 + $0x3c] sm:$0xf] }
 0x280   : >> { %1761 = vst [vmem:[%s2691_s21 + $0x38] sm:$0xf] %v1760_v53  ;;  %v1764_v45 = vld [vmem:[%s2695_s26 + $0x40] sm:$0xf]  ;;  %v1766_v48 = vld [vmem:[%s2695_s26 + $0x44] sm:$0xf] }
 0x281   : >> { %1763 = vst [vmem:[%s2691_s21 + $0x3c] sm:$0xf] %v1762_v44  ;;  %1765 = vst [vmem:[%s2691_s21 + $0x40] sm:$0xf] %v1764_v45  ;;  %v1768_v51 = vld [vmem:[%s2695_s26 + $0x48] sm:$0xf] }
 0x282   : >> { %1767 = vst [vmem:[%s2691_s21 + $0x44] sm:$0xf] %v1766_v48  ;;  %v1770_v25 = vld [vmem:[%s2695_s26 + $0x4c] sm:$0xf]  ;;  %v1772_v5 = vld [vmem:[%s2695_s26 + $0x50] sm:$0xf] }
 0x283   : >> { %1769 = vst [vmem:[%s2691_s21 + $0x48] sm:$0xf] %v1768_v51  ;;  %1771 = vst [vmem:[%s2691_s21 + $0x4c] sm:$0xf] %v1770_v25  ;;  %v1774_v52 = vld [vmem:[%s2695_s26 + $0x54] sm:$0xf] }
 0x284   : >> { %1773 = vst [vmem:[%s2691_s21 + $0x50] sm:$0xf] %v1772_v5  ;;  %v1776_v28 = vld [vmem:[%s2695_s26 + $0x58] sm:$0xf]  ;;  %v1778_v55 = vld [vmem:[%s2695_s26 + $0x5c] sm:$0xf] }
 0x285   : >> { %1775 = vst [vmem:[%s2691_s21 + $0x54] sm:$0xf] %v1774_v52  ;;  %1777 = vst [vmem:[%s2691_s21 + $0x58] sm:$0xf] %v1776_v28  ;;  %v1780_v12 = vld [vmem:[%s2695_s26 + $0x60] sm:$0xf] }
 0x286   : >> { %1779 = vst [vmem:[%s2691_s21 + $0x5c] sm:$0xf] %v1778_v55  ;;  %v1782_v32 = vld [vmem:[%s2695_s26 + $0x64] sm:$0xf]  ;;  %v1784_v56 = vld [vmem:[%s2695_s26 + $0x68] sm:$0xf] }
 0x287   : >> { %1781 = vst [vmem:[%s2691_s21 + $0x60] sm:$0xf] %v1780_v12  ;;  %1783 = vst [vmem:[%s2691_s21 + $0x64] sm:$0xf] %v1782_v32  ;;  %v1786_v57 = vld [vmem:[%s2695_s26 + $0x6c] sm:$0xf] }
 0x288   : >> { %1785 = vst [vmem:[%s2691_s21 + $0x68] sm:$0xf] %v1784_v56  ;;  %v1788_v58 = vld [vmem:[%s2695_s26 + $0x70] sm:$0xf]  ;;  %v1790_v43 = vld [vmem:[%s2695_s26 + $0x74] sm:$0xf] }
 0x289   : >> { %1787 = vst [vmem:[%s2691_s21 + $0x6c] sm:$0xf] %v1786_v57  ;;  %1789 = vst [vmem:[%s2691_s21 + $0x70] sm:$0xf] %v1788_v58  ;;  %v1792_v14 = vld [vmem:[%s2695_s26 + $0x78] sm:$0xf] }
 0x28a   : >> { %1791 = vst [vmem:[%s2691_s21 + $0x74] sm:$0xf] %v1790_v43  ;;  %v1794_v63 = vld [vmem:[%s2695_s26 + $0x7c] sm:$0xf]  ;;  %1793 = vst [vmem:[%s2691_s21 + $0x78] sm:$0xf] %v1792_v14 }
 0x28b   : >> { %1795 = vst [vmem:[%s2691_s21 + $0x7c] sm:$0xf] %v1794_v63  ;;  %s3306_s13 = smov (%p1797_p11, %s1796_s13), 0  ;;  %s1726_s12 = sadd.s32 1, %s2703_s12  }
 0x28c   : >> { %s2187_s14 = sshll.u32 %s3306_s13, 7  ;;  %p1725_p12 = scmp.ge.s32.totalorder %s1726_s12, %s3168_s10 }
 0x28d   : >> { %s1801_s26 = scalar_lea.vmem %s3061_s18, %s2187_s14 [#allocation2]   ;;  %s1802_s21 = scalar_lea.vmem %s3162_s8, %s2187_s14  }
 0x28e   : >> { %s3299_s29 = smov %s3306_s13  ;;  %1728 = sbr.rel (!%p1725_p12) target bundleno = 630 (0x276), region = 126 }
 0x295 PF: > { %s3272_s15 = sand.u32 31, %s3304_s28   ;;  %s2230_s16 = sshll.u32 %s3168_s10, 7 }
 0x296   : > { %s1807_s17 = scalar_lea.vmem %s3061_s18, %s2230_s16 [#allocation2]   ;;  %s1809_s20 = scalar_lea.vmem %s3162_s8, %s2230_s16  }
 0x297   : > { %p2192_p13 = scmp.le.s32.totalorder %s3272_s15, 0 }
 0x298   : > { %s2705_s11 = smov (!%p2192_p13), %s1809_s20   ;;  %s2709_s23 = smov (!%p2192_p13), %s1807_s17  }
 0x299   : > { %2007 = sbr.rel (%p2192_p13) target bundleno = 682 (0x2aa), region = 131  ;;  %s2713_s24 = smov (!%p2192_p13), 0  }
 0x29a   : > { %s2717_s27 = smov (!%p2192_p13), 0  }
 0x2a0 LB: >> { %v1819_v34 = vld [vmem:[%s2711_s23] sm:$0xf]  ;;  %s1821_s28 = sadd.s32 1, %s2715_s24  ;;  %s1813_s27 = sadd.s32 1, %s2719_s27   ;;  %s2719_s27 = sphi %s2717_s27, %s1813_s27   ;;  %s2715_s24 = sphi %s2713_s24, %s2714_s24   ;;  %s2711_s23 = sphi %s2709_s23, %s1826_s23   ;;  %s2707_s11 = sphi %s2705_s11, %s1827_s11  }
 0x2a1   : >> { %1820 = vst [vmem:[%s2707_s11] sm:$0xf] %v1819_v34  ;;  %p1822_p0 = scmp.ge.s32.totalorder %s1821_s28, %s3272_s15  ;;  %p1812_p1 = scmp.ge.s32.totalorder %s1813_s27, %s3272_s15 }
 0x2a3   : >> { %s3308_s28 = smov (%p1822_p0, %s1821_s28), 0  ;;  %1815 = sbr.rel (!%p1812_p1) target bundleno = 672 (0x2a0), region = 137 }
 0x2a4   : >> { %s2193_s18 = sshll.u32 %s3308_s28, 2  ;;  %s2714_s24 = smov %s3308_s28  }
 0x2a5   : >> { %s1826_s23 = scalar_lea.vmem %s1807_s17, %s2193_s18 [#allocation2]   ;;  %s1827_s11 = scalar_lea.vmem %s1809_s20, %s2193_s18  }
 0x2aa PF: > { %p12_p2 = scmp.ge.s32.totalorder %s2766_s22, 5   ;;  %s3300_s18 = smov %s2683_s19 }
 0x2ab   : > { %s3301_s19 = smov %s2774_s25  ;;  %s3302_s20 = smov %s2766_s22 }
 0x2ac   :  { %14 = sbr.rel (!%p12_p2) target bundleno = 2 (0x2), region = 148 }

// kernel: _lambda_.13
= control target key start
LH: loop header
LB: loop body
LE: loop exit
PB: predicated region body
PF: predicated region fallthrough
CT: control target
= control target key end

     0   :  { %s3000_s18 = smov 0   ;;  %s3493_s0 = inlined_call_operand.vmem [shape: bf16[512,576], index: 0, kind: input, shape index: {}]   ;;  %s3494_s1 = inlined_call_operand.vmem [shape: bf16[576,64], index: 1, kind: input, shape index: {}]   ;;  %s3495_s2 = inlined_call_operand.vmem [shape: f32[1,64], index: 2, kind: input, shape index: {}]   ;;  %s3496_s3 = inlined_call_operand.vmem [shape: bf16[64,64], index: 3, kind: input, shape index: {}]   ;;  %s3497_s4 = inlined_call_operand.vmem [shape: f32[1,64], index: 4, kind: input, shape index: {}]   ;;  %s3498_s5 = inlined_call_operand.vmem [shape: bf16[512,64], index: 5, kind: output, shape index: {}]  }
   0x1 LB: > { %s2228_s19 = sadd.s32 4294967295, %s2968_s18   ;;  %p2232_p0 = scmp.ge.s32.totalorder %s2968_s18, 1  ;;  %s2968_s18 = sphi %s3000_s18, %s15_s18  }
   0x2   : > { %p189_p1 = scmp.lt.s32.totalorder %s2968_s18, 3 }
   0x4   : > { %p190_p2 = pnand %p2232_p0, %p189_p1 }
   0x5   : > { %v2810_v0 = vld [vmem:[%s3494_s1 + $0x40] sm:$0xff] (!%p190_p2)   ;;  %v2814_v4 = vld [vmem:[%s3494_s1 + $0x48] sm:$0xff] (!%p190_p2)   ;;  %v2818_v8 = vld [vmem:[%s3494_s1 + $0x50] sm:$0xff] (!%p190_p2)   ;;  %s2233_s25 = sshll.u32 (!%p190_p2), %s2228_s19, 5  ;;  %vm1023_vm0 = vcmask (!%p190_p2), 523264  }
   0x6   : > { %193 = sbr.rel (%p190_p2) target bundleno = 668 (0x29c), region = 40  ;;  %v2811_v1 = vld [vmem:[%s3494_s1] sm:$0xff] (!%p190_p2)   ;;  %2457 = vmatprep.subr.bf16.mxu0 (!%p190_p2), %v2810_v0  ;;  %v2815_v5 = vld [vmem:[%s3494_s1 + $0x8] sm:$0xff] (!%p190_p2)   ;;  %v2819_v9 = vld [vmem:[%s3494_s1 + $0x10] sm:$0xff] (!%p190_p2)   ;;  %p219_p3 = scmp.lt.s32.totalorder (!%p190_p2), %s2233_s25, 63 }
   0x7   : > { %v2812_v2 = vld [vmem:[%s3494_s1 + $0xc0] sm:$0xff] (!%p190_p2)   ;;  %2458 = vmatpush3.bf16.msra.mxu0 (!%p190_p2), %v2811_v1  ;;  %v2816_v6 = vld [vmem:[%s3494_s1 + $0xc8] sm:$0xff] (!%p190_p2)   ;;  %v2820_v10 = vld [vmem:[%s3494_s1 + $0xd0] sm:$0xff] (!%p190_p2)  }
   0x8   : > { %v2813_v3 = vld [vmem:[%s3494_s1 + $0x80] sm:$0xff] (!%p190_p2)   ;;  %2569 = vmatprep.subr.bf16.mxu1 (!%p190_p2), %v2812_v2  ;;  %2459 = vmatprep.subr.bf16.mxu0 (!%p190_p2), %v2814_v4  ;;  %v2817_v7 = vld [vmem:[%s3494_s1 + $0x88] sm:$0xff] (!%p190_p2)   ;;  %v2821_v11 = vld [vmem:[%s3494_s1 + $0x90] sm:$0xff] (!%p190_p2)  }
   0x9   : > { %2570 = vmatpush3.bf16.msra.mxu1 (!%p190_p2), %v2813_v3  ;;  %v2822_v12 = vld [vmem:[%s3494_s1 + $0x58] sm:$0xff] (!%p190_p2)   ;;  %v2826_v16 = vld [vmem:[%s3494_s1 + $0x60] sm:$0xff] (!%p190_p2)   ;;  %v2830_v20 = vld [vmem:[%s3494_s1 + $0x68] sm:$0xff] (!%p190_p2)  }
   0xa   : > { %2571 = vmatprep.subr.bf16.mxu1 (!%p190_p2), %v2816_v6  ;;  %v2823_v13 = vld [vmem:[%s3494_s1 + $0x18] sm:$0xff] (!%p190_p2)   ;;  %v2827_v17 = vld [vmem:[%s3494_s1 + $0x20] sm:$0xff] (!%p190_p2)   ;;  %v2831_v21 = vld [vmem:[%s3494_s1 + $0x28] sm:$0xff] (!%p190_p2)  }
   0xb   : > { %2460 = vmatpush3.bf16.msra.mxu0 (!%p190_p2), %v2815_v5  ;;  %v2824_v14 = vld [vmem:[%s3494_s1 + $0xd8] sm:$0xff] (!%p190_p2)   ;;  %v2828_v18 = vld [vmem:[%s3494_s1 + $0xe0] sm:$0xff] (!%p190_p2)   ;;  %v2832_v22 = vld [vmem:[%s3494_s1 + $0xe8] sm:$0xff] (!%p190_p2)  }
   0xc   : > { %2461 = vmatprep.subr.bf16.mxu0 (!%p190_p2), %v2818_v8  ;;  %v2825_v15 = vld [vmem:[%s3494_s1 + $0x98] sm:$0xff] (!%p190_p2)   ;;  %v2829_v19 = vld [vmem:[%s3494_s1 + $0xa0] sm:$0xff] (!%p190_p2)   ;;  %v2833_v23 = vld [vmem:[%s3494_s1 + $0xa8] sm:$0xff] (!%p190_p2)  }
   0xd   : > { %2572 = vmatpush3.bf16.msra.mxu1 %v2817_v7  ;;  %s3500_s25 = smov (!%p219_p3, %s2233_s25), 63  ;;  %v2834_v24 = vld [vmem:[%s3494_s1 + $0x70] sm:$0xff]   ;;  %v2838_v28 = vld [vmem:[%s3494_s1 + $0x78] sm:$0xff]   ;;  %v2845_v34 = vld [vmem:[%s3494_s1 + $0x100] sm:$0xff]  }
   0xe   : > { %2573 = vmatprep.subr.bf16.mxu1 %v2820_v10  ;;  %s2801_s24 = smul.u32 20, %s3500_s25  ;;  %v2835_v25 = vld [vmem:[%s3494_s1 + $0x30] sm:$0xff]   ;;  %v2839_v29 = vld [vmem:[%s3494_s1 + $0x38] sm:$0xff]   ;;  %v2870_v43 = vld [vmem:[%s3494_s1 + $0x108] sm:$0xff]   ;;  %s2236_s14 = sshll.u32 %s3500_s25, 2 }
   0xf   : > { %2462 = vmatpush3.bf16.msra.mxu0 %v2819_v9  ;;  %v2836_v26 = vld [vmem:[%s3494_s1 + $0xf0] sm:$0xff]   ;;  %v2840_v30 = vld [vmem:[%s3494_s1 + $0xf8] sm:$0xff]   ;;  %s3396_s17 = scalar_lea.vmem %s3498_s5, %s2236_s14 }
  0x10   : > { %2463 = vmatprep.subr.bf16.mxu0 %v2822_v12  ;;  %v2837_v27 = vld [vmem:[%s3494_s1 + $0xb0] sm:$0xff]   ;;  %s3103_s10 = scalar_lea.vmem %s3493_s0, %s2801_s24  ;;  %v2844_v33 = vld [vmem:[%s3494_s1 + $0xb8] sm:$0xff]  }
  0x11   : > { %2574 = vmatpush3.bf16.msra.mxu1 %v2821_v11  ;;  %v2841_v31 = vld [vmem:[%s3103_s10] ss:$20 sps:$4 sm:$0xff]   ;;  %v2843_v32 = vld [vmem:[%s3103_s10 + $0x4] ss:$20 sps:$4 sm:$0xff]   ;;  %v2846_v35 = vld [vmem:[%s3103_s10 + $0x8] ss:$20 sps:$4 sm:$0xff]  }
  0x12   : > { %2575 = vmatprep.subr.bf16.mxu1 %v2824_v14  ;;  %1104 = vmatprep.mubr.bf16.mxu0 %v2843_v32  ;;  %v2848_v36 = vld [vmem:[%s3103_s10 + $0xc] ss:$20 sps:$4 sm:$0xff]   ;;  %v2852_v38 = vld [vmem:[%s3103_s10 + $0x34] ss:$20 sps:$4 sm:$0xff]   ;;  %v2854_v41 = vld [vmem:[%s3103_s10 + $0x30] ss:$20 sps:$4 sm:$0xff]  }
  0x13   : > { %2464 = vmatpush3.bf16.msra.mxu0 %v2823_v13  ;;  %v2849_v37 = vld [vmem:[%s3103_s10 + $0x2c] ss:$20 sps:$4 sm:$0xff]   ;;  %1265 = vmatprep.mubr.bf16.mxu1 %v2848_v36  ;;  %v2851_v39 = vld [vmem:[%s3103_s10 + $0x28] ss:$20 sps:$4 sm:$0xff]   ;;  %v2857_v44 = vld [vmem:[%s3103_s10 + $0x50] ss:$20 sps:$4 sm:$0xff]  }
  0x14   : > { %2465 = vmatprep.subr.bf16.mxu0 %v2826_v16  ;;  %v2855_v40 = vld [vmem:[%s3103_s10 + $0x54] ss:$20 sps:$4 sm:$0xff]   ;;  %v2858_v42 = vld [vmem:[%s3103_s10 + $0x5c] ss:$20 sps:$4 sm:$0xff]   ;;  %v2860_v46 = vld [vmem:[%s3103_s10 + $0x58] ss:$20 sps:$4 sm:$0xff]  }
  0x15   : > { %2576 = vmatpush3.bf16.msra.mxu1 %v2825_v15  ;;  %v2861_v45 = vld [vmem:[%s3103_s10 + $0x7c] ss:$20 sps:$4 sm:$0xff]   ;;  %v2864_v47 = vld [vmem:[%s3103_s10 + $0x84] ss:$20 sps:$4 sm:$0xff]   ;;  %v2866_v51 = vld [vmem:[%s3103_s10 + $0x80] ss:$20 sps:$4 sm:$0xff]  }
  0x16   : > { %2577 = vmatprep.subr.bf16.mxu1 %v2828_v18  ;;  %v2863_v48 = vld [vmem:[%s3103_s10 + $0x78] ss:$20 sps:$4 sm:$0xff]   ;;  %v2895_v50 = vld [vmem:[%s3494_s1 + $0x110] sm:$0xff]   ;;  %v2873_v55 = vld [vmem:[%s3103_s10 + $0xa8] ss:$20 sps:$4 sm:$0xff]  }
  0x17   : > { %2466 = vmatpush3.bf16.msra.mxu0 %v2827_v17  ;;  %v2867_v49 = vld [vmem:[%s3103_s10 + $0xa4] ss:$20 sps:$4 sm:$0xff]   ;;  %v2871_v52 = vld [vmem:[%s3103_s10 + $0xac] ss:$20 sps:$4 sm:$0xff]   ;;  %v2877_v56 = vld [vmem:[%s3103_s10 + $0xd4] ss:$20 sps:$4 sm:$0xff]  }
  0x18   : > { %2467 = vmatprep.subr.bf16.mxu0 %v2830_v20  ;;  %v2869_v53 = vld [vmem:[%s3103_s10 + $0xa0] ss:$20 sps:$4 sm:$0xff]   ;;  %v2920_v57 = vld [vmem:[%s3494_s1 + $0x118] sm:$0xff]   ;;  %v2879_v60 = vld [vmem:[%s3103_s10 + $0xd0] ss:$20 sps:$4 sm:$0xff]  }
  0x19   : > { %2578 = vmatpush3.bf16.msra.mxu1 %v2829_v19  ;;  %v2874_v54 = vld [vmem:[%s3103_s10 + $0xcc] ss:$20 sps:$4 sm:$0xff]   ;;  %v2876_v58 = vld [vmem:[%s3103_s10 + $0xc8] ss:$20 sps:$4 sm:$0xff]   ;;  %v2882_v62 = vld [vmem:[%s3103_s10 + $0xf0] ss:$20 sps:$4 sm:$0xff]  }
  0x1a   : > { %2579 = vmatprep.subr.bf16.mxu1 %v2832_v22  ;;  %v2880_v59 = vld [vmem:[%s3103_s10 + $0xf4] ss:$20 sps:$4 sm:$0xff]   ;;  %v2883_v61 = vld [vmem:[%s3103_s10 + $0xfc] ss:$20 sps:$4 sm:$0xff]   ;;  %v2885_v0 = vld [vmem:[%s3103_s10 + $0xf8] ss:$20 sps:$4 sm:$0xff]  }
  0x1b   : > { %2468 = vmatpush3.bf16.msra.mxu0 %v2831_v21  ;;  %v2886_v63 = vld [vmem:[%s3103_s10 + $0x11c] ss:$20 sps:$4 sm:$0xff]   ;;  %v2889_v1 = vld [vmem:[%s3103_s10 + $0x124] ss:$20 sps:$4 sm:$0xff]   ;;  %v2891_v4 = vld [vmem:[%s3103_s10 + $0x120] ss:$20 sps:$4 sm:$0xff]  }
  0x1c   : > { %2469 = vmatprep.subr.bf16.mxu0 %v2834_v24  ;;  %v2888_v2 = vld [vmem:[%s3103_s10 + $0x118] ss:$20 sps:$4 sm:$0xff]   ;;  %v2894_v6 = vld [vmem:[%s3103_s10 + $0x140] ss:$20 sps:$4 sm:$0xff]   ;;  %v2898_v8 = vld [vmem:[%s3103_s10 + $0x148] ss:$20 sps:$4 sm:$0xff]  }
  0x1d   : > { %2580 = vmatpush3.bf16.msra.mxu1 %v2833_v23  ;;  %v2892_v3 = vld [vmem:[%s3103_s10 + $0x144] ss:$20 sps:$4 sm:$0xff]   ;;  %v2896_v5 = vld [vmem:[%s3103_s10 + $0x14c] ss:$20 sps:$4 sm:$0xff]   ;;  %v2902_v9 = vld [vmem:[%s3103_s10 + $0x174] ss:$20 sps:$4 sm:$0xff]  }
  0x1e   : > { %2581 = vmatprep.subr.bf16.mxu1 %v2836_v26  ;;  %v2899_v7 = vld [vmem:[%s3103_s10 + $0x16c] ss:$20 sps:$4 sm:$0xff]   ;;  %v2901_v10 = vld [vmem:[%s3103_s10 + $0x168] ss:$20 sps:$4 sm:$0xff]   ;;  %v2904_v12 = vld [vmem:[%s3103_s10 + $0x170] ss:$20 sps:$4 sm:$0xff]  }
  0x1f   : > { %2470 = vmatpush3.bf16.msra.mxu0 %v2835_v25  ;;  %v2905_v11 = vld [vmem:[%s3103_s10 + $0x194] ss:$20 sps:$4 sm:$0xff]   ;;  %v2908_v13 = vld [vmem:[%s3103_s10 + $0x19c] ss:$20 sps:$4 sm:$0xff]   ;;  %v2910_v16 = vld [vmem:[%s3103_s10 + $0x198] ss:$20 sps:$4 sm:$0xff]  }
  0x20   : > { %2471 = vmatprep.subr.bf16.mxu0 %v2838_v28  ;;  %v2907_v14 = vld [vmem:[%s3103_s10 + $0x190] ss:$20 sps:$4 sm:$0xff]   ;;  %v2913_v18 = vld [vmem:[%s3103_s10 + $0x1b8] ss:$20 sps:$4 sm:$0xff]   ;;  %v2916_v20 = vld [vmem:[%s3103_s10 + $0x1c0] ss:$20 sps:$4 sm:$0xff]  }
  0x21   : > { %2582 = vmatpush3.bf16.msra.mxu1 %v2837_v27  ;;  %v2911_v15 = vld [vmem:[%s3103_s10 + $0x1bc] ss:$20 sps:$4 sm:$0xff]   ;;  %v2914_v17 = vld [vmem:[%s3103_s10 + $0x1c4] ss:$20 sps:$4 sm:$0xff]   ;;  %v2921_v21 = vld [vmem:[%s3103_s10 + $0x1ec] ss:$20 sps:$4 sm:$0xff]  }
  0x22   : > { %2583 = vmatprep.subr.bf16.mxu1 %v2840_v30  ;;  %v2917_v19 = vld [vmem:[%s3103_s10 + $0x1e4] ss:$20 sps:$4 sm:$0xff]   ;;  %v2919_v22 = vld [vmem:[%s3103_s10 + $0x1e0] ss:$20 sps:$4 sm:$0xff]   ;;  %v2923_v24 = vld [vmem:[%s3103_s10 + $0x1e8] ss:$20 sps:$4 sm:$0xff]  }
  0x23   : > { %2472 = vmatpush3.bf16.msra.mxu0 %v2839_v29  ;;  %v2924_v23 = vld [vmem:[%s3103_s10 + $0x20c] ss:$20 sps:$4 sm:$0xff]   ;;  %v2927_v25 = vld [vmem:[%s3103_s10 + $0x214] ss:$20 sps:$4 sm:$0xff]   ;;  %v2929_v29 = vld [vmem:[%s3103_s10 + $0x210] ss:$20 sps:$4 sm:$0xff]  }
  0x24   : > { %2721 = vmatprep.subr.bf16.mxu0 %v2845_v34  ;;  %v2958_v26 = vld [vmem:[%s3496_s3] sm:$0xff]   ;;  %v2926_v27 = vld [vmem:[%s3103_s10 + $0x208] ss:$20 sps:$4 sm:$0xff]  }
  0x25   : > { %2584 = vmatpush3.bf16.msra.mxu1 %v2844_v33  ;;  %v2930_v28 = vld [vmem:[%s3103_s10 + $0x234] ss:$20 sps:$4 sm:$0xff]   ;;  %v2933_v30 = vld [vmem:[%s3103_s10 + $0x23c] ss:$20 sps:$4 sm:$0xff]   ;;  %v2935_v33 = vld [vmem:[%s3103_s10 + $0x238] ss:$20 sps:$4 sm:$0xff]  }
  0x26   : > { %1105 = vmatmul.mubr.bf16.vlgmr.msra.gmra.mrb[0].mxu0 %v2841_v31  ;;  %2761 = vmatprep.subr.bf16.mxu1 %v2958_v26  ;;  %v2932_v31 = vld [vmem:[%s3103_s10 + $0x230] ss:$20 sps:$4 sm:$0xff]  }
  0x27   : > { %2722 = vmatpush3.bf16.msra.mxu0 %v2845_v34  ;;  %1112 = vmatprep.mubr.bf16.mxu0 %v2849_v37  ;;  %v2936_v32 = vld [vmem:[%s3103_s10 + $0x25c] ss:$20 sps:$4 sm:$0xff]   ;;  %v2939_v34 = vld [vmem:[%s3103_s10 + $0x264] ss:$20 sps:$4 sm:$0xff]   ;;  %v2941_v37 = vld [vmem:[%s3103_s10 + $0x260] ss:$20 sps:$4 sm:$0xff]  }
  0x28   : > { %1266 = vmatmul.mubr.bf16.vlgmr.msra.gmra.mrb[0].mxu1 %v2846_v35  ;;  %2723 = vmatprep.subr.bf16.mxu0 %v2870_v43  ;;  %v2938_v35 = vld [vmem:[%s3103_s10 + $0x258] ss:$20 sps:$4 sm:$0xff]   ;;  %v2942_v36 = vld [vmem:[%s3103_s10 + $0x10] ss:$20 sps:$4 sm:$0xff]  }
  0x29   : > { %1273 = vmatprep.mubr.bf16.mxu1 %v2852_v38  ;;  %2762 = vmatpush3.bf16.msra.mxu1 %v2958_v26  ;;  %v2943_v38 = vld [vmem:[%s3103_s10 + $0x38] ss:$20 sps:$4 sm:$0xff]  }
  0x2b   : > { %2724 = vmatpush3.bf16.msra.mxu0 %v2870_v43  ;;  %v2947_v43 = vld [vmem:[%s3103_s10 + $0xd8] ss:$20 sps:$4 sm:$0xff]  }
  0x2c   : > { %2725 = vmatprep.subr.bf16.mxu0 %v2895_v50 }
  0x2e   : > { %1113 = vmatmul.mubr.bf16.gmra.mrb[4].mxu0 %v2851_v39  ;;  %v2944_v39 = vld [vmem:[%s3103_s10 + $0x60] ss:$20 sps:$4 sm:$0xff]  }
  0x2f   : > { %1120 = vmatprep.mubr.bf16.mxu0 %v2855_v40  ;;  %2726 = vmatpush3.bf16.msra.mxu0 %v2895_v50  ;;  %v2959_v40 = vld [vmem:[%s3496_s3 + $0x8] sm:$0xff]  }
  0x30   : > { %1274 = vmatmul.mubr.bf16.gmra.mrb[4].mxu1 %v2854_v41  ;;  %2727 = vmatprep.subr.bf16.mxu0 %v2920_v57  ;;  %v2945_v41 = vld [vmem:[%s3103_s10 + $0x88] ss:$20 sps:$4 sm:$0xff]  }
  0x31   : > { %1281 = vmatprep.mubr.bf16.mxu1 %v2858_v42  ;;  %2763 = vmatprep.subr.bf16.mxu1 %v2959_v40  ;;  %v2946_v42 = vld [vmem:[%s3103_s10 + $0xb0] ss:$20 sps:$4 sm:$0xff]   ;;  %v2953_v50 = vld [vmem:[%s3103_s10 + $0x1c8] ss:$20 sps:$4 sm:$0xff]  }
  0x32   : > { %2764 = vmatpush3.bf16.msra.mxu1 %v2959_v40 }
  0x33   : > { %2728 = vmatpush3.bf16.msra.mxu0 %v2920_v57  ;;  %v3237_v57 = vld [vmem:[%s3495_s2] ss:$0 sm:$0xff] }
  0x36   : > { %1121 = vmatmul.mubr.bf16.gmra.mrb[8].mxu0 %v2857_v44  ;;  %v2948_v44 = vld [vmem:[%s3103_s10 + $0x100] ss:$20 sps:$4 sm:$0xff]  }
  0x37   : > { %1128 = vmatprep.mubr.bf16.mxu0 %v2861_v45  ;;  %v2949_v45 = vld [vmem:[%s3103_s10 + $0x128] ss:$20 sps:$4 sm:$0xff]  }
  0x38   : > { %1282 = vmatmul.mubr.bf16.gmra.mrb[8].mxu1 %v2860_v46  ;;  %v2950_v46 = vld [vmem:[%s3103_s10 + $0x150] ss:$20 sps:$4 sm:$0xff]  }
  0x39   : > { %1289 = vmatprep.mubr.bf16.mxu1 %v2864_v47  ;;  %v2951_v47 = vld [vmem:[%s3103_s10 + $0x178] ss:$20 sps:$4 sm:$0xff]  }
  0x3e   : > { %1129 = vmatmul.mubr.bf16.gmra.mrb[12].mxu0 %v2863_v48  ;;  %v2952_v48 = vld [vmem:[%s3103_s10 + $0x1a0] ss:$20 sps:$4 sm:$0xff]  }
  0x3f   : > { %1136 = vmatprep.mubr.bf16.mxu0 %v2867_v49  ;;  %v2960_v49 = vld [vmem:[%s3496_s3 + $0x10] sm:$0xff]  }
  0x40   : > { %1290 = vmatmul.mubr.bf16.gmra.mrb[12].mxu1 %v2866_v51  ;;  %2765 = vmatprep.subr.bf16.mxu1 %v2960_v49  ;;  %v2954_v51 = vld [vmem:[%s3103_s10 + $0x1f0] ss:$20 sps:$4 sm:$0xff]  }
  0x41   : > { %1297 = vmatprep.mubr.bf16.mxu1 %v2871_v52  ;;  %2766 = vmatpush3.bf16.msra.mxu1 %v2960_v49  ;;  %v2955_v52 = vld [vmem:[%s3103_s10 + $0x218] ss:$20 sps:$4 sm:$0xff]  }
  0x46   : > { %1137 = vmatmul.mubr.bf16.gmra.mrb[16].mxu0 %v2869_v53  ;;  %v2956_v53 = vld [vmem:[%s3103_s10 + $0x240] ss:$20 sps:$4 sm:$0xff]  }
  0x47   : > { %1144 = vmatprep.mubr.bf16.mxu0 %v2874_v54  ;;  %v2957_v54 = vld [vmem:[%s3103_s10 + $0x268] ss:$20 sps:$4 sm:$0xff]  }
  0x48   : > { %1298 = vmatmul.mubr.bf16.gmra.mrb[16].mxu1 %v2873_v55  ;;  %v2961_v55 = vld [vmem:[%s3496_s3 + $0x18] sm:$0xff]  }
  0x49   : > { %1305 = vmatprep.mubr.bf16.mxu1 %v2877_v56  ;;  %2767 = vmatprep.subr.bf16.mxu1 %v2961_v55 }
  0x4a   : > { %2768 = vmatpush3.bf16.msra.mxu1 %v2961_v55 }
  0x4e   : > { %1145 = vmatmul.mubr.bf16.gmra.mrb[20].mxu0 %v2876_v58 }
  0x4f   : > { %1152 = vmatprep.mubr.bf16.mxu0 %v2880_v59 }
  0x50   : > { %1306 = vmatmul.mubr.bf16.gmra.mrb[20].mxu1 %v2879_v60 }
  0x51   : > { %1313 = vmatprep.mubr.bf16.mxu1 %v2883_v61 }
  0x56   : > { %1153 = vmatmul.mubr.bf16.gmra.mrb[24].mxu0 %v2882_v62 }
  0x57   : > { %1160 = vmatprep.mubr.bf16.mxu0 %v2886_v63 }
  0x58   : > { %1314 = vmatmul.mubr.bf16.gmra.mrb[24].mxu1 %v2885_v0 }
  0x59   : > { %1321 = vmatprep.mubr.bf16.mxu1 %v2889_v1 }
  0x5e   : > { %1161 = vmatmul.mubr.bf16.gmra.mrb[28].mxu0 %v2888_v2 }
  0x5f   : > { %1168 = vmatprep.mubr.bf16.mxu0 %v2892_v3 }
  0x60   : > { %1322 = vmatmul.mubr.bf16.gmra.mrb[28].mxu1 %v2891_v4 }
  0x61   : > { %1329 = vmatprep.mubr.bf16.mxu1 %v2896_v5 }
  0x66   : > { %1169 = vmatmul.mubr.bf16.gmra.mrb[32].mxu0 %v2894_v6 }
  0x67   : > { %1176 = vmatprep.mubr.bf16.mxu0 %v2899_v7 }
  0x68   : > { %1330 = vmatmul.mubr.bf16.gmra.mrb[32].mxu1 %v2898_v8 }
  0x69   : > { %1337 = vmatprep.mubr.bf16.mxu1 %v2902_v9 }
  0x6e   : > { %1177 = vmatmul.mubr.bf16.gmra.mrb[36].mxu0 %v2901_v10 }
  0x6f   : > { %1184 = vmatprep.mubr.bf16.mxu0 %v2905_v11 }
  0x70   : > { %1338 = vmatmul.mubr.bf16.gmra.mrb[36].mxu1 %v2904_v12 }
  0x71   : > { %1345 = vmatprep.mubr.bf16.mxu1 %v2908_v13 }
  0x76   : > { %1185 = vmatmul.mubr.bf16.gmra.mrb[40].mxu0 %v2907_v14 }
  0x77   : > { %1192 = vmatprep.mubr.bf16.mxu0 %v2911_v15 }
  0x78   : > { %1346 = vmatmul.mubr.bf16.gmra.mrb[40].mxu1 %v2910_v16 }
  0x79   : > { %1353 = vmatprep.mubr.bf16.mxu1 %v2914_v17 }
  0x7e   : > { %1193 = vmatmul.mubr.bf16.gmra.mrb[44].mxu0 %v2913_v18 }
  0x7f   : > { %1200 = vmatprep.mubr.bf16.mxu0 %v2917_v19 }
  0x80   : > { %1354 = vmatmul.mubr.bf16.gmra.mrb[44].mxu1 %v2916_v20 }
  0x81   : > { %1361 = vmatprep.mubr.bf16.mxu1 %v2921_v21 }
  0x86   : > { %1201 = vmatmul.mubr.bf16.gmra.mrb[48].mxu0 %v2919_v22 }
  0x87   : > { %1208 = vmatprep.mubr.bf16.mxu0 %v2924_v23 }
  0x88   : > { %1362 = vmatmul.mubr.bf16.gmra.mrb[48].mxu1 %v2923_v24 }
  0x89   : > { %1369 = vmatprep.mubr.bf16.mxu1 %v2927_v25 }
  0x8e   : > { %1209 = vmatmul.mubr.bf16.gmra.mrb[52].mxu0 %v2926_v27 }
  0x8f   : > { %1216 = vmatprep.mubr.bf16.mxu0 %v2930_v28 }
  0x90   : > { %1370 = vmatmul.mubr.bf16.gmra.mrb[52].mxu1 %v2929_v29 }
  0x91   : > { %1377 = vmatprep.mubr.bf16.mxu1 %v2933_v30 }
  0x96   : > { %1217 = vmatmul.mubr.bf16.gmra.mrb[56].mxu0 %v2932_v31 }
  0x97   : > { %1224 = vmatprep.mubr.bf16.mxu0 %v2936_v32 }
  0x98   : > { %1378 = vmatmul.mubr.bf16.gmra.mrb[56].mxu1 %v2935_v33 }
  0x99   : > { %1385 = vmatprep.mubr.bf16.mxu1 %v2939_v34 }
  0x9e   : > { %1225 = vmatmul.mubr.bf16.gmra.mrb[60].mxu0 %v2938_v35 }
  0x9f   : > { %2729 = vmatprep.mubr.msk.bf16.mxu0 %vm1023_vm0, %v2942_v36 }
  0xa0   : > { %1386 = vmatmul.mubr.bf16.gmra.mrb[60].mxu1 %v2941_v37 }
  0xa6   : > { %2730 = vmatmul.mubr.msk.bf16.vlgmr.msra.gmra.mrb[64].mxu0 %vm1023_vm0, %v2943_v38 }
  0xa7   : > { %2733 = vmatprep.mubr.msk.bf16.mxu0 %vm1023_vm0, %v2944_v39 }
  0xae   : > { %2734 = vmatmul.mubr.msk.bf16.gmra.mrb[68].mxu0 %vm1023_vm0, %v2945_v41 }
  0xaf   : > { %2737 = vmatprep.mubr.msk.bf16.mxu0 %vm1023_vm0, %v2946_v42 }
  0xb6   : > { %2738 = vmatmul.mubr.msk.bf16.gmra.mrb[72].mxu0 %vm1023_vm0, %v2947_v43 }
  0xb7   : > { %2741 = vmatprep.mubr.msk.bf16.mxu0 %vm1023_vm0, %v2948_v44 }
  0xbe   : > { %2742 = vmatmul.mubr.msk.bf16.gmra.mrb[76].mxu0 %vm1023_vm0, %v2949_v45 }
  0xbf   : > { %2745 = vmatprep.mubr.msk.bf16.mxu0 %vm1023_vm0, %v2950_v46 }
  0xc6   : > { %2746 = vmatmul.mubr.msk.bf16.gmra.mrb[80].mxu0 %vm1023_vm0, %v2951_v47 }
  0xc7   : > { %2749 = vmatprep.mubr.msk.bf16.mxu0 %vm1023_vm0, %v2952_v48 }
  0xce   : > { %2750 = vmatmul.mubr.msk.bf16.gmra.mrb[84].mxu0 %vm1023_vm0, %v2953_v50 }
  0xcf   : > { %2753 = vmatprep.mubr.msk.bf16.mxu0 %vm1023_vm0, %v2954_v51 }
  0xd6   : > { %2754 = vmatmul.mubr.msk.bf16.gmra.mrb[88].mxu0 %vm1023_vm0, %v2955_v52 }
  0xd7   : > { %2757 = vmatprep.mubr.msk.bf16.mxu0 %vm1023_vm0, %v2956_v53 }
  0xde   : > { %2758 = vmatmul.mubr.msk.bf16.gmra.mrb[92].mxu0 %vm1023_vm0, %v2957_v54 }
  0xf9   : > { %v2473_v56 = vpop.f32.mrb[0].mxu0 }
  0xfa   : > { %v2474_v58 = vpop.f32.mrb[1].mxu0 }
  0xfb   : > { %v2475_v59 = vadd.f32 %v2474_v58, %v2473_v56  ;;  %v2476_v60 = vpop.f32.mrb[2].mxu0  ;;  %v2585_v61 = vpop.f32.mrb[0].mxu1 }
  0xfc   : > { %v2477_v62 = vpop.f32.mrb[3].mxu0  ;;  %v2586_v1 = vpop.f32.mrb[1].mxu1 }
  0xfd   : > { %v1107_v63 = vadd.f32 %v2475_v59, %v3237_v57  ;;  %v2478_v0 = vadd.f32 %v2477_v62, %v2476_v60  ;;  %v2587_v2 = vadd.f32 %v2586_v1, %v2585_v61  ;;  %v2588_v3 = vpop.f32.mrb[2].mxu1 }
  0xfe   : > { %v2589_v5 = vpop.f32.mrb[3].mxu1 }
  0xff   : > { %v1110_v4 = vadd.f32 %v2478_v0, %v3237_v57  ;;  %v2590_v6 = vadd.f32 %v2589_v5, %v2588_v3  ;;  %v3241_v7 = vadd.f32 %v2587_v2, %v1107_v63 }
 0x101   : > { %v2479_v8 = vpop.f32.mrb[4].mxu0  ;;  %v3243_v10 = vadd.f32 %v2590_v6, %v1110_v4 }
 0x102   : > { %v2480_v9 = vpop.f32.mrb[5].mxu0 }
 0x103   : > { %v2481_v11 = vadd.f32 %v2480_v9, %v2479_v8  ;;  %v2482_v12 = vpop.f32.mrb[6].mxu0  ;;  %v2591_v13 = vpop.f32.mrb[4].mxu1 }
 0x104   : > { %v2483_v14 = vpop.f32.mrb[7].mxu0  ;;  %v2592_v17 = vpop.f32.mrb[5].mxu1 }
 0x105   : > { %v1115_v15 = vadd.f32 %v2481_v11, %v3237_v57  ;;  %v2484_v16 = vadd.f32 %v2483_v14, %v2482_v12  ;;  %v2593_v18 = vadd.f32 %v2592_v17, %v2591_v13  ;;  %v2594_v19 = vpop.f32.mrb[6].mxu1 }
 0x106   : > { %v2595_v21 = vpop.f32.mrb[7].mxu1 }
 0x107   : > { %v1118_v20 = vadd.f32 %v2484_v16, %v3237_v57  ;;  %v2596_v22 = vadd.f32 %v2595_v21, %v2594_v19  ;;  %v3247_v23 = vadd.f32 %v2593_v18, %v1115_v15 }
 0x109   : > { %v2485_v24 = vpop.f32.mrb[8].mxu0  ;;  %v3249_v26 = vadd.f32 %v2596_v22, %v1118_v20 }
 0x10a   : > { %v2486_v25 = vpop.f32.mrb[9].mxu0 }
 0x10b   : > { %v2487_v27 = vadd.f32 %v2486_v25, %v2485_v24  ;;  %v2488_v28 = vpop.f32.mrb[10].mxu0  ;;  %v2597_v29 = vpop.f32.mrb[8].mxu1 }
 0x10c   : > { %v2489_v30 = vpop.f32.mrb[11].mxu0  ;;  %v2598_v33 = vpop.f32.mrb[9].mxu1 }
 0x10d   : > { %v1123_v31 = vadd.f32 %v2487_v27, %v3237_v57  ;;  %v2490_v32 = vadd.f32 %v2489_v30, %v2488_v28  ;;  %v2599_v34 = vadd.f32 %v2598_v33, %v2597_v29  ;;  %v2600_v35 = vpop.f32.mrb[10].mxu1 }
 0x10e   : > { %v2601_v37 = vpop.f32.mrb[11].mxu1 }
 0x10f   : > { %v1126_v36 = vadd.f32 %v2490_v32, %v3237_v57  ;;  %v2602_v38 = vadd.f32 %v2601_v37, %v2600_v35  ;;  %v3253_v39 = vadd.f32 %v2599_v34, %v1123_v31 }
 0x111   : > { %v2491_v40 = vpop.f32.mrb[12].mxu0  ;;  %v3255_v42 = vadd.f32 %v2602_v38, %v1126_v36 }
 0x112   : > { %v2492_v41 = vpop.f32.mrb[13].mxu0 }
 0x113   : > { %v2493_v43 = vadd.f32 %v2492_v41, %v2491_v40  ;;  %v2494_v44 = vpop.f32.mrb[14].mxu0  ;;  %v2603_v45 = vpop.f32.mrb[12].mxu1 }
 0x114   : > { %v2495_v46 = vpop.f32.mrb[15].mxu0  ;;  %v2604_v49 = vpop.f32.mrb[13].mxu1 }
 0x115   : > { %v1131_v47 = vadd.f32 %v2493_v43, %v3237_v57  ;;  %v2496_v48 = vadd.f32 %v2495_v46, %v2494_v44  ;;  %v2605_v50 = vadd.f32 %v2604_v49, %v2603_v45  ;;  %v2606_v51 = vpop.f32.mrb[14].mxu1 }
 0x116   : > { %v2607_v53 = vpop.f32.mrb[15].mxu1 }
 0x117   : > { %v1134_v52 = vadd.f32 %v2496_v48, %v3237_v57  ;;  %v2608_v54 = vadd.f32 %v2607_v53, %v2606_v51  ;;  %v3259_v55 = vadd.f32 %v2605_v50, %v1131_v47 }
 0x119   : > { %v2497_v56 = vpop.f32.mrb[16].mxu0  ;;  %v3261_v59 = vadd.f32 %v2608_v54, %v1134_v52 }
 0x11a   : > { %v2498_v58 = vpop.f32.mrb[17].mxu0 }
 0x11b   : > { %v2499_v60 = vadd.f32 %v2498_v58, %v2497_v56  ;;  %v2500_v61 = vpop.f32.mrb[18].mxu0  ;;  %v2609_v62 = vpop.f32.mrb[16].mxu1 }
 0x11c   : > { %v2501_v63 = vpop.f32.mrb[19].mxu0  ;;  %v2610_v2 = vpop.f32.mrb[17].mxu1 }
 0x11d   : > { %v1139_v0 = vadd.f32 %v2499_v60, %v3237_v57  ;;  %v2502_v1 = vadd.f32 %v2501_v63, %v2500_v61  ;;  %v2611_v3 = vadd.f32 %v2610_v2, %v2609_v62  ;;  %v2612_v4 = vpop.f32.mrb[18].mxu1 }
 0x11e   : > { %v2613_v6 = vpop.f32.mrb[19].mxu1 }
 0x11f   : > { %v1142_v5 = vadd.f32 %v2502_v1, %v3237_v57  ;;  %v2614_v8 = vadd.f32 %v2613_v6, %v2612_v4  ;;  %v3265_v9 = vadd.f32 %v2611_v3, %v1139_v0 }
 0x121   : > { %v2503_v11 = vpop.f32.mrb[20].mxu0  ;;  %v3267_v13 = vadd.f32 %v2614_v8, %v1142_v5 }
 0x122   : > { %v2504_v12 = vpop.f32.mrb[21].mxu0 }
 0x123   : > { %v2505_v14 = vadd.f32 %v2504_v12, %v2503_v11  ;;  %v2506_v15 = vpop.f32.mrb[22].mxu0  ;;  %v2615_v16 = vpop.f32.mrb[20].mxu1 }
 0x124   : > { %v2507_v17 = vpop.f32.mrb[23].mxu0  ;;  %v2616_v20 = vpop.f32.mrb[21].mxu1 }
 0x125   : > { %v1147_v18 = vadd.f32 %v2505_v14, %v3237_v57  ;;  %v2508_v19 = vadd.f32 %v2507_v17, %v2506_v15  ;;  %v2617_v21 = vadd.f32 %v2616_v20, %v2615_v16  ;;  %v2618_v22 = vpop.f32.mrb[22].mxu1 }
 0x126   : > { %v2619_v25 = vpop.f32.mrb[23].mxu1 }
 0x127   : > { %v1150_v24 = vadd.f32 %v2508_v19, %v3237_v57  ;;  %v2620_v27 = vadd.f32 %v2619_v25, %v2618_v22  ;;  %v3271_v28 = vadd.f32 %v2617_v21, %v1147_v18 }
 0x129   : > { %v2509_v29 = vpop.f32.mrb[24].mxu0  ;;  %v3273_v31 = vadd.f32 %v2620_v27, %v1150_v24 }
 0x12a   : > { %v2510_v30 = vpop.f32.mrb[25].mxu0 }
 0x12b   : > { %v2511_v32 = vadd.f32 %v2510_v30, %v2509_v29  ;;  %v2512_v33 = vpop.f32.mrb[26].mxu0  ;;  %v2621_v34 = vpop.f32.mrb[24].mxu1 }
 0x12c   : > { %v2513_v35 = vpop.f32.mrb[27].mxu0  ;;  %v2622_v38 = vpop.f32.mrb[25].mxu1 }
 0x12d   : > { %v1155_v36 = vadd.f32 %v2511_v32, %v3237_v57  ;;  %v2514_v37 = vadd.f32 %v2513_v35, %v2512_v33  ;;  %v2623_v40 = vadd.f32 %v2622_v38, %v2621_v34  ;;  %v2624_v41 = vpop.f32.mrb[26].mxu1 }
 0x12e   : > { %v2625_v44 = vpop.f32.mrb[27].mxu1 }
 0x12f   : > { %v1158_v43 = vadd.f32 %v2514_v37, %v3237_v57  ;;  %v2626_v45 = vadd.f32 %v2625_v44, %v2624_v41  ;;  %v3277_v46 = vadd.f32 %v2623_v40, %v1155_v36 }
 0x131   : > { %v2515_v47 = vpop.f32.mrb[28].mxu0  ;;  %v3279_v49 = vadd.f32 %v2626_v45, %v1158_v43 }
 0x132   : > { %v2516_v48 = vpop.f32.mrb[29].mxu0 }
 0x133   : > { %v2517_v50 = vadd.f32 %v2516_v48, %v2515_v47  ;;  %v2518_v51 = vpop.f32.mrb[30].mxu0  ;;  %v2627_v52 = vpop.f32.mrb[28].mxu1 }
 0x134   : > { %v2519_v53 = vpop.f32.mrb[31].mxu0  ;;  %v2628_v58 = vpop.f32.mrb[29].mxu1 }
 0x135   : > { %v1163_v54 = vadd.f32 %v2517_v50, %v3237_v57  ;;  %v2520_v56 = vadd.f32 %v2519_v53, %v2518_v51  ;;  %v2629_v60 = vadd.f32 %v2628_v58, %v2627_v52  ;;  %v2630_v61 = vpop.f32.mrb[30].mxu1 }
 0x136   : > { %v2631_v63 = vpop.f32.mrb[31].mxu1 }
 0x137   : > { %v1166_v62 = vadd.f32 %v2520_v56, %v3237_v57  ;;  %v2632_v0 = vadd.f32 %v2631_v63, %v2630_v61  ;;  %v3283_v1 = vadd.f32 %v2629_v60, %v1163_v54 }
 0x139   : > { %v2521_v2 = vpop.f32.mrb[32].mxu0  ;;  %v3285_v4 = vadd.f32 %v2632_v0, %v1166_v62 }
 0x13a   : > { %v2522_v3 = vpop.f32.mrb[33].mxu0 }
 0x13b   : > { %v2523_v5 = vadd.f32 %v2522_v3, %v2521_v2  ;;  %v2524_v6 = vpop.f32.mrb[34].mxu0  ;;  %v2633_v8 = vpop.f32.mrb[32].mxu1 }
 0x13c   : > { %v2525_v11 = vpop.f32.mrb[35].mxu0  ;;  %v2634_v15 = vpop.f32.mrb[33].mxu1 }
 0x13d   : > { %v1171_v12 = vadd.f32 %v2523_v5, %v3237_v57  ;;  %v2526_v14 = vadd.f32 %v2525_v11, %v2524_v6  ;;  %v2635_v16 = vadd.f32 %v2634_v15, %v2633_v8  ;;  %v2636_v17 = vpop.f32.mrb[34].mxu1 }
 0x13e   : > { %v2637_v19 = vpop.f32.mrb[35].mxu1 }
 0x13f   : > { %v1174_v18 = vadd.f32 %v2526_v14, %v3237_v57  ;;  %v2638_v20 = vadd.f32 %v2637_v19, %v2636_v17  ;;  %v3289_v21 = vadd.f32 %v2635_v16, %v1171_v12 }
 0x141   : > { %v2527_v22 = vpop.f32.mrb[36].mxu0  ;;  %v3291_v25 = vadd.f32 %v2638_v20, %v1174_v18 }
 0x142   : > { %v2528_v24 = vpop.f32.mrb[37].mxu0 }
 0x143   : > { %v2529_v27 = vadd.f32 %v2528_v24, %v2527_v22  ;;  %v2530_v29 = vpop.f32.mrb[38].mxu0  ;;  %v2639_v30 = vpop.f32.mrb[36].mxu1 }
 0x144   : > { %v2531_v32 = vpop.f32.mrb[39].mxu0  ;;  %v2640_v35 = vpop.f32.mrb[37].mxu1 }
 0x145   : > { %v1179_v33 = vadd.f32 %v2529_v27, %v3237_v57  ;;  %v2532_v34 = vadd.f32 %v2531_v32, %v2530_v29  ;;  %v2641_v36 = vadd.f32 %v2640_v35, %v2639_v30  ;;  %v2642_v37 = vpop.f32.mrb[38].mxu1 }
 0x146   : > { %v2643_v40 = vpop.f32.mrb[39].mxu1 }
 0x147   : > { %v1182_v38 = vadd.f32 %v2532_v34, %v3237_v57  ;;  %v2644_v41 = vadd.f32 %v2643_v40, %v2642_v37  ;;  %v3295_v43 = vadd.f32 %v2641_v36, %v1179_v33 }
 0x149   : > { %v2533_v44 = vpop.f32.mrb[40].mxu0  ;;  %v3297_v47 = vadd.f32 %v2644_v41, %v1182_v38 }
 0x14a   : > { %v2534_v45 = vpop.f32.mrb[41].mxu0 }
 0x14b   : > { %v2535_v48 = vadd.f32 %v2534_v45, %v2533_v44  ;;  %v2536_v50 = vpop.f32.mrb[42].mxu0  ;;  %v2645_v51 = vpop.f32.mrb[40].mxu1 }
 0x14c   : > { %v2537_v52 = vpop.f32.mrb[43].mxu0  ;;  %v2646_v56 = vpop.f32.mrb[41].mxu1 }
 0x14d   : > { %v1187_v53 = vadd.f32 %v2535_v48, %v3237_v57  ;;  %v2538_v54 = vadd.f32 %v2537_v52, %v2536_v50  ;;  %v2647_v58 = vadd.f32 %v2646_v56, %v2645_v51  ;;  %v2648_v60 = vpop.f32.mrb[42].mxu1 }
 0x14e   : > { %v2649_v62 = vpop.f32.mrb[43].mxu1 }
 0x14f   : > { %v1190_v61 = vadd.f32 %v2538_v54, %v3237_v57  ;;  %v2650_v63 = vadd.f32 %v2649_v62, %v2648_v60  ;;  %v3301_v0 = vadd.f32 %v2647_v58, %v1187_v53 }
 0x151   : > { %v2539_v2 = vpop.f32.mrb[44].mxu0  ;;  %v3303_v5 = vadd.f32 %v2650_v63, %v1190_v61 }
 0x152   : > { %v2540_v3 = vpop.f32.mrb[45].mxu0 }
 0x153   : > { %v2541_v6 = vadd.f32 %v2540_v3, %v2539_v2  ;;  %v2542_v8 = vpop.f32.mrb[46].mxu0  ;;  %v2651_v11 = vpop.f32.mrb[44].mxu1 }
 0x154   : > { %v2543_v12 = vpop.f32.mrb[47].mxu0  ;;  %v2652_v16 = vpop.f32.mrb[45].mxu1 }
 0x155   : > { %v1195_v14 = vadd.f32 %v2541_v6, %v3237_v57  ;;  %v2544_v15 = vadd.f32 %v2543_v12, %v2542_v8  ;;  %v2653_v17 = vadd.f32 %v2652_v16, %v2651_v11  ;;  %v2654_v18 = vpop.f32.mrb[46].mxu1 }
 0x156   : > { %v2655_v20 = vpop.f32.mrb[47].mxu1 }
 0x157   : > { %v1198_v19 = vadd.f32 %v2544_v15, %v3237_v57  ;;  %v2656_v22 = vadd.f32 %v2655_v20, %v2654_v18  ;;  %v3307_v24 = vadd.f32 %v2653_v17, %v1195_v14 }
 0x159   : > { %v2545_v27 = vpop.f32.mrb[48].mxu0  ;;  %v3309_v30 = vadd.f32 %v2656_v22, %v1198_v19 }
 0x15a   : > { %v2546_v29 = vpop.f32.mrb[49].mxu0 }
 0x15b   : > { %v2547_v32 = vadd.f32 %v2546_v29, %v2545_v27  ;;  %v2548_v33 = vpop.f32.mrb[50].mxu0  ;;  %v2657_v34 = vpop.f32.mrb[48].mxu1 }
 0x15c   : > { %v2549_v35 = vpop.f32.mrb[51].mxu0  ;;  %v2658_v38 = vpop.f32.mrb[49].mxu1 }
 0x15d   : > { %v1203_v36 = vadd.f32 %v2547_v32, %v3237_v57  ;;  %v2550_v37 = vadd.f32 %v2549_v35, %v2548_v33  ;;  %v2659_v40 = vadd.f32 %v2658_v38, %v2657_v34  ;;  %v2660_v41 = vpop.f32.mrb[50].mxu1 }
 0x15e   : > { %v2661_v45 = vpop.f32.mrb[51].mxu1 }
 0x15f   : > { %v1206_v44 = vadd.f32 %v2550_v37, %v3237_v57  ;;  %v2662_v48 = vadd.f32 %v2661_v45, %v2660_v41  ;;  %v3313_v50 = vadd.f32 %v2659_v40, %v1203_v36 }
 0x161   : > { %v2551_v51 = vpop.f32.mrb[52].mxu0  ;;  %v3315_v53 = vadd.f32 %v2662_v48, %v1206_v44 }
 0x162   : > { %v2552_v52 = vpop.f32.mrb[53].mxu0 }
 0x163   : > { %v2553_v54 = vadd.f32 %v2552_v52, %v2551_v51  ;;  %v2554_v56 = vpop.f32.mrb[54].mxu0  ;;  %v2663_v58 = vpop.f32.mrb[52].mxu1 }
 0x164   : > { %v2555_v60 = vpop.f32.mrb[55].mxu0  ;;  %v2664_v63 = vpop.f32.mrb[53].mxu1 }
 0x165   : > { %v1211_v61 = vadd.f32 %v2553_v54, %v3237_v57  ;;  %v2556_v62 = vadd.f32 %v2555_v60, %v2554_v56  ;;  %v2665_v2 = vadd.f32 %v2664_v63, %v2663_v58  ;;  %v2666_v3 = vpop.f32.mrb[54].mxu1 }
 0x166   : > { %v2667_v8 = vpop.f32.mrb[55].mxu1 }
 0x167   : > { %v1214_v6 = vadd.f32 %v2556_v62, %v3237_v57  ;;  %v2668_v11 = vadd.f32 %v2667_v8, %v2666_v3  ;;  %v3319_v12 = vadd.f32 %v2665_v2, %v1211_v61 }
 0x169   : > { %v2557_v14 = vpop.f32.mrb[56].mxu0  ;;  %v3321_v16 = vadd.f32 %v2668_v11, %v1214_v6 }
 0x16a   : > { %v2558_v15 = vpop.f32.mrb[57].mxu0 }
 0x16b   : > { %v2559_v17 = vadd.f32 %v2558_v15, %v2557_v14  ;;  %v2560_v18 = vpop.f32.mrb[58].mxu0  ;;  %v2669_v19 = vpop.f32.mrb[56].mxu1 }
 0x16c   : > { %v2561_v20 = vpop.f32.mrb[59].mxu0  ;;  %v2670_v29 = vpop.f32.mrb[57].mxu1 }
 0x16d   : > { %v1219_v22 = vadd.f32 %v2559_v17, %v3237_v57  ;;  %v2562_v27 = vadd.f32 %v2561_v20, %v2560_v18  ;;  %v2671_v32 = vadd.f32 %v2670_v29, %v2669_v19  ;;  %v2672_v33 = vpop.f32.mrb[58].mxu1 }
 0x16e   : > { %v2673_v35 = vpop.f32.mrb[59].mxu1 }
 0x16f   : > { %v1222_v34 = vadd.f32 %v2562_v27, %v3237_v57  ;;  %v2674_v36 = vadd.f32 %v2673_v35, %v2672_v33  ;;  %v3325_v37 = vadd.f32 %v2671_v32, %v1219_v22 }
 0x171   : > { %v2563_v38 = vpop.f32.mrb[60].mxu0  ;;  %v3327_v41 = vadd.f32 %v2674_v36, %v1222_v34 }
 0x172   : > { %v2564_v40 = vpop.f32.mrb[61].mxu0 }
 0x173   : > { %v2565_v44 = vadd.f32 %v2564_v40, %v2563_v38  ;;  %v2566_v45 = vpop.f32.mrb[62].mxu0  ;;  %v2675_v48 = vpop.f32.mrb[60].mxu1 }
 0x174   : > { %v2567_v51 = vpop.f32.mrb[63].mxu0  ;;  %v2676_v56 = vpop.f32.mrb[61].mxu1 }
 0x175   : > { %v1227_v52 = vadd.f32 %v2565_v44, %v3237_v57  ;;  %v2568_v54 = vadd.f32 %v2567_v51, %v2566_v45  ;;  %v2677_v58 = vadd.f32 %v2676_v56, %v2675_v48  ;;  %v2678_v60 = vpop.f32.mrb[62].mxu1 }
 0x176   : > { %v2679_v62 = vpop.f32.mrb[63].mxu1 }
 0x177   : > { %v1230_v61 = vadd.f32 %v2568_v54, %v3237_v57  ;;  %v2680_v63 = vadd.f32 %v2679_v62, %v2678_v60  ;;  %v3331_v2 = vadd.f32 %v2677_v58, %v1227_v52 }
 0x179   : > { %v2731_v3 = vpop.f32.mrb[64].mxu0  ;;  %v3334_v11 = vadd.f32 %v2680_v63, %v1230_v61 }
 0x17a   : > { %v1437_v6 = vadd.f32 %v2731_v3, %v3247_v23  ;;  %v1428_v8 = vpop.f32.mrb[65].mxu0 }
 0x17b   : > { %v1429_v14 = vadd.f32 %v1428_v8, %v3241_v7  ;;  %v2732_v15 = vpop.f32.mrb[66].mxu0 }
 0x17c   : > { %v1589_v17 = vmul.f32 0.2, %v1437_v6  ;;  %v1440_v18 = vadd.f32 %v2732_v15, %v3249_v26  ;;  %v1431_v19 = vpop.f32.mrb[67].mxu0  ;;  %vm1557_vm1 = vcmp.ge.f32.partialorder %v1437_v6, 0.0 }
 0x17d   : > { %v1587_v20 = vmul.f32 0.2, %v1429_v14  ;;  %v1432_v57 = vadd.f32 %v1431_v19, %v3243_v10  ;;  %vm1555_vm2 = vcmp.ge.f32.partialorder %v1429_v14, 0.0 }
 0x17e   : > { %vm1558_vm3 = vcmp.ge.f32.partialorder %v1440_v18, 0.0  ;;  %v1590_v22 = vmul.f32 0.2, %v1440_v18  ;;  %v1621_v23 = vsel %vm1557_vm1, %v1437_v6, %v1589_v17 }
 0x17f   : > { %vm1556_vm4 = vcmp.ge.f32.partialorder %v1432_v57, 0.0  ;;  %v1588_v27 = vmul.f32 0.2, %v1432_v57  ;;  %v1619_v32 = vsel %vm1555_vm2, %v1429_v14, %v1587_v20 }
 0x180   : > { %v1622_v29 = vsel %vm1558_vm3, %v1440_v18, %v1590_v22 }
 0x181   : > { %v1652_v33 = vpack.c.bf16 %v1622_v29, %v1621_v23  ;;  %v1620_v34 = vsel %vm1556_vm4, %v1432_v57, %v1588_v27  ;;  %v2735_v7 = vpop.f32.mrb[68].mxu0 }
 0x182   : > { %v1651_v35 = vpack.c.bf16 %v1620_v34, %v1619_v32  ;;  %v1453_v36 = vadd.f32 %v2735_v7, %v3259_v55  ;;  %v1444_v26 = vpop.f32.mrb[69].mxu0 }
 0x183   : > { %v1445_v38 = vadd.f32 %v1444_v26, %v3253_v39  ;;  %v2736_v40 = vpop.f32.mrb[70].mxu0 }
 0x184   : > { %v1593_v44 = vmul.f32 0.2, %v1453_v36  ;;  %v1456_v10 = vadd.f32 %v2736_v40, %v3261_v59  ;;  %v1447_v45 = vpop.f32.mrb[71].mxu0  ;;  %2769 = vmatprep.mubr.msk.bf16.mxu1 %vm1023_vm0, %v1651_v35  ;;  %vm1561_vm5 = vcmp.ge.f32.partialorder %v1453_v36, 0.0 }
 0x185   : > { %v1591_v48 = vmul.f32 0.2, %v1445_v38  ;;  %v1448_v51 = vadd.f32 %v1447_v45, %v3255_v42  ;;  %2770 = vmatmul.mubr.msk.bf16.vlgmr.msra.gmra.mrb[64].mxu1 %vm1023_vm0, %v1652_v33  ;;  %vm1559_vm6 = vcmp.ge.f32.partialorder %v1445_v38, 0.0 }
 0x186   : > { %vm1562_vm7 = vcmp.ge.f32.partialorder %v1456_v10, 0.0  ;;  %v1594_v52 = vmul.f32 0.2, %v1456_v10  ;;  %v1625_v54 = vsel %vm1561_vm5, %v1453_v36, %v1593_v44 }
 0x187   : > { %vm1560_vm8 = vcmp.ge.f32.partialorder %v1448_v51, 0.0  ;;  %v1592_v55 = vmul.f32 0.2, %v1448_v51  ;;  %v1623_v56 = vsel %vm1559_vm6, %v1445_v38, %v1591_v48 }
 0x188   : > { %v1626_v39 = vsel %vm1562_vm7, %v1456_v10, %v1594_v52 }
 0x189   : > { %v1654_v58 = vpack.c.bf16 %v1626_v39, %v1625_v54  ;;  %v1624_v60 = vsel %vm1560_vm8, %v1448_v51, %v1592_v55  ;;  %v2739_v59 = vpop.f32.mrb[72].mxu0 }
 0x18a   : > { %v1653_v61 = vpack.c.bf16 %v1624_v60, %v1623_v56  ;;  %v1469_v62 = vadd.f32 %v2739_v59, %v3271_v28  ;;  %v1460_v63 = vpop.f32.mrb[73].mxu0 }
 0x18b   : > { %v1461_v3 = vadd.f32 %v1460_v63, %v3265_v9  ;;  %v2740_v42 = vpop.f32.mrb[74].mxu0 }
 0x18c   : > { %v1597_v6 = vmul.f32 0.2, %v1469_v62  ;;  %v1472_v8 = vadd.f32 %v2740_v42, %v3273_v31  ;;  %v1463_v14 = vpop.f32.mrb[75].mxu0  ;;  %2773 = vmatprep.mubr.msk.bf16.mxu1 %vm1023_vm0, %v1653_v61  ;;  %vm1565_vm9 = vcmp.ge.f32.partialorder %v1469_v62, 0.0 }
 0x18d   : > { %v1595_v15 = vmul.f32 0.2, %v1461_v3  ;;  %v1464_v17 = vadd.f32 %v1463_v14, %v3267_v13  ;;  %2774 = vmatmul.mubr.msk.bf16.gmra.mrb[68].mxu1 %vm1023_vm0, %v1654_v58  ;;  %vm1563_vm10 = vcmp.ge.f32.partialorder %v1461_v3, 0.0 }
 0x18e   : > { %vm1566_vm11 = vcmp.ge.f32.partialorder %v1472_v8, 0.0  ;;  %v1598_v18 = vmul.f32 0.2, %v1472_v8  ;;  %v1629_v19 = vsel %vm1565_vm9, %v1469_v62, %v1597_v6 }
 0x18f   : > { %vm1564_vm12 = vcmp.ge.f32.partialorder %v1464_v17, 0.0  ;;  %v1596_v28 = vmul.f32 0.2, %v1464_v17  ;;  %v1627_v20 = vsel %vm1563_vm10, %v1461_v3, %v1595_v15 }
 0x190   : > { %v1630_v9 = vsel %vm1566_vm11, %v1472_v8, %v1598_v18 }
 0x191   : > { %v1656_v57 = vpack.c.bf16 %v1630_v9, %v1629_v19  ;;  %v1628_v22 = vsel %vm1564_vm12, %v1464_v17, %v1596_v28  ;;  %v2743_v31 = vpop.f32.mrb[76].mxu0 }
 0x192   : > { %v1655_v27 = vpack.c.bf16 %v1628_v22, %v1627_v20  ;;  %v1485_v23 = vadd.f32 %v2743_v31, %v3283_v1  ;;  %v1476_v29 = vpop.f32.mrb[77].mxu0 }
 0x193   : > { %v1477_v32 = vadd.f32 %v1476_v29, %v3277_v46  ;;  %v2744_v13 = vpop.f32.mrb[78].mxu0 }
 0x194   : > { %v1601_v33 = vmul.f32 0.2, %v1485_v23  ;;  %v1488_v34 = vadd.f32 %v2744_v13, %v3285_v4  ;;  %v1479_v7 = vpop.f32.mrb[79].mxu0  ;;  %2777 = vmatprep.mubr.msk.bf16.mxu1 %vm1023_vm0, %v1655_v27  ;;  %vm1569_vm13 = vcmp.ge.f32.partialorder %v1485_v23, 0.0 }
 0x195   : > { %v1599_v35 = vmul.f32 0.2, %v1477_v32  ;;  %v1480_v36 = vadd.f32 %v1479_v7, %v3279_v49  ;;  %2778 = vmatmul.mubr.msk.bf16.gmra.mrb[72].mxu1 %vm1023_vm0, %v1656_v57  ;;  %vm1567_vm14 = vcmp.ge.f32.partialorder %v1477_v32, 0.0 }
 0x196   : > { %vm1570_vm15 = vcmp.ge.f32.partialorder %v1488_v34, 0.0  ;;  %v1602_v26 = vmul.f32 0.2, %v1488_v34  ;;  %v1633_v38 = vsel %vm1569_vm13, %v1485_v23, %v1601_v33 }
 0x197   : > { %vm1568_vm1 = vcmp.ge.f32.partialorder %v1480_v36, 0.0  ;;  %v1600_v1 = vmul.f32 0.2, %v1480_v36  ;;  %v1631_v40 = vsel %vm1567_vm14, %v1477_v32, %v1599_v35 }
 0x198   : > { %v1634_v46 = vsel %vm1570_vm15, %v1488_v34, %v1602_v26 }
 0x199   : > { %v1658_v44 = vpack.c.bf16 %v1634_v46, %v1633_v38  ;;  %v1632_v10 = vsel %vm1568_vm1, %v1480_v36, %v1600_v1  ;;  %v2747_v4 = vpop.f32.mrb[80].mxu0 }
 0x19a   : > { %v1657_v45 = vpack.c.bf16 %v1632_v10, %v1631_v40  ;;  %v1501_v48 = vadd.f32 %v2747_v4, %v3295_v43  ;;  %v1492_v51 = vpop.f32.mrb[81].mxu0 }
 0x19b   : > { %v1493_v52 = vadd.f32 %v1492_v51, %v3289_v21  ;;  %v2748_v49 = vpop.f32.mrb[82].mxu0 }
 0x19c   : > { %v1605_v55 = vmul.f32 0.2, %v1501_v48  ;;  %v1504_v54 = vadd.f32 %v2748_v49, %v3297_v47  ;;  %v1495_v39 = vpop.f32.mrb[83].mxu0  ;;  %2781 = vmatprep.mubr.msk.bf16.mxu1 %vm1023_vm0, %v1657_v45  ;;  %vm1573_vm2 = vcmp.ge.f32.partialorder %v1501_v48, 0.0 }
 0x19d   : > { %v1603_v56 = vmul.f32 0.2, %v1493_v52  ;;  %v1496_v58 = vadd.f32 %v1495_v39, %v3291_v25  ;;  %2782 = vmatmul.mubr.msk.bf16.gmra.mrb[76].mxu1 %vm1023_vm0, %v1658_v44  ;;  %vm1571_vm3 = vcmp.ge.f32.partialorder %v1493_v52, 0.0 }
 0x19e   : > { %vm1574_vm4 = vcmp.ge.f32.partialorder %v1504_v54, 0.0  ;;  %v1606_v60 = vmul.f32 0.2, %v1504_v54  ;;  %v1637_v59 = vsel %vm1573_vm2, %v1501_v48, %v1605_v55 }
 0x19f   : > { %vm1572_vm5 = vcmp.ge.f32.partialorder %v1496_v58, 0.0  ;;  %v1604_v43 = vmul.f32 0.2, %v1496_v58  ;;  %v1635_v61 = vsel %vm1571_vm3, %v1493_v52, %v1603_v56 }
 0x1a0   : > { %v1638_v21 = vsel %vm1574_vm4, %v1504_v54, %v1606_v60 }
 0x1a1   : > { %v1660_v62 = vpack.c.bf16 %v1638_v21, %v1637_v59  ;;  %v1636_v63 = vsel %vm1572_vm5, %v1496_v58, %v1604_v43  ;;  %v2751_v47 = vpop.f32.mrb[84].mxu0 }
 0x1a2   : > { %v1659_v3 = vpack.c.bf16 %v1636_v63, %v1635_v61  ;;  %v1517_v42 = vadd.f32 %v2751_v47, %v3307_v24  ;;  %v1508_v6 = vpop.f32.mrb[85].mxu0 }
 0x1a3   : > { %v1509_v8 = vadd.f32 %v1508_v6, %v3301_v0  ;;  %v2752_v25 = vpop.f32.mrb[86].mxu0 }
 0x1a4   : > { %v1609_v14 = vmul.f32 0.2, %v1517_v42  ;;  %v1520_v15 = vadd.f32 %v2752_v25, %v3309_v30  ;;  %v1511_v17 = vpop.f32.mrb[87].mxu0  ;;  %2785 = vmatprep.mubr.msk.bf16.mxu1 %vm1023_vm0, %v1659_v3  ;;  %vm1577_vm6 = vcmp.ge.f32.partialorder %v1517_v42, 0.0 }
 0x1a5   : > { %v1607_v18 = vmul.f32 0.2, %v1509_v8  ;;  %v1512_v28 = vadd.f32 %v1511_v17, %v3303_v5  ;;  %2786 = vmatmul.mubr.msk.bf16.gmra.mrb[80].mxu1 %vm1023_vm0, %v1660_v62  ;;  %vm1575_vm7 = vcmp.ge.f32.partialorder %v1509_v8, 0.0 }
 0x1a6   : > { %vm1578_vm8 = vcmp.ge.f32.partialorder %v1520_v15, 0.0  ;;  %v1610_v19 = vmul.f32 0.2, %v1520_v15  ;;  %v1641_v9 = vsel %vm1577_vm6, %v1517_v42, %v1609_v14 }
 0x1a7   : > { %vm1576_vm9 = vcmp.ge.f32.partialorder %v1512_v28, 0.0  ;;  %v1608_v24 = vmul.f32 0.2, %v1512_v28  ;;  %v1639_v20 = vsel %vm1575_vm7, %v1509_v8, %v1607_v18 }
 0x1a8   : > { %v1642_v0 = vsel %vm1578_vm8, %v1520_v15, %v1610_v19 }
 0x1a9   : > { %v1662_v57 = vpack.c.bf16 %v1642_v0, %v1641_v9  ;;  %v1640_v22 = vsel %vm1576_vm9, %v1512_v28, %v1608_v24  ;;  %v2755_v30 = vpop.f32.mrb[88].mxu0 }
 0x1aa   : > { %v1661_v31 = vpack.c.bf16 %v1640_v22, %v1639_v20  ;;  %v1533_v27 = vadd.f32 %v2755_v30, %v3319_v12  ;;  %v1524_v23 = vpop.f32.mrb[89].mxu0 }
 0x1ab   : > { %v1525_v29 = vadd.f32 %v1524_v23, %v3313_v50  ;;  %v2756_v5 = vpop.f32.mrb[90].mxu0 }
 0x1ac   : > { %v1613_v32 = vmul.f32 0.2, %v1533_v27  ;;  %v1536_v13 = vadd.f32 %v2756_v5, %v3321_v16  ;;  %v1527_v33 = vpop.f32.mrb[91].mxu0  ;;  %2789 = vmatprep.mubr.msk.bf16.mxu1 %vm1023_vm0, %v1661_v31  ;;  %vm1581_vm10 = vcmp.ge.f32.partialorder %v1533_v27, 0.0 }
 0x1ad   : > { %v1611_v34 = vmul.f32 0.2, %v1525_v29  ;;  %v1528_v7 = vadd.f32 %v1527_v33, %v3315_v53  ;;  %2790 = vmatmul.mubr.msk.bf16.gmra.mrb[84].mxu1 %vm1023_vm0, %v1662_v57  ;;  %vm1579_vm11 = vcmp.ge.f32.partialorder %v1525_v29, 0.0 }
 0x1ae   : > { %vm1582_vm12 = vcmp.ge.f32.partialorder %v1536_v13, 0.0  ;;  %v1614_v35 = vmul.f32 0.2, %v1536_v13  ;;  %v1645_v36 = vsel %vm1581_vm10, %v1533_v27, %v1613_v32 }
 0x1af   : > { %vm1580_vm13 = vcmp.ge.f32.partialorder %v1528_v7, 0.0  ;;  %v1612_v12 = vmul.f32 0.2, %v1528_v7  ;;  %v1643_v26 = vsel %vm1579_vm11, %v1525_v29, %v1611_v34 }
 0x1b0   : > { %v1646_v50 = vsel %vm1582_vm12, %v1536_v13, %v1614_v35 }
 0x1b1   : > { %v1664_v1 = vpack.c.bf16 %v1646_v50, %v1645_v36  ;;  %v1644_v38 = vsel %vm1580_vm13, %v1528_v7, %v1612_v12  ;;  %v2759_v16 = vpop.f32.mrb[92].mxu0 }
 0x1b2   : > { %v1663_v46 = vpack.c.bf16 %v1644_v38, %v1643_v26  ;;  %v1549_v40 = vadd.f32 %v2759_v16, %v3331_v2  ;;  %v1540_v44 = vpop.f32.mrb[93].mxu0 }
 0x1b3   : > { %v1541_v10 = vadd.f32 %v1540_v44, %v3325_v37  ;;  %v2760_v53 = vpop.f32.mrb[94].mxu0 }
 0x1b4   : > { %v1617_v4 = vmul.f32 0.2, %v1549_v40  ;;  %v1552_v45 = vadd.f32 %v2760_v53, %v3334_v11  ;;  %v1543_v48 = vpop.f32.mrb[95].mxu0  ;;  %2793 = vmatprep.mubr.msk.bf16.mxu1 %vm1023_vm0, %v1663_v46  ;;  %vm1585_vm14 = vcmp.ge.f32.partialorder %v1549_v40, 0.0 }
 0x1b5   : > { %v1615_v51 = vmul.f32 0.2, %v1541_v10  ;;  %v1544_v52 = vadd.f32 %v1543_v48, %v3327_v41  ;;  %2794 = vmatmul.mubr.msk.bf16.gmra.mrb[88].mxu1 %vm1023_vm0, %v1664_v1  ;;  %vm1583_vm15 = vcmp.ge.f32.partialorder %v1541_v10, 0.0  ;;  %v3386_v41 = vld [vmem:[%s3497_s4] ss:$0 sm:$0xff] }
 0x1b6   : > { %vm1586_vm1 = vcmp.ge.f32.partialorder %v1552_v45, 0.0  ;;  %v1618_v2 = vmul.f32 0.2, %v1552_v45  ;;  %v1649_v37 = vsel %vm1585_vm14, %v1549_v40, %v1617_v4 }
 0x1b7   : > { %vm1584_vm2 = vcmp.ge.f32.partialorder %v1544_v52, 0.0  ;;  %v1616_v49 = vmul.f32 0.2, %v1544_v52  ;;  %v1647_v54 = vsel %vm1583_vm15, %v1541_v10, %v1615_v51 }
 0x1b8   : > { %v1650_v55 = vsel %vm1586_vm1, %v1552_v45, %v1618_v2 }
 0x1b9   : > { %v1666_v39 = vpack.c.bf16 %v1650_v55, %v1649_v37  ;;  %v1648_v11 = vsel %vm1584_vm2, %v1544_v52, %v1616_v49 }
 0x1ba   : > { %v1665_v56 = vpack.c.bf16 %v1648_v11, %v1647_v54 }
 0x1bc   : > { %2797 = vmatprep.mubr.msk.bf16.mxu1 %vm1023_vm0, %v1665_v56 }
 0x1bd   : > { %2798 = vmatmul.mubr.msk.bf16.gmra.mrb[92].mxu1 %vm1023_vm0, %v1666_v39  ;;  %vm2139_vm0 = vcmask 519168  }
 0x258   : > { %v2771_v58 = vpop.f32.mrb[64].mxu1 }
 0x259   : > { %v1797_v60 = vadd.f32 %v2771_v58, %v3386_v41  ;;  %v1788_v43 = vpop.f32.mrb[65].mxu1 }
 0x25a   : > { %v1789_v59 = vadd.f32 %v3386_v41, %v1788_v43  ;;  %v2772_v21 = vpop.f32.mrb[66].mxu1 }
 0x25b   : > { %vm1917_vm3 = vcmp.ge.f32.partialorder %v1797_v60, 0.0  ;;  %v1949_v61 = vmul.f32 0.2, %v1797_v60  ;;  %v1800_v62 = vadd.f32 %v2772_v21, %v3386_v41  ;;  %v1791_v63 = vpop.f32.mrb[67].mxu1 }
 0x25c   : > { %vm1915_vm4 = vcmp.ge.f32.partialorder %v1789_v59, 0.0  ;;  %v1947_v47 = vmul.f32 0.2, %v1789_v59  ;;  %v1792_v3 = vadd.f32 %v3386_v41, %v1791_v63 }
 0x25d   : > { %v1981_v42 = vsel %vm1917_vm3, %v1797_v60, %v1949_v61  ;;  %vm1918_vm5 = vcmp.ge.f32.partialorder %v1800_v62, 0.0  ;;  %v1950_v6 = vmul.f32 0.2, %v1800_v62 }
 0x25e   : > { %v2427_v8 = vpack.c.bf16 %v1981_v42, %v1981_v42  ;;  %v1979_v25 = vsel %vm1915_vm4, %v1789_v59, %v1947_v47  ;;  %vm1916_vm6 = vcmp.ge.f32.partialorder %v1792_v3, 0.0  ;;  %v1948_v14 = vmul.f32 0.2, %v1792_v3 }
 0x25f   : > { %v2425_v15 = vpack.c.bf16 %v1979_v25, %v1979_v25  ;;  %v1982_v17 = vsel %vm1918_vm5, %v1800_v62, %v1950_v6 }
 0x260   : > { %2142 = vst.msk [vmem:[%s3396_s17 + $0x8] sm:$0xf] %vm2139_vm0, %v2427_v8  ;;  %v2428_v18 = vpack.c.bf16 %v1982_v17, %v1982_v17  ;;  %v1980_v28 = vsel %vm1916_vm6, %v1792_v3, %v1948_v14  ;;  %v2775_v19 = vpop.f32.mrb[68].mxu1 }
 0x261   : > { %2140 = vst.msk [vmem:[%s3396_s17] sm:$0xf] %vm2139_vm0, %v2425_v15  ;;  %v2426_v24 = vpack.c.bf16 %v1980_v28, %v1980_v28  ;;  %v1813_v9 = vadd.f32 %v2775_v19, %v3386_v41  ;;  %v1804_v0 = vpop.f32.mrb[69].mxu1 }
 0x262   : > { %2143 = vst.msk [vmem:[%s3396_s17 + $0xc] sm:$0xf] %vm2139_vm0, %v2428_v18  ;;  %v1805_v20 = vadd.f32 %v3386_v41, %v1804_v0  ;;  %v2776_v57 = vpop.f32.mrb[70].mxu1 }
 0x263   : > { %2141 = vst.msk [vmem:[%s3396_s17 + $0x4] sm:$0xf] %vm2139_vm0, %v2426_v24  ;;  %vm1921_vm7 = vcmp.ge.f32.partialorder %v1813_v9, 0.0  ;;  %v1953_v22 = vmul.f32 0.2, %v1813_v9  ;;  %v1816_v30 = vadd.f32 %v2776_v57, %v3386_v41  ;;  %v1807_v31 = vpop.f32.mrb[71].mxu1 }
 0x264   : > { %vm1919_vm8 = vcmp.ge.f32.partialorder %v1805_v20, 0.0  ;;  %v1951_v27 = vmul.f32 0.2, %v1805_v20  ;;  %v1808_v23 = vadd.f32 %v3386_v41, %v1807_v31 }
 0x265   : > { %v1985_v29 = vsel %vm1921_vm7, %v1813_v9, %v1953_v22  ;;  %vm1922_vm9 = vcmp.ge.f32.partialorder %v1816_v30, 0.0  ;;  %v1954_v5 = vmul.f32 0.2, %v1816_v30 }
 0x266   : > { %v2431_v32 = vpack.c.bf16 %v1985_v29, %v1985_v29  ;;  %v1983_v13 = vsel %vm1919_vm8, %v1805_v20, %v1951_v27  ;;  %vm1920_vm10 = vcmp.ge.f32.partialorder %v1808_v23, 0.0  ;;  %v1952_v33 = vmul.f32 0.2, %v1808_v23 }
 0x267   : > { %v2429_v34 = vpack.c.bf16 %v1983_v13, %v1983_v13  ;;  %v1986_v7 = vsel %vm1922_vm9, %v1816_v30, %v1954_v5 }
 0x268   : > { %2146 = vst.msk [vmem:[%s3396_s17 + $0x18] sm:$0xf] %vm2139_vm0, %v2431_v32  ;;  %v2432_v35 = vpack.c.bf16 %v1986_v7, %v1986_v7  ;;  %v1984_v12 = vsel %vm1920_vm10, %v1808_v23, %v1952_v33  ;;  %v2779_v36 = vpop.f32.mrb[72].mxu1 }
 0x269   : > { %2144 = vst.msk [vmem:[%s3396_s17 + $0x10] sm:$0xf] %vm2139_vm0, %v2429_v34  ;;  %v2430_v50 = vpack.c.bf16 %v1984_v12, %v1984_v12  ;;  %v1829_v26 = vadd.f32 %v2779_v36, %v3386_v41  ;;  %v1820_v1 = vpop.f32.mrb[73].mxu1 }
 0x26a   : > { %2147 = vst.msk [vmem:[%s3396_s17 + $0x1c] sm:$0xf] %vm2139_vm0, %v2432_v35  ;;  %v1821_v38 = vadd.f32 %v3386_v41, %v1820_v1  ;;  %v2780_v16 = vpop.f32.mrb[74].mxu1 }
 0x26b   : > { %2145 = vst.msk [vmem:[%s3396_s17 + $0x14] sm:$0xf] %vm2139_vm0, %v2430_v50  ;;  %vm1925_vm11 = vcmp.ge.f32.partialorder %v1829_v26, 0.0  ;;  %v1957_v46 = vmul.f32 0.2, %v1829_v26  ;;  %v1832_v40 = vadd.f32 %v2780_v16, %v3386_v41  ;;  %v1823_v44 = vpop.f32.mrb[75].mxu1 }
 0x26c   : > { %vm1923_vm12 = vcmp.ge.f32.partialorder %v1821_v38, 0.0  ;;  %v1955_v10 = vmul.f32 0.2, %v1821_v38  ;;  %v1824_v53 = vadd.f32 %v3386_v41, %v1823_v44 }
 0x26d   : > { %v1989_v4 = vsel %vm1925_vm11, %v1829_v26, %v1957_v46  ;;  %vm1926_vm13 = vcmp.ge.f32.partialorder %v1832_v40, 0.0  ;;  %v1958_v45 = vmul.f32 0.2, %v1832_v40 }
 0x26e   : > { %v2435_v48 = vpack.c.bf16 %v1989_v4, %v1989_v4  ;;  %v1987_v51 = vsel %vm1923_vm12, %v1821_v38, %v1955_v10  ;;  %vm1924_vm14 = vcmp.ge.f32.partialorder %v1824_v53, 0.0  ;;  %v1956_v52 = vmul.f32 0.2, %v1824_v53 }
 0x26f   : > { %v2433_v2 = vpack.c.bf16 %v1987_v51, %v1987_v51  ;;  %v1990_v49 = vsel %vm1926_vm13, %v1832_v40, %v1958_v45 }
 0x270   : > { %2150 = vst.msk [vmem:[%s3396_s17 + $0x28] sm:$0xf] %vm2139_vm0, %v2435_v48  ;;  %v2436_v37 = vpack.c.bf16 %v1990_v49, %v1990_v49  ;;  %v1988_v55 = vsel %vm1924_vm14, %v1824_v53, %v1956_v52  ;;  %v2783_v54 = vpop.f32.mrb[76].mxu1 }
 0x271   : > { %2148 = vst.msk [vmem:[%s3396_s17 + $0x20] sm:$0xf] %vm2139_vm0, %v2433_v2  ;;  %v2434_v39 = vpack.c.bf16 %v1988_v55, %v1988_v55  ;;  %v1845_v11 = vadd.f32 %v2783_v54, %v3386_v41  ;;  %v1836_v56 = vpop.f32.mrb[77].mxu1 }
 0x272   : > { %2151 = vst.msk [vmem:[%s3396_s17 + $0x2c] sm:$0xf] %vm2139_vm0, %v2436_v37  ;;  %v1837_v58 = vadd.f32 %v3386_v41, %v1836_v56  ;;  %v2784_v60 = vpop.f32.mrb[78].mxu1 }
 0x273   : > { %2149 = vst.msk [vmem:[%s3396_s17 + $0x24] sm:$0xf] %vm2139_vm0, %v2434_v39  ;;  %vm1929_vm15 = vcmp.ge.f32.partialorder %v1845_v11, 0.0  ;;  %v1961_v43 = vmul.f32 0.2, %v1845_v11  ;;  %v1848_v59 = vadd.f32 %v2784_v60, %v3386_v41  ;;  %v1839_v21 = vpop.f32.mrb[79].mxu1 }
 0x274   : > { %vm1927_vm1 = vcmp.ge.f32.partialorder %v1837_v58, 0.0  ;;  %v1959_v61 = vmul.f32 0.2, %v1837_v58  ;;  %v1840_v62 = vadd.f32 %v3386_v41, %v1839_v21 }
 0x275   : > { %v1993_v63 = vsel %vm1929_vm15, %v1845_v11, %v1961_v43  ;;  %vm1930_vm2 = vcmp.ge.f32.partialorder %v1848_v59, 0.0  ;;  %v1962_v47 = vmul.f32 0.2, %v1848_v59 }
 0x276   : > { %v2439_v3 = vpack.c.bf16 %v1993_v63, %v1993_v63  ;;  %v1991_v42 = vsel %vm1927_vm1, %v1837_v58, %v1959_v61  ;;  %vm1928_vm3 = vcmp.ge.f32.partialorder %v1840_v62, 0.0  ;;  %v1960_v6 = vmul.f32 0.2, %v1840_v62 }
 0x277   : > { %v2437_v8 = vpack.c.bf16 %v1991_v42, %v1991_v42  ;;  %v1994_v25 = vsel %vm1930_vm2, %v1848_v59, %v1962_v47 }
 0x278   : > { %2154 = vst.msk [vmem:[%s3396_s17 + $0x38] sm:$0xf] %vm2139_vm0, %v2439_v3  ;;  %v2440_v14 = vpack.c.bf16 %v1994_v25, %v1994_v25  ;;  %v1992_v15 = vsel %vm1928_vm3, %v1840_v62, %v1960_v6  ;;  %v2787_v17 = vpop.f32.mrb[80].mxu1 }
 0x279   : > { %2152 = vst.msk [vmem:[%s3396_s17 + $0x30] sm:$0xf] %vm2139_vm0, %v2437_v8  ;;  %v2438_v18 = vpack.c.bf16 %v1992_v15, %v1992_v15  ;;  %v1861_v28 = vadd.f32 %v2787_v17, %v3386_v41  ;;  %v1852_v19 = vpop.f32.mrb[81].mxu1 }
 0x27a   : > { %2155 = vst.msk [vmem:[%s3396_s17 + $0x3c] sm:$0xf] %vm2139_vm0, %v2440_v14  ;;  %v1853_v24 = vadd.f32 %v3386_v41, %v1852_v19  ;;  %v2788_v9 = vpop.f32.mrb[82].mxu1 }
 0x27b   : > { %2153 = vst.msk [vmem:[%s3396_s17 + $0x34] sm:$0xf] %vm2139_vm0, %v2438_v18  ;;  %vm1933_vm4 = vcmp.ge.f32.partialorder %v1861_v28, 0.0  ;;  %v1965_v0 = vmul.f32 0.2, %v1861_v28  ;;  %v1864_v20 = vadd.f32 %v2788_v9, %v3386_v41  ;;  %v1855_v57 = vpop.f32.mrb[83].mxu1 }
 0x27c   : > { %vm1931_vm5 = vcmp.ge.f32.partialorder %v1853_v24, 0.0  ;;  %v1963_v22 = vmul.f32 0.2, %v1853_v24  ;;  %v1856_v30 = vadd.f32 %v3386_v41, %v1855_v57 }
 0x27d   : > { %v1997_v31 = vsel %vm1933_vm4, %v1861_v28, %v1965_v0  ;;  %vm1934_vm6 = vcmp.ge.f32.partialorder %v1864_v20, 0.0  ;;  %v1966_v27 = vmul.f32 0.2, %v1864_v20 }
 0x27e   : > { %v2443_v23 = vpack.c.bf16 %v1997_v31, %v1997_v31  ;;  %v1995_v29 = vsel %vm1931_vm5, %v1853_v24, %v1963_v22  ;;  %vm1932_vm7 = vcmp.ge.f32.partialorder %v1856_v30, 0.0  ;;  %v1964_v5 = vmul.f32 0.2, %v1856_v30 }
 0x27f   : > { %v2441_v32 = vpack.c.bf16 %v1995_v29, %v1995_v29  ;;  %v1998_v13 = vsel %vm1934_vm6, %v1864_v20, %v1966_v27 }
 0x280   : > { %2158 = vst.msk [vmem:[%s3396_s17 + $0x48] sm:$0xf] %vm2139_vm0, %v2443_v23  ;;  %v2444_v33 = vpack.c.bf16 %v1998_v13, %v1998_v13  ;;  %v1996_v34 = vsel %vm1932_vm7, %v1856_v30, %v1964_v5  ;;  %v2791_v7 = vpop.f32.mrb[84].mxu1 }
 0x281   : > { %2156 = vst.msk [vmem:[%s3396_s17 + $0x40] sm:$0xf] %vm2139_vm0, %v2441_v32  ;;  %v2442_v35 = vpack.c.bf16 %v1996_v34, %v1996_v34  ;;  %v1877_v12 = vadd.f32 %v2791_v7, %v3386_v41  ;;  %v1868_v36 = vpop.f32.mrb[85].mxu1 }
 0x282   : > { %2159 = vst.msk [vmem:[%s3396_s17 + $0x4c] sm:$0xf] %vm2139_vm0, %v2444_v33  ;;  %v1869_v50 = vadd.f32 %v3386_v41, %v1868_v36  ;;  %v2792_v26 = vpop.f32.mrb[86].mxu1 }
 0x283   : > { %2157 = vst.msk [vmem:[%s3396_s17 + $0x44] sm:$0xf] %vm2139_vm0, %v2442_v35  ;;  %vm1937_vm8 = vcmp.ge.f32.partialorder %v1877_v12, 0.0  ;;  %v1969_v1 = vmul.f32 0.2, %v1877_v12  ;;  %v1880_v38 = vadd.f32 %v2792_v26, %v3386_v41  ;;  %v1871_v16 = vpop.f32.mrb[87].mxu1 }
 0x284   : > { %vm1935_vm9 = vcmp.ge.f32.partialorder %v1869_v50, 0.0  ;;  %v1967_v46 = vmul.f32 0.2, %v1869_v50  ;;  %v1872_v40 = vadd.f32 %v3386_v41, %v1871_v16 }
 0x285   : > { %v2001_v44 = vsel %vm1937_vm8, %v1877_v12, %v1969_v1  ;;  %vm1938_vm10 = vcmp.ge.f32.partialorder %v1880_v38, 0.0  ;;  %v1970_v10 = vmul.f32 0.2, %v1880_v38 }
 0x286   : > { %v2447_v53 = vpack.c.bf16 %v2001_v44, %v2001_v44  ;;  %v1999_v4 = vsel %vm1935_vm9, %v1869_v50, %v1967_v46  ;;  %vm1936_vm11 = vcmp.ge.f32.partialorder %v1872_v40, 0.0  ;;  %v1968_v45 = vmul.f32 0.2, %v1872_v40 }
 0x287   : > { %v2445_v48 = vpack.c.bf16 %v1999_v4, %v1999_v4  ;;  %v2002_v51 = vsel %vm1938_vm10, %v1880_v38, %v1970_v10 }
 0x288   : > { %2162 = vst.msk [vmem:[%s3396_s17 + $0x58] sm:$0xf] %vm2139_vm0, %v2447_v53  ;;  %v2448_v52 = vpack.c.bf16 %v2002_v51, %v2002_v51  ;;  %v2000_v2 = vsel %vm1936_vm11, %v1872_v40, %v1968_v45  ;;  %v2795_v49 = vpop.f32.mrb[88].mxu1 }
 0x289   : > { %2160 = vst.msk [vmem:[%s3396_s17 + $0x50] sm:$0xf] %vm2139_vm0, %v2445_v48  ;;  %v2446_v37 = vpack.c.bf16 %v2000_v2, %v2000_v2  ;;  %v1893_v55 = vadd.f32 %v2795_v49, %v3386_v41  ;;  %v1884_v54 = vpop.f32.mrb[89].mxu1 }
 0x28a   : > { %2163 = vst.msk [vmem:[%s3396_s17 + $0x5c] sm:$0xf] %vm2139_vm0, %v2448_v52  ;;  %v1885_v39 = vadd.f32 %v3386_v41, %v1884_v54  ;;  %v2796_v11 = vpop.f32.mrb[90].mxu1 }
 0x28b   : > { %2161 = vst.msk [vmem:[%s3396_s17 + $0x54] sm:$0xf] %vm2139_vm0, %v2446_v37  ;;  %vm1941_vm12 = vcmp.ge.f32.partialorder %v1893_v55, 0.0  ;;  %v1973_v56 = vmul.f32 0.2, %v1893_v55  ;;  %v1896_v58 = vadd.f32 %v2796_v11, %v3386_v41  ;;  %v1887_v60 = vpop.f32.mrb[91].mxu1 }
 0x28c   : > { %vm1939_vm13 = vcmp.ge.f32.partialorder %v1885_v39, 0.0  ;;  %v1971_v43 = vmul.f32 0.2, %v1885_v39  ;;  %v1888_v59 = vadd.f32 %v3386_v41, %v1887_v60 }
 0x28d   : > { %v2005_v21 = vsel %vm1941_vm12, %v1893_v55, %v1973_v56  ;;  %vm1942_vm14 = vcmp.ge.f32.partialorder %v1896_v58, 0.0  ;;  %v1974_v61 = vmul.f32 0.2, %v1896_v58 }
 0x28e   : > { %v2451_v62 = vpack.c.bf16 %v2005_v21, %v2005_v21  ;;  %v2003_v63 = vsel %vm1939_vm13, %v1885_v39, %v1971_v43  ;;  %vm1940_vm15 = vcmp.ge.f32.partialorder %v1888_v59, 0.0  ;;  %v1972_v47 = vmul.f32 0.2, %v1888_v59 }
 0x28f   : > { %v2449_v3 = vpack.c.bf16 %v2003_v63, %v2003_v63  ;;  %v2006_v42 = vsel %vm1942_vm14, %v1896_v58, %v1974_v61 }
 0x290   : > { %2166 = vst.msk [vmem:[%s3396_s17 + $0x68] sm:$0xf] %vm2139_vm0, %v2451_v62  ;;  %v2452_v6 = vpack.c.bf16 %v2006_v42, %v2006_v42  ;;  %v2004_v8 = vsel %vm1940_vm15, %v1888_v59, %v1972_v47  ;;  %v2799_v25 = vpop.f32.mrb[92].mxu1 }
 0x291   : > { %2164 = vst.msk [vmem:[%s3396_s17 + $0x60] sm:$0xf] %vm2139_vm0, %v2449_v3  ;;  %v2450_v14 = vpack.c.bf16 %v2004_v8, %v2004_v8  ;;  %v1909_v15 = vadd.f32 %v2799_v25, %v3386_v41  ;;  %v1900_v17 = vpop.f32.mrb[93].mxu1 }
 0x292   : > { %2167 = vst.msk [vmem:[%s3396_s17 + $0x6c] sm:$0xf] %vm2139_vm0, %v2452_v6  ;;  %v1901_v18 = vadd.f32 %v3386_v41, %v1900_v17  ;;  %v2800_v28 = vpop.f32.mrb[94].mxu1 }
 0x293   : > { %2165 = vst.msk [vmem:[%s3396_s17 + $0x64] sm:$0xf] %vm2139_vm0, %v2450_v14  ;;  %vm1945_vm1 = vcmp.ge.f32.partialorder %v1909_v15, 0.0  ;;  %v1977_v19 = vmul.f32 0.2, %v1909_v15  ;;  %v1912_v24 = vadd.f32 %v2800_v28, %v3386_v41  ;;  %v1903_v9 = vpop.f32.mrb[95].mxu1 }
 0x294   : > { %vm1943_vm2 = vcmp.ge.f32.partialorder %v1901_v18, 0.0  ;;  %v1975_v0 = vmul.f32 0.2, %v1901_v18  ;;  %v1904_v20 = vadd.f32 %v3386_v41, %v1903_v9 }
 0x295   : > { %v2009_v57 = vsel %vm1945_vm1, %v1909_v15, %v1977_v19  ;;  %vm1946_vm3 = vcmp.ge.f32.partialorder %v1912_v24, 0.0  ;;  %v1978_v22 = vmul.f32 0.2, %v1912_v24 }
 0x296   : > { %v2455_v30 = vpack.c.bf16 %v2009_v57, %v2009_v57  ;;  %v2007_v31 = vsel %vm1943_vm2, %v1901_v18, %v1975_v0  ;;  %vm1944_vm4 = vcmp.ge.f32.partialorder %v1904_v20, 0.0  ;;  %v1976_v27 = vmul.f32 0.2, %v1904_v20 }
 0x297   : > { %v2453_v23 = vpack.c.bf16 %v2007_v31, %v2007_v31  ;;  %v2010_v29 = vsel %vm1946_vm3, %v1912_v24, %v1978_v22 }
 0x298   : > { %2170 = vst.msk [vmem:[%s3396_s17 + $0x78] sm:$0xf] %vm2139_vm0, %v2455_v30  ;;  %v2456_v5 = vpack.c.bf16 %v2010_v29, %v2010_v29  ;;  %v2008_v32 = vsel %vm1944_vm4, %v1904_v20, %v1976_v27 }
 0x299   : > { %2168 = vst.msk [vmem:[%s3396_s17 + $0x70] sm:$0xf] %vm2139_vm0, %v2453_v23  ;;  %v2454_v13 = vpack.c.bf16 %v2008_v32, %v2008_v32 }
 0x29a   : > { %2171 = vst.msk [vmem:[%s3396_s17 + $0x7c] sm:$0xf] %vm2139_vm0, %v2456_v5 }
 0x29b   : > { %2169 = vst.msk [vmem:[%s3396_s17 + $0x74] sm:$0xf] %vm2139_vm0, %v2454_v13 }
 0x29c PF: > { %s15_s18 = sadd.s32 1, %s2968_s18  }
 0x29d   : > { %p12_p4 = scmp.ge.s32.totalorder %s15_s18, 4  }
 0x29f   :  { %14 = sbr.rel (!%p12_p4) target bundleno = 1 (0x1), region = 70 }

// kernel: _lambda_.14
= control target key start
LH: loop header
LB: loop body
LE: loop exit
PB: predicated region body
PF: predicated region fallthrough
CT: control target
= control target key end

     0   :  { %vm564_vm0 = vcmask 523264   ;;  %s2125_s1 = inlined_call_operand.vmem [shape: bf16[576,128], index: 1, kind: input, shape index: {}]   ;;  %s2126_s0 = inlined_call_operand.vmem [shape: bf16[128,576], index: 0, kind: input, shape index: {}]   ;;  %s2127_s3 = inlined_call_operand.vmem [shape: bf16[128,128], index: 3, kind: input, shape index: {}]   ;;  %s2128_s2 = inlined_call_operand.vmem [shape: f32[1,128], index: 2, kind: input, shape index: {}]   ;;  %s2129_s4 = inlined_call_operand.vmem [shape: f32[1,128], index: 4, kind: input, shape index: {}]   ;;  %s2130_s5 = inlined_call_operand.vmem [shape: bf16[128,128], index: 5, kind: output, shape index: {}]  }
   0x1   :  { %v1621_v0 = vld [vmem:[%s2125_s1 + $0x40] sm:$0xff]   ;;  %v1625_v4 = vld [vmem:[%s2125_s1 + $0x48] sm:$0xff]   ;;  %v1629_v8 = vld [vmem:[%s2125_s1 + $0x50] sm:$0xff]  }
   0x2   :  { %v1622_v1 = vld [vmem:[%s2125_s1] sm:$0xff]   ;;  %1409 = vmatprep.subr.bf16.mxu0 %v1621_v0  ;;  %v1626_v5 = vld [vmem:[%s2125_s1 + $0x8] sm:$0xff]   ;;  %v1630_v9 = vld [vmem:[%s2125_s1 + $0x10] sm:$0xff]  }
   0x3   :  { %v1623_v2 = vld [vmem:[%s2125_s1 + $0xc0] sm:$0xff]   ;;  %1410 = vmatpush3.bf16.msra.mxu0 %v1622_v1  ;;  %v1627_v6 = vld [vmem:[%s2125_s1 + $0xc8] sm:$0xff]   ;;  %v1631_v10 = vld [vmem:[%s2125_s1 + $0xd0] sm:$0xff]  }
   0x4   :  { %v1624_v3 = vld [vmem:[%s2125_s1 + $0x80] sm:$0xff]   ;;  %1473 = vmatprep.subr.bf16.mxu1 %v1623_v2  ;;  %1411 = vmatprep.subr.bf16.mxu0 %v1625_v4  ;;  %v1628_v7 = vld [vmem:[%s2125_s1 + $0x88] sm:$0xff]   ;;  %v1632_v11 = vld [vmem:[%s2125_s1 + $0x90] sm:$0xff]  }
   0x5   :  { %1474 = vmatpush3.bf16.msra.mxu1 %v1624_v3  ;;  %v1633_v12 = vld [vmem:[%s2125_s1 + $0x58] sm:$0xff]   ;;  %v1637_v16 = vld [vmem:[%s2125_s1 + $0x60] sm:$0xff]   ;;  %v1641_v20 = vld [vmem:[%s2125_s1 + $0x68] sm:$0xff]  }
   0x6   :  { %1475 = vmatprep.subr.bf16.mxu1 %v1627_v6  ;;  %v1634_v13 = vld [vmem:[%s2125_s1 + $0x18] sm:$0xff]   ;;  %v1638_v17 = vld [vmem:[%s2125_s1 + $0x20] sm:$0xff]   ;;  %v1642_v21 = vld [vmem:[%s2125_s1 + $0x28] sm:$0xff]  }
   0x7   :  { %1412 = vmatpush3.bf16.msra.mxu0 %v1626_v5  ;;  %v1635_v14 = vld [vmem:[%s2125_s1 + $0xd8] sm:$0xff]   ;;  %v1639_v18 = vld [vmem:[%s2125_s1 + $0xe0] sm:$0xff]   ;;  %v1643_v22 = vld [vmem:[%s2125_s1 + $0xe8] sm:$0xff]  }
   0x8   :  { %1413 = vmatprep.subr.bf16.mxu0 %v1629_v8  ;;  %v1636_v15 = vld [vmem:[%s2125_s1 + $0x98] sm:$0xff]   ;;  %v1640_v19 = vld [vmem:[%s2125_s1 + $0xa0] sm:$0xff]   ;;  %v1644_v23 = vld [vmem:[%s2125_s1 + $0xa8] sm:$0xff]  }
   0x9   :  { %1476 = vmatpush3.bf16.msra.mxu1 %v1628_v7  ;;  %v1645_v24 = vld [vmem:[%s2125_s1 + $0x70] sm:$0xff]   ;;  %v1649_v28 = vld [vmem:[%s2125_s1 + $0x78] sm:$0xff]   ;;  %v1656_v34 = vld [vmem:[%s2125_s1 + $0x100] sm:$0xff]  }
   0xa   :  { %1477 = vmatprep.subr.bf16.mxu1 %v1631_v10  ;;  %v1646_v25 = vld [vmem:[%s2125_s1 + $0x30] sm:$0xff]   ;;  %v1650_v29 = vld [vmem:[%s2125_s1 + $0x38] sm:$0xff]   ;;  %v1659_v36 = vld [vmem:[%s2126_s0 + $0xc] ss:$20 sps:$4 sm:$0xff]  }
   0xb   :  { %1414 = vmatpush3.bf16.msra.mxu0 %v1630_v9  ;;  %v1647_v26 = vld [vmem:[%s2125_s1 + $0xf0] sm:$0xff]   ;;  %v1651_v30 = vld [vmem:[%s2125_s1 + $0xf8] sm:$0xff]   ;;  %v1660_v37 = vld [vmem:[%s2126_s0 + $0x2c] ss:$20 sps:$4 sm:$0xff]   ;;  %718 = vmatprep.mubr.bf16.mxu1 %v1659_v36 }
   0xc   :  { %1415 = vmatprep.subr.bf16.mxu0 %v1633_v12  ;;  %v1648_v27 = vld [vmem:[%s2125_s1 + $0xb0] sm:$0xff]   ;;  %v1654_v32 = vld [vmem:[%s2126_s0 + $0x4] ss:$20 sps:$4 sm:$0xff]   ;;  %v1657_v35 = vld [vmem:[%s2126_s0 + $0x8] ss:$20 sps:$4 sm:$0xff]  }
   0xd   :  { %1478 = vmatpush3.bf16.msra.mxu1 %v1632_v11  ;;  %v1652_v31 = vld [vmem:[%s2126_s0] ss:$20 sps:$4 sm:$0xff]   ;;  %v1655_v33 = vld [vmem:[%s2125_s1 + $0xb8] sm:$0xff]   ;;  %621 = vmatprep.mubr.bf16.mxu0 %v1654_v32  ;;  %v1669_v41 = vld [vmem:[%s2125_s1 + $0x108] sm:$0xff]  }
   0xe   :  { %1479 = vmatprep.subr.bf16.mxu1 %v1635_v14  ;;  %v1663_v38 = vld [vmem:[%s2126_s0 + $0x34] ss:$20 sps:$4 sm:$0xff]   ;;  %v1665_v42 = vld [vmem:[%s2126_s0 + $0x30] ss:$20 sps:$4 sm:$0xff]   ;;  %v1672_v47 = vld [vmem:[%s2126_s0 + $0x58] ss:$20 sps:$4 sm:$0xff]  }
   0xf   :  { %1416 = vmatpush3.bf16.msra.mxu0 %v1634_v13  ;;  %v1662_v39 = vld [vmem:[%s2126_s0 + $0x28] ss:$20 sps:$4 sm:$0xff]   ;;  %v1682_v44 = vld [vmem:[%s2125_s1 + $0x110] sm:$0xff]   ;;  %v1676_v48 = vld [vmem:[%s2126_s0 + $0x84] ss:$20 sps:$4 sm:$0xff]  }
  0x10   :  { %1417 = vmatprep.subr.bf16.mxu0 %v1637_v16  ;;  %v1666_v40 = vld [vmem:[%s2126_s0 + $0x54] ss:$20 sps:$4 sm:$0xff]   ;;  %v1670_v43 = vld [vmem:[%s2126_s0 + $0x5c] ss:$20 sps:$4 sm:$0xff]   ;;  %v1675_v50 = vld [vmem:[%s2126_s0 + $0x78] ss:$20 sps:$4 sm:$0xff]  }
  0x11   :  { %1480 = vmatpush3.bf16.msra.mxu1 %v1636_v15  ;;  %v1668_v45 = vld [vmem:[%s2126_s0 + $0x50] ss:$20 sps:$4 sm:$0xff]   ;;  %v1695_v49 = vld [vmem:[%s2125_s1 + $0x118] sm:$0xff]   ;;  %v1678_v52 = vld [vmem:[%s2126_s0 + $0x80] ss:$20 sps:$4 sm:$0xff]  }
  0x12   :  { %1481 = vmatprep.subr.bf16.mxu1 %v1639_v18  ;;  %v1673_v46 = vld [vmem:[%s2126_s0 + $0x7c] ss:$20 sps:$4 sm:$0xff]   ;;  %v1679_v51 = vld [vmem:[%s2126_s0 + $0xa4] ss:$20 sps:$4 sm:$0xff]   ;;  %v1683_v53 = vld [vmem:[%s2126_s0 + $0xac] ss:$20 sps:$4 sm:$0xff]  }
  0x13   :  { %1418 = vmatpush3.bf16.msra.mxu0 %v1638_v17  ;;  %v1681_v54 = vld [vmem:[%s2126_s0 + $0xa0] ss:$20 sps:$4 sm:$0xff]   ;;  %v1685_v56 = vld [vmem:[%s2126_s0 + $0xa8] ss:$20 sps:$4 sm:$0xff]   ;;  %v1691_v60 = vld [vmem:[%s2126_s0 + $0xd0] ss:$20 sps:$4 sm:$0xff]  }
  0x14   :  { %1419 = vmatprep.subr.bf16.mxu0 %v1641_v20  ;;  %v1686_v55 = vld [vmem:[%s2126_s0 + $0xcc] ss:$20 sps:$4 sm:$0xff]   ;;  %v1689_v57 = vld [vmem:[%s2126_s0 + $0xd4] ss:$20 sps:$4 sm:$0xff]   ;;  %v1696_v61 = vld [vmem:[%s2126_s0 + $0xfc] ss:$20 sps:$4 sm:$0xff]  }
  0x15   :  { %1482 = vmatpush3.bf16.msra.mxu1 %v1640_v19  ;;  %v1688_v58 = vld [vmem:[%s2126_s0 + $0xc8] ss:$20 sps:$4 sm:$0xff]   ;;  %v1694_v62 = vld [vmem:[%s2126_s0 + $0xf0] ss:$20 sps:$4 sm:$0xff]   ;;  %v1698_v0 = vld [vmem:[%s2126_s0 + $0xf8] ss:$20 sps:$4 sm:$0xff]  }
  0x16   :  { %1483 = vmatprep.subr.bf16.mxu1 %v1643_v22  ;;  %v1692_v59 = vld [vmem:[%s2126_s0 + $0xf4] ss:$20 sps:$4 sm:$0xff]   ;;  %v1699_v63 = vld [vmem:[%s2126_s0 + $0x11c] ss:$20 sps:$4 sm:$0xff]   ;;  %v1702_v1 = vld [vmem:[%s2126_s0 + $0x124] ss:$20 sps:$4 sm:$0xff]  }
  0x17   :  { %1420 = vmatpush3.bf16.msra.mxu0 %v1642_v21  ;;  %v1701_v2 = vld [vmem:[%s2126_s0 + $0x118] ss:$20 sps:$4 sm:$0xff]   ;;  %v1705_v3 = vld [vmem:[%s2126_s0 + $0x10] ss:$20 sps:$4 sm:$0xff]   ;;  %v1704_v4 = vld [vmem:[%s2126_s0 + $0x120] ss:$20 sps:$4 sm:$0xff]  }
  0x18   :  { %1421 = vmatprep.subr.bf16.mxu0 %v1645_v24  ;;  %v1706_v5 = vld [vmem:[%s2126_s0 + $0x38] ss:$20 sps:$4 sm:$0xff]   ;;  %v1707_v6 = vld [vmem:[%s2126_s0 + $0x60] ss:$20 sps:$4 sm:$0xff]   ;;  %v1708_v7 = vld [vmem:[%s2126_s0 + $0x88] ss:$20 sps:$4 sm:$0xff]  }
  0x19   :  { %1484 = vmatpush3.bf16.msra.mxu1 %v1644_v23  ;;  %v1709_v8 = vld [vmem:[%s2126_s0 + $0xb0] ss:$20 sps:$4 sm:$0xff]   ;;  %v1710_v9 = vld [vmem:[%s2126_s0 + $0xd8] ss:$20 sps:$4 sm:$0xff]   ;;  %v1711_v10 = vld [vmem:[%s2126_s0 + $0x100] ss:$20 sps:$4 sm:$0xff]  }
  0x1a   :  { %1485 = vmatprep.subr.bf16.mxu1 %v1647_v26  ;;  %v1712_v11 = vld [vmem:[%s2126_s0 + $0x128] ss:$20 sps:$4 sm:$0xff]   ;;  %v1713_v12 = vld [vmem:[%s2127_s3] sm:$0xff]   ;;  %v1715_v14 = vld [vmem:[%s2127_s3 + $0x10] sm:$0xff]  }
  0x1b   :  { %1422 = vmatpush3.bf16.msra.mxu0 %v1646_v25  ;;  %v1714_v13 = vld [vmem:[%s2127_s3 + $0x8] sm:$0xff]   ;;  %v1716_v15 = vld [vmem:[%s2127_s3 + $0x18] sm:$0xff]   ;;  %v1717_v16 = vld [vmem:[%s2127_s3 + $0x20] sm:$0xff]  }
  0x1c   :  { %1423 = vmatprep.subr.bf16.mxu0 %v1649_v28  ;;  %v1718_v17 = vld [vmem:[%s2127_s3 + $0x28] sm:$0xff]   ;;  %v1719_v18 = vld [vmem:[%s2127_s3 + $0x30] sm:$0xff]   ;;  %v1720_v19 = vld [vmem:[%s2127_s3 + $0x38] sm:$0xff]  }
  0x1d   :  { %1486 = vmatpush3.bf16.msra.mxu1 %v1648_v27  ;;  %v2014_v21 = vld [vmem:[%s2128_s2] ss:$0 sm:$0xff] }
  0x1e   :  { %1487 = vmatprep.subr.bf16.mxu1 %v1651_v30 }
  0x1f   :  { %1424 = vmatpush3.bf16.msra.mxu0 %v1650_v29 }
  0x20   :  { %1565 = vmatprep.subr.bf16.mxu0 %v1656_v34 }
  0x21   :  { %1488 = vmatpush3.bf16.msra.mxu1 %v1655_v33 }
  0x22   :  { %622 = vmatmul.mubr.bf16.vlgmr.msra.gmra.mrb[0].mxu0 %v1652_v31  ;;  %1589 = vmatprep.subr.bf16.mxu1 %v1713_v12 }
  0x23   :  { %1566 = vmatpush3.bf16.msra.mxu0 %v1656_v34  ;;  %629 = vmatprep.mubr.bf16.mxu0 %v1660_v37 }
  0x24   :  { %719 = vmatmul.mubr.bf16.vlgmr.msra.gmra.mrb[0].mxu1 %v1657_v35  ;;  %1567 = vmatprep.subr.bf16.mxu0 %v1669_v41 }
  0x25   :  { %726 = vmatprep.mubr.bf16.mxu1 %v1663_v38  ;;  %1590 = vmatpush3.bf16.msra.mxu1 %v1713_v12 }
  0x26   :  { %1591 = vmatprep.subr.bf16.mxu1 %v1714_v13 }
  0x27   :  { %1568 = vmatpush3.bf16.msra.mxu0 %v1669_v41 }
  0x28   :  { %1569 = vmatprep.subr.bf16.mxu0 %v1682_v44 }
  0x29   :  { %1592 = vmatpush3.bf16.msra.mxu1 %v1714_v13 }
  0x2a   :  { %630 = vmatmul.mubr.bf16.gmra.mrb[4].mxu0 %v1662_v39  ;;  %1593 = vmatprep.subr.bf16.mxu1 %v1715_v14 }
  0x2b   :  { %637 = vmatprep.mubr.bf16.mxu0 %v1666_v40  ;;  %1570 = vmatpush3.bf16.msra.mxu0 %v1682_v44 }
  0x2c   :  { %727 = vmatmul.mubr.bf16.gmra.mrb[4].mxu1 %v1665_v42  ;;  %1571 = vmatprep.subr.bf16.mxu0 %v1695_v49 }
  0x2d   :  { %734 = vmatprep.mubr.bf16.mxu1 %v1670_v43  ;;  %1594 = vmatpush3.bf16.msra.mxu1 %v1715_v14 }
  0x2e   :  { %1595 = vmatprep.subr.bf16.mxu1 %v1716_v15 }
  0x2f   :  { %1572 = vmatpush3.bf16.msra.mxu0 %v1695_v49 }
  0x31   :  { %1596 = vmatpush3.bf16.msra.mxu1 %v1716_v15 }
  0x32   :  { %638 = vmatmul.mubr.bf16.gmra.mrb[8].mxu0 %v1668_v45  ;;  %1597 = vmatprep.subr.bf16.mxu1 %v1717_v16 }
  0x33   :  { %645 = vmatprep.mubr.bf16.mxu0 %v1673_v46 }
  0x34   :  { %735 = vmatmul.mubr.bf16.gmra.mrb[8].mxu1 %v1672_v47 }
  0x35   :  { %742 = vmatprep.mubr.bf16.mxu1 %v1676_v48  ;;  %1598 = vmatpush3.bf16.msra.mxu1 %v1717_v16 }
  0x36   :  { %1599 = vmatprep.subr.bf16.mxu1 %v1718_v17 }
  0x39   :  { %1600 = vmatpush3.bf16.msra.mxu1 %v1718_v17 }
  0x3a   :  { %646 = vmatmul.mubr.bf16.gmra.mrb[12].mxu0 %v1675_v50  ;;  %1601 = vmatprep.subr.bf16.mxu1 %v1719_v18 }
  0x3b   :  { %653 = vmatprep.mubr.bf16.mxu0 %v1679_v51 }
  0x3c   :  { %743 = vmatmul.mubr.bf16.gmra.mrb[12].mxu1 %v1678_v52 }
  0x3d   :  { %750 = vmatprep.mubr.bf16.mxu1 %v1683_v53  ;;  %1602 = vmatpush3.bf16.msra.mxu1 %v1719_v18 }
  0x3e   :  { %1603 = vmatprep.subr.bf16.mxu1 %v1720_v19 }
  0x41   :  { %1604 = vmatpush3.bf16.msra.mxu1 %v1720_v19 }
  0x42   :  { %654 = vmatmul.mubr.bf16.gmra.mrb[16].mxu0 %v1681_v54 }
  0x43   :  { %661 = vmatprep.mubr.bf16.mxu0 %v1686_v55 }
  0x44   :  { %751 = vmatmul.mubr.bf16.gmra.mrb[16].mxu1 %v1685_v56 }
  0x45   :  { %758 = vmatprep.mubr.bf16.mxu1 %v1689_v57 }
  0x4a   :  { %662 = vmatmul.mubr.bf16.gmra.mrb[20].mxu0 %v1688_v58 }
  0x4b   :  { %669 = vmatprep.mubr.bf16.mxu0 %v1692_v59 }
  0x4c   :  { %759 = vmatmul.mubr.bf16.gmra.mrb[20].mxu1 %v1691_v60 }
  0x4d   :  { %766 = vmatprep.mubr.bf16.mxu1 %v1696_v61 }
  0x52   :  { %670 = vmatmul.mubr.bf16.gmra.mrb[24].mxu0 %v1694_v62 }
  0x53   :  { %677 = vmatprep.mubr.bf16.mxu0 %v1699_v63 }
  0x54   :  { %767 = vmatmul.mubr.bf16.gmra.mrb[24].mxu1 %v1698_v0 }
  0x55   :  { %774 = vmatprep.mubr.bf16.mxu1 %v1702_v1 }
  0x5a   :  { %678 = vmatmul.mubr.bf16.gmra.mrb[28].mxu0 %v1701_v2 }
  0x5b   :  { %1573 = vmatprep.mubr.msk.bf16.mxu0 %vm564_vm0, %v1705_v3 }
  0x5c   :  { %775 = vmatmul.mubr.bf16.gmra.mrb[28].mxu1 %v1704_v4 }
  0x62   :  { %1574 = vmatmul.mubr.msk.bf16.vlgmr.msra.gmra.mrb[32].mxu0 %vm564_vm0, %v1706_v5 }
  0x63   :  { %1577 = vmatprep.mubr.msk.bf16.mxu0 %vm564_vm0, %v1707_v6 }
  0x6a   :  { %1578 = vmatmul.mubr.msk.bf16.gmra.mrb[36].mxu0 %vm564_vm0, %v1708_v7 }
  0x6b   :  { %1581 = vmatprep.mubr.msk.bf16.mxu0 %vm564_vm0, %v1709_v8 }
  0x72   :  { %1582 = vmatmul.mubr.msk.bf16.gmra.mrb[40].mxu0 %vm564_vm0, %v1710_v9 }
  0x73   :  { %1585 = vmatprep.mubr.msk.bf16.mxu0 %vm564_vm0, %v1711_v10 }
  0x7a   :  { %1586 = vmatmul.mubr.msk.bf16.gmra.mrb[44].mxu0 %vm564_vm0, %v1712_v11 }
  0xf5   :  { %v1425_v20 = vpop.f32.mrb[0].mxu0 }
  0xf6   :  { %v1426_v22 = vpop.f32.mrb[1].mxu0 }
  0xf7   :  { %v1427_v23 = vadd.f32 %v1426_v22, %v1425_v20  ;;  %v1428_v24 = vpop.f32.mrb[2].mxu0  ;;  %v1489_v25 = vpop.f32.mrb[0].mxu1 }
  0xf8   :  { %v1429_v26 = vpop.f32.mrb[3].mxu0  ;;  %v1490_v29 = vpop.f32.mrb[1].mxu1 }
  0xf9   :  { %v624_v27 = vadd.f32 %v1427_v23, %v2014_v21  ;;  %v1430_v28 = vadd.f32 %v1429_v26, %v1428_v24  ;;  %v1491_v30 = vadd.f32 %v1490_v29, %v1489_v25  ;;  %v1492_v31 = vpop.f32.mrb[2].mxu1 }
  0xfa   :  { %v1493_v33 = vpop.f32.mrb[3].mxu1 }
  0xfb   :  { %v627_v32 = vadd.f32 %v1430_v28, %v2014_v21  ;;  %v1494_v34 = vadd.f32 %v1493_v33, %v1492_v31  ;;  %v2018_v35 = vadd.f32 %v1491_v30, %v624_v27 }
  0xfd   :  { %v1431_v36 = vpop.f32.mrb[4].mxu0  ;;  %v2020_v38 = vadd.f32 %v1494_v34, %v627_v32 }
  0xfe   :  { %v1432_v37 = vpop.f32.mrb[5].mxu0 }
  0xff   :  { %v1433_v39 = vadd.f32 %v1432_v37, %v1431_v36  ;;  %v1434_v40 = vpop.f32.mrb[6].mxu0  ;;  %v1495_v41 = vpop.f32.mrb[4].mxu1 }
 0x100   :  { %v1435_v42 = vpop.f32.mrb[7].mxu0  ;;  %v1496_v45 = vpop.f32.mrb[5].mxu1 }
 0x101   :  { %v632_v43 = vadd.f32 %v1433_v39, %v2014_v21  ;;  %v1436_v44 = vadd.f32 %v1435_v42, %v1434_v40  ;;  %v1497_v46 = vadd.f32 %v1496_v45, %v1495_v41  ;;  %v1498_v47 = vpop.f32.mrb[6].mxu1 }
 0x102   :  { %v1499_v49 = vpop.f32.mrb[7].mxu1 }
 0x103   :  { %v635_v48 = vadd.f32 %v1436_v44, %v2014_v21  ;;  %v1500_v50 = vadd.f32 %v1499_v49, %v1498_v47  ;;  %v2024_v51 = vadd.f32 %v1497_v46, %v632_v43 }
 0x105   :  { %v1437_v52 = vpop.f32.mrb[8].mxu0  ;;  %v2026_v54 = vadd.f32 %v1500_v50, %v635_v48 }
 0x106   :  { %v1438_v53 = vpop.f32.mrb[9].mxu0 }
 0x107   :  { %v1439_v55 = vadd.f32 %v1438_v53, %v1437_v52  ;;  %v1440_v56 = vpop.f32.mrb[10].mxu0  ;;  %v1501_v57 = vpop.f32.mrb[8].mxu1 }
 0x108   :  { %v1441_v58 = vpop.f32.mrb[11].mxu0  ;;  %v1502_v61 = vpop.f32.mrb[9].mxu1 }
 0x109   :  { %v640_v59 = vadd.f32 %v1439_v55, %v2014_v21  ;;  %v1442_v60 = vadd.f32 %v1441_v58, %v1440_v56  ;;  %v1503_v62 = vadd.f32 %v1502_v61, %v1501_v57  ;;  %v1504_v63 = vpop.f32.mrb[10].mxu1 }
 0x10a   :  { %v1505_v1 = vpop.f32.mrb[11].mxu1 }
 0x10b   :  { %v643_v0 = vadd.f32 %v1442_v60, %v2014_v21  ;;  %v1506_v2 = vadd.f32 %v1505_v1, %v1504_v63  ;;  %v2030_v3 = vadd.f32 %v1503_v62, %v640_v59 }
 0x10d   :  { %v1443_v4 = vpop.f32.mrb[12].mxu0  ;;  %v2032_v6 = vadd.f32 %v1506_v2, %v643_v0 }
 0x10e   :  { %v1444_v5 = vpop.f32.mrb[13].mxu0 }
 0x10f   :  { %v1445_v7 = vadd.f32 %v1444_v5, %v1443_v4  ;;  %v1446_v8 = vpop.f32.mrb[14].mxu0  ;;  %v1507_v9 = vpop.f32.mrb[12].mxu1 }
 0x110   :  { %v1447_v10 = vpop.f32.mrb[15].mxu0  ;;  %v1508_v13 = vpop.f32.mrb[13].mxu1 }
 0x111   :  { %v648_v11 = vadd.f32 %v1445_v7, %v2014_v21  ;;  %v1448_v12 = vadd.f32 %v1447_v10, %v1446_v8  ;;  %v1509_v14 = vadd.f32 %v1508_v13, %v1507_v9  ;;  %v1510_v15 = vpop.f32.mrb[14].mxu1 }
 0x112   :  { %v1511_v17 = vpop.f32.mrb[15].mxu1 }
 0x113   :  { %v651_v16 = vadd.f32 %v1448_v12, %v2014_v21  ;;  %v1512_v18 = vadd.f32 %v1511_v17, %v1510_v15  ;;  %v2036_v19 = vadd.f32 %v1509_v14, %v648_v11 }
 0x115   :  { %v1449_v20 = vpop.f32.mrb[16].mxu0  ;;  %v2038_v23 = vadd.f32 %v1512_v18, %v651_v16 }
 0x116   :  { %v1450_v22 = vpop.f32.mrb[17].mxu0 }
 0x117   :  { %v1451_v24 = vadd.f32 %v1450_v22, %v1449_v20  ;;  %v1452_v25 = vpop.f32.mrb[18].mxu0  ;;  %v1513_v26 = vpop.f32.mrb[16].mxu1 }
 0x118   :  { %v1453_v27 = vpop.f32.mrb[19].mxu0  ;;  %v1514_v30 = vpop.f32.mrb[17].mxu1 }
 0x119   :  { %v656_v28 = vadd.f32 %v1451_v24, %v2014_v21  ;;  %v1454_v29 = vadd.f32 %v1453_v27, %v1452_v25  ;;  %v1515_v31 = vadd.f32 %v1514_v30, %v1513_v26  ;;  %v1516_v32 = vpop.f32.mrb[18].mxu1 }
 0x11a   :  { %v1517_v34 = vpop.f32.mrb[19].mxu1 }
 0x11b   :  { %v659_v33 = vadd.f32 %v1454_v29, %v2014_v21  ;;  %v1518_v36 = vadd.f32 %v1517_v34, %v1516_v32  ;;  %v2042_v37 = vadd.f32 %v1515_v31, %v656_v28 }
 0x11d   :  { %v1455_v39 = vpop.f32.mrb[20].mxu0  ;;  %v2044_v41 = vadd.f32 %v1518_v36, %v659_v33 }
 0x11e   :  { %v1456_v40 = vpop.f32.mrb[21].mxu0 }
 0x11f   :  { %v1457_v42 = vadd.f32 %v1456_v40, %v1455_v39  ;;  %v1458_v43 = vpop.f32.mrb[22].mxu0  ;;  %v1519_v44 = vpop.f32.mrb[20].mxu1 }
 0x120   :  { %v1459_v45 = vpop.f32.mrb[23].mxu0  ;;  %v1520_v48 = vpop.f32.mrb[21].mxu1 }
 0x121   :  { %v664_v46 = vadd.f32 %v1457_v42, %v2014_v21  ;;  %v1460_v47 = vadd.f32 %v1459_v45, %v1458_v43  ;;  %v1521_v49 = vadd.f32 %v1520_v48, %v1519_v44  ;;  %v1522_v50 = vpop.f32.mrb[22].mxu1 }
 0x122   :  { %v1523_v53 = vpop.f32.mrb[23].mxu1 }
 0x123   :  { %v667_v52 = vadd.f32 %v1460_v47, %v2014_v21  ;;  %v1524_v55 = vadd.f32 %v1523_v53, %v1522_v50  ;;  %v2048_v56 = vadd.f32 %v1521_v49, %v664_v46 }
 0x125   :  { %v1461_v57 = vpop.f32.mrb[24].mxu0  ;;  %v2050_v59 = vadd.f32 %v1524_v55, %v667_v52 }
 0x126   :  { %v1462_v58 = vpop.f32.mrb[25].mxu0 }
 0x127   :  { %v1463_v60 = vadd.f32 %v1462_v58, %v1461_v57  ;;  %v1464_v61 = vpop.f32.mrb[26].mxu0  ;;  %v1525_v62 = vpop.f32.mrb[24].mxu1 }
 0x128   :  { %v1465_v63 = vpop.f32.mrb[27].mxu0  ;;  %v1526_v2 = vpop.f32.mrb[25].mxu1 }
 0x129   :  { %v672_v0 = vadd.f32 %v1463_v60, %v2014_v21  ;;  %v1466_v1 = vadd.f32 %v1465_v63, %v1464_v61  ;;  %v1527_v4 = vadd.f32 %v1526_v2, %v1525_v62  ;;  %v1528_v5 = vpop.f32.mrb[26].mxu1 }
 0x12a   :  { %v1529_v8 = vpop.f32.mrb[27].mxu1 }
 0x12b   :  { %v675_v7 = vadd.f32 %v1466_v1, %v2014_v21  ;;  %v1530_v9 = vadd.f32 %v1529_v8, %v1528_v5  ;;  %v2054_v10 = vadd.f32 %v1527_v4, %v672_v0 }
 0x12d   :  { %v1467_v11 = vpop.f32.mrb[28].mxu0  ;;  %v2056_v13 = vadd.f32 %v1530_v9, %v675_v7 }
 0x12e   :  { %v1468_v12 = vpop.f32.mrb[29].mxu0 }
 0x12f   :  { %v1469_v14 = vadd.f32 %v1468_v12, %v1467_v11  ;;  %v1470_v15 = vpop.f32.mrb[30].mxu0  ;;  %v1531_v16 = vpop.f32.mrb[28].mxu1 }
 0x130   :  { %v1471_v17 = vpop.f32.mrb[31].mxu0  ;;  %v1532_v22 = vpop.f32.mrb[29].mxu1 }
 0x131   :  { %v680_v18 = vadd.f32 %v1469_v14, %v2014_v21  ;;  %v1472_v20 = vadd.f32 %v1471_v17, %v1470_v15  ;;  %v1533_v24 = vadd.f32 %v1532_v22, %v1531_v16  ;;  %v1534_v25 = vpop.f32.mrb[30].mxu1 }
 0x132   :  { %v1535_v27 = vpop.f32.mrb[31].mxu1 }
 0x133   :  { %v683_v26 = vadd.f32 %v1472_v20, %v2014_v21  ;;  %v1536_v28 = vadd.f32 %v1535_v27, %v1534_v25  ;;  %v2060_v29 = vadd.f32 %v1533_v24, %v680_v18 }
 0x135   :  { %v1575_v30 = vpop.f32.mrb[32].mxu0  ;;  %v2063_v33 = vadd.f32 %v1536_v28, %v683_v26 }
 0x136   :  { %v826_v31 = vadd.f32 %v1575_v30, %v2024_v51  ;;  %v817_v32 = vpop.f32.mrb[33].mxu0 }
 0x137   :  { %v818_v34 = vadd.f32 %v817_v32, %v2018_v35  ;;  %v1576_v36 = vpop.f32.mrb[34].mxu0 }
 0x138   :  { %v898_v39 = vmul.f32 0.2, %v826_v31  ;;  %v829_v40 = vadd.f32 %v1576_v36, %v2026_v54  ;;  %v820_v42 = vpop.f32.mrb[35].mxu0  ;;  %vm882_vm1 = vcmp.ge.f32.partialorder %v826_v31, 0.0 }
 0x139   :  { %v896_v43 = vmul.f32 0.2, %v818_v34  ;;  %v821_v21 = vadd.f32 %v820_v42, %v2020_v38  ;;  %vm880_vm2 = vcmp.ge.f32.partialorder %v818_v34, 0.0 }
 0x13a   :  { %vm883_vm3 = vcmp.ge.f32.partialorder %v829_v40, 0.0  ;;  %v899_v44 = vmul.f32 0.2, %v829_v40  ;;  %v914_v51 = vsel %vm882_vm1, %v826_v31, %v898_v39 }
 0x13b   :  { %vm881_vm4 = vcmp.ge.f32.partialorder %v821_v21, 0.0  ;;  %v897_v45 = vmul.f32 0.2, %v821_v21  ;;  %v912_v49 = vsel %vm880_vm2, %v818_v34, %v896_v43 }
 0x13c   :  { %v915_v46 = vsel %vm883_vm3, %v829_v40, %v899_v44 }
 0x13d   :  { %v929_v47 = vpack.c.bf16 %v915_v46, %v914_v51  ;;  %v1579_v48 = vpop.f32.mrb[36].mxu0  ;;  %v913_v35 = vsel %vm881_vm4, %v821_v21, %v897_v45 }
 0x13e   :  { %v842_v50 = vadd.f32 %v1579_v48, %v2036_v19  ;;  %v833_v52 = vpop.f32.mrb[37].mxu0  ;;  %v928_v54 = vpack.c.bf16 %v913_v35, %v912_v49 }
 0x13f   :  { %v834_v53 = vadd.f32 %v833_v52, %v2030_v3  ;;  %v1580_v55 = vpop.f32.mrb[38].mxu0 }
 0x140   :  { %v902_v57 = vmul.f32 0.2, %v842_v50  ;;  %v845_v38 = vadd.f32 %v1580_v55, %v2038_v23  ;;  %v836_v58 = vpop.f32.mrb[39].mxu0  ;;  %1605 = vmatprep.mubr.bf16.mxu1 %v928_v54  ;;  %vm886_vm5 = vcmp.ge.f32.partialorder %v842_v50, 0.0 }
 0x141   :  { %v900_v60 = vmul.f32 0.2, %v834_v53  ;;  %v837_v61 = vadd.f32 %v836_v58, %v2032_v6  ;;  %1606 = vmatmul.mubr.bf16.vlgmr.msra.gmra.mrb[32].mxu1 %v929_v47  ;;  %vm884_vm6 = vcmp.ge.f32.partialorder %v834_v53, 0.0 }
 0x142   :  { %vm887_vm7 = vcmp.ge.f32.partialorder %v845_v38, 0.0  ;;  %v903_v62 = vmul.f32 0.2, %v845_v38  ;;  %v918_v63 = vsel %vm886_vm5, %v842_v50, %v902_v57 }
 0x143   :  { %vm885_vm8 = vcmp.ge.f32.partialorder %v837_v61, 0.0  ;;  %v901_v19 = vmul.f32 0.2, %v837_v61  ;;  %v916_v3 = vsel %vm884_vm6, %v834_v53, %v900_v60 }
 0x144   :  { %v919_v0 = vsel %vm887_vm7, %v845_v38, %v903_v62 }
 0x145   :  { %v1583_v1 = vpop.f32.mrb[40].mxu0  ;;  %v917_v2 = vsel %vm885_vm8, %v837_v61, %v901_v19  ;;  %v931_v4 = vpack.c.bf16 %v919_v0, %v918_v63 }
 0x146   :  { %v858_v23 = vadd.f32 %v1583_v1, %v2048_v56  ;;  %v849_v5 = vpop.f32.mrb[41].mxu0  ;;  %v930_v7 = vpack.c.bf16 %v917_v2, %v916_v3 }
 0x147   :  { %v850_v8 = vadd.f32 %v849_v5, %v2042_v37  ;;  %v1584_v9 = vpop.f32.mrb[42].mxu0 }
 0x148   :  { %v906_v6 = vmul.f32 0.2, %v858_v23  ;;  %v861_v11 = vadd.f32 %v1584_v9, %v2050_v59  ;;  %v852_v12 = vpop.f32.mrb[43].mxu0  ;;  %1609 = vmatprep.mubr.bf16.mxu1 %v930_v7  ;;  %vm890_vm9 = vcmp.ge.f32.partialorder %v858_v23, 0.0 }
 0x149   :  { %v904_v14 = vmul.f32 0.2, %v850_v8  ;;  %v853_v15 = vadd.f32 %v852_v12, %v2044_v41  ;;  %1610 = vmatmul.mubr.bf16.gmra.mrb[36].mxu1 %v931_v4  ;;  %vm888_vm10 = vcmp.ge.f32.partialorder %v850_v8, 0.0 }
 0x14a   :  { %vm891_vm11 = vcmp.ge.f32.partialorder %v861_v11, 0.0  ;;  %v907_v16 = vmul.f32 0.2, %v861_v11  ;;  %v922_v17 = vsel %vm890_vm9, %v858_v23, %v906_v6 }
 0x14b   :  { %vm889_vm12 = vcmp.ge.f32.partialorder %v853_v15, 0.0  ;;  %v905_v56 = vmul.f32 0.2, %v853_v15  ;;  %v920_v37 = vsel %vm888_vm10, %v850_v8, %v904_v14 }
 0x14c   :  { %v923_v18 = vsel %vm891_vm11, %v861_v11, %v907_v16 }
 0x14d   :  { %v1587_v20 = vpop.f32.mrb[44].mxu0  ;;  %v921_v22 = vsel %vm889_vm12, %v853_v15, %v905_v56  ;;  %v933_v24 = vpack.c.bf16 %v923_v18, %v922_v17 }
 0x14e   :  { %v874_v59 = vadd.f32 %v1587_v20, %v2060_v29  ;;  %v865_v25 = vpop.f32.mrb[45].mxu0  ;;  %v932_v26 = vpack.c.bf16 %v921_v22, %v920_v37 }
 0x14f   :  { %v866_v27 = vadd.f32 %v865_v25, %v2054_v10  ;;  %v1588_v28 = vpop.f32.mrb[46].mxu0 }
 0x150   :  { %v910_v41 = vmul.f32 0.2, %v874_v59  ;;  %v877_v30 = vadd.f32 %v1588_v28, %v2063_v33  ;;  %v868_v31 = vpop.f32.mrb[47].mxu0  ;;  %1613 = vmatprep.mubr.bf16.mxu1 %v932_v26  ;;  %vm894_vm13 = vcmp.ge.f32.partialorder %v874_v59, 0.0  ;;  %v2083_v33 = vld [vmem:[%s2129_s4] ss:$0 sm:$0xff] }
 0x151   :  { %v908_v32 = vmul.f32 0.2, %v866_v27  ;;  %v869_v34 = vadd.f32 %v868_v31, %v2056_v13  ;;  %1614 = vmatmul.mubr.bf16.gmra.mrb[40].mxu1 %v933_v24  ;;  %vm892_vm14 = vcmp.ge.f32.partialorder %v866_v27, 0.0 }
 0x152   :  { %vm895_vm15 = vcmp.ge.f32.partialorder %v877_v30, 0.0  ;;  %v911_v36 = vmul.f32 0.2, %v877_v30  ;;  %v926_v39 = vsel %vm894_vm13, %v874_v59, %v910_v41 }
 0x153   :  { %vm893_vm0 = vcmp.ge.f32.partialorder %v869_v34, 0.0  ;;  %v909_v29 = vmul.f32 0.2, %v869_v34  ;;  %v924_v42 = vsel %vm892_vm14, %v866_v27, %v908_v32 }
 0x154   :  { %v927_v40 = vsel %vm895_vm15, %v877_v30, %v911_v36 }
 0x155   :  { %v925_v10 = vsel %vm893_vm0, %v869_v34, %v909_v29  ;;  %v935_v43 = vpack.c.bf16 %v927_v40, %v926_v39 }
 0x156   :  { %v934_v21 = vpack.c.bf16 %v925_v10, %v924_v42 }
 0x158   :  { %1617 = vmatprep.mubr.bf16.mxu1 %v934_v21 }
 0x159   :  { %1618 = vmatmul.mubr.bf16.gmra.mrb[44].mxu1 %v935_v43 }
 0x214   :  { %v1607_v13 = vpop.f32.mrb[32].mxu1 }
 0x215   :  { %v1050_v44 = vadd.f32 %v1607_v13, %v2083_v33  ;;  %v1041_v45 = vpop.f32.mrb[33].mxu1 }
 0x216   :  { %v1042_v51 = vadd.f32 %v2083_v33, %v1041_v45  ;;  %v1608_v46 = vpop.f32.mrb[34].mxu1 }
 0x217   :  { %v1122_v47 = vmul.f32 0.2, %v1050_v44  ;;  %v1053_v48 = vadd.f32 %v1608_v46, %v2083_v33  ;;  %v1044_v49 = vpop.f32.mrb[35].mxu1  ;;  %vm1106_vm1 = vcmp.ge.f32.partialorder %v1050_v44, 0.0 }
 0x218   :  { %v1120_v35 = vmul.f32 0.2, %v1042_v51  ;;  %v1045_v50 = vadd.f32 %v2083_v33, %v1044_v49  ;;  %vm1104_vm2 = vcmp.ge.f32.partialorder %v1042_v51, 0.0 }
 0x219   :  { %vm1107_vm3 = vcmp.ge.f32.partialorder %v1053_v48, 0.0  ;;  %v1123_v52 = vmul.f32 0.2, %v1053_v48  ;;  %v1138_v53 = vsel %vm1106_vm1, %v1050_v44, %v1122_v47 }
 0x21a   :  { %vm1105_vm4 = vcmp.ge.f32.partialorder %v1045_v50, 0.0  ;;  %v1121_v54 = vmul.f32 0.2, %v1045_v50  ;;  %v1136_v57 = vsel %vm1104_vm2, %v1042_v51, %v1120_v35 }
 0x21b   :  { %v1139_v55 = vsel %vm1107_vm3, %v1053_v48, %v1123_v52 }
 0x21c   :  { %v1370_v38 = vpack.c.bf16 %v1139_v55, %v1138_v53  ;;  %v1137_v58 = vsel %vm1105_vm4, %v1045_v50, %v1121_v54  ;;  %v1611_v60 = vpop.f32.mrb[36].mxu1 }
 0x21d   :  { %v1365_v61 = vpack.c.bf16 %v1137_v58, %v1136_v57  ;;  %v1066_v62 = vadd.f32 %v1611_v60, %v2083_v33  ;;  %v1057_v19 = vpop.f32.mrb[37].mxu1 }
 0x21e   :  { %1402 = vst [vmem:[%s2130_s5 + $0x8] sm:$0xff] %v1370_v38   ;;  %v1058_v63 = vadd.f32 %v2083_v33, %v1057_v19  ;;  %v1612_v0 = vpop.f32.mrb[38].mxu1 }
 0x21f   :  { %1366 = vst [vmem:[%s2130_s5] sm:$0xff] %v1365_v61   ;;  %v1126_v1 = vmul.f32 0.2, %v1066_v62  ;;  %v1069_v3 = vadd.f32 %v1612_v0, %v2083_v33  ;;  %v1060_v2 = vpop.f32.mrb[39].mxu1  ;;  %vm1110_vm5 = vcmp.ge.f32.partialorder %v1066_v62, 0.0 }
 0x220   :  { %v1124_v4 = vmul.f32 0.2, %v1058_v63  ;;  %v1061_v23 = vadd.f32 %v2083_v33, %v1060_v2  ;;  %vm1108_vm6 = vcmp.ge.f32.partialorder %v1058_v63, 0.0 }
 0x221   :  { %vm1111_vm7 = vcmp.ge.f32.partialorder %v1069_v3, 0.0  ;;  %v1127_v5 = vmul.f32 0.2, %v1069_v3  ;;  %v1142_v8 = vsel %vm1110_vm5, %v1066_v62, %v1126_v1 }
 0x222   :  { %vm1109_vm8 = vcmp.ge.f32.partialorder %v1061_v23, 0.0  ;;  %v1125_v7 = vmul.f32 0.2, %v1061_v23  ;;  %v1140_v6 = vsel %vm1108_vm6, %v1058_v63, %v1124_v4 }
 0x223   :  { %v1143_v9 = vsel %vm1111_vm7, %v1069_v3, %v1127_v5 }
 0x224   :  { %v1380_v11 = vpack.c.bf16 %v1143_v9, %v1142_v8  ;;  %v1141_v12 = vsel %vm1109_vm8, %v1061_v23, %v1125_v7  ;;  %v1615_v14 = vpop.f32.mrb[40].mxu1 }
 0x225   :  { %v1375_v15 = vpack.c.bf16 %v1141_v12, %v1140_v6  ;;  %v1082_v16 = vadd.f32 %v1615_v14, %v2083_v33  ;;  %v1073_v56 = vpop.f32.mrb[41].mxu1 }
 0x226   :  { %1404 = vst [vmem:[%s2130_s5 + $0x18] sm:$0xff] %v1380_v11   ;;  %v1074_v17 = vadd.f32 %v2083_v33, %v1073_v56  ;;  %v1616_v18 = vpop.f32.mrb[42].mxu1 }
 0x227   :  { %1403 = vst [vmem:[%s2130_s5 + $0x10] sm:$0xff] %v1375_v15   ;;  %v1130_v20 = vmul.f32 0.2, %v1082_v16  ;;  %v1085_v37 = vadd.f32 %v1616_v18, %v2083_v33  ;;  %v1076_v22 = vpop.f32.mrb[43].mxu1  ;;  %vm1114_vm9 = vcmp.ge.f32.partialorder %v1082_v16, 0.0 }
 0x228   :  { %v1128_v24 = vmul.f32 0.2, %v1074_v17  ;;  %v1077_v59 = vadd.f32 %v2083_v33, %v1076_v22  ;;  %vm1112_vm10 = vcmp.ge.f32.partialorder %v1074_v17, 0.0 }
 0x229   :  { %vm1115_vm11 = vcmp.ge.f32.partialorder %v1085_v37, 0.0  ;;  %v1131_v25 = vmul.f32 0.2, %v1085_v37  ;;  %v1146_v27 = vsel %vm1114_vm9, %v1082_v16, %v1130_v20 }
 0x22a   :  { %vm1113_vm12 = vcmp.ge.f32.partialorder %v1077_v59, 0.0  ;;  %v1129_v26 = vmul.f32 0.2, %v1077_v59  ;;  %v1144_v41 = vsel %vm1112_vm10, %v1074_v17, %v1128_v24 }
 0x22b   :  { %v1147_v28 = vsel %vm1115_vm11, %v1085_v37, %v1131_v25 }
 0x22c   :  { %v1390_v30 = vpack.c.bf16 %v1147_v28, %v1146_v27  ;;  %v1145_v31 = vsel %vm1113_vm12, %v1077_v59, %v1129_v26  ;;  %v1619_v32 = vpop.f32.mrb[44].mxu1 }
 0x22d   :  { %v1385_v34 = vpack.c.bf16 %v1145_v31, %v1144_v41  ;;  %v1098_v36 = vadd.f32 %v1619_v32, %v2083_v33  ;;  %v1089_v29 = vpop.f32.mrb[45].mxu1 }
 0x22e   :  { %1406 = vst [vmem:[%s2130_s5 + $0x28] sm:$0xff] %v1390_v30   ;;  %v1090_v39 = vadd.f32 %v2083_v33, %v1089_v29  ;;  %v1620_v40 = vpop.f32.mrb[46].mxu1 }
 0x22f   :  { %1405 = vst [vmem:[%s2130_s5 + $0x20] sm:$0xff] %v1385_v34   ;;  %v1134_v42 = vmul.f32 0.2, %v1098_v36  ;;  %v1101_v10 = vadd.f32 %v1620_v40, %v2083_v33  ;;  %v1092_v43 = vpop.f32.mrb[47].mxu1  ;;  %vm1118_vm13 = vcmp.ge.f32.partialorder %v1098_v36, 0.0 }
 0x230   :  { %v1132_v21 = vmul.f32 0.2, %v1090_v39  ;;  %v1093_v13 = vadd.f32 %v2083_v33, %v1092_v43  ;;  %vm1116_vm14 = vcmp.ge.f32.partialorder %v1090_v39, 0.0 }
 0x231   :  { %vm1119_vm15 = vcmp.ge.f32.partialorder %v1101_v10, 0.0  ;;  %v1135_v44 = vmul.f32 0.2, %v1101_v10  ;;  %v1150_v51 = vsel %vm1118_vm13, %v1098_v36, %v1134_v42 }
 0x232   :  { %vm1117_vm0 = vcmp.ge.f32.partialorder %v1093_v13, 0.0  ;;  %v1133_v45 = vmul.f32 0.2, %v1093_v13  ;;  %v1148_v47 = vsel %vm1116_vm14, %v1090_v39, %v1132_v21 }
 0x233   :  { %v1151_v46 = vsel %vm1119_vm15, %v1101_v10, %v1135_v44 }
 0x234   :  { %v1400_v48 = vpack.c.bf16 %v1151_v46, %v1150_v51  ;;  %v1149_v49 = vsel %vm1117_vm0, %v1093_v13, %v1133_v45 }
 0x235   :  { %v1395_v35 = vpack.c.bf16 %v1149_v49, %v1148_v47 }
 0x236   :  { %1408 = vst [vmem:[%s2130_s5 + $0x38] sm:$0xff] %v1400_v48  }
 0x237   :  { %1407 = vst [vmem:[%s2130_s5 + $0x30] sm:$0xff] %v1395_v35  }

// kernel: _lambda_.15
= control target key start
LH: loop header
LB: loop body
LE: loop exit
PB: predicated region body
PF: predicated region fallthrough
CT: control target
= control target key end

     0   :  { %s1640_s1 = inlined_call_operand.vmem [shape: bf16[1152,128], index: 1, kind: input, shape index: {}]   ;;  %s1641_s0 = inlined_call_operand.vmem [shape: bf16[32,1152], index: 0, kind: input, shape index: {}]   ;;  %s1642_s2 = inlined_call_operand.vmem [shape: f32[1,128], index: 2, kind: input, shape index: {}]   ;;  %s1643_s3 = inlined_call_operand.vmem [shape: bf16[32,128], index: 3, kind: output, shape index: {}]  }
   0x1   :  { %v1243_v0 = vld [vmem:[%s1640_s1 + $0x40] sm:$0xff]   ;;  %v1247_v4 = vld [vmem:[%s1640_s1 + $0x48] sm:$0xff]   ;;  %v1251_v8 = vld [vmem:[%s1640_s1 + $0x50] sm:$0xff]  }
   0x2   :  { %v1244_v1 = vld [vmem:[%s1640_s1] sm:$0xff]   ;;  %1101 = vmatprep.subr.bf16.mxu0 %v1243_v0  ;;  %v1248_v5 = vld [vmem:[%s1640_s1 + $0x8] sm:$0xff]   ;;  %v1252_v9 = vld [vmem:[%s1640_s1 + $0x10] sm:$0xff]  }
   0x3   :  { %v1245_v2 = vld [vmem:[%s1640_s1 + $0xc0] sm:$0xff]   ;;  %1102 = vmatpush3.bf16.msra.mxu0 %v1244_v1  ;;  %v1249_v6 = vld [vmem:[%s1640_s1 + $0xc8] sm:$0xff]   ;;  %v1253_v10 = vld [vmem:[%s1640_s1 + $0xd0] sm:$0xff]  }
   0x4   :  { %v1246_v3 = vld [vmem:[%s1640_s1 + $0x80] sm:$0xff]   ;;  %1129 = vmatprep.subr.bf16.mxu1 %v1245_v2  ;;  %1103 = vmatprep.subr.bf16.mxu0 %v1247_v4  ;;  %v1250_v7 = vld [vmem:[%s1640_s1 + $0x88] sm:$0xff]   ;;  %v1254_v11 = vld [vmem:[%s1640_s1 + $0x90] sm:$0xff]  }
   0x5   :  { %1130 = vmatpush3.bf16.msra.mxu1 %v1246_v3  ;;  %v1255_v12 = vld [vmem:[%s1640_s1 + $0x58] sm:$0xff]   ;;  %v1259_v16 = vld [vmem:[%s1640_s1 + $0x60] sm:$0xff]   ;;  %v1263_v20 = vld [vmem:[%s1640_s1 + $0x68] sm:$0xff]  }
   0x6   :  { %1131 = vmatprep.subr.bf16.mxu1 %v1249_v6  ;;  %v1256_v13 = vld [vmem:[%s1640_s1 + $0x18] sm:$0xff]   ;;  %v1260_v17 = vld [vmem:[%s1640_s1 + $0x20] sm:$0xff]   ;;  %v1264_v21 = vld [vmem:[%s1640_s1 + $0x28] sm:$0xff]  }
   0x7   :  { %1104 = vmatpush3.bf16.msra.mxu0 %v1248_v5  ;;  %v1257_v14 = vld [vmem:[%s1640_s1 + $0xd8] sm:$0xff]   ;;  %v1261_v18 = vld [vmem:[%s1640_s1 + $0xe0] sm:$0xff]   ;;  %v1265_v22 = vld [vmem:[%s1640_s1 + $0xe8] sm:$0xff]  }
   0x8   :  { %1105 = vmatprep.subr.bf16.mxu0 %v1251_v8  ;;  %v1258_v15 = vld [vmem:[%s1640_s1 + $0x98] sm:$0xff]   ;;  %v1262_v19 = vld [vmem:[%s1640_s1 + $0xa0] sm:$0xff]   ;;  %v1266_v23 = vld [vmem:[%s1640_s1 + $0xa8] sm:$0xff]  }
   0x9   :  { %1132 = vmatpush3.bf16.msra.mxu1 %v1250_v7  ;;  %v1267_v24 = vld [vmem:[%s1640_s1 + $0x70] sm:$0xff]   ;;  %v1271_v28 = vld [vmem:[%s1640_s1 + $0x78] sm:$0xff]   ;;  %v1274_v31 = vld [vmem:[%s1641_s0] ss:$36 sps:$4 sm:$0xff]  }
   0xa   :  { %1133 = vmatprep.subr.bf16.mxu1 %v1253_v10  ;;  %v1268_v25 = vld [vmem:[%s1640_s1 + $0x30] sm:$0xff]   ;;  %v1272_v29 = vld [vmem:[%s1640_s1 + $0x38] sm:$0xff]   ;;  %v1276_v32 = vld [vmem:[%s1641_s0 + $0x4] ss:$36 sps:$4 sm:$0xff]  }
   0xb   :  { %1106 = vmatpush3.bf16.msra.mxu0 %v1252_v9  ;;  %v1269_v26 = vld [vmem:[%s1640_s1 + $0xf0] sm:$0xff]   ;;  %v1273_v30 = vld [vmem:[%s1640_s1 + $0xf8] sm:$0xff]   ;;  %742 = vmatprep.mubr.bf16.mxu0 %v1276_v32  ;;  %v1278_v34 = vld [vmem:[%s1640_s1 + $0x140] sm:$0xff]  }
   0xc   :  { %1107 = vmatprep.subr.bf16.mxu0 %v1255_v12  ;;  %v1270_v27 = vld [vmem:[%s1640_s1 + $0xb0] sm:$0xff]   ;;  %v1277_v33 = vld [vmem:[%s1640_s1 + $0xb8] sm:$0xff]   ;;  %v1279_v35 = vld [vmem:[%s1641_s0 + $0x8] ss:$36 sps:$4 sm:$0xff]  }
   0xd   :  { %1134 = vmatpush3.bf16.msra.mxu1 %v1254_v11  ;;  %v1281_v36 = vld [vmem:[%s1641_s0 + $0xc] ss:$36 sps:$4 sm:$0xff]   ;;  %v1282_v37 = vld [vmem:[%s1640_s1 + $0x100] sm:$0xff]   ;;  %v1293_v48 = vld [vmem:[%s1640_s1 + $0x158] sm:$0xff]  }
   0xe   :  { %1135 = vmatprep.subr.bf16.mxu1 %v1257_v14  ;;  %791 = vmatprep.mubr.bf16.mxu1 %v1281_v36  ;;  %v1283_v38 = vld [vmem:[%s1640_s1 + $0x1c0] sm:$0xff]   ;;  %v1285_v40 = vld [vmem:[%s1640_s1 + $0x148] sm:$0xff]   ;;  %v1289_v44 = vld [vmem:[%s1640_s1 + $0x150] sm:$0xff]  }
   0xf   :  { %1108 = vmatpush3.bf16.msra.mxu0 %v1256_v13  ;;  %v1284_v39 = vld [vmem:[%s1640_s1 + $0x180] sm:$0xff]   ;;  %v1286_v41 = vld [vmem:[%s1640_s1 + $0x108] sm:$0xff]   ;;  %v1290_v45 = vld [vmem:[%s1640_s1 + $0x110] sm:$0xff]  }
  0x10   :  { %1109 = vmatprep.subr.bf16.mxu0 %v1259_v16  ;;  %v1287_v42 = vld [vmem:[%s1640_s1 + $0x1c8] sm:$0xff]   ;;  %v1291_v46 = vld [vmem:[%s1640_s1 + $0x1d0] sm:$0xff]   ;;  %v1294_v49 = vld [vmem:[%s1640_s1 + $0x118] sm:$0xff]  }
  0x11   :  { %1136 = vmatpush3.bf16.msra.mxu1 %v1258_v15  ;;  %v1288_v43 = vld [vmem:[%s1640_s1 + $0x188] sm:$0xff]   ;;  %v1292_v47 = vld [vmem:[%s1640_s1 + $0x190] sm:$0xff]   ;;  %v1295_v50 = vld [vmem:[%s1640_s1 + $0x1d8] sm:$0xff]  }
  0x12   :  { %1137 = vmatprep.subr.bf16.mxu1 %v1261_v18  ;;  %v1296_v51 = vld [vmem:[%s1640_s1 + $0x198] sm:$0xff]   ;;  %v1297_v52 = vld [vmem:[%s1640_s1 + $0x160] sm:$0xff]   ;;  %v1301_v56 = vld [vmem:[%s1640_s1 + $0x168] sm:$0xff]  }
  0x13   :  { %1110 = vmatpush3.bf16.msra.mxu0 %v1260_v17  ;;  %v1298_v53 = vld [vmem:[%s1640_s1 + $0x120] sm:$0xff]   ;;  %v1302_v57 = vld [vmem:[%s1641_s0 + $0x4c] ss:$36 sps:$4 sm:$0xff]   ;;  %v1307_v61 = vld [vmem:[%s1641_s0 + $0x54] ss:$36 sps:$4 sm:$0xff]  }
  0x14   :  { %1111 = vmatprep.subr.bf16.mxu0 %v1263_v20  ;;  %v1299_v54 = vld [vmem:[%s1640_s1 + $0x1e0] sm:$0xff]   ;;  %v1304_v58 = vld [vmem:[%s1640_s1 + $0x128] sm:$0xff]   ;;  %v1310_v63 = vld [vmem:[%s1641_s0 + $0x50] ss:$36 sps:$4 sm:$0xff]  }
  0x15   :  { %1138 = vmatpush3.bf16.msra.mxu1 %v1262_v19  ;;  %v1300_v55 = vld [vmem:[%s1640_s1 + $0x1a0] sm:$0xff]   ;;  %v1305_v59 = vld [vmem:[%s1641_s0 + $0x48] ss:$36 sps:$4 sm:$0xff]   ;;  %v1311_v0 = vld [vmem:[%s1640_s1 + $0x170] sm:$0xff]  }
  0x16   :  { %1139 = vmatprep.subr.bf16.mxu1 %v1265_v22  ;;  %v1306_v60 = vld [vmem:[%s1640_s1 + $0x1e8] sm:$0xff]   ;;  %v1312_v1 = vld [vmem:[%s1640_s1 + $0x130] sm:$0xff]   ;;  %v1315_v4 = vld [vmem:[%s1640_s1 + $0x178] sm:$0xff]  }
  0x17   :  { %1112 = vmatpush3.bf16.msra.mxu0 %v1264_v21  ;;  %v1309_v62 = vld [vmem:[%s1640_s1 + $0x1a8] sm:$0xff]   ;;  %v1313_v2 = vld [vmem:[%s1640_s1 + $0x1f0] sm:$0xff]   ;;  %v1316_v5 = vld [vmem:[%s1640_s1 + $0x138] sm:$0xff]  }
  0x18   :  { %1113 = vmatprep.subr.bf16.mxu0 %v1267_v24  ;;  %v1314_v3 = vld [vmem:[%s1640_s1 + $0x1b0] sm:$0xff]   ;;  %v1317_v6 = vld [vmem:[%s1640_s1 + $0x1f8] sm:$0xff]   ;;  %v1322_v10 = vld [vmem:[%s1640_s1 + $0x200] sm:$0xff]  }
  0x19   :  { %1140 = vmatpush3.bf16.msra.mxu1 %v1266_v23  ;;  %v1318_v7 = vld [vmem:[%s1641_s0 + $0x10] ss:$36 sps:$4 sm:$0xff]   ;;  %v1321_v9 = vld [vmem:[%s1640_s1 + $0x1b8] sm:$0xff]   ;;  %v1326_v13 = vld [vmem:[%s1640_s1 + $0x208] sm:$0xff]  }
  0x1a   :  { %1141 = vmatprep.subr.bf16.mxu1 %v1269_v26  ;;  %v1320_v8 = vld [vmem:[%s1641_s0 + $0x14] ss:$36 sps:$4 sm:$0xff]   ;;  %v1325_v12 = vld [vmem:[%s1641_s0 + $0x1c] ss:$36 sps:$4 sm:$0xff]   ;;  %v1331_v17 = vld [vmem:[%s1641_s0 + $0x64] ss:$36 sps:$4 sm:$0xff]  }
  0x1b   :  { %1114 = vmatpush3.bf16.msra.mxu0 %v1268_v25  ;;  %v1323_v11 = vld [vmem:[%s1641_s0 + $0x18] ss:$36 sps:$4 sm:$0xff]   ;;  %v1330_v16 = vld [vmem:[%s1640_s1 + $0x210] sm:$0xff]   ;;  %v1333_v18 = vld [vmem:[%s1641_s0 + $0x60] ss:$36 sps:$4 sm:$0xff]  }
  0x1c   :  { %1115 = vmatprep.subr.bf16.mxu0 %v1271_v28  ;;  %v1327_v14 = vld [vmem:[%s1641_s0 + $0x5c] ss:$36 sps:$4 sm:$0xff]   ;;  %v1336_v22 = vld [vmem:[%s1640_s1 + $0x228] sm:$0xff]   ;;  %v1337_v23 = vld [vmem:[%s1640_s1 + $0x230] sm:$0xff]  }
  0x1d   :  { %1142 = vmatpush3.bf16.msra.mxu1 %v1270_v27  ;;  %v1329_v15 = vld [vmem:[%s1641_s0 + $0x58] ss:$36 sps:$4 sm:$0xff]   ;;  %v1335_v20 = vld [vmem:[%s1640_s1 + $0x220] sm:$0xff]   ;;  %v1340_v25 = vld [vmem:[%s1641_s0 + $0x68] ss:$36 sps:$4 sm:$0xff]  }
  0x1e   :  { %1143 = vmatprep.subr.bf16.mxu1 %v1273_v30  ;;  %v1334_v19 = vld [vmem:[%s1640_s1 + $0x218] sm:$0xff]   ;;  %v1339_v21 = vld [vmem:[%s1641_s0 + $0x20] ss:$36 sps:$4 sm:$0xff]  }
  0x1f   :  { %1116 = vmatpush3.bf16.msra.mxu0 %v1272_v29  ;;  %v1338_v24 = vld [vmem:[%s1640_s1 + $0x238] sm:$0xff]   ;;  %v991_v27 = vld [vmem:[%s1642_s2] ss:$0 sm:$0xff] }
  0x20   :  { %1157 = vmatprep.subr.bf16.mxu0 %v1278_v34 }
  0x21   :  { %1144 = vmatpush3.bf16.msra.mxu1 %v1277_v33 }
  0x22   :  { %743 = vmatmul.mubr.bf16.vlgmr.msra.gmra.mrb[0].mxu0 %v1274_v31  ;;  %1185 = vmatprep.subr.bf16.mxu1 %v1283_v38 }
  0x23   :  { %1158 = vmatpush3.bf16.msra.mxu0 %v1282_v37  ;;  %750 = vmatprep.mubr.bf16.mxu0 %v1302_v57 }
  0x24   :  { %792 = vmatmul.mubr.bf16.vlgmr.msra.gmra.mrb[0].mxu1 %v1279_v35  ;;  %1159 = vmatprep.subr.bf16.mxu0 %v1285_v40 }
  0x25   :  { %1186 = vmatpush3.bf16.msra.mxu1 %v1284_v39  ;;  %799 = vmatprep.mubr.bf16.mxu1 %v1307_v61 }
  0x26   :  { %1187 = vmatprep.subr.bf16.mxu1 %v1287_v42 }
  0x27   :  { %1160 = vmatpush3.bf16.msra.mxu0 %v1286_v41 }
  0x28   :  { %1161 = vmatprep.subr.bf16.mxu0 %v1289_v44 }
  0x29   :  { %1188 = vmatpush3.bf16.msra.mxu1 %v1288_v43 }
  0x2a   :  { %1189 = vmatprep.subr.bf16.mxu1 %v1291_v46  ;;  %751 = vmatmul.mubr.bf16.gmra.mrb[4].mxu0 %v1305_v59 }
  0x2b   :  { %1162 = vmatpush3.bf16.msra.mxu0 %v1290_v45  ;;  %840 = vmatprep.mubr.bf16.mxu0 %v1320_v8 }
  0x2c   :  { %1163 = vmatprep.subr.bf16.mxu0 %v1293_v48  ;;  %800 = vmatmul.mubr.bf16.gmra.mrb[4].mxu1 %v1310_v63 }
  0x2d   :  { %1190 = vmatpush3.bf16.msra.mxu1 %v1292_v47  ;;  %889 = vmatprep.mubr.bf16.mxu1 %v1325_v12 }
  0x2e   :  { %1191 = vmatprep.subr.bf16.mxu1 %v1295_v50 }
  0x2f   :  { %1164 = vmatpush3.bf16.msra.mxu0 %v1294_v49 }
  0x30   :  { %1165 = vmatprep.subr.bf16.mxu0 %v1297_v52 }
  0x31   :  { %1192 = vmatpush3.bf16.msra.mxu1 %v1296_v51 }
  0x32   :  { %1193 = vmatprep.subr.bf16.mxu1 %v1299_v54 }
  0x33   :  { %1166 = vmatpush3.bf16.msra.mxu0 %v1298_v53 }
  0x34   :  { %1167 = vmatprep.subr.bf16.mxu0 %v1301_v56 }
  0x35   :  { %1194 = vmatpush3.bf16.msra.mxu1 %v1300_v55 }
  0x36   :  { %1195 = vmatprep.subr.bf16.mxu1 %v1306_v60 }
  0x37   :  { %1168 = vmatpush3.bf16.msra.mxu0 %v1304_v58 }
  0x38   :  { %1169 = vmatprep.subr.bf16.mxu0 %v1311_v0 }
  0x39   :  { %1196 = vmatpush3.bf16.msra.mxu1 %v1309_v62 }
  0x3a   :  { %1197 = vmatprep.subr.bf16.mxu1 %v1313_v2 }
  0x3b   :  { %1170 = vmatpush3.bf16.msra.mxu0 %v1312_v1 }
  0x3c   :  { %1171 = vmatprep.subr.bf16.mxu0 %v1315_v4 }
  0x3d   :  { %1198 = vmatpush3.bf16.msra.mxu1 %v1314_v3 }
  0x3e   :  { %1199 = vmatprep.subr.bf16.mxu1 %v1317_v6 }
  0x3f   :  { %1172 = vmatpush3.bf16.msra.mxu0 %v1316_v5 }
  0x40   :  { %1223 = vmatprep.subr.bf16.mxu0 %v1322_v10 }
  0x41   :  { %1200 = vmatpush3.bf16.msra.mxu1 %v1321_v9 }
  0x42   :  { %841 = vmatmul.mubr.bf16.vlgmr.msra.gmra.mrb[8].mxu0 %v1318_v7 }
  0x43   :  { %1224 = vmatpush3.bf16.msra.mxu0 %v1322_v10  ;;  %848 = vmatprep.mubr.bf16.mxu0 %v1327_v14 }
  0x44   :  { %890 = vmatmul.mubr.bf16.vlgmr.msra.gmra.mrb[8].mxu1 %v1323_v11  ;;  %1225 = vmatprep.subr.bf16.mxu0 %v1326_v13 }
  0x45   :  { %897 = vmatprep.mubr.bf16.mxu1 %v1331_v17 }
  0x47   :  { %1226 = vmatpush3.bf16.msra.mxu0 %v1326_v13 }
  0x48   :  { %1227 = vmatprep.subr.bf16.mxu0 %v1330_v16 }
  0x4a   :  { %849 = vmatmul.mubr.bf16.gmra.mrb[12].mxu0 %v1329_v15 }
  0x4b   :  { %1228 = vmatpush3.bf16.msra.mxu0 %v1330_v16  ;;  %1239 = vmatprep.mubr.bf16.mxu0 %v1339_v21 }
  0x4c   :  { %898 = vmatmul.mubr.bf16.gmra.mrb[12].mxu1 %v1333_v18  ;;  %1229 = vmatprep.subr.bf16.mxu0 %v1334_v19 }
  0x4f   :  { %1230 = vmatpush3.bf16.msra.mxu0 %v1334_v19 }
  0x50   :  { %1231 = vmatprep.subr.bf16.mxu0 %v1335_v20 }
  0x53   :  { %1232 = vmatpush3.bf16.msra.mxu0 %v1335_v20 }
  0x54   :  { %1233 = vmatprep.subr.bf16.mxu0 %v1336_v22 }
  0x57   :  { %1234 = vmatpush3.bf16.msra.mxu0 %v1336_v22 }
  0x58   :  { %1235 = vmatprep.subr.bf16.mxu0 %v1337_v23 }
  0x5b   :  { %1236 = vmatpush3.bf16.msra.mxu0 %v1337_v23 }
  0x5c   :  { %1237 = vmatprep.subr.bf16.mxu0 %v1338_v24 }
  0x5f   :  { %1238 = vmatpush3.bf16.msra.mxu0 %v1338_v24 }
  0x62   :  { %1240 = vmatmul.mubr.bf16.vlgmr.msra.gmra.mrb[16].mxu0 %v1340_v25 }
  0xf5   :  { %v1117_v26 = vpop.f32.mrb[0].mxu0 }
  0xf6   :  { %v1118_v28 = vpop.f32.mrb[1].mxu0 }
  0xf7   :  { %v1119_v29 = vadd.f32 %v1118_v28, %v1117_v26  ;;  %v1120_v30 = vpop.f32.mrb[2].mxu0  ;;  %v1145_v31 = vpop.f32.mrb[0].mxu1 }
  0xf8   :  { %v1121_v32 = vpop.f32.mrb[3].mxu0  ;;  %v1146_v35 = vpop.f32.mrb[1].mxu1 }
  0xf9   :  { %v745_v33 = vadd.f32 %v1119_v29, %v991_v27  ;;  %v1122_v34 = vadd.f32 %v1121_v32, %v1120_v30  ;;  %v1147_v36 = vadd.f32 %v1146_v35, %v1145_v31  ;;  %v1148_v37 = vpop.f32.mrb[2].mxu1 }
  0xfa   :  { %v1149_v39 = vpop.f32.mrb[3].mxu1 }
  0xfb   :  { %v748_v38 = vadd.f32 %v1122_v34, %v991_v27  ;;  %v794_v40 = vadd.f32 %v1147_v36, %v745_v33  ;;  %v1150_v41 = vadd.f32 %v1149_v39, %v1148_v37 }
  0xfd   :  { %v797_v42 = vadd.f32 %v1150_v41, %v748_v38  ;;  %v1123_v43 = vpop.f32.mrb[4].mxu0 }
  0xfe   :  { %v1124_v44 = vpop.f32.mrb[5].mxu0 }
  0xff   :  { %v1125_v45 = vadd.f32 %v1124_v44, %v1123_v43  ;;  %v1126_v46 = vpop.f32.mrb[6].mxu0  ;;  %v1151_v47 = vpop.f32.mrb[4].mxu1 }
 0x100   :  { %v1127_v48 = vpop.f32.mrb[7].mxu0  ;;  %v1152_v51 = vpop.f32.mrb[5].mxu1 }
 0x101   :  { %v753_v49 = vadd.f32 %v1125_v45, %v991_v27  ;;  %v1128_v50 = vadd.f32 %v1127_v48, %v1126_v46  ;;  %v1153_v52 = vadd.f32 %v1152_v51, %v1151_v47  ;;  %v1154_v53 = vpop.f32.mrb[6].mxu1 }
 0x102   :  { %v1155_v55 = vpop.f32.mrb[7].mxu1 }
 0x103   :  { %v756_v54 = vadd.f32 %v1128_v50, %v991_v27  ;;  %v802_v56 = vadd.f32 %v1153_v52, %v753_v49  ;;  %v1156_v57 = vadd.f32 %v1155_v55, %v1154_v53 }
 0x105   :  { %v805_v58 = vadd.f32 %v1156_v57, %v756_v54 }
 0x115   :  { %v1173_v59 = vpop.f32.mrb[8].mxu0 }
 0x116   :  { %v1174_v60 = vpop.f32.mrb[9].mxu0 }
 0x117   :  { %v1175_v61 = vadd.f32 %v1174_v60, %v1173_v59  ;;  %v1176_v62 = vpop.f32.mrb[10].mxu0  ;;  %v1201_v63 = vpop.f32.mrb[8].mxu1 }
 0x118   :  { %v1177_v0 = vpop.f32.mrb[11].mxu0  ;;  %v1202_v3 = vpop.f32.mrb[9].mxu1 }
 0x119   :  { %v843_v1 = vadd.f32 %v1175_v61, %v794_v40  ;;  %v1178_v2 = vadd.f32 %v1177_v0, %v1176_v62  ;;  %v1203_v4 = vadd.f32 %v1202_v3, %v1201_v63  ;;  %v1204_v5 = vpop.f32.mrb[10].mxu1 }
 0x11a   :  { %v1205_v7 = vpop.f32.mrb[11].mxu1 }
 0x11b   :  { %v846_v6 = vadd.f32 %v1178_v2, %v797_v42  ;;  %v1206_v8 = vadd.f32 %v1205_v7, %v1204_v5  ;;  %v892_v9 = vadd.f32 %v1203_v4, %v843_v1 }
 0x11d   :  { %v1179_v10 = vpop.f32.mrb[12].mxu0  ;;  %v895_v12 = vadd.f32 %v1206_v8, %v846_v6 }
 0x11e   :  { %v1180_v11 = vpop.f32.mrb[13].mxu0 }
 0x11f   :  { %v1181_v13 = vadd.f32 %v1180_v11, %v1179_v10  ;;  %v1182_v14 = vpop.f32.mrb[14].mxu0  ;;  %v1207_v15 = vpop.f32.mrb[12].mxu1 }
 0x120   :  { %v1183_v16 = vpop.f32.mrb[15].mxu0  ;;  %v1208_v19 = vpop.f32.mrb[13].mxu1 }
 0x121   :  { %v851_v17 = vadd.f32 %v1181_v13, %v802_v56  ;;  %v1184_v18 = vadd.f32 %v1183_v16, %v1182_v14  ;;  %v1209_v20 = vadd.f32 %v1208_v19, %v1207_v15  ;;  %v1210_v21 = vpop.f32.mrb[14].mxu1 }
 0x122   :  { %v1211_v23 = vpop.f32.mrb[15].mxu1 }
 0x123   :  { %v854_v22 = vadd.f32 %v1184_v18, %v805_v58  ;;  %v1212_v24 = vadd.f32 %v1211_v23, %v1210_v21  ;;  %v900_v25 = vadd.f32 %v1209_v20, %v851_v17 }
 0x125   :  { %v903_v26 = vadd.f32 %v1212_v24, %v854_v22 }
 0x135   :  { %v1241_v27 = vpop.f32.mrb[16].mxu0 }
 0x136   :  { %v949_v28 = vadd.f32 %v1241_v27, %v900_v25  ;;  %v940_v29 = vpop.f32.mrb[17].mxu0 }
 0x137   :  { %v941_v30 = vadd.f32 %v940_v29, %v892_v9  ;;  %v1242_v31 = vpop.f32.mrb[18].mxu0 }
 0x138   :  { %v961_v32 = vmul.f32 0.2, %v949_v28  ;;  %v952_v33 = vadd.f32 %v1242_v31, %v903_v26  ;;  %v943_v34 = vpop.f32.mrb[19].mxu0  ;;  %vm957_vm0 = vcmp.ge.f32.partialorder %v949_v28, 0.0 }
 0x139   :  { %v959_v35 = vmul.f32 0.2, %v941_v30  ;;  %v944_v36 = vadd.f32 %v943_v34, %v895_v12  ;;  %vm955_vm1 = vcmp.ge.f32.partialorder %v941_v30, 0.0 }
 0x13a   :  { %vm958_vm2 = vcmp.ge.f32.partialorder %v952_v33, 0.0  ;;  %v962_v37 = vmul.f32 0.2, %v952_v33  ;;  %v965_v39 = vsel %vm957_vm0, %v949_v28, %v961_v32 }
 0x13b   :  { %vm956_vm3 = vcmp.ge.f32.partialorder %v944_v36, 0.0  ;;  %v960_v38 = vmul.f32 0.2, %v944_v36  ;;  %v963_v41 = vsel %vm955_vm1, %v941_v30, %v959_v35 }
 0x13c   :  { %v966_v40 = vsel %vm958_vm2, %v952_v33, %v962_v37 }
 0x13d   :  { %v1098_v42 = vpack.c.bf16 %v966_v40, %v965_v39  ;;  %v964_v43 = vsel %vm956_vm3, %v944_v36, %v960_v38 }
 0x13e   :  { %v1093_v44 = vpack.c.bf16 %v964_v43, %v963_v41 }
 0x13f   :  { %1100 = vst [vmem:[%s1643_s3 + $0x8] sm:$0xff] %v1098_v42  }
 0x140   :  { %1094 = vst [vmem:[%s1643_s3] sm:$0xff] %v1093_v44  }

// kernel: _lambda_.16
= control target key start
LH: loop header
LB: loop body
LE: loop exit
PB: predicated region body
PF: predicated region fallthrough
CT: control target
= control target key end

     0   :  { %vm1127_vm0 = vmmov 0   ;;  %s1385_s1 = inlined_call_operand.vmem [shape: bf16[1152,128], index: 1, kind: input, shape index: {}]   ;;  %s1386_s0 = inlined_call_operand.vmem [shape: bf16[8,1152], index: 0, kind: input, shape index: {}]   ;;  %s1387_s2 = inlined_call_operand.vmem [shape: f32[1,128], index: 2, kind: input, shape index: {}]   ;;  %s1388_s3 = inlined_call_operand.vmem [shape: bf16[8,128], index: 3, kind: output, shape index: {}]  }
   0x1   :  { %v1045_v0 = vld [vmem:[%s1385_s1 + $0x40] sm:$0xff]   ;;  %v1049_v4 = vld [vmem:[%s1385_s1 + $0x48] sm:$0xff]   ;;  %v1053_v8 = vld [vmem:[%s1385_s1 + $0x50] sm:$0xff]  }
   0x2   :  { %v1046_v1 = vld [vmem:[%s1385_s1] sm:$0xff]   ;;  %926 = vmatprep.subr.bf16.mxu0 %v1045_v0  ;;  %v1050_v5 = vld [vmem:[%s1385_s1 + $0x8] sm:$0xff]   ;;  %v1054_v9 = vld [vmem:[%s1385_s1 + $0x10] sm:$0xff]  }
   0x3   :  { %v1047_v2 = vld [vmem:[%s1385_s1 + $0xc0] sm:$0xff]   ;;  %927 = vmatpush3.bf16.msra.mxu0 %v1046_v1  ;;  %v1051_v6 = vld [vmem:[%s1385_s1 + $0xc8] sm:$0xff]   ;;  %v1055_v10 = vld [vmem:[%s1385_s1 + $0xd0] sm:$0xff]  }
   0x4   :  { %v1048_v3 = vld [vmem:[%s1385_s1 + $0x80] sm:$0xff]   ;;  %948 = vmatprep.subr.bf16.mxu1 %v1047_v2  ;;  %928 = vmatprep.subr.bf16.mxu0 %v1049_v4  ;;  %v1052_v7 = vld [vmem:[%s1385_s1 + $0x88] sm:$0xff]   ;;  %v1056_v11 = vld [vmem:[%s1385_s1 + $0x90] sm:$0xff]  }
   0x5   :  { %949 = vmatpush3.bf16.msra.mxu1 %v1048_v3  ;;  %v1057_v12 = vld [vmem:[%s1385_s1 + $0x58] sm:$0xff]   ;;  %v1061_v16 = vld [vmem:[%s1385_s1 + $0x60] sm:$0xff]   ;;  %v1065_v20 = vld [vmem:[%s1385_s1 + $0x68] sm:$0xff]  }
   0x6   :  { %950 = vmatprep.subr.bf16.mxu1 %v1051_v6  ;;  %v1058_v13 = vld [vmem:[%s1385_s1 + $0x18] sm:$0xff]   ;;  %v1062_v17 = vld [vmem:[%s1385_s1 + $0x20] sm:$0xff]   ;;  %v1066_v21 = vld [vmem:[%s1385_s1 + $0x28] sm:$0xff]  }
   0x7   :  { %929 = vmatpush3.bf16.msra.mxu0 %v1050_v5  ;;  %v1059_v14 = vld [vmem:[%s1385_s1 + $0xd8] sm:$0xff]   ;;  %v1063_v18 = vld [vmem:[%s1385_s1 + $0xe0] sm:$0xff]   ;;  %v1067_v22 = vld [vmem:[%s1385_s1 + $0xe8] sm:$0xff]  }
   0x8   :  { %930 = vmatprep.subr.bf16.mxu0 %v1053_v8  ;;  %v1060_v15 = vld [vmem:[%s1385_s1 + $0x98] sm:$0xff]   ;;  %v1064_v19 = vld [vmem:[%s1385_s1 + $0xa0] sm:$0xff]   ;;  %v1068_v23 = vld [vmem:[%s1385_s1 + $0xa8] sm:$0xff]  }
   0x9   :  { %951 = vmatpush3.bf16.msra.mxu1 %v1052_v7  ;;  %v1069_v24 = vld [vmem:[%s1385_s1 + $0x70] sm:$0xff]   ;;  %v1073_v28 = vld [vmem:[%s1385_s1 + $0x78] sm:$0xff]   ;;  %v15_v31 = vld [vmem:[%s1386_s0] sm:$0xff] }
   0xa   :  { %952 = vmatprep.subr.bf16.mxu1 %v1055_v10  ;;  %v1070_v25 = vld [vmem:[%s1385_s1 + $0x30] sm:$0xff]   ;;  %v1074_v29 = vld [vmem:[%s1385_s1 + $0x38] sm:$0xff]   ;;  %v845_v32 = vcombine.low %v15_v31, %v15_v31  ;;  %v846_v33 = vcombine.high %v15_v31, %v15_v31  ;;  %v1079_v35 = vld [vmem:[%s1385_s1 + $0x140] sm:$0xff]  }
   0xb   :  { %931 = vmatpush3.bf16.msra.mxu0 %v1054_v9  ;;  %v1071_v26 = vld [vmem:[%s1385_s1 + $0xf0] sm:$0xff]   ;;  %v1075_v30 = vld [vmem:[%s1385_s1 + $0xf8] sm:$0xff]   ;;  %v16_v36 = vld [vmem:[%s1386_s0 + $0x8] sm:$0xff]  ;;  %v1126_v9 = vmov 0.0  }
   0xc   :  { %932 = vmatprep.subr.bf16.mxu0 %v1057_v12  ;;  %v1072_v27 = vld [vmem:[%s1385_s1 + $0xb0] sm:$0xff]   ;;  %v1078_v34 = vld [vmem:[%s1385_s1 + $0xb8] sm:$0xff]   ;;  %667 = vmatprep.mubr.bf16.mxu0 %v846_v33  ;;  %v847_v37 = vcombine.low %v16_v36, %v16_v36  ;;  %v848_v38 = vcombine.high %v16_v36, %v16_v36  ;;  %v1082_v39 = vld [vmem:[%s1385_s1 + $0x100] sm:$0xff]  }
   0xd   :  { %953 = vmatpush3.bf16.msra.mxu1 %v1056_v11  ;;  %v1083_v40 = vld [vmem:[%s1385_s1 + $0x1c0] sm:$0xff]   ;;  %v1085_v42 = vld [vmem:[%s1385_s1 + $0x148] sm:$0xff]   ;;  %v1089_v46 = vld [vmem:[%s1385_s1 + $0x150] sm:$0xff]  }
   0xe   :  { %954 = vmatprep.subr.bf16.mxu1 %v1059_v14  ;;  %707 = vmatprep.mubr.bf16.mxu1 %v848_v38  ;;  %v1084_v41 = vld [vmem:[%s1385_s1 + $0x180] sm:$0xff]   ;;  %v1086_v43 = vld [vmem:[%s1385_s1 + $0x108] sm:$0xff]   ;;  %v1090_v47 = vld [vmem:[%s1385_s1 + $0x110] sm:$0xff]  }
   0xf   :  { %933 = vmatpush3.bf16.msra.mxu0 %v1058_v13  ;;  %v1087_v44 = vld [vmem:[%s1385_s1 + $0x1c8] sm:$0xff]   ;;  %v1091_v48 = vld [vmem:[%s1385_s1 + $0x1d0] sm:$0xff]   ;;  %v1093_v50 = vld [vmem:[%s1385_s1 + $0x158] sm:$0xff]  }
  0x10   :  { %934 = vmatprep.subr.bf16.mxu0 %v1061_v16  ;;  %v1088_v45 = vld [vmem:[%s1385_s1 + $0x188] sm:$0xff]   ;;  %v1092_v49 = vld [vmem:[%s1385_s1 + $0x190] sm:$0xff]   ;;  %v1094_v51 = vld [vmem:[%s1385_s1 + $0x118] sm:$0xff]  }
  0x11   :  { %955 = vmatpush3.bf16.msra.mxu1 %v1060_v15  ;;  %v1095_v52 = vld [vmem:[%s1385_s1 + $0x1d8] sm:$0xff]   ;;  %v1097_v54 = vld [vmem:[%s1385_s1 + $0x160] sm:$0xff]   ;;  %v1101_v58 = vld [vmem:[%s1385_s1 + $0x168] sm:$0xff]  }
  0x12   :  { %956 = vmatprep.subr.bf16.mxu1 %v1063_v18  ;;  %v1096_v53 = vld [vmem:[%s1385_s1 + $0x198] sm:$0xff]   ;;  %v1098_v55 = vld [vmem:[%s1385_s1 + $0x120] sm:$0xff]   ;;  %v1102_v59 = vld [vmem:[%s1385_s1 + $0x128] sm:$0xff]  }
  0x13   :  { %935 = vmatpush3.bf16.msra.mxu0 %v1062_v17  ;;  %v1099_v56 = vld [vmem:[%s1385_s1 + $0x1e0] sm:$0xff]   ;;  %v1103_v60 = vld [vmem:[%s1385_s1 + $0x1e8] sm:$0xff]   ;;  %v1105_v62 = vld [vmem:[%s1385_s1 + $0x170] sm:$0xff]  }
  0x14   :  { %936 = vmatprep.subr.bf16.mxu0 %v1065_v20  ;;  %v1100_v57 = vld [vmem:[%s1385_s1 + $0x1a0] sm:$0xff]   ;;  %v1104_v61 = vld [vmem:[%s1385_s1 + $0x1a8] sm:$0xff]   ;;  %v1106_v63 = vld [vmem:[%s1385_s1 + $0x130] sm:$0xff]  }
  0x15   :  { %957 = vmatpush3.bf16.msra.mxu1 %v1064_v19  ;;  %v1107_v0 = vld [vmem:[%s1385_s1 + $0x1f0] sm:$0xff]   ;;  %v1109_v2 = vld [vmem:[%s1385_s1 + $0x178] sm:$0xff]   ;;  %v1117_v13 = vld [vmem:[%s1385_s1 + $0x200] sm:$0xff]  }
  0x16   :  { %958 = vmatprep.subr.bf16.mxu1 %v1067_v22  ;;  %v1108_v1 = vld [vmem:[%s1385_s1 + $0x1b0] sm:$0xff]   ;;  %v1110_v3 = vld [vmem:[%s1385_s1 + $0x138] sm:$0xff]   ;;  %v1118_v14 = vld [vmem:[%s1385_s1 + $0x208] sm:$0xff]  }
  0x17   :  { %937 = vmatpush3.bf16.msra.mxu0 %v1066_v21  ;;  %v1111_v4 = vld [vmem:[%s1385_s1 + $0x1f8] sm:$0xff]   ;;  %v17_v5 = vld [vmem:[%s1386_s0 + $0x10] sm:$0xff]  ;;  %v1121_v17 = vld [vmem:[%s1385_s1 + $0x220] sm:$0xff]  }
  0x18   :  { %938 = vmatprep.subr.bf16.mxu0 %v1069_v24  ;;  %v849_v6 = vcombine.low %v17_v5, %v17_v5  ;;  %v850_v7 = vcombine.high %v17_v5, %v17_v5  ;;  %v1114_v8 = vld [vmem:[%s1385_s1 + $0x1b8] sm:$0xff]   ;;  %v1119_v15 = vld [vmem:[%s1385_s1 + $0x210] sm:$0xff]   ;;  %v1122_v18 = vld [vmem:[%s1385_s1 + $0x228] sm:$0xff]  }
  0x19   :  { %959 = vmatpush3.bf16.msra.mxu1 %v1068_v23  ;;  %v18_v10 = vld [vmem:[%s1386_s0 + $0x18] sm:$0xff]  ;;  %v1123_v19 = vld [vmem:[%s1385_s1 + $0x230] sm:$0xff]   ;;  %v1125_v21 = vld [vmem:[%s1386_s0 + $0x20] ss:$0 sps:$4 sm:$0xff]  }
  0x1a   :  { %960 = vmatprep.subr.bf16.mxu1 %v1071_v26  ;;  %v851_v11 = vcombine.low %v18_v10, %v18_v10  ;;  %v852_v12 = vcombine.high %v18_v10, %v18_v10  ;;  %v1120_v16 = vld [vmem:[%s1385_s1 + $0x218] sm:$0xff]   ;;  %v844_v23 = vld [vmem:[%s1387_s2] ss:$0 sm:$0xff] }
  0x1b   :  { %939 = vmatpush3.bf16.msra.mxu0 %v1070_v25  ;;  %v1124_v20 = vld [vmem:[%s1385_s1 + $0x238] sm:$0xff]  }
  0x1c   :  { %940 = vmatprep.subr.bf16.mxu0 %v1073_v28 }
  0x1d   :  { %961 = vmatpush3.bf16.msra.mxu1 %v1072_v27 }
  0x1e   :  { %962 = vmatprep.subr.bf16.mxu1 %v1075_v30 }
  0x1f   :  { %941 = vmatpush3.bf16.msra.mxu0 %v1074_v29 }
  0x20   :  { %970 = vmatprep.subr.bf16.mxu0 %v1079_v35 }
  0x21   :  { %963 = vmatpush3.bf16.msra.mxu1 %v1078_v34 }
  0x22   :  { %668 = vmatmul.mubr.bf16.vlgmr.msra.gmra.mrb[0].mxu0 %v845_v32  ;;  %992 = vmatprep.subr.bf16.mxu1 %v1083_v40 }
  0x23   :  { %971 = vmatpush3.bf16.msra.mxu0 %v1082_v39  ;;  %747 = vmatprep.mubr.bf16.mxu0 %v850_v7 }
  0x24   :  { %708 = vmatmul.mubr.bf16.vlgmr.msra.gmra.mrb[0].mxu1 %v847_v37  ;;  %972 = vmatprep.subr.bf16.mxu0 %v1085_v42 }
  0x25   :  { %993 = vmatpush3.bf16.msra.mxu1 %v1084_v41  ;;  %787 = vmatprep.mubr.bf16.mxu1 %v852_v12 }
  0x26   :  { %994 = vmatprep.subr.bf16.mxu1 %v1087_v44 }
  0x27   :  { %973 = vmatpush3.bf16.msra.mxu0 %v1086_v43 }
  0x28   :  { %974 = vmatprep.subr.bf16.mxu0 %v1089_v46 }
  0x29   :  { %995 = vmatpush3.bf16.msra.mxu1 %v1088_v45 }
  0x2a   :  { %996 = vmatprep.subr.bf16.mxu1 %v1091_v48 }
  0x2b   :  { %975 = vmatpush3.bf16.msra.mxu0 %v1090_v47 }
  0x2c   :  { %976 = vmatprep.subr.bf16.mxu0 %v1093_v50 }
  0x2d   :  { %997 = vmatpush3.bf16.msra.mxu1 %v1092_v49 }
  0x2e   :  { %998 = vmatprep.subr.bf16.mxu1 %v1095_v52 }
  0x2f   :  { %977 = vmatpush3.bf16.msra.mxu0 %v1094_v51 }
  0x30   :  { %978 = vmatprep.subr.bf16.mxu0 %v1097_v54 }
  0x31   :  { %999 = vmatpush3.bf16.msra.mxu1 %v1096_v53 }
  0x32   :  { %1000 = vmatprep.subr.bf16.mxu1 %v1099_v56 }
  0x33   :  { %979 = vmatpush3.bf16.msra.mxu0 %v1098_v55 }
  0x34   :  { %980 = vmatprep.subr.bf16.mxu0 %v1101_v58 }
  0x35   :  { %1001 = vmatpush3.bf16.msra.mxu1 %v1100_v57 }
  0x36   :  { %1002 = vmatprep.subr.bf16.mxu1 %v1103_v60 }
  0x37   :  { %981 = vmatpush3.bf16.msra.mxu0 %v1102_v59 }
  0x38   :  { %982 = vmatprep.subr.bf16.mxu0 %v1105_v62 }
  0x39   :  { %1003 = vmatpush3.bf16.msra.mxu1 %v1104_v61 }
  0x3a   :  { %1004 = vmatprep.subr.bf16.mxu1 %v1107_v0 }
  0x3b   :  { %983 = vmatpush3.bf16.msra.mxu0 %v1106_v63 }
  0x3c   :  { %984 = vmatprep.subr.bf16.mxu0 %v1109_v2 }
  0x3d   :  { %1005 = vmatpush3.bf16.msra.mxu1 %v1108_v1 }
  0x3e   :  { %1006 = vmatprep.subr.bf16.mxu1 %v1111_v4 }
  0x3f   :  { %985 = vmatpush3.bf16.msra.mxu0 %v1110_v3 }
  0x40   :  { %1023 = vmatprep.subr.bf16.mxu0 %v1126_v9 }
  0x41   :  { %1007 = vmatpush3.bf16.msra.mxu1 %v1114_v8 }
  0x42   :  { %748 = vmatmul.mubr.bf16.vlgmr.msra.gmra.mrb[4].mxu0 %v849_v6 }
  0x43   :  { %1024 = vmatpush3.bf16.msra.mxu0 %v1117_v13  ;;  %1039 = vmatprep.mubr.msk.bf16.mxu0 %vm1127_vm0, %v1126_v9 }
  0x44   :  { %788 = vmatmul.mubr.bf16.vlgmr.msra.gmra.mrb[4].mxu1 %v851_v11  ;;  %1025 = vmatprep.subr.bf16.mxu0 %v1126_v9 }
  0x47   :  { %1026 = vmatpush3.bf16.msra.mxu0 %v1118_v14 }
  0x48   :  { %1027 = vmatprep.subr.bf16.mxu0 %v1126_v9 }
  0x4b   :  { %1028 = vmatpush3.bf16.msra.mxu0 %v1119_v15 }
  0x4c   :  { %1029 = vmatprep.subr.bf16.mxu0 %v1126_v9 }
  0x4f   :  { %1030 = vmatpush3.bf16.msra.mxu0 %v1120_v16 }
  0x50   :  { %1031 = vmatprep.subr.bf16.mxu0 %v1126_v9 }
  0x53   :  { %1032 = vmatpush3.bf16.msra.mxu0 %v1121_v17 }
  0x54   :  { %1033 = vmatprep.subr.bf16.mxu0 %v1126_v9 }
  0x57   :  { %1034 = vmatpush3.bf16.msra.mxu0 %v1122_v18 }
  0x58   :  { %1035 = vmatprep.subr.bf16.mxu0 %v1126_v9 }
  0x5b   :  { %1036 = vmatpush3.bf16.msra.mxu0 %v1123_v19 }
  0x5c   :  { %1037 = vmatprep.subr.bf16.mxu0 %v1126_v9 }
  0x5f   :  { %1038 = vmatpush3.bf16.msra.mxu0 %v1124_v20 }
  0x62   :  { %1040 = vmatmul.mubr.bf16.vlgmr.msra.gmra.mrb[8].mxu0 %v1125_v21 }
  0xf5   :  { %v942_v22 = vpop.f32.mrb[0].mxu0 }
  0xf6   :  { %v943_v24 = vpop.f32.mrb[1].mxu0 }
  0xf7   :  { %v944_v25 = vadd.f32 %v943_v24, %v942_v22  ;;  %v945_v26 = vpop.f32.mrb[2].mxu0  ;;  %v964_v27 = vpop.f32.mrb[0].mxu1 }
  0xf8   :  { %v946_v28 = vpop.f32.mrb[3].mxu0  ;;  %v965_v29 = vpop.f32.mrb[1].mxu1 }
  0xf9   :  { %v670_v30 = vadd.f32 %v944_v25, %v844_v23  ;;  %v966_v31 = vadd.f32 %v965_v29, %v964_v27  ;;  %v967_v32 = vpop.f32.mrb[2].mxu1 }
  0xfa   :  { %v968_v33 = vpop.f32.mrb[3].mxu1 }
  0xfb   :  { %v710_v34 = vadd.f32 %v966_v31, %v670_v30 }
 0x115   :  { %v986_v35 = vpop.f32.mrb[4].mxu0 }
 0x116   :  { %v987_v36 = vpop.f32.mrb[5].mxu0 }
 0x117   :  { %v988_v37 = vadd.f32 %v987_v36, %v986_v35  ;;  %v989_v38 = vpop.f32.mrb[6].mxu0  ;;  %v1008_v39 = vpop.f32.mrb[4].mxu1 }
 0x118   :  { %v990_v40 = vpop.f32.mrb[7].mxu0  ;;  %v1009_v41 = vpop.f32.mrb[5].mxu1 }
 0x119   :  { %v750_v42 = vadd.f32 %v988_v37, %v710_v34  ;;  %v1010_v43 = vadd.f32 %v1009_v41, %v1008_v39  ;;  %v1011_v44 = vpop.f32.mrb[6].mxu1 }
 0x11a   :  { %v1012_v45 = vpop.f32.mrb[7].mxu1 }
 0x11b   :  { %v790_v46 = vadd.f32 %v1010_v43, %v750_v42 }
 0x135   :  { %v829_v47 = vpop.f32.mrb[8].mxu0 }
 0x136   :  { %v830_v48 = vadd.f32 %v829_v47, %v790_v46  ;;  %v1041_v49 = vpop.f32.mrb[9].mxu0 }
 0x137   :  { %v832_v50 = vpop.f32.mrb[10].mxu0 }
 0x138   :  { %vm835_vm1 = vcmp.ge.f32.partialorder %v830_v48, 0.0  ;;  %v836_v51 = vmul.f32 0.2, %v830_v48  ;;  %v1042_v52 = vpop.f32.mrb[11].mxu0 }
 0x13a   :  { %v837_v53 = vsel %vm835_vm1, %v830_v48, %v836_v51 }
 0x13b   :  { %v838_v54 = vpack.c.bf16 %v837_v53, %v837_v53 }
 0x13d   :  { %839 = vst [vmem:[%s1388_s3] sm:$0xf] %v838_v54 }

// kernel: _lambda_.17
= control target key start
LH: loop header
LB: loop body
LE: loop exit
PB: predicated region body
PF: predicated region fallthrough
CT: control target
= control target key end

     0   :  { %s2189_s12 = smov 0   ;;  %s2191_s13 = smov 0   ;;  %s2648_s0 = inlined_call_operand.vmem [shape: bf16[2,1152], index: 0, kind: input, shape index: {}]   ;;  %s2649_s1 = inlined_call_operand.vmem [shape: bf16[1152,256], index: 1, kind: input, shape index: {}]   ;;  %s2650_s2 = inlined_call_operand.vmem [shape: f32[1,256], index: 2, kind: input, shape index: {}]   ;;  %s2651_s3 = inlined_call_operand.vmem [shape: f32[2,256], index: 3, kind: output, shape index: {}]  }
   0x1   :  { %s2193_s14 = smov 0   ;;  %s2195_s15 = smov 0  }
   0x2   :  { %s2197_s16 = smov 0  }
   0x3 LB: > { %s22_s17 = sadd.s32 1, %s2160_s15  ;;  %p65_p1 = scmp.ne.s32.totalorder %s2152_s13, %s2148_s12  ;;  %s2164_s16 = sphi %s2197_s16, %s13_s16   ;;  %s2160_s15 = sphi %s2195_s15, %s2655_s15   ;;  %s2156_s14 = sphi %s2193_s14, %s2654_s14   ;;  %s2152_s13 = sphi %s2191_s13, %s2653_s13   ;;  %s2148_s12 = sphi %s2189_s12, %s2652_s12  }
   0x4   : > { %p23_p0 = scmp.ge.s32.totalorder %s22_s17, 2  ;;  %p66_p2 = scmp.eq.s32.totalorder %s2164_s16, 0 }
   0x5   : > { %s58_s19 = sadd.s32 1, %s2152_s13  ;;  %p1809_p5 = scmp.ge.s32.totalorder %s2164_s16, 2 }
   0x6   : > { %s2657_s17 = smov (%p23_p0, %s22_s17), 0  ;;  %p67_p3 = por %p66_p2, %p65_p1 }
   0x7   : > { %s55_s18 = ssub.s32 %s2160_s15, %s2657_s17  ;;  %152 = sbr.rel (%p1809_p5) target bundleno = 114 (0x72), region = 20 }
   0x8   : > { %p56_p4 = scmp.eq.s32.totalorder %s55_s18, 0 }
   0xa   : > { %s2224_s20 = scalar_select %p56_p4, %s2152_s13, %s58_s19  }
   0xe   : > { %155 = sbr.rel (!%p67_p3) target bundleno = 114 (0x72), region = 24  ;;  %s157_s21 = sand.u32 (%p67_p3), 1, %s2152_s13  }
   0xf   : > { %s1810_s22 = sshll.u32 (%p67_p3), %s2160_s15, 2  ;;  %s2006_s23 = smul.u32 (%p67_p3), 576, %s157_s21 }
  0x10   : > { %s2232_s26 = scalar_lea.vmem (%p67_p3), %s2649_s1, %s1810_s22 }
  0x11   : > { %v177_v0 = vld [vmem:[%s2232_s26] sm:$0xf] (%p67_p3)  ;;  %v179_v1 = vld [vmem:[%s2232_s26 + $0x8] sm:$0xf] (%p67_p3)  ;;  %v181_v2 = vld [vmem:[%s2232_s26 + $0x10] sm:$0xf] (%p67_p3) }
  0x12   : > { %v183_v3 = vld [vmem:[%s2232_s26 + $0x18] sm:$0xf] (%p67_p3)  ;;  %v185_v4 = vld [vmem:[%s2232_s26 + $0x20] sm:$0xf] (%p67_p3)  ;;  %s2239_s27 = scalar_lea.vmem (%p67_p3), [#allocation2], %s2006_s23 }
  0x13   : > { %178 = vst [vmem:[%s2239_s27] sm:$0xf] (%p67_p3), %v177_v0  ;;  %180 = vst [vmem:[%s2239_s27 + $0x4] sm:$0xf] (%p67_p3), %v179_v1  ;;  %v187_v5 = vld [vmem:[%s2232_s26 + $0x28] sm:$0xf] (%p67_p3) }
  0x14   : > { %182 = vst [vmem:[%s2239_s27 + $0x8] sm:$0xf] (%p67_p3), %v181_v2  ;;  %184 = vst [vmem:[%s2239_s27 + $0xc] sm:$0xf] (%p67_p3), %v183_v3  ;;  %v189_v6 = vld [vmem:[%s2232_s26 + $0x30] sm:$0xf] (%p67_p3) }
  0x15   : > { %186 = vst [vmem:[%s2239_s27 + $0x10] sm:$0xf] %v185_v4  ;;  %v191_v7 = vld [vmem:[%s2232_s26 + $0x38] sm:$0xf]  ;;  %188 = vst [vmem:[%s2239_s27 + $0x14] sm:$0xf] %v187_v5 }
  0x16   : > { %190 = vst [vmem:[%s2239_s27 + $0x18] sm:$0xf] %v189_v6  ;;  %192 = vst [vmem:[%s2239_s27 + $0x1c] sm:$0xf] %v191_v7  ;;  %v193_v8 = vld [vmem:[%s2232_s26 + $0x40] sm:$0xf] }
  0x17   : > { %v195_v9 = vld [vmem:[%s2232_s26 + $0x48] sm:$0xf]  ;;  %v197_v10 = vld [vmem:[%s2232_s26 + $0x50] sm:$0xf]  ;;  %194 = vst [vmem:[%s2239_s27 + $0x20] sm:$0xf] %v193_v8 }
  0x18   : > { %196 = vst [vmem:[%s2239_s27 + $0x24] sm:$0xf] %v195_v9  ;;  %198 = vst [vmem:[%s2239_s27 + $0x28] sm:$0xf] %v197_v10  ;;  %v199_v11 = vld [vmem:[%s2232_s26 + $0x58] sm:$0xf] }
  0x19   : > { %v201_v12 = vld [vmem:[%s2232_s26 + $0x60] sm:$0xf]  ;;  %v203_v13 = vld [vmem:[%s2232_s26 + $0x68] sm:$0xf]  ;;  %200 = vst [vmem:[%s2239_s27 + $0x2c] sm:$0xf] %v199_v11 }
  0x1a   : > { %202 = vst [vmem:[%s2239_s27 + $0x30] sm:$0xf] %v201_v12  ;;  %204 = vst [vmem:[%s2239_s27 + $0x34] sm:$0xf] %v203_v13  ;;  %v205_v14 = vld [vmem:[%s2232_s26 + $0x70] sm:$0xf] }
  0x1b   : > { %v207_v15 = vld [vmem:[%s2232_s26 + $0x78] sm:$0xf]  ;;  %v209_v16 = vld [vmem:[%s2232_s26 + $0x80] sm:$0xf]  ;;  %206 = vst [vmem:[%s2239_s27 + $0x38] sm:$0xf] %v205_v14 }
  0x1c   : > { %208 = vst [vmem:[%s2239_s27 + $0x3c] sm:$0xf] %v207_v15  ;;  %210 = vst [vmem:[%s2239_s27 + $0x40] sm:$0xf] %v209_v16  ;;  %v211_v17 = vld [vmem:[%s2232_s26 + $0x88] sm:$0xf] }
  0x1d   : > { %v213_v18 = vld [vmem:[%s2232_s26 + $0x90] sm:$0xf]  ;;  %v215_v19 = vld [vmem:[%s2232_s26 + $0x98] sm:$0xf]  ;;  %212 = vst [vmem:[%s2239_s27 + $0x44] sm:$0xf] %v211_v17 }
  0x1e   : > { %214 = vst [vmem:[%s2239_s27 + $0x48] sm:$0xf] %v213_v18  ;;  %216 = vst [vmem:[%s2239_s27 + $0x4c] sm:$0xf] %v215_v19  ;;  %v217_v20 = vld [vmem:[%s2232_s26 + $0xa0] sm:$0xf] }
  0x1f   : > { %v219_v21 = vld [vmem:[%s2232_s26 + $0xa8] sm:$0xf]  ;;  %v221_v22 = vld [vmem:[%s2232_s26 + $0xb0] sm:$0xf]  ;;  %218 = vst [vmem:[%s2239_s27 + $0x50] sm:$0xf] %v217_v20 }
  0x20   : > { %220 = vst [vmem:[%s2239_s27 + $0x54] sm:$0xf] %v219_v21  ;;  %222 = vst [vmem:[%s2239_s27 + $0x58] sm:$0xf] %v221_v22  ;;  %v223_v23 = vld [vmem:[%s2232_s26 + $0xb8] sm:$0xf] }
  0x21   : > { %v225_v24 = vld [vmem:[%s2232_s26 + $0xc0] sm:$0xf]  ;;  %v227_v25 = vld [vmem:[%s2232_s26 + $0xc8] sm:$0xf]  ;;  %224 = vst [vmem:[%s2239_s27 + $0x5c] sm:$0xf] %v223_v23 }
  0x22   : > { %226 = vst [vmem:[%s2239_s27 + $0x60] sm:$0xf] %v225_v24  ;;  %228 = vst [vmem:[%s2239_s27 + $0x64] sm:$0xf] %v227_v25  ;;  %v229_v26 = vld [vmem:[%s2232_s26 + $0xd0] sm:$0xf] }
  0x23   : > { %v231_v27 = vld [vmem:[%s2232_s26 + $0xd8] sm:$0xf]  ;;  %v233_v28 = vld [vmem:[%s2232_s26 + $0xe0] sm:$0xf]  ;;  %230 = vst [vmem:[%s2239_s27 + $0x68] sm:$0xf] %v229_v26 }
  0x24   : > { %232 = vst [vmem:[%s2239_s27 + $0x6c] sm:$0xf] %v231_v27  ;;  %234 = vst [vmem:[%s2239_s27 + $0x70] sm:$0xf] %v233_v28  ;;  %v235_v29 = vld [vmem:[%s2232_s26 + $0xe8] sm:$0xf] }
  0x25   : > { %v237_v30 = vld [vmem:[%s2232_s26 + $0xf0] sm:$0xf]  ;;  %v239_v31 = vld [vmem:[%s2232_s26 + $0xf8] sm:$0xf]  ;;  %236 = vst [vmem:[%s2239_s27 + $0x74] sm:$0xf] %v235_v29 }
  0x26   : > { %238 = vst [vmem:[%s2239_s27 + $0x78] sm:$0xf] %v237_v30  ;;  %240 = vst [vmem:[%s2239_s27 + $0x7c] sm:$0xf] %v239_v31  ;;  %v241_v32 = vld [vmem:[%s2232_s26 + $0x100] sm:$0xf] }
  0x27   : > { %v243_v33 = vld [vmem:[%s2232_s26 + $0x108] sm:$0xf]  ;;  %v245_v34 = vld [vmem:[%s2232_s26 + $0x110] sm:$0xf]  ;;  %242 = vst [vmem:[%s2239_s27 + $0x80] sm:$0xf] %v241_v32 }
  0x28   : > { %244 = vst [vmem:[%s2239_s27 + $0x84] sm:$0xf] %v243_v33  ;;  %246 = vst [vmem:[%s2239_s27 + $0x88] sm:$0xf] %v245_v34  ;;  %v247_v35 = vld [vmem:[%s2232_s26 + $0x118] sm:$0xf] }
  0x29   : > { %v249_v36 = vld [vmem:[%s2232_s26 + $0x120] sm:$0xf]  ;;  %v251_v37 = vld [vmem:[%s2232_s26 + $0x128] sm:$0xf]  ;;  %248 = vst [vmem:[%s2239_s27 + $0x8c] sm:$0xf] %v247_v35 }
  0x2a   : > { %250 = vst [vmem:[%s2239_s27 + $0x90] sm:$0xf] %v249_v36  ;;  %252 = vst [vmem:[%s2239_s27 + $0x94] sm:$0xf] %v251_v37  ;;  %v253_v38 = vld [vmem:[%s2232_s26 + $0x130] sm:$0xf] }
  0x2b   : > { %v255_v39 = vld [vmem:[%s2232_s26 + $0x138] sm:$0xf]  ;;  %v257_v40 = vld [vmem:[%s2232_s26 + $0x140] sm:$0xf]  ;;  %254 = vst [vmem:[%s2239_s27 + $0x98] sm:$0xf] %v253_v38 }
  0x2c   : > { %256 = vst [vmem:[%s2239_s27 + $0x9c] sm:$0xf] %v255_v39  ;;  %258 = vst [vmem:[%s2239_s27 + $0xa0] sm:$0xf] %v257_v40  ;;  %v259_v41 = vld [vmem:[%s2232_s26 + $0x148] sm:$0xf] }
  0x2d   : > { %v261_v42 = vld [vmem:[%s2232_s26 + $0x150] sm:$0xf]  ;;  %v263_v43 = vld [vmem:[%s2232_s26 + $0x158] sm:$0xf]  ;;  %260 = vst [vmem:[%s2239_s27 + $0xa4] sm:$0xf] %v259_v41 }
  0x2e   : > { %262 = vst [vmem:[%s2239_s27 + $0xa8] sm:$0xf] %v261_v42  ;;  %264 = vst [vmem:[%s2239_s27 + $0xac] sm:$0xf] %v263_v43  ;;  %v265_v44 = vld [vmem:[%s2232_s26 + $0x160] sm:$0xf] }
  0x2f   : > { %v267_v45 = vld [vmem:[%s2232_s26 + $0x168] sm:$0xf]  ;;  %v269_v46 = vld [vmem:[%s2232_s26 + $0x170] sm:$0xf]  ;;  %266 = vst [vmem:[%s2239_s27 + $0xb0] sm:$0xf] %v265_v44 }
  0x30   : > { %268 = vst [vmem:[%s2239_s27 + $0xb4] sm:$0xf] %v267_v45  ;;  %270 = vst [vmem:[%s2239_s27 + $0xb8] sm:$0xf] %v269_v46  ;;  %v271_v47 = vld [vmem:[%s2232_s26 + $0x178] sm:$0xf] }
  0x31   : > { %v273_v48 = vld [vmem:[%s2232_s26 + $0x180] sm:$0xf]  ;;  %v275_v49 = vld [vmem:[%s2232_s26 + $0x188] sm:$0xf]  ;;  %272 = vst [vmem:[%s2239_s27 + $0xbc] sm:$0xf] %v271_v47 }
  0x32   : > { %274 = vst [vmem:[%s2239_s27 + $0xc0] sm:$0xf] %v273_v48  ;;  %276 = vst [vmem:[%s2239_s27 + $0xc4] sm:$0xf] %v275_v49  ;;  %v277_v50 = vld [vmem:[%s2232_s26 + $0x190] sm:$0xf] }
  0x33   : > { %v279_v51 = vld [vmem:[%s2232_s26 + $0x198] sm:$0xf]  ;;  %v281_v52 = vld [vmem:[%s2232_s26 + $0x1a0] sm:$0xf]  ;;  %278 = vst [vmem:[%s2239_s27 + $0xc8] sm:$0xf] %v277_v50 }
  0x34   : > { %280 = vst [vmem:[%s2239_s27 + $0xcc] sm:$0xf] %v279_v51  ;;  %282 = vst [vmem:[%s2239_s27 + $0xd0] sm:$0xf] %v281_v52  ;;  %v283_v53 = vld [vmem:[%s2232_s26 + $0x1a8] sm:$0xf] }
  0x35   : > { %v285_v54 = vld [vmem:[%s2232_s26 + $0x1b0] sm:$0xf]  ;;  %v287_v55 = vld [vmem:[%s2232_s26 + $0x1b8] sm:$0xf]  ;;  %284 = vst [vmem:[%s2239_s27 + $0xd4] sm:$0xf] %v283_v53 }
  0x36   : > { %286 = vst [vmem:[%s2239_s27 + $0xd8] sm:$0xf] %v285_v54  ;;  %288 = vst [vmem:[%s2239_s27 + $0xdc] sm:$0xf] %v287_v55  ;;  %v289_v56 = vld [vmem:[%s2232_s26 + $0x1c0] sm:$0xf] }
  0x37   : > { %v291_v57 = vld [vmem:[%s2232_s26 + $0x1c8] sm:$0xf]  ;;  %v293_v58 = vld [vmem:[%s2232_s26 + $0x1d0] sm:$0xf]  ;;  %290 = vst [vmem:[%s2239_s27 + $0xe0] sm:$0xf] %v289_v56 }
  0x38   : > { %292 = vst [vmem:[%s2239_s27 + $0xe4] sm:$0xf] %v291_v57  ;;  %294 = vst [vmem:[%s2239_s27 + $0xe8] sm:$0xf] %v293_v58  ;;  %v295_v59 = vld [vmem:[%s2232_s26 + $0x1d8] sm:$0xf] }
  0x39   : > { %v297_v60 = vld [vmem:[%s2232_s26 + $0x1e0] sm:$0xf]  ;;  %v299_v61 = vld [vmem:[%s2232_s26 + $0x1e8] sm:$0xf]  ;;  %296 = vst [vmem:[%s2239_s27 + $0xec] sm:$0xf] %v295_v59 }
  0x3a   : > { %298 = vst [vmem:[%s2239_s27 + $0xf0] sm:$0xf] %v297_v60  ;;  %300 = vst [vmem:[%s2239_s27 + $0xf4] sm:$0xf] %v299_v61  ;;  %v301_v62 = vld [vmem:[%s2232_s26 + $0x1f0] sm:$0xf] }
  0x3b   : > { %v303_v63 = vld [vmem:[%s2232_s26 + $0x1f8] sm:$0xf]  ;;  %v305_v0 = vld [vmem:[%s2232_s26 + $0x200] sm:$0xf]  ;;  %302 = vst [vmem:[%s2239_s27 + $0xf8] sm:$0xf] %v301_v62 }
  0x3c   : > { %304 = vst [vmem:[%s2239_s27 + $0xfc] sm:$0xf] %v303_v63  ;;  %306 = vst [vmem:[%s2239_s27 + $0x100] sm:$0xf] %v305_v0  ;;  %v307_v1 = vld [vmem:[%s2232_s26 + $0x208] sm:$0xf] }
  0x3d   : > { %v309_v2 = vld [vmem:[%s2232_s26 + $0x210] sm:$0xf]  ;;  %v311_v3 = vld [vmem:[%s2232_s26 + $0x218] sm:$0xf]  ;;  %308 = vst [vmem:[%s2239_s27 + $0x104] sm:$0xf] %v307_v1 }
  0x3e   : > { %310 = vst [vmem:[%s2239_s27 + $0x108] sm:$0xf] %v309_v2  ;;  %312 = vst [vmem:[%s2239_s27 + $0x10c] sm:$0xf] %v311_v3  ;;  %v313_v4 = vld [vmem:[%s2232_s26 + $0x220] sm:$0xf] }
  0x3f   : > { %v315_v5 = vld [vmem:[%s2232_s26 + $0x228] sm:$0xf]  ;;  %v317_v6 = vld [vmem:[%s2232_s26 + $0x230] sm:$0xf]  ;;  %314 = vst [vmem:[%s2239_s27 + $0x110] sm:$0xf] %v313_v4 }
  0x40   : > { %316 = vst [vmem:[%s2239_s27 + $0x114] sm:$0xf] %v315_v5  ;;  %318 = vst [vmem:[%s2239_s27 + $0x118] sm:$0xf] %v317_v6  ;;  %v319_v7 = vld [vmem:[%s2232_s26 + $0x238] sm:$0xf] }
  0x41   : > { %v321_v8 = vld [vmem:[%s2232_s26 + $0x240] sm:$0xf]  ;;  %v323_v9 = vld [vmem:[%s2232_s26 + $0x248] sm:$0xf]  ;;  %320 = vst [vmem:[%s2239_s27 + $0x11c] sm:$0xf] %v319_v7 }
  0x42   : > { %322 = vst [vmem:[%s2239_s27 + $0x120] sm:$0xf] %v321_v8  ;;  %324 = vst [vmem:[%s2239_s27 + $0x124] sm:$0xf] %v323_v9  ;;  %v325_v10 = vld [vmem:[%s2232_s26 + $0x250] sm:$0xf] }
  0x43   : > { %v327_v11 = vld [vmem:[%s2232_s26 + $0x258] sm:$0xf]  ;;  %v329_v12 = vld [vmem:[%s2232_s26 + $0x260] sm:$0xf]  ;;  %326 = vst [vmem:[%s2239_s27 + $0x128] sm:$0xf] %v325_v10 }
  0x44   : > { %328 = vst [vmem:[%s2239_s27 + $0x12c] sm:$0xf] %v327_v11  ;;  %330 = vst [vmem:[%s2239_s27 + $0x130] sm:$0xf] %v329_v12  ;;  %v331_v13 = vld [vmem:[%s2232_s26 + $0x268] sm:$0xf] }
  0x45   : > { %v333_v14 = vld [vmem:[%s2232_s26 + $0x270] sm:$0xf]  ;;  %v335_v15 = vld [vmem:[%s2232_s26 + $0x278] sm:$0xf]  ;;  %332 = vst [vmem:[%s2239_s27 + $0x134] sm:$0xf] %v331_v13 }
  0x46   : > { %334 = vst [vmem:[%s2239_s27 + $0x138] sm:$0xf] %v333_v14  ;;  %336 = vst [vmem:[%s2239_s27 + $0x13c] sm:$0xf] %v335_v15  ;;  %v337_v16 = vld [vmem:[%s2232_s26 + $0x280] sm:$0xf] }
  0x47   : > { %v339_v17 = vld [vmem:[%s2232_s26 + $0x288] sm:$0xf]  ;;  %v341_v18 = vld [vmem:[%s2232_s26 + $0x290] sm:$0xf]  ;;  %338 = vst [vmem:[%s2239_s27 + $0x140] sm:$0xf] %v337_v16 }
  0x48   : > { %340 = vst [vmem:[%s2239_s27 + $0x144] sm:$0xf] %v339_v17  ;;  %342 = vst [vmem:[%s2239_s27 + $0x148] sm:$0xf] %v341_v18  ;;  %v343_v19 = vld [vmem:[%s2232_s26 + $0x298] sm:$0xf] }
  0x49   : > { %v345_v20 = vld [vmem:[%s2232_s26 + $0x2a0] sm:$0xf]  ;;  %v347_v21 = vld [vmem:[%s2232_s26 + $0x2a8] sm:$0xf]  ;;  %344 = vst [vmem:[%s2239_s27 + $0x14c] sm:$0xf] %v343_v19 }
  0x4a   : > { %346 = vst [vmem:[%s2239_s27 + $0x150] sm:$0xf] %v345_v20  ;;  %348 = vst [vmem:[%s2239_s27 + $0x154] sm:$0xf] %v347_v21  ;;  %v349_v22 = vld [vmem:[%s2232_s26 + $0x2b0] sm:$0xf] }
  0x4b   : > { %v351_v23 = vld [vmem:[%s2232_s26 + $0x2b8] sm:$0xf]  ;;  %v353_v24 = vld [vmem:[%s2232_s26 + $0x2c0] sm:$0xf]  ;;  %350 = vst [vmem:[%s2239_s27 + $0x158] sm:$0xf] %v349_v22 }
  0x4c   : > { %352 = vst [vmem:[%s2239_s27 + $0x15c] sm:$0xf] %v351_v23  ;;  %354 = vst [vmem:[%s2239_s27 + $0x160] sm:$0xf] %v353_v24  ;;  %v355_v25 = vld [vmem:[%s2232_s26 + $0x2c8] sm:$0xf] }
  0x4d   : > { %v357_v26 = vld [vmem:[%s2232_s26 + $0x2d0] sm:$0xf]  ;;  %v359_v27 = vld [vmem:[%s2232_s26 + $0x2d8] sm:$0xf]  ;;  %356 = vst [vmem:[%s2239_s27 + $0x164] sm:$0xf] %v355_v25 }
  0x4e   : > { %358 = vst [vmem:[%s2239_s27 + $0x168] sm:$0xf] %v357_v26  ;;  %360 = vst [vmem:[%s2239_s27 + $0x16c] sm:$0xf] %v359_v27  ;;  %v361_v28 = vld [vmem:[%s2232_s26 + $0x2e0] sm:$0xf] }
  0x4f   : > { %v363_v29 = vld [vmem:[%s2232_s26 + $0x2e8] sm:$0xf]  ;;  %v365_v30 = vld [vmem:[%s2232_s26 + $0x2f0] sm:$0xf]  ;;  %362 = vst [vmem:[%s2239_s27 + $0x170] sm:$0xf] %v361_v28 }
  0x50   : > { %364 = vst [vmem:[%s2239_s27 + $0x174] sm:$0xf] %v363_v29  ;;  %366 = vst [vmem:[%s2239_s27 + $0x178] sm:$0xf] %v365_v30  ;;  %v367_v31 = vld [vmem:[%s2232_s26 + $0x2f8] sm:$0xf] }
  0x51   : > { %v369_v32 = vld [vmem:[%s2232_s26 + $0x300] sm:$0xf]  ;;  %v371_v33 = vld [vmem:[%s2232_s26 + $0x308] sm:$0xf]  ;;  %368 = vst [vmem:[%s2239_s27 + $0x17c] sm:$0xf] %v367_v31 }
  0x52   : > { %370 = vst [vmem:[%s2239_s27 + $0x180] sm:$0xf] %v369_v32  ;;  %372 = vst [vmem:[%s2239_s27 + $0x184] sm:$0xf] %v371_v33  ;;  %v373_v34 = vld [vmem:[%s2232_s26 + $0x310] sm:$0xf] }
  0x53   : > { %v375_v35 = vld [vmem:[%s2232_s26 + $0x318] sm:$0xf]  ;;  %v377_v36 = vld [vmem:[%s2232_s26 + $0x320] sm:$0xf]  ;;  %374 = vst [vmem:[%s2239_s27 + $0x188] sm:$0xf] %v373_v34 }
  0x54   : > { %376 = vst [vmem:[%s2239_s27 + $0x18c] sm:$0xf] %v375_v35  ;;  %378 = vst [vmem:[%s2239_s27 + $0x190] sm:$0xf] %v377_v36  ;;  %v379_v37 = vld [vmem:[%s2232_s26 + $0x328] sm:$0xf] }
  0x55   : > { %v381_v38 = vld [vmem:[%s2232_s26 + $0x330] sm:$0xf]  ;;  %v383_v39 = vld [vmem:[%s2232_s26 + $0x338] sm:$0xf]  ;;  %380 = vst [vmem:[%s2239_s27 + $0x194] sm:$0xf] %v379_v37 }
  0x56   : > { %382 = vst [vmem:[%s2239_s27 + $0x198] sm:$0xf] %v381_v38  ;;  %384 = vst [vmem:[%s2239_s27 + $0x19c] sm:$0xf] %v383_v39  ;;  %v385_v40 = vld [vmem:[%s2232_s26 + $0x340] sm:$0xf] }
  0x57   : > { %v387_v41 = vld [vmem:[%s2232_s26 + $0x348] sm:$0xf]  ;;  %v389_v42 = vld [vmem:[%s2232_s26 + $0x350] sm:$0xf]  ;;  %386 = vst [vmem:[%s2239_s27 + $0x1a0] sm:$0xf] %v385_v40 }
  0x58   : > { %388 = vst [vmem:[%s2239_s27 + $0x1a4] sm:$0xf] %v387_v41  ;;  %390 = vst [vmem:[%s2239_s27 + $0x1a8] sm:$0xf] %v389_v42  ;;  %v391_v43 = vld [vmem:[%s2232_s26 + $0x358] sm:$0xf] }
  0x59   : > { %v393_v44 = vld [vmem:[%s2232_s26 + $0x360] sm:$0xf]  ;;  %v395_v45 = vld [vmem:[%s2232_s26 + $0x368] sm:$0xf]  ;;  %392 = vst [vmem:[%s2239_s27 + $0x1ac] sm:$0xf] %v391_v43 }
  0x5a   : > { %394 = vst [vmem:[%s2239_s27 + $0x1b0] sm:$0xf] %v393_v44  ;;  %396 = vst [vmem:[%s2239_s27 + $0x1b4] sm:$0xf] %v395_v45  ;;  %v397_v46 = vld [vmem:[%s2232_s26 + $0x370] sm:$0xf] }
  0x5b   : > { %v399_v47 = vld [vmem:[%s2232_s26 + $0x378] sm:$0xf]  ;;  %v401_v48 = vld [vmem:[%s2232_s26 + $0x380] sm:$0xf]  ;;  %398 = vst [vmem:[%s2239_s27 + $0x1b8] sm:$0xf] %v397_v46 }
  0x5c   : > { %400 = vst [vmem:[%s2239_s27 + $0x1bc] sm:$0xf] %v399_v47  ;;  %402 = vst [vmem:[%s2239_s27 + $0x1c0] sm:$0xf] %v401_v48  ;;  %v403_v49 = vld [vmem:[%s2232_s26 + $0x388] sm:$0xf] }
  0x5d   : > { %v405_v50 = vld [vmem:[%s2232_s26 + $0x390] sm:$0xf]  ;;  %v407_v51 = vld [vmem:[%s2232_s26 + $0x398] sm:$0xf]  ;;  %404 = vst [vmem:[%s2239_s27 + $0x1c4] sm:$0xf] %v403_v49 }
  0x5e   : > { %406 = vst [vmem:[%s2239_s27 + $0x1c8] sm:$0xf] %v405_v50  ;;  %408 = vst [vmem:[%s2239_s27 + $0x1cc] sm:$0xf] %v407_v51  ;;  %v409_v52 = vld [vmem:[%s2232_s26 + $0x3a0] sm:$0xf] }
  0x5f   : > { %v411_v53 = vld [vmem:[%s2232_s26 + $0x3a8] sm:$0xf]  ;;  %v413_v54 = vld [vmem:[%s2232_s26 + $0x3b0] sm:$0xf]  ;;  %410 = vst [vmem:[%s2239_s27 + $0x1d0] sm:$0xf] %v409_v52 }
  0x60   : > { %412 = vst [vmem:[%s2239_s27 + $0x1d4] sm:$0xf] %v411_v53  ;;  %414 = vst [vmem:[%s2239_s27 + $0x1d8] sm:$0xf] %v413_v54  ;;  %v415_v55 = vld [vmem:[%s2232_s26 + $0x3b8] sm:$0xf] }
  0x61   : > { %v417_v56 = vld [vmem:[%s2232_s26 + $0x3c0] sm:$0xf]  ;;  %v419_v57 = vld [vmem:[%s2232_s26 + $0x3c8] sm:$0xf]  ;;  %416 = vst [vmem:[%s2239_s27 + $0x1dc] sm:$0xf] %v415_v55 }
  0x62   : > { %418 = vst [vmem:[%s2239_s27 + $0x1e0] sm:$0xf] %v417_v56  ;;  %420 = vst [vmem:[%s2239_s27 + $0x1e4] sm:$0xf] %v419_v57  ;;  %v421_v58 = vld [vmem:[%s2232_s26 + $0x3d0] sm:$0xf] }
  0x63   : > { %v423_v59 = vld [vmem:[%s2232_s26 + $0x3d8] sm:$0xf]  ;;  %v425_v60 = vld [vmem:[%s2232_s26 + $0x3e0] sm:$0xf]  ;;  %422 = vst [vmem:[%s2239_s27 + $0x1e8] sm:$0xf] %v421_v58 }
  0x64   : > { %424 = vst [vmem:[%s2239_s27 + $0x1ec] sm:$0xf] %v423_v59  ;;  %426 = vst [vmem:[%s2239_s27 + $0x1f0] sm:$0xf] %v425_v60  ;;  %v427_v61 = vld [vmem:[%s2232_s26 + $0x3e8] sm:$0xf] }
  0x65   : > { %v429_v62 = vld [vmem:[%s2232_s26 + $0x3f0] sm:$0xf]  ;;  %v431_v63 = vld [vmem:[%s2232_s26 + $0x3f8] sm:$0xf]  ;;  %428 = vst [vmem:[%s2239_s27 + $0x1f4] sm:$0xf] %v427_v61 }
  0x66   : > { %430 = vst [vmem:[%s2239_s27 + $0x1f8] sm:$0xf] %v429_v62  ;;  %432 = vst [vmem:[%s2239_s27 + $0x1fc] sm:$0xf] %v431_v63  ;;  %v433_v0 = vld [vmem:[%s2232_s26 + $0x400] sm:$0xf] }
  0x67   : > { %v435_v1 = vld [vmem:[%s2232_s26 + $0x408] sm:$0xf]  ;;  %v437_v2 = vld [vmem:[%s2232_s26 + $0x410] sm:$0xf]  ;;  %434 = vst [vmem:[%s2239_s27 + $0x200] sm:$0xf] %v433_v0 }
  0x68   : > { %436 = vst [vmem:[%s2239_s27 + $0x204] sm:$0xf] %v435_v1  ;;  %438 = vst [vmem:[%s2239_s27 + $0x208] sm:$0xf] %v437_v2  ;;  %v439_v3 = vld [vmem:[%s2232_s26 + $0x418] sm:$0xf] }
  0x69   : > { %v441_v4 = vld [vmem:[%s2232_s26 + $0x420] sm:$0xf]  ;;  %v443_v5 = vld [vmem:[%s2232_s26 + $0x428] sm:$0xf]  ;;  %440 = vst [vmem:[%s2239_s27 + $0x20c] sm:$0xf] %v439_v3 }
  0x6a   : > { %442 = vst [vmem:[%s2239_s27 + $0x210] sm:$0xf] %v441_v4  ;;  %444 = vst [vmem:[%s2239_s27 + $0x214] sm:$0xf] %v443_v5  ;;  %v445_v6 = vld [vmem:[%s2232_s26 + $0x430] sm:$0xf] }
  0x6b   : > { %v447_v7 = vld [vmem:[%s2232_s26 + $0x438] sm:$0xf]  ;;  %v449_v8 = vld [vmem:[%s2232_s26 + $0x440] sm:$0xf]  ;;  %446 = vst [vmem:[%s2239_s27 + $0x218] sm:$0xf] %v445_v6 }
  0x6c   : > { %448 = vst [vmem:[%s2239_s27 + $0x21c] sm:$0xf] %v447_v7  ;;  %450 = vst [vmem:[%s2239_s27 + $0x220] sm:$0xf] %v449_v8  ;;  %v451_v9 = vld [vmem:[%s2232_s26 + $0x448] sm:$0xf] }
  0x6d   : > { %v453_v10 = vld [vmem:[%s2232_s26 + $0x450] sm:$0xf]  ;;  %v455_v11 = vld [vmem:[%s2232_s26 + $0x458] sm:$0xf]  ;;  %452 = vst [vmem:[%s2239_s27 + $0x224] sm:$0xf] %v451_v9 }
  0x6e   : > { %454 = vst [vmem:[%s2239_s27 + $0x228] sm:$0xf] %v453_v10  ;;  %456 = vst [vmem:[%s2239_s27 + $0x22c] sm:$0xf] %v455_v11  ;;  %v457_v12 = vld [vmem:[%s2232_s26 + $0x460] sm:$0xf] }
  0x6f   : > { %v459_v13 = vld [vmem:[%s2232_s26 + $0x468] sm:$0xf]  ;;  %v461_v14 = vld [vmem:[%s2232_s26 + $0x470] sm:$0xf]  ;;  %458 = vst [vmem:[%s2239_s27 + $0x230] sm:$0xf] %v457_v12 }
  0x70   : > { %460 = vst [vmem:[%s2239_s27 + $0x234] sm:$0xf] %v459_v13  ;;  %462 = vst [vmem:[%s2239_s27 + $0x238] sm:$0xf] %v461_v14  ;;  %v463_v15 = vld [vmem:[%s2232_s26 + $0x478] sm:$0xf] }
  0x71   : > { %464 = vst [vmem:[%s2239_s27 + $0x23c] sm:$0xf] %v463_v15 }
  0x72 PF: > { %p1811_p6 = scmp.ge.s32.totalorder %s2164_s16, 1  ;;  %p780_p7 = scmp.lt.s32.totalorder %s2164_s16, 3 }
  0x74   : > { %p781_p8 = pnand %p1811_p6, %p780_p7 }
  0x75   : > { %s787_s28 = sand.u32 (!%p781_p8), 1, %s2148_s12   ;;  %v995_v16 = vlaneseq (!%p781_p8)  ;;  %v2166_v17 = vmov (!%p781_p8), 1966171168   ;;  %v836_v20 = vld [vmem:[%s2648_s0] sm:$0xff] (!%p781_p8)  ;;  %vm2168_vm0 = vmmov (!%p781_p8), 0   ;;  %p824_p9 = scmp.lt.s32.totalorder (!%p781_p8), %s2156_s14, 1 }
  0x76   : > { %784 = sbr.rel (%p781_p8) target bundleno = 445 (0x1bd), region = 69  ;;  %v993_v18 = vunpack.c.l.s4 (!%p781_p8), %v2166_v17  ;;  %v991_v45 = vcombine.high (!%p781_p8), %v836_v20, %v836_v20 }
  0x77   : > { %s2007_s29 = smul.u32 (!%p781_p8), 576, %s787_s28  ;;  %v996_v19 = vshrl.u32 (!%p781_p8), %v995_v16, 7 }
  0x78   : > { %v994_v21 = vunpack.c.0.s8 (!%p781_p8), %v993_v18 }
  0x79   : > { %s2530_s5 = scalar_lea.vmem (!%p781_p8), [#allocation2], %s2007_s29 }
  0x7a   : > { %v2051_v22 = vld [vmem:[%s2530_s5 + $0x40] sm:$0xff] (!%p781_p8)   ;;  %v2534_v24 = vsub.s32 (!%p781_p8), %v994_v21, %v996_v19  ;;  %v2055_v28 = vld [vmem:[%s2530_s5 + $0x48] sm:$0xff] (!%p781_p8)   ;;  %v2059_v34 = vld [vmem:[%s2530_s5 + $0x50] sm:$0xff] (!%p781_p8)  }
  0x7b   : > { %v2052_v23 = vld [vmem:[%s2530_s5] sm:$0xff] (!%p781_p8)   ;;  %1889 = vmatprep.subr.bf16.mxu0 (!%p781_p8), %v2051_v22  ;;  %v2056_v29 = vld [vmem:[%s2530_s5 + $0x8] sm:$0xff] (!%p781_p8)   ;;  %v2060_v35 = vld [vmem:[%s2530_s5 + $0x10] sm:$0xff] (!%p781_p8)  }
  0x7c   : > { %v2053_v25 = vld [vmem:[%s2530_s5 + $0xc0] sm:$0xff] (!%p781_p8)   ;;  %1890 = vmatpush3.bf16.msra.mxu0 (!%p781_p8), %v2052_v23  ;;  %v998_v27 = vrot.slane (!%p781_p8), %v836_v20, %v2534_v24  ;;  %v2057_v31 = vld [vmem:[%s2530_s5 + $0xc8] sm:$0xff] (!%p781_p8)   ;;  %v2061_v37 = vld [vmem:[%s2530_s5 + $0xd0] sm:$0xff] (!%p781_p8)   ;;  %v2559_v50 = vrot.slane (!%p781_p8), %v991_v45, %v2534_v24 }
  0x7d   : > { %v2054_v26 = vld [vmem:[%s2530_s5 + $0x80] sm:$0xff]   ;;  %1911 = vmatprep.subr.bf16.mxu1 %v2053_v25  ;;  %1891 = vmatprep.subr.bf16.mxu0 %v2055_v28  ;;  %v2058_v32 = vld [vmem:[%s2530_s5 + $0x88] sm:$0xff]   ;;  %v2062_v38 = vld [vmem:[%s2530_s5 + $0x90] sm:$0xff]   ;;  %s2659_s14 = smov (!%p824_p9, %s2156_s14), 1 }
  0x7e   : > { %1912 = vmatpush3.bf16.msra.mxu1 %v2054_v26  ;;  %v1006_v30 = vcombine.high %v998_v27, %v998_v27  ;;  %v2063_v39 = vld [vmem:[%s2530_s5 + $0x58] sm:$0xff]   ;;  %v2067_v43 = vld [vmem:[%s2530_s5 + $0x60] sm:$0xff]   ;;  %v2071_v48 = vld [vmem:[%s2530_s5 + $0x68] sm:$0xff]   ;;  %v1007_v55 = vcombine.high %v2559_v50, %v2559_v50  ;;  %v1014_v59 = vrot.slane %v998_v27, %v2534_v24  ;;  %s826_s10 = scalar_lea.vmem %s2650_s2, %s2659_s14  ;;  %s1812_s11 = sshll.u32 %s2659_s14, 1 }
  0x7f   : > { %1913 = vmatprep.subr.bf16.mxu1 %v2057_v31  ;;  %v2064_v40 = vld [vmem:[%s2530_s5 + $0x18] sm:$0xff]   ;;  %v2068_v44 = vld [vmem:[%s2530_s5 + $0x20] sm:$0xff]   ;;  %v2072_v49 = vld [vmem:[%s2530_s5 + $0x28] sm:$0xff]   ;;  %s834_s19 = scalar_lea.vmem %s2651_s3, %s1812_s11 }
  0x80   : > { %1892 = vmatpush3.bf16.msra.mxu0 %v2056_v29  ;;  %v1028_v33 = vrot.slane %v1006_v30, %v2534_v24  ;;  %v2065_v41 = vld [vmem:[%s2530_s5 + $0xd8] sm:$0xff]   ;;  %v2069_v46 = vld [vmem:[%s2530_s5 + $0xe0] sm:$0xff]   ;;  %v2073_v51 = vld [vmem:[%s2530_s5 + $0xe8] sm:$0xff]   ;;  %v1035_v61 = vrot.slane %v1007_v55, %v2534_v24  ;;  %v1036_v1 = vcombine.high %v1014_v59, %v1014_v59 }
  0x81   : > { %1893 = vmatprep.subr.bf16.mxu0 %v2059_v34  ;;  %v2066_v42 = vld [vmem:[%s2530_s5 + $0x98] sm:$0xff]   ;;  %v2070_v47 = vld [vmem:[%s2530_s5 + $0xa0] sm:$0xff]   ;;  %v2074_v52 = vld [vmem:[%s2530_s5 + $0xa8] sm:$0xff]  }
  0x82   : > { %1914 = vmatpush3.bf16.msra.mxu1 %v2058_v32  ;;  %1527 = vmatprep.mubr.bf16.mxu0 %v1028_v33  ;;  %v1038_v36 = vcombine.high %v1028_v33, %v1028_v33  ;;  %v2075_v53 = vld [vmem:[%s2530_s5 + $0x70] sm:$0xff]   ;;  %v2079_v58 = vld [vmem:[%s2530_s5 + $0x78] sm:$0xff]   ;;  %v2084_v0 = vld [vmem:[%s2530_s5 + $0x140] sm:$0xff]   ;;  %v1039_v3 = vcombine.high %v1035_v61, %v1035_v61  ;;  %v1021_v32 = vrot.slane %v2559_v50, %v2534_v24 }
  0x83   : > { %1915 = vmatprep.subr.bf16.mxu1 %v2061_v37  ;;  %v2076_v54 = vld [vmem:[%s2530_s5 + $0x30] sm:$0xff]   ;;  %v2080_v60 = vld [vmem:[%s2530_s5 + $0x38] sm:$0xff]   ;;  %v2085_v2 = vld [vmem:[%s2530_s5 + $0x100] sm:$0xff]  }
  0x84   : > { %1894 = vmatpush3.bf16.msra.mxu0 %v2060_v35  ;;  %1567 = vmatprep.mubr.bf16.mxu1 %v1038_v36  ;;  %v2077_v56 = vld [vmem:[%s2530_s5 + $0xf0] sm:$0xff]   ;;  %v2081_v62 = vld [vmem:[%s2530_s5 + $0xf8] sm:$0xff]   ;;  %v2086_v4 = vld [vmem:[%s2530_s5 + $0x1c0] sm:$0xff]   ;;  %v2167_v36 = vmov 0.0  }
  0x85   : > { %1895 = vmatprep.subr.bf16.mxu0 %v2063_v39  ;;  %v2078_v57 = vld [vmem:[%s2530_s5 + $0xb0] sm:$0xff]   ;;  %v2083_v63 = vld [vmem:[%s2530_s5 + $0xb8] sm:$0xff]   ;;  %v2087_v5 = vld [vmem:[%s2530_s5 + $0x180] sm:$0xff]  }
  0x86   : > { %1916 = vmatpush3.bf16.msra.mxu1 %v2062_v38  ;;  %v2088_v6 = vld [vmem:[%s2530_s5 + $0x148] sm:$0xff]   ;;  %v2092_v10 = vld [vmem:[%s2530_s5 + $0x150] sm:$0xff]   ;;  %v2096_v14 = vld [vmem:[%s2530_s5 + $0x158] sm:$0xff]   ;;  %v1037_v38 = vcombine.high %v1021_v32, %v1021_v32 }
  0x87   : > { %1917 = vmatprep.subr.bf16.mxu1 %v2065_v41  ;;  %v2089_v7 = vld [vmem:[%s2530_s5 + $0x108] sm:$0xff]   ;;  %v2093_v11 = vld [vmem:[%s2530_s5 + $0x110] sm:$0xff]   ;;  %v2097_v15 = vld [vmem:[%s2530_s5 + $0x118] sm:$0xff]  }
  0x88   : > { %1896 = vmatpush3.bf16.msra.mxu0 %v2064_v40  ;;  %v2090_v8 = vld [vmem:[%s2530_s5 + $0x1c8] sm:$0xff]   ;;  %v2094_v12 = vld [vmem:[%s2530_s5 + $0x1d0] sm:$0xff]   ;;  %v2098_v16 = vld [vmem:[%s2530_s5 + $0x1d8] sm:$0xff]  }
  0x89   : > { %1897 = vmatprep.subr.bf16.mxu0 %v2067_v43  ;;  %v2091_v9 = vld [vmem:[%s2530_s5 + $0x188] sm:$0xff]   ;;  %v2095_v13 = vld [vmem:[%s2530_s5 + $0x190] sm:$0xff]   ;;  %v2099_v17 = vld [vmem:[%s2530_s5 + $0x198] sm:$0xff]  }
  0x8a   : > { %1918 = vmatpush3.bf16.msra.mxu1 %v2066_v42  ;;  %v2100_v18 = vld [vmem:[%s2530_s5 + $0x160] sm:$0xff]   ;;  %v2104_v22 = vld [vmem:[%s2530_s5 + $0x168] sm:$0xff]   ;;  %v2108_v27 = vld [vmem:[%s2530_s5 + $0x170] sm:$0xff]  }
  0x8b   : > { %1919 = vmatprep.subr.bf16.mxu1 %v2069_v46  ;;  %v2101_v19 = vld [vmem:[%s2530_s5 + $0x120] sm:$0xff]   ;;  %v2105_v23 = vld [vmem:[%s2530_s5 + $0x128] sm:$0xff]   ;;  %v2109_v28 = vld [vmem:[%s2530_s5 + $0x130] sm:$0xff]  }
  0x8c   : > { %1898 = vmatpush3.bf16.msra.mxu0 %v2068_v44  ;;  %v2102_v20 = vld [vmem:[%s2530_s5 + $0x1e0] sm:$0xff]   ;;  %v2106_v25 = vld [vmem:[%s2530_s5 + $0x1e8] sm:$0xff]   ;;  %v2110_v29 = vld [vmem:[%s2530_s5 + $0x1f0] sm:$0xff]  }
  0x8d   : > { %1899 = vmatprep.subr.bf16.mxu0 %v2071_v48  ;;  %v2103_v21 = vld [vmem:[%s2530_s5 + $0x1a0] sm:$0xff]   ;;  %v2107_v26 = vld [vmem:[%s2530_s5 + $0x1a8] sm:$0xff]   ;;  %v2111_v30 = vld [vmem:[%s2530_s5 + $0x1b0] sm:$0xff]  }
  0x8e   : > { %1920 = vmatpush3.bf16.msra.mxu1 %v2070_v47  ;;  %v2112_v31 = vld [vmem:[%s2530_s5 + $0x178] sm:$0xff]   ;;  %v2116_v37 = vld [vmem:[%s2530_s5 + $0x200] sm:$0xff]   ;;  %v2117_v39 = vld [vmem:[%s2530_s5 + $0x208] sm:$0xff]  }
  0x8f   : > { %1921 = vmatprep.subr.bf16.mxu1 %v2073_v51  ;;  %v2113_v33 = vld [vmem:[%s2530_s5 + $0x138] sm:$0xff]   ;;  %v2118_v40 = vld [vmem:[%s2530_s5 + $0x210] sm:$0xff]   ;;  %v2120_v42 = vld [vmem:[%s2530_s5 + $0x220] sm:$0xff]  }
  0x90   : > { %1900 = vmatpush3.bf16.msra.mxu0 %v2072_v49  ;;  %v2114_v34 = vld [vmem:[%s2530_s5 + $0x1f8] sm:$0xff]   ;;  %v2121_v43 = vld [vmem:[%s2530_s5 + $0x228] sm:$0xff]   ;;  %v2122_v44 = vld [vmem:[%s2530_s5 + $0x230] sm:$0xff]  }
  0x91   : > { %1901 = vmatprep.subr.bf16.mxu0 %v2075_v53  ;;  %v2115_v35 = vld [vmem:[%s2530_s5 + $0x1b8] sm:$0xff]   ;;  %v1814_v46 = vld.sshfl [vmem:[%s2648_s0 + $0x8] sm:$0x1 pattern:$0x75316420] }
  0x92   : > { %1922 = vmatpush3.bf16.msra.mxu1 %v2074_v52  ;;  %v2119_v41 = vld [vmem:[%s2530_s5 + $0x218] sm:$0xff]   ;;  %v1053_v47 = vrot.slane %v1814_v46, %v2534_v24  ;;  %v1813_v49 = vld [vmem:[%s826_s10] ss:$0 sm:$0xff] }
  0x93   : > { %1923 = vmatprep.subr.bf16.mxu1 %v2077_v56  ;;  %v2123_v45 = vld [vmem:[%s2530_s5 + $0x238] sm:$0xff]  }
  0x94   : > { %1902 = vmatpush3.bf16.msra.mxu0 %v2076_v54 }
  0x95   : > { %1903 = vmatprep.subr.bf16.mxu0 %v2079_v58 }
  0x96   : > { %1924 = vmatpush3.bf16.msra.mxu1 %v2078_v57 }
  0x97   : > { %1925 = vmatprep.subr.bf16.mxu1 %v2081_v62 }
  0x98   : > { %1904 = vmatpush3.bf16.msra.mxu0 %v2080_v60 }
  0x99   : > { %1933 = vmatprep.subr.bf16.mxu0 %v2084_v0 }
  0x9a   : > { %1926 = vmatpush3.bf16.msra.mxu1 %v2083_v63 }
  0x9b   : > { %1528 = vmatmul.mubr.bf16.vlgmr.msra.gmra.mrb[0].mxu0 %v1014_v59  ;;  %1955 = vmatprep.subr.bf16.mxu1 %v2086_v4 }
  0x9c   : > { %1934 = vmatpush3.bf16.msra.mxu0 %v2085_v2  ;;  %1607 = vmatprep.mubr.bf16.mxu0 %v1035_v61 }
  0x9d   : > { %1568 = vmatmul.mubr.bf16.vlgmr.msra.gmra.mrb[0].mxu1 %v1036_v1  ;;  %1935 = vmatprep.subr.bf16.mxu0 %v2088_v6 }
  0x9e   : > { %1956 = vmatpush3.bf16.msra.mxu1 %v2087_v5  ;;  %1647 = vmatprep.mubr.bf16.mxu1 %v1039_v3 }
  0x9f   : > { %1957 = vmatprep.subr.bf16.mxu1 %v2090_v8 }
  0xa0   : > { %1936 = vmatpush3.bf16.msra.mxu0 %v2089_v7 }
  0xa1   : > { %1937 = vmatprep.subr.bf16.mxu0 %v2092_v10 }
  0xa2   : > { %1958 = vmatpush3.bf16.msra.mxu1 %v2091_v9 }
  0xa3   : > { %1959 = vmatprep.subr.bf16.mxu1 %v2094_v12 }
  0xa4   : > { %1938 = vmatpush3.bf16.msra.mxu0 %v2093_v11 }
  0xa5   : > { %1939 = vmatprep.subr.bf16.mxu0 %v2096_v14 }
  0xa6   : > { %1960 = vmatpush3.bf16.msra.mxu1 %v2095_v13 }
  0xa7   : > { %1961 = vmatprep.subr.bf16.mxu1 %v2098_v16 }
  0xa8   : > { %1940 = vmatpush3.bf16.msra.mxu0 %v2097_v15 }
  0xa9   : > { %1941 = vmatprep.subr.bf16.mxu0 %v2100_v18 }
  0xaa   : > { %1962 = vmatpush3.bf16.msra.mxu1 %v2099_v17 }
  0xab   : > { %1963 = vmatprep.subr.bf16.mxu1 %v2102_v20 }
  0xac   : > { %1942 = vmatpush3.bf16.msra.mxu0 %v2101_v19 }
  0xad   : > { %1943 = vmatprep.subr.bf16.mxu0 %v2104_v22 }
  0xae   : > { %1964 = vmatpush3.bf16.msra.mxu1 %v2103_v21 }
  0xaf   : > { %1965 = vmatprep.subr.bf16.mxu1 %v2106_v25 }
  0xb0   : > { %1944 = vmatpush3.bf16.msra.mxu0 %v2105_v23 }
  0xb1   : > { %1945 = vmatprep.subr.bf16.mxu0 %v2108_v27 }
  0xb2   : > { %1966 = vmatpush3.bf16.msra.mxu1 %v2107_v26 }
  0xb3   : > { %1967 = vmatprep.subr.bf16.mxu1 %v2110_v29 }
  0xb4   : > { %1946 = vmatpush3.bf16.msra.mxu0 %v2109_v28 }
  0xb5   : > { %1947 = vmatprep.subr.bf16.mxu0 %v2112_v31 }
  0xb6   : > { %1968 = vmatpush3.bf16.msra.mxu1 %v2111_v30 }
  0xb7   : > { %1969 = vmatprep.subr.bf16.mxu1 %v2114_v34 }
  0xb8   : > { %1948 = vmatpush3.bf16.msra.mxu0 %v2113_v33 }
  0xb9   : > { %1986 = vmatprep.subr.bf16.mxu0 %v2167_v36 }
  0xba   : > { %1970 = vmatpush3.bf16.msra.mxu1 %v2115_v35 }
  0xbb   : > { %1608 = vmatmul.mubr.bf16.vlgmr.msra.gmra.mrb[4].mxu0 %v1021_v32 }
  0xbc   : > { %1987 = vmatpush3.bf16.msra.mxu0 %v2116_v37  ;;  %2002 = vmatprep.mubr.msk.bf16.mxu0 %vm2168_vm0, %v2167_v36 }
  0xbd   : > { %1648 = vmatmul.mubr.bf16.vlgmr.msra.gmra.mrb[4].mxu1 %v1037_v38  ;;  %1988 = vmatprep.subr.bf16.mxu0 %v2167_v36 }
  0xc0   : > { %1989 = vmatpush3.bf16.msra.mxu0 %v2117_v39 }
  0xc1   : > { %1990 = vmatprep.subr.bf16.mxu0 %v2167_v36 }
  0xc4   : > { %1991 = vmatpush3.bf16.msra.mxu0 %v2118_v40 }
  0xc5   : > { %1992 = vmatprep.subr.bf16.mxu0 %v2167_v36 }
  0xc8   : > { %1993 = vmatpush3.bf16.msra.mxu0 %v2119_v41 }
  0xc9   : > { %1994 = vmatprep.subr.bf16.mxu0 %v2167_v36 }
  0xcc   : > { %1995 = vmatpush3.bf16.msra.mxu0 %v2120_v42 }
  0xcd   : > { %1996 = vmatprep.subr.bf16.mxu0 %v2167_v36 }
  0xd0   : > { %1997 = vmatpush3.bf16.msra.mxu0 %v2121_v43 }
  0xd1   : > { %1998 = vmatprep.subr.bf16.mxu0 %v2167_v36 }
  0xd4   : > { %1999 = vmatpush3.bf16.msra.mxu0 %v2122_v44 }
  0xd5   : > { %2000 = vmatprep.subr.bf16.mxu0 %v2167_v36 }
  0xd8   : > { %2001 = vmatpush3.bf16.msra.mxu0 %v2123_v45 }
  0xdb   : > { %2003 = vmatmul.mubr.bf16.vlgmr.msra.gmra.mrb[8].mxu0 %v1053_v47 }
 0x16e   : > { %v1905_v48 = vpop.f32.mrb[0].mxu0 }
 0x16f   : > { %v1906_v50 = vpop.f32.mrb[1].mxu0 }
 0x170   : > { %v1907_v51 = vadd.f32 %v1906_v50, %v1905_v48  ;;  %v1908_v52 = vpop.f32.mrb[2].mxu0  ;;  %v1927_v53 = vpop.f32.mrb[0].mxu1 }
 0x171   : > { %v1909_v54 = vpop.f32.mrb[3].mxu0  ;;  %v1928_v55 = vpop.f32.mrb[1].mxu1 }
 0x172   : > { %v1530_v56 = vadd.f32 %v1907_v51, %v1813_v49  ;;  %v1929_v24 = vadd.f32 %v1928_v55, %v1927_v53  ;;  %v1930_v57 = vpop.f32.mrb[2].mxu1 }
 0x173   : > { %v1931_v58 = vpop.f32.mrb[3].mxu1 }
 0x174   : > { %v1570_v59 = vadd.f32 %v1929_v24, %v1530_v56 }
 0x18e   : > { %v1949_v60 = vpop.f32.mrb[4].mxu0 }
 0x18f   : > { %v1950_v61 = vpop.f32.mrb[5].mxu0 }
 0x190   : > { %v1951_v62 = vadd.f32 %v1950_v61, %v1949_v60  ;;  %v1952_v63 = vpop.f32.mrb[6].mxu0  ;;  %v1971_v0 = vpop.f32.mrb[4].mxu1 }
 0x191   : > { %v1953_v1 = vpop.f32.mrb[7].mxu0  ;;  %v1972_v2 = vpop.f32.mrb[5].mxu1 }
 0x192   : > { %v1610_v3 = vadd.f32 %v1951_v62, %v1570_v59  ;;  %v1973_v4 = vadd.f32 %v1972_v2, %v1971_v0  ;;  %v1974_v5 = vpop.f32.mrb[6].mxu1 }
 0x193   : > { %v1975_v6 = vpop.f32.mrb[7].mxu1 }
 0x194   : > { %v1650_v7 = vadd.f32 %v1973_v4, %v1610_v3 }
 0x1ae   : > { %v1689_v8 = vpop.f32.mrb[8].mxu0 }
 0x1af   : > { %v1690_v9 = vadd.f32 %v1689_v8, %v1650_v7  ;;  %v2004_v10 = vpop.f32.mrb[9].mxu0 }
 0x1b0   : > { %v1692_v11 = vpop.f32.mrb[10].mxu0 }
 0x1b1   : > { %2124 = vtanh.f32 %v1690_v9  ;;  %v2005_v12 = vpop.f32.mrb[11].mxu0 }
 0x1bb   : > { %v2125_v13 = vpop.eup %2124 }
 0x1bc   : > { %1696 = vst [vmem:[%s834_s19] sm:$0x3] %v2125_v13 }
 0x1bd PF: > { %s13_s16 = sadd.s32 1, %s2164_s16   ;;  %s2652_s12 = smov %s2152_s13 }
 0x1be   : > { %p10_p10 = scmp.ge.s32.totalorder %s13_s16, 4   ;;  %s2653_s13 = smov %s2224_s20 }
 0x1bf   : > { %s2654_s14 = smov %s2160_s15  ;;  %s2655_s15 = smov %s2657_s17 }
 0x1c0   :  { %12 = sbr.rel (!%p10_p10) target bundleno = 3 (0x3), region = 114 }

</bundles_post_ra>
